<compile_context>
chip_gen: v6e
topology: v6e:2x2x1
jax: 0.10.0
libtpu: 0.0.40
codegen_flags: <defaults>
</compile_context>

<pallas_src>
import jax
import jax.numpy as jnp
from jax import lax
from jax.experimental import pallas as pl
from jax.experimental.pallas import tpu as pltpu

LANES = 512                      # lane width of the channel-flattened view
ROW_TILE = 1024                  # max rows per block (GEMM M tile / elementwise rows)
VMEM_LIMIT = 32 * 1024 * 1024    # explicit scoped-VMEM limit


def _cdiv(a, b):
    return (a + b - 1) // b


def _round_up(x, m):
    return _cdiv(x, m) * m


def _cparams(*sem):
    return pltpu.CompilerParams(dimension_semantics=sem,
                                vmem_limit_bytes=VMEM_LIMIT)


def _gemm_row_tile(m, kp, np_):
    """Row tile for the GEMM: largest multiple of 8 (<= ROW_TILE) whose
    double-buffered A/out slabs plus the whole-K B stay inside VMEM, then
    balanced across grid steps to minimize row padding.  Returns (tm, Mp)."""
    m8 = _round_up(max(m, 1), 8)
    bytes_per_row = 2 * (kp * 2 + np_ * 4)            # dbl-buffered bf16 A + f32 out
    budget = VMEM_LIMIT - 2 * kp * np_ * 2 - (4 << 20)
    cap = max(8, budget // bytes_per_row // 8 * 8)
    tm = min(ROW_TILE, m8, cap)
    ntiles = _cdiv(m8, tm)
    tm = _round_up(_cdiv(m8, ntiles), 8)
    return tm, tm * ntiles


def _row_tile(rows):
    """Balanced row tile (multiple of 8, <= ROW_TILE) for elementwise views."""
    rows8 = _round_up(max(rows, 1), 8)
    ntiles = _cdiv(rows8, ROW_TILE)
    tr = _round_up(_cdiv(rows8, ntiles), 8)
    return tr, tr * ntiles


# ------------------------------- Pallas kernels -------------------------------

def _matmul_kernel(a_ref, b_ref, o_ref):
    # Whole-K block (K = Cin <= 256): no accumulator scratch, no pl.when phases.
    o_ref[...] = jnp.dot(a_ref[...], b_ref[...],
                         preferred_element_type=jnp.float32)


def matmul(a, b, tm):
    """(Mp, Kp) bf16 @ (Kp, Np) bf16 -> (Mp, Np) f32.  Mp % tm == 0, Np % 128 == 0."""
    M, K = a.shape
    _, N = b.shape
    assert M % tm == 0 and N % 128 == 0 and tm % 8 == 0
    return pl.pallas_call(
        _matmul_kernel,
        out_shape=jax.ShapeDtypeStruct((M, N), jnp.float32),
        grid=(M // tm,),
        in_specs=[pl.BlockSpec((tm, K), lambda i: (i, 0)),
                  pl.BlockSpec((K, N), lambda i: (0, 0))],   # same block -> DMA'd once
        out_specs=pl.BlockSpec((tm, N), lambda i: (i, 0)),
        compiler_params=_cparams("parallel"),
    )(a, b)


def _stats_kernel(x_ref, sum_ref, sq_ref):
    @pl.when(pl.program_id(0) == 0)
    def _():
        sum_ref[...] = jnp.zeros_like(sum_ref)
        sq_ref[...] = jnp.zeros_like(sq_ref)
    x = x_ref[...]
    sum_ref[...] += jnp.sum(x, axis=0, keepdims=True)
    sq_ref[...] += jnp.sum(x * x, axis=0, keepdims=True)


def lane_stats(x, tr):
    """Per-lane sum and sum-of-squares over rows of a (R, L) f32 view."""
    R, L = x.shape
    assert R % tr == 0
    return pl.pallas_call(
        _stats_kernel,
        out_shape=(jax.ShapeDtypeStruct((1, L), jnp.float32),
                   jax.ShapeDtypeStruct((1, L), jnp.float32)),
        grid=(R // tr,),
        in_specs=[pl.BlockSpec((tr, L), lambda i: (i, 0))],
        out_specs=(pl.BlockSpec((1, L), lambda i: (0, 0)),
                   pl.BlockSpec((1, L), lambda i: (0, 0))),
        compiler_params=_cparams("arbitrary"),
    )(x)


def _scale_shift_relu_kernel(x_ref, scale_ref, shift_ref, o_ref):
    y = x_ref[...] * scale_ref[...] + shift_ref[...]
    o_ref[...] = jnp.maximum(y, 0.0).astype(o_ref.dtype)


def scale_shift_relu(x, scale, shift, tr):
    """relu(x * scale + shift); written directly as bf16 for the next GEMM."""
    R, L = x.shape
    assert R % tr == 0
    return pl.pallas_call(
        _scale_shift_relu_kernel,
        out_shape=jax.ShapeDtypeStruct((R, L), jnp.bfloat16),
        grid=(R // tr,),
        in_specs=[pl.BlockSpec((tr, L), lambda i: (i, 0)),
                  pl.BlockSpec((1, L), lambda i: (0, 0)),
                  pl.BlockSpec((1, L), lambda i: (0, 0))],
        out_specs=pl.BlockSpec((tr, L), lambda i: (i, 0)),
        compiler_params=_cparams("parallel"),
    )(x, scale, shift)


def _bias_tanh_kernel(x_ref, bias_ref, o_ref):
    o_ref[...] = jnp.tanh(x_ref[...] + bias_ref[...])


def bias_tanh(x, bias, tr):
    R, L = x.shape
    assert R % tr == 0
    return pl.pallas_call(
        _bias_tanh_kernel,
        out_shape=jax.ShapeDtypeStruct((R, L), jnp.float32),
        grid=(R // tr,),
        in_specs=[pl.BlockSpec((tr, L), lambda i: (i, 0)),
                  pl.BlockSpec((1, L), lambda i: (0, 0))],
        out_specs=pl.BlockSpec((tr, L), lambda i: (i, 0)),
        compiler_params=_cparams("parallel"),
    )(x, bias)


# ------------------------- lane-dense channelwise view -------------------------

def _lane_view(z, count, c):
    """Flatten a channels-last tensor into a lane-dense (rows, L) f32 view.

    `count` real scalars; lane j of every row holds channel (j % c); the padded
    tail is exact zeros (harmless for the stats reduction, sliced off after)."""
    L = LANES if LANES % c == 0 else c        # fallback: channels-as-lanes
    tr, rows = _row_tile(_cdiv(count, L))
    flat = z.reshape(-1)
    pad = rows * L - count
    if pad:
        flat = jnp.pad(flat, (0, pad))
    return flat.reshape(rows, L), L, tr


def _to_lanes(v, L):
    """Tile a per-channel (C,) vector across the L-lane view (lane j -> v[j % C])."""
    return jnp.tile(v, L // v.shape[0]).reshape(1, L)


# ------------------- ConvTranspose2d = one GEMM + col2im combine -------------------

def conv_transpose(x_nhwc, w, stride):
    """PyTorch ConvTranspose2d (padding=0, no bias) on NHWC activations.

    Lowered as X(N*H*W, Cin) @ Wflat(Cin, k*k*Cout) on the MXU, then a col2im
    combine expressed as interior-dilated lax.pad of each tap plus a fused add
    chain (no lax.scatter, single pass over the output)."""
    N, H, W, Cin = x_nhwc.shape
    _, Cout, k, _ = w.shape
    s = stride

    M, Ncols = N * H * W, k * k * Cout
    Kp = _round_up(Cin, 16)                 # bf16 sublane packing for B
    Np = _round_up(Ncols, 128)              # lane-dense GEMM output
    tm, Mp = _gemm_row_tile(M, Kp, Np)

    a = x_nhwc.astype(jnp.bfloat16).reshape(M, Cin)
    if Mp - M or Kp - Cin:
        a = jnp.pad(a, ((0, Mp - M), (0, Kp - Cin)))
    # Wflat[ci, (kh*k + kw)*Cout + co] = w[ci, co, kh, kw]
    wflat = w.transpose(0, 2, 3, 1).reshape(Cin, Ncols).astype(jnp.bfloat16)
    if Kp - Cin or Np - Ncols:
        wflat = jnp.pad(wflat, ((0, Kp - Cin), (0, Np - Ncols)))

    y = matmul(a, wflat, tm)                # (Mp, Np) f32

    # col2im: tap (kh, kw) of input pixel (i, j) lands on output (i*s+kh, j*s+kw).
    # lax.pad with interior dilation s-1 places every tap on the output grid;
    # the k*k pads + adds fuse into one loop that writes the output once.
    # TODO(synk): no clean single-pass Pallas tiling for the overlapping col2im
    # combine at these sizes; kept as fusible plain-JAX glue.
    y = y[:M, :Ncols].reshape(N, H, W, k, k, Cout)
    zero = jnp.zeros((), jnp.float32)
    out = None
    for kh in range(k):
        for kw in range(k):
            piece = lax.pad(y[:, :, :, kh, kw, :], zero,
                            ((0, 0, 0),
                             (kh, k - 1 - kh, s - 1),
                             (kw, k - 1 - kw, s - 1),
                             (0, 0, 0)))
            out = piece if out is None else out + piece
    return out                              # (N, (H-1)*s+k, (W-1)*s+k, Cout) f32


def gen_block(x_nhwc, blk, eps=1e-5):
    w, s = blk["w"], blk["stride"]
    Cout = w.shape[1]
    z = conv_transpose(x_nhwc, w, s)        # (N, Hout, Wout, Cout) f32, no bias yet
    N, Hout, Wout, _ = z.shape
    count = N * Hout * Wout * Cout
    zv, L, tr = _lane_view(z, count, Cout)

    if blk["final"]:
        # bias is applied once per output pixel (post col2im), fused with tanh.
        out = bias_tanh(zv, _to_lanes(blk["b"], L), tr)
    else:
        # Training-mode BatchNorm: the conv bias is a per-channel constant that
        # cancels exactly under mean subtraction, so it is never materialized
        # (this also keeps the zero-padded rows of zv exact for the stats).
        sums, sqs = lane_stats(zv, tr)
        m = count // Cout                   # true per-channel sample count
        csum = sums.reshape(L // Cout, Cout).sum(axis=0)
        csq = sqs.reshape(L // Cout, Cout).sum(axis=0)
        mean = csum / m
        var = jnp.maximum(csq / m - mean * mean, 0.0)   # guard E[x^2]-E[x]^2 cancellation
        scale = blk["gamma"] * lax.rsqrt(var + eps)
        shift = blk["beta"] - mean * scale
        out = scale_shift_relu(zv, _to_lanes(scale, L), _to_lanes(shift, L), tr)  # bf16

    return out.reshape(-1)[:count].reshape(N, Hout, Wout, Cout)


# -------------------------------- Generator model --------------------------------

def init_params(key, z_dim=10, im_chan=1, hidden_dim=16):
    # (Cin, Cout, kernel, stride, final) -- mirrors Generator.__init__
    cfg = [(z_dim, hidden_dim, 4, 1, False),
           (hidden_dim, hidden_dim * 4, 4, 3, False),
           (hidden_dim * 4, hidden_dim * 2, 5, 2, False),
           (hidden_dim * 2, hidden_dim, 5, 2, False),
           (hidden_dim, im_chan, 6, 2, True)]
    blocks = []
    for (cin, cout, k, s, final) in cfg:
        key, kw, kb = jax.random.split(key, 3)
        w = jax.random.normal(kw, (cin, cout, k, k), jnp.float32) / jnp.sqrt(cin * k * k)
        b = jax.random.normal(kb, (cout,), jnp.float32) * 0.01
        blk = {"w": w, "b": b, "stride": s, "final": final}
        if not final:
            blk["gamma"] = jnp.ones((cout,), jnp.float32)
            blk["beta"] = jnp.zeros((cout,), jnp.float32)
        blocks.append(blk)
    return {"z_dim": z_dim, "blocks": blocks}


def generator_forward(params, noise):
    # noise: (n, z_dim).  PyTorch views it as NCHW (n, z_dim, 1, 1);
    # in our NHWC layout that is (n, 1, 1, z_dim).
    n = noise.shape[0]
    x = noise.reshape(n, 1, 1, params["z_dim"])
    for blk in params["blocks"]:
        x = gen_block(x, blk)
    return x.astype(jnp.float32).transpose(0, 3, 1, 2)   # NCHW like PyTorch


# -------------------------------- pure-JAX reference --------------------------------

def ref_forward(params, noise, eps=1e-5):
    n = noise.shape[0]
    x = noise.reshape(n, 1, 1, params["z_dim"]).astype(jnp.float32)
    for blk in params["blocks"]:
        w, b, s = blk["w"], blk["b"], blk["stride"]
        k = w.shape[2]
        w_hwio = jnp.flip(w, axis=(2, 3)).transpose(2, 3, 0, 1)  # (k, k, Cin, Cout)
        y = lax.conv_general_dilated(
            x, w_hwio, window_strides=(1, 1),
            padding=[(k - 1, k - 1), (k - 1, k - 1)],
            lhs_dilation=(s, s),
            dimension_numbers=("NHWC", "HWIO", "NHWC"),
            precision=lax.Precision.HIGHEST) + b
        if blk["final"]:
            x = jnp.tanh(y)
        else:
            mean = y.mean(axis=(0, 1, 2))
            var = y.var(axis=(0, 1, 2))
            x = jnp.maximum((y - mean) / jnp.sqrt(var + eps) * blk["gamma"]
                            + blk["beta"], 0.0)
    return x.transpose(0, 3, 1, 2)


# --------------------------------------- main ---------------------------------------

if __name__ == "__main__":
    Z_DIM, IM_CHAN, HIDDEN = 10, 1, 16   # small hidden_dim for the test
    key = jax.random.PRNGKey(0)
    pkey, nkey = jax.random.split(key)
    params = init_params(pkey, Z_DIM, IM_CHAN, HIDDEN)
    noise = jax.random.normal(nkey, (2, Z_DIM), jnp.float32)

    fwd = jax.jit(lambda z: generator_forward(params, z))
    out = jax.block_until_ready(fwd(noise))

    # 1x1 -> 4 -> 13 -> 29 -> 61 -> 126 spatial; NCHW output like PyTorch.
    assert out.shape == (2, IM_CHAN, 126, 126), out.shape

    ref = jax.block_until_ready(ref_forward(params, noise))
    err = float(jnp.max(jnp.abs(out - ref)))
    # bf16 MXU inputs (f32 accumulation) across 5 stacked conv+BN layers.
    assert err < 0.15, err

    print("KERNEL_OK")
</pallas_src>

<mosaic_0001>
module attributes {stable_mosaic.version = 11 : i64} {
  func.func @_matmul_kernel(%arg0: i32, %arg1: memref<8x16xbf16, #tpu.memory_space<vmem>>, %arg2: memref<16x256xbf16, #tpu.memory_space<vmem>>, %arg3: memref<8x256xf32, #tpu.memory_space<vmem>>) attributes {dimension_semantics = [#tpu.dimension_semantics<parallel>], iteration_bounds = array<i64: 1>, scalar_prefetch = 0 : i64, scratch_operands = 0 : i64, tpu.core_type = #tpu.core_type<tc>, window_params = [{transform_indices = @transform_0, window_bounds = array<i64: 8, 16>}, {pipeline_mode = #tpu.pipeline_mode<synchronous>, transform_indices = @transform_1, window_bounds = array<i64: 16, 256>}, {transform_indices = @transform_2, window_bounds = array<i64: 8, 256>}]} {
    %c0 = arith.constant 0 : index
    %c0_0 = arith.constant 0 : index
    %0 = vector.load %arg1[%c0, %c0_0] : memref<8x16xbf16, #tpu.memory_space<vmem>>, vector<8x16xbf16>
    %c0_1 = arith.constant 0 : index
    %c0_2 = arith.constant 0 : index
    %1 = vector.load %arg2[%c0_1, %c0_2] : memref<16x256xbf16, #tpu.memory_space<vmem>>, vector<16x256xbf16>
    %cst = arith.constant dense<0.000000e+00> : vector<8x256xf32>
    %2 = tpu.matmul %0, %1, %cst {dimension_numbers = #tpu.dot_dimension_numbers<[1], [0], [0], [1], [0, 0, 1, 1], [], []>} : vector<8x16xbf16>, vector<16x256xbf16>, vector<8x256xf32> -> vector<8x256xf32>
    %c0_3 = arith.constant 0 : index
    %c0_4 = arith.constant 0 : index
    %3 = vector.load %arg3[%c0_3, %c0_4] : memref<8x256xf32, #tpu.memory_space<vmem>>, vector<8x256xf32>
    tpu.vector_store %arg3[%c0_3, %c0_4], %2 {strides = array<i32>} : memref<8x256xf32, #tpu.memory_space<vmem>>, vector<8x256xf32>,
    return
  }
  func.func @transform_0(%arg0: i32) -> (i32, i32) {
    %c0_i32 = arith.constant 0 : i32
    %c0_i32_0 = arith.constant 0 : i32
    return %arg0, %c0_i32 : i32, i32
  }
  func.func @transform_1(%arg0: i32) -> (i32, i32) {
    %c0_i32 = arith.constant 0 : i32
    %c0_i32_0 = arith.constant 0 : i32
    %c0_i32_1 = arith.constant 0 : i32
    return %c0_i32, %c0_i32_0 : i32, i32
  }
  func.func @transform_2(%arg0: i32) -> (i32, i32) {
    %c0_i32 = arith.constant 0 : i32
    %c0_i32_0 = arith.constant 0 : i32
    return %arg0, %c0_i32 : i32, i32
  }
}

module attributes {stable_mosaic.version = 11 : i64} {
  func.func @_stats_kernel(%arg0: i32, %arg1: memref<8x512xf32, #tpu.memory_space<vmem>>, %arg2: memref<1x512xf32, #tpu.memory_space<vmem>>, %arg3: memref<1x512xf32, #tpu.memory_space<vmem>>) attributes {dimension_semantics = [#tpu.dimension_semantics<arbitrary>], iteration_bounds = array<i64: 1>, scalar_prefetch = 0 : i64, scratch_operands = 0 : i64, tpu.core_type = #tpu.core_type<tc>, window_params = [{transform_indices = @transform_0, window_bounds = array<i64: 8, 512>}, {pipeline_mode = #tpu.pipeline_mode<synchronous>, transform_indices = @transform_1, window_bounds = array<i64: 1, 512>}, {pipeline_mode = #tpu.pipeline_mode<synchronous>, transform_indices = @transform_2, window_bounds = array<i64: 1, 512>}]} {
    %c0_i32 = arith.constant 0 : i32
    %0 = arith.cmpi eq, %arg0, %c0_i32 : i32
    %1 = arith.extui %0 : i1 to i32
    %c0_i32_0 = arith.constant 0 : i32
    %2 = arith.cmpi ne, %1, %c0_i32_0 : i32
    scf.if %2 {
      %cst_11 = arith.constant 0.000000e+00 : f32
      %15 = vector.broadcast %cst_11 : f32 to vector<1x512xf32>
      %c0_12 = arith.constant 0 : index
      %c0_13 = arith.constant 0 : index
      %16 = vector.load %arg2[%c0_12, %c0_13] : memref<1x512xf32, #tpu.memory_space<vmem>>, vector<1x512xf32>
      tpu.vector_store %arg2[%c0_12, %c0_13], %15 {strides = array<i32>} : memref<1x512xf32, #tpu.memory_space<vmem>>, vector<1x512xf32>,
      %cst_14 = arith.constant 0.000000e+00 : f32
      %17 = vector.broadcast %cst_14 : f32 to vector<1x512xf32>
      %c0_15 = arith.constant 0 : index
      %c0_16 = arith.constant 0 : index
      %18 = vector.load %arg3[%c0_15, %c0_16] : memref<1x512xf32, #tpu.memory_space<vmem>>, vector<1x512xf32>
      tpu.vector_store %arg3[%c0_15, %c0_16], %17 {strides = array<i32>} : memref<1x512xf32, #tpu.memory_space<vmem>>, vector<1x512xf32>,
    } else {
    }
    %c0 = arith.constant 0 : index
    %c0_1 = arith.constant 0 : index
    %3 = vector.load %arg1[%c0, %c0_1] : memref<8x512xf32, #tpu.memory_space<vmem>>, vector<8x512xf32>
    %c0_2 = arith.constant 0 : index
    %c0_3 = arith.constant 0 : index
    %4 = vector.load %arg2[%c0_2, %c0_3] : memref<1x512xf32, #tpu.memory_space<vmem>>, vector<1x512xf32>
    %cst = arith.constant dense<0.000000e+00> : vector<512xf32>
    %5 = vector.multi_reduction <add>, %3, %cst [0] : vector<8x512xf32> to vector<512xf32>
    %6 = vector.shape_cast %5 : vector<512xf32> to vector<1x512xf32>
    %7 = arith.addf %4, %6 : vector<1x512xf32>
    %c0_4 = arith.constant 0 : index
    %c0_5 = arith.constant 0 : index
    %8 = vector.load %arg2[%c0_4, %c0_5] : memref<1x512xf32, #tpu.memory_space<vmem>>, vector<1x512xf32>
    tpu.vector_store %arg2[%c0_4, %c0_5], %7 {strides = array<i32>} : memref<1x512xf32, #tpu.memory_space<vmem>>, vector<1x512xf32>,
    %c0_6 = arith.constant 0 : index
    %c0_7 = arith.constant 0 : index
    %9 = vector.load %arg3[%c0_6, %c0_7] : memref<1x512xf32, #tpu.memory_space<vmem>>, vector<1x512xf32>
    %10 = arith.mulf %3, %3 : vector<8x512xf32>
    %cst_8 = arith.constant dense<0.000000e+00> : vector<512xf32>
    %11 = vector.multi_reduction <add>, %10, %cst_8 [0] : vector<8x512xf32> to vector<512xf32>
    %12 = vector.shape_cast %11 : vector<512xf32> to vector<1x512xf32>
    %13 = arith.addf %9, %12 : vector<1x512xf32>
    %c0_9 = arith.constant 0 : index
    %c0_10 = arith.constant 0 : index
    %14 = vector.load %arg3[%c0_9, %c0_10] : memref<1x512xf32, #tpu.memory_space<vmem>>, vector<1x512xf32>
    tpu.vector_store %arg3[%c0_9, %c0_10], %13 {strides = array<i32>} : memref<1x512xf32, #tpu.memory_space<vmem>>, vector<1x512xf32>,
    return
  }
  func.func @transform_0(%arg0: i32) -> (i32, i32) {
    %c0_i32 = arith.constant 0 : i32
    %c0_i32_0 = arith.constant 0 : i32
    return %arg0, %c0_i32 : i32, i32
  }
  func.func @transform_1(%arg0: i32) -> (i32, i32) {
    %c0_i32 = arith.constant 0 : i32
    %c0_i32_0 = arith.constant 0 : i32
    %c0_i32_1 = arith.constant 0 : i32
    return %c0_i32, %c0_i32_0 : i32, i32
  }
  func.func @transform_2(%arg0: i32) -> (i32, i32) {
    %c0_i32 = arith.constant 0 : i32
    %c0_i32_0 = arith.constant 0 : i32
    %c0_i32_1 = arith.constant 0 : i32
    return %c0_i32, %c0_i32_0 : i32, i32
  }
}

module attributes {stable_mosaic.version = 11 : i64} {
  func.func @_matmul_kernel(%arg0: i32, %arg1: memref<32x16xbf16, #tpu.memory_space<vmem>>, %arg2: memref<16x1024xbf16, #tpu.memory_space<vmem>>, %arg3: memref<32x1024xf32, #tpu.memory_space<vmem>>) attributes {dimension_semantics = [#tpu.dimension_semantics<parallel>], iteration_bounds = array<i64: 1>, scalar_prefetch = 0 : i64, scratch_operands = 0 : i64, tpu.core_type = #tpu.core_type<tc>, window_params = [{transform_indices = @transform_0, window_bounds = array<i64: 32, 16>}, {pipeline_mode = #tpu.pipeline_mode<synchronous>, transform_indices = @transform_1, window_bounds = array<i64: 16, 1024>}, {transform_indices = @transform_2, window_bounds = array<i64: 32, 1024>}]} {
    %c0 = arith.constant 0 : index
    %c0_0 = arith.constant 0 : index
    %0 = vector.load %arg1[%c0, %c0_0] : memref<32x16xbf16, #tpu.memory_space<vmem>>, vector<32x16xbf16>
    %c0_1 = arith.constant 0 : index
    %c0_2 = arith.constant 0 : index
    %1 = vector.load %arg2[%c0_1, %c0_2] : memref<16x1024xbf16, #tpu.memory_space<vmem>>, vector<16x1024xbf16>
    %cst = arith.constant dense<0.000000e+00> : vector<32x1024xf32>
    %2 = tpu.matmul %0, %1, %cst {dimension_numbers = #tpu.dot_dimension_numbers<[1], [0], [0], [1], [0, 0, 1, 1], [], []>} : vector<32x16xbf16>, vector<16x1024xbf16>, vector<32x1024xf32> -> vector<32x1024xf32>
    %c0_3 = arith.constant 0 : index
    %c0_4 = arith.constant 0 : index
    %3 = vector.load %arg3[%c0_3, %c0_4] : memref<32x1024xf32, #tpu.memory_space<vmem>>, vector<32x1024xf32>
    tpu.vector_store %arg3[%c0_3, %c0_4], %2 {strides = array<i32>} : memref<32x1024xf32, #tpu.memory_space<vmem>>, vector<32x1024xf32>,
    return
  }
  func.func @transform_0(%arg0: i32) -> (i32, i32) {
    %c0_i32 = arith.constant 0 : i32
    %c0_i32_0 = arith.constant 0 : i32
    return %arg0, %c0_i32 : i32, i32
  }
  func.func @transform_1(%arg0: i32) -> (i32, i32) {
    %c0_i32 = arith.constant 0 : i32
    %c0_i32_0 = arith.constant 0 : i32
    %c0_i32_1 = arith.constant 0 : i32
    return %c0_i32, %c0_i32_0 : i32, i32
  }
  func.func @transform_2(%arg0: i32) -> (i32, i32) {
    %c0_i32 = arith.constant 0 : i32
    %c0_i32_0 = arith.constant 0 : i32
    return %arg0, %c0_i32 : i32, i32
  }
}

module attributes {stable_mosaic.version = 11 : i64} {
  func.func @_scale_shift_relu_kernel(%arg0: i32, %arg1: memref<8x512xf32, #tpu.memory_space<vmem>>, %arg2: memref<1x512xf32, #tpu.memory_space<vmem>>, %arg3: memref<1x512xf32, #tpu.memory_space<vmem>>, %arg4: memref<8x512xbf16, #tpu.memory_space<vmem>>) attributes {dimension_semantics = [#tpu.dimension_semantics<parallel>], iteration_bounds = array<i64: 1>, scalar_prefetch = 0 : i64, scratch_operands = 0 : i64, tpu.core_type = #tpu.core_type<tc>, window_params = [{transform_indices = @transform_0, window_bounds = array<i64: 8, 512>}, {pipeline_mode = #tpu.pipeline_mode<synchronous>, transform_indices = @transform_1, window_bounds = array<i64: 1, 512>}, {pipeline_mode = #tpu.pipeline_mode<synchronous>, transform_indices = @transform_2, window_bounds = array<i64: 1, 512>}, {transform_indices = @transform_3, window_bounds = array<i64: 8, 512>}]} {
    %c0 = arith.constant 0 : index
    %c0_0 = arith.constant 0 : index
    %0 = vector.load %arg1[%c0, %c0_0] : memref<8x512xf32, #tpu.memory_space<vmem>>, vector<8x512xf32>
    %c0_1 = arith.constant 0 : index
    %c0_2 = arith.constant 0 : index
    %1 = vector.load %arg2[%c0_1, %c0_2] : memref<1x512xf32, #tpu.memory_space<vmem>>, vector<1x512xf32>
    %2 = vector.broadcast %1 : vector<1x512xf32> to vector<8x512xf32>
    %3 = arith.mulf %0, %2 : vector<8x512xf32>
    %c0_3 = arith.constant 0 : index
    %c0_4 = arith.constant 0 : index
    %4 = vector.load %arg3[%c0_3, %c0_4] : memref<1x512xf32, #tpu.memory_space<vmem>>, vector<1x512xf32>
    %5 = vector.broadcast %4 : vector<1x512xf32> to vector<8x512xf32>
    %6 = arith.addf %3, %5 : vector<8x512xf32>
    %cst = arith.constant 0.000000e+00 : f32
    %7 = vector.broadcast %cst : f32 to vector<8x512xf32>
    %8 = arith.maximumf %6, %7 : vector<8x512xf32>
    %9 = arith.truncf %8 : vector<8x512xf32> to vector<8x512xbf16>
    %c0_5 = arith.constant 0 : index
    %c0_6 = arith.constant 0 : index
    %10 = vector.load %arg4[%c0_5, %c0_6] : memref<8x512xbf16, #tpu.memory_space<vmem>>, vector<8x512xbf16>
    tpu.vector_store %arg4[%c0_5, %c0_6], %9 {strides = array<i32>} : memref<8x512xbf16, #tpu.memory_space<vmem>>, vector<8x512xbf16>,
    return
  }
  func.func @transform_0(%arg0: i32) -> (i32, i32) {
    %c0_i32 = arith.constant 0 : i32
    %c0_i32_0 = arith.constant 0 : i32
    return %arg0, %c0_i32 : i32, i32
  }
  func.func @transform_1(%arg0: i32) -> (i32, i32) {
    %c0_i32 = arith.constant 0 : i32
    %c0_i32_0 = arith.constant 0 : i32
    %c0_i32_1 = arith.constant 0 : i32
    return %c0_i32, %c0_i32_0 : i32, i32
  }
  func.func @transform_2(%arg0: i32) -> (i32, i32) {
    %c0_i32 = arith.constant 0 : i32
    %c0_i32_0 = arith.constant 0 : i32
    %c0_i32_1 = arith.constant 0 : i32
    return %c0_i32, %c0_i32_0 : i32, i32
  }
  func.func @transform_3(%arg0: i32) -> (i32, i32) {
    %c0_i32 = arith.constant 0 : i32
    %c0_i32_0 = arith.constant 0 : i32
    return %arg0, %c0_i32 : i32, i32
  }
}

module attributes {stable_mosaic.version = 11 : i64} {
  func.func @_scale_shift_relu_kernel(%arg0: i32, %arg1: memref<48x512xf32, #tpu.memory_space<vmem>>, %arg2: memref<1x512xf32, #tpu.memory_space<vmem>>, %arg3: memref<1x512xf32, #tpu.memory_space<vmem>>, %arg4: memref<48x512xbf16, #tpu.memory_space<vmem>>) attributes {dimension_semantics = [#tpu.dimension_semantics<parallel>], iteration_bounds = array<i64: 1>, scalar_prefetch = 0 : i64, scratch_operands = 0 : i64, tpu.core_type = #tpu.core_type<tc>, window_params = [{transform_indices = @transform_0, window_bounds = array<i64: 48, 512>}, {pipeline_mode = #tpu.pipeline_mode<synchronous>, transform_indices = @transform_1, window_bounds = array<i64: 1, 512>}, {pipeline_mode = #tpu.pipeline_mode<synchronous>, transform_indices = @transform_2, window_bounds = array<i64: 1, 512>}, {transform_indices = @transform_3, window_bounds = array<i64: 48, 512>}]} {
    %c0 = arith.constant 0 : index
    %c0_0 = arith.constant 0 : index
    %0 = vector.load %arg1[%c0, %c0_0] : memref<48x512xf32, #tpu.memory_space<vmem>>, vector<48x512xf32>
    %c0_1 = arith.constant 0 : index
    %c0_2 = arith.constant 0 : index
    %1 = vector.load %arg2[%c0_1, %c0_2] : memref<1x512xf32, #tpu.memory_space<vmem>>, vector<1x512xf32>
    %2 = vector.broadcast %1 : vector<1x512xf32> to vector<48x512xf32>
    %3 = arith.mulf %0, %2 : vector<48x512xf32>
    %c0_3 = arith.constant 0 : index
    %c0_4 = arith.constant 0 : index
    %4 = vector.load %arg3[%c0_3, %c0_4] : memref<1x512xf32, #tpu.memory_space<vmem>>, vector<1x512xf32>
    %5 = vector.broadcast %4 : vector<1x512xf32> to vector<48x512xf32>
    %6 = arith.addf %3, %5 : vector<48x512xf32>
    %cst = arith.constant 0.000000e+00 : f32
    %7 = vector.broadcast %cst : f32 to vector<48x512xf32>
    %8 = arith.maximumf %6, %7 : vector<48x512xf32>
    %9 = arith.truncf %8 : vector<48x512xf32> to vector<48x512xbf16>
    %c0_5 = arith.constant 0 : index
    %c0_6 = arith.constant 0 : index
    %10 = vector.load %arg4[%c0_5, %c0_6] : memref<48x512xbf16, #tpu.memory_space<vmem>>, vector<48x512xbf16>
    tpu.vector_store %arg4[%c0_5, %c0_6], %9 {strides = array<i32>} : memref<48x512xbf16, #tpu.memory_space<vmem>>, vector<48x512xbf16>,
    return
  }
  func.func @transform_0(%arg0: i32) -> (i32, i32) {
    %c0_i32 = arith.constant 0 : i32
    %c0_i32_0 = arith.constant 0 : i32
    return %arg0, %c0_i32 : i32, i32
  }
  func.func @transform_1(%arg0: i32) -> (i32, i32) {
    %c0_i32 = arith.constant 0 : i32
    %c0_i32_0 = arith.constant 0 : i32
    %c0_i32_1 = arith.constant 0 : i32
    return %c0_i32, %c0_i32_0 : i32, i32
  }
  func.func @transform_2(%arg0: i32) -> (i32, i32) {
    %c0_i32 = arith.constant 0 : i32
    %c0_i32_0 = arith.constant 0 : i32
    %c0_i32_1 = arith.constant 0 : i32
    return %c0_i32, %c0_i32_0 : i32, i32
  }
  func.func @transform_3(%arg0: i32) -> (i32, i32) {
    %c0_i32 = arith.constant 0 : i32
    %c0_i32_0 = arith.constant 0 : i32
    return %arg0, %c0_i32 : i32, i32
  }
}

module attributes {stable_mosaic.version = 11 : i64} {
  func.func @_stats_kernel(%arg0: i32, %arg1: memref<48x512xf32, #tpu.memory_space<vmem>>, %arg2: memref<1x512xf32, #tpu.memory_space<vmem>>, %arg3: memref<1x512xf32, #tpu.memory_space<vmem>>) attributes {dimension_semantics = [#tpu.dimension_semantics<arbitrary>], iteration_bounds = array<i64: 1>, scalar_prefetch = 0 : i64, scratch_operands = 0 : i64, tpu.core_type = #tpu.core_type<tc>, window_params = [{transform_indices = @transform_0, window_bounds = array<i64: 48, 512>}, {pipeline_mode = #tpu.pipeline_mode<synchronous>, transform_indices = @transform_1, window_bounds = array<i64: 1, 512>}, {pipeline_mode = #tpu.pipeline_mode<synchronous>, transform_indices = @transform_2, window_bounds = array<i64: 1, 512>}]} {
    %c0_i32 = arith.constant 0 : i32
    %0 = arith.cmpi eq, %arg0, %c0_i32 : i32
    %1 = arith.extui %0 : i1 to i32
    %c0_i32_0 = arith.constant 0 : i32
    %2 = arith.cmpi ne, %1, %c0_i32_0 : i32
    scf.if %2 {
      %cst_11 = arith.constant 0.000000e+00 : f32
      %15 = vector.broadcast %cst_11 : f32 to vector<1x512xf32>
      %c0_12 = arith.constant 0 : index
      %c0_13 = arith.constant 0 : index
      %16 = vector.load %arg2[%c0_12, %c0_13] : memref<1x512xf32, #tpu.memory_space<vmem>>, vector<1x512xf32>
      tpu.vector_store %arg2[%c0_12, %c0_13], %15 {strides = array<i32>} : memref<1x512xf32, #tpu.memory_space<vmem>>, vector<1x512xf32>,
      %cst_14 = arith.constant 0.000000e+00 : f32
      %17 = vector.broadcast %cst_14 : f32 to vector<1x512xf32>
      %c0_15 = arith.constant 0 : index
      %c0_16 = arith.constant 0 : index
      %18 = vector.load %arg3[%c0_15, %c0_16] : memref<1x512xf32, #tpu.memory_space<vmem>>, vector<1x512xf32>
      tpu.vector_store %arg3[%c0_15, %c0_16], %17 {strides = array<i32>} : memref<1x512xf32, #tpu.memory_space<vmem>>, vector<1x512xf32>,
    } else {
    }
    %c0 = arith.constant 0 : index
    %c0_1 = arith.constant 0 : index
    %3 = vector.load %arg1[%c0, %c0_1] : memref<48x512xf32, #tpu.memory_space<vmem>>, vector<48x512xf32>
    %c0_2 = arith.constant 0 : index
    %c0_3 = arith.constant 0 : index
    %4 = vector.load %arg2[%c0_2, %c0_3] : memref<1x512xf32, #tpu.memory_space<vmem>>, vector<1x512xf32>
    %cst = arith.constant dense<0.000000e+00> : vector<512xf32>
    %5 = vector.multi_reduction <add>, %3, %cst [0] : vector<48x512xf32> to vector<512xf32>
    %6 = vector.shape_cast %5 : vector<512xf32> to vector<1x512xf32>
    %7 = arith.addf %4, %6 : vector<1x512xf32>
    %c0_4 = arith.constant 0 : index
    %c0_5 = arith.constant 0 : index
    %8 = vector.load %arg2[%c0_4, %c0_5] : memref<1x512xf32, #tpu.memory_space<vmem>>, vector<1x512xf32>
    tpu.vector_store %arg2[%c0_4, %c0_5], %7 {strides = array<i32>} : memref<1x512xf32, #tpu.memory_space<vmem>>, vector<1x512xf32>,
    %c0_6 = arith.constant 0 : index
    %c0_7 = arith.constant 0 : index
    %9 = vector.load %arg3[%c0_6, %c0_7] : memref<1x512xf32, #tpu.memory_space<vmem>>, vector<1x512xf32>
    %10 = arith.mulf %3, %3 : vector<48x512xf32>
    %cst_8 = arith.constant dense<0.000000e+00> : vector<512xf32>
    %11 = vector.multi_reduction <add>, %10, %cst_8 [0] : vector<48x512xf32> to vector<512xf32>
    %12 = vector.shape_cast %11 : vector<512xf32> to vector<1x512xf32>
    %13 = arith.addf %9, %12 : vector<1x512xf32>
    %c0_9 = arith.constant 0 : index
    %c0_10 = arith.constant 0 : index
    %14 = vector.load %arg3[%c0_9, %c0_10] : memref<1x512xf32, #tpu.memory_space<vmem>>, vector<1x512xf32>
    tpu.vector_store %arg3[%c0_9, %c0_10], %13 {strides = array<i32>} : memref<1x512xf32, #tpu.memory_space<vmem>>, vector<1x512xf32>,
    return
  }
  func.func @transform_0(%arg0: i32) -> (i32, i32) {
    %c0_i32 = arith.constant 0 : i32
    %c0_i32_0 = arith.constant 0 : i32
    return %arg0, %c0_i32 : i32, i32
  }
  func.func @transform_1(%arg0: i32) -> (i32, i32) {
    %c0_i32 = arith.constant 0 : i32
    %c0_i32_0 = arith.constant 0 : i32
    %c0_i32_1 = arith.constant 0 : i32
    return %c0_i32, %c0_i32_0 : i32, i32
  }
  func.func @transform_2(%arg0: i32) -> (i32, i32) {
    %c0_i32 = arith.constant 0 : i32
    %c0_i32_0 = arith.constant 0 : i32
    %c0_i32_1 = arith.constant 0 : i32
    return %c0_i32, %c0_i32_0 : i32, i32
  }
}

module attributes {stable_mosaic.version = 11 : i64} {
  func.func @_matmul_kernel(%arg0: i32, %arg1: memref<344x64xbf16, #tpu.memory_space<vmem>>, %arg2: memref<64x896xbf16, #tpu.memory_space<vmem>>, %arg3: memref<344x896xf32, #tpu.memory_space<vmem>>) attributes {dimension_semantics = [#tpu.dimension_semantics<parallel>], iteration_bounds = array<i64: 1>, scalar_prefetch = 0 : i64, scratch_operands = 0 : i64, tpu.core_type = #tpu.core_type<tc>, window_params = [{transform_indices = @transform_0, window_bounds = array<i64: 344, 64>}, {pipeline_mode = #tpu.pipeline_mode<synchronous>, transform_indices = @transform_1, window_bounds = array<i64: 64, 896>}, {transform_indices = @transform_2, window_bounds = array<i64: 344, 896>}]} {
    %c0 = arith.constant 0 : index
    %c0_0 = arith.constant 0 : index
    %0 = vector.load %arg1[%c0, %c0_0] : memref<344x64xbf16, #tpu.memory_space<vmem>>, vector<344x64xbf16>
    %c0_1 = arith.constant 0 : index
    %c0_2 = arith.constant 0 : index
    %1 = vector.load %arg2[%c0_1, %c0_2] : memref<64x896xbf16, #tpu.memory_space<vmem>>, vector<64x896xbf16>
    %cst = arith.constant dense<0.000000e+00> : vector<344x896xf32>
    %2 = tpu.matmul %0, %1, %cst {dimension_numbers = #tpu.dot_dimension_numbers<[1], [0], [0], [1], [0, 0, 1, 1], [], []>} : vector<344x64xbf16>, vector<64x896xbf16>, vector<344x896xf32> -> vector<344x896xf32>
    %c0_3 = arith.constant 0 : index
    %c0_4 = arith.constant 0 : index
    %3 = vector.load %arg3[%c0_3, %c0_4] : memref<344x896xf32, #tpu.memory_space<vmem>>, vector<344x896xf32>
    tpu.vector_store %arg3[%c0_3, %c0_4], %2 {strides = array<i32>} : memref<344x896xf32, #tpu.memory_space<vmem>>, vector<344x896xf32>,
    return
  }
  func.func @transform_0(%arg0: i32) -> (i32, i32) {
    %c0_i32 = arith.constant 0 : i32
    %c0_i32_0 = arith.constant 0 : i32
    return %arg0, %c0_i32 : i32, i32
  }
  func.func @transform_1(%arg0: i32) -> (i32, i32) {
    %c0_i32 = arith.constant 0 : i32
    %c0_i32_0 = arith.constant 0 : i32
    %c0_i32_1 = arith.constant 0 : i32
    return %c0_i32, %c0_i32_0 : i32, i32
  }
  func.func @transform_2(%arg0: i32) -> (i32, i32) {
    %c0_i32 = arith.constant 0 : i32
    %c0_i32_0 = arith.constant 0 : i32
    return %arg0, %c0_i32 : i32, i32
  }
}

module attributes {stable_mosaic.version = 11 : i64} {
  func.func @_stats_kernel(%arg0: i32, %arg1: memref<112x512xf32, #tpu.memory_space<vmem>>, %arg2: memref<1x512xf32, #tpu.memory_space<vmem>>, %arg3: memref<1x512xf32, #tpu.memory_space<vmem>>) attributes {dimension_semantics = [#tpu.dimension_semantics<arbitrary>], iteration_bounds = array<i64: 1>, scalar_prefetch = 0 : i64, scratch_operands = 0 : i64, tpu.core_type = #tpu.core_type<tc>, window_params = [{transform_indices = @transform_0, window_bounds = array<i64: 112, 512>}, {pipeline_mode = #tpu.pipeline_mode<synchronous>, transform_indices = @transform_1, window_bounds = array<i64: 1, 512>}, {pipeline_mode = #tpu.pipeline_mode<synchronous>, transform_indices = @transform_2, window_bounds = array<i64: 1, 512>}]} {
    %c0_i32 = arith.constant 0 : i32
    %0 = arith.cmpi eq, %arg0, %c0_i32 : i32
    %1 = arith.extui %0 : i1 to i32
    %c0_i32_0 = arith.constant 0 : i32
    %2 = arith.cmpi ne, %1, %c0_i32_0 : i32
    scf.if %2 {
      %cst_11 = arith.constant 0.000000e+00 : f32
      %15 = vector.broadcast %cst_11 : f32 to vector<1x512xf32>
      %c0_12 = arith.constant 0 : index
      %c0_13 = arith.constant 0 : index
      %16 = vector.load %arg2[%c0_12, %c0_13] : memref<1x512xf32, #tpu.memory_space<vmem>>, vector<1x512xf32>
      tpu.vector_store %arg2[%c0_12, %c0_13], %15 {strides = array<i32>} : memref<1x512xf32, #tpu.memory_space<vmem>>, vector<1x512xf32>,
      %cst_14 = arith.constant 0.000000e+00 : f32
      %17 = vector.broadcast %cst_14 : f32 to vector<1x512xf32>
      %c0_15 = arith.constant 0 : index
      %c0_16 = arith.constant 0 : index
      %18 = vector.load %arg3[%c0_15, %c0_16] : memref<1x512xf32, #tpu.memory_space<vmem>>, vector<1x512xf32>
      tpu.vector_store %arg3[%c0_15, %c0_16], %17 {strides = array<i32>} : memref<1x512xf32, #tpu.memory_space<vmem>>, vector<1x512xf32>,
    } else {
    }
    %c0 = arith.constant 0 : index
    %c0_1 = arith.constant 0 : index
    %3 = vector.load %arg1[%c0, %c0_1] : memref<112x512xf32, #tpu.memory_space<vmem>>, vector<112x512xf32>
    %c0_2 = arith.constant 0 : index
    %c0_3 = arith.constant 0 : index
    %4 = vector.load %arg2[%c0_2, %c0_3] : memref<1x512xf32, #tpu.memory_space<vmem>>, vector<1x512xf32>
    %cst = arith.constant dense<0.000000e+00> : vector<512xf32>
    %5 = vector.multi_reduction <add>, %3, %cst [0] : vector<112x512xf32> to vector<512xf32>
    %6 = vector.shape_cast %5 : vector<512xf32> to vector<1x512xf32>
    %7 = arith.addf %4, %6 : vector<1x512xf32>
    %c0_4 = arith.constant 0 : index
    %c0_5 = arith.constant 0 : index
    %8 = vector.load %arg2[%c0_4, %c0_5] : memref<1x512xf32, #tpu.memory_space<vmem>>, vector<1x512xf32>
    tpu.vector_store %arg2[%c0_4, %c0_5], %7 {strides = array<i32>} : memref<1x512xf32, #tpu.memory_space<vmem>>, vector<1x512xf32>,
    %c0_6 = arith.constant 0 : index
    %c0_7 = arith.constant 0 : index
    %9 = vector.load %arg3[%c0_6, %c0_7] : memref<1x512xf32, #tpu.memory_space<vmem>>, vector<1x512xf32>
    %10 = arith.mulf %3, %3 : vector<112x512xf32>
    %cst_8 = arith.constant dense<0.000000e+00> : vector<512xf32>
    %11 = vector.multi_reduction <add>, %10, %cst_8 [0] : vector<112x512xf32> to vector<512xf32>
    %12 = vector.shape_cast %11 : vector<512xf32> to vector<1x512xf32>
    %13 = arith.addf %9, %12 : vector<1x512xf32>
    %c0_9 = arith.constant 0 : index
    %c0_10 = arith.constant 0 : index
    %14 = vector.load %arg3[%c0_9, %c0_10] : memref<1x512xf32, #tpu.memory_space<vmem>>, vector<1x512xf32>
    tpu.vector_store %arg3[%c0_9, %c0_10], %13 {strides = array<i32>} : memref<1x512xf32, #tpu.memory_space<vmem>>, vector<1x512xf32>,
    return
  }
  func.func @transform_0(%arg0: i32) -> (i32, i32) {
    %c0_i32 = arith.constant 0 : i32
    %c0_i32_0 = arith.constant 0 : i32
    return %arg0, %c0_i32 : i32, i32
  }
  func.func @transform_1(%arg0: i32) -> (i32, i32) {
    %c0_i32 = arith.constant 0 : i32
    %c0_i32_0 = arith.constant 0 : i32
    %c0_i32_1 = arith.constant 0 : i32
    return %c0_i32, %c0_i32_0 : i32, i32
  }
  func.func @transform_2(%arg0: i32) -> (i32, i32) {
    %c0_i32 = arith.constant 0 : i32
    %c0_i32_0 = arith.constant 0 : i32
    %c0_i32_1 = arith.constant 0 : i32
    return %c0_i32, %c0_i32_0 : i32, i32
  }
}

module attributes {stable_mosaic.version = 11 : i64} {
  func.func @_scale_shift_relu_kernel(%arg0: i32, %arg1: memref<112x512xf32, #tpu.memory_space<vmem>>, %arg2: memref<1x512xf32, #tpu.memory_space<vmem>>, %arg3: memref<1x512xf32, #tpu.memory_space<vmem>>, %arg4: memref<112x512xbf16, #tpu.memory_space<vmem>>) attributes {dimension_semantics = [#tpu.dimension_semantics<parallel>], iteration_bounds = array<i64: 1>, scalar_prefetch = 0 : i64, scratch_operands = 0 : i64, tpu.core_type = #tpu.core_type<tc>, window_params = [{transform_indices = @transform_0, window_bounds = array<i64: 112, 512>}, {pipeline_mode = #tpu.pipeline_mode<synchronous>, transform_indices = @transform_1, window_bounds = array<i64: 1, 512>}, {pipeline_mode = #tpu.pipeline_mode<synchronous>, transform_indices = @transform_2, window_bounds = array<i64: 1, 512>}, {transform_indices = @transform_3, window_bounds = array<i64: 112, 512>}]} {
    %c0 = arith.constant 0 : index
    %c0_0 = arith.constant 0 : index
    %0 = vector.load %arg1[%c0, %c0_0] : memref<112x512xf32, #tpu.memory_space<vmem>>, vector<112x512xf32>
    %c0_1 = arith.constant 0 : index
    %c0_2 = arith.constant 0 : index
    %1 = vector.load %arg2[%c0_1, %c0_2] : memref<1x512xf32, #tpu.memory_space<vmem>>, vector<1x512xf32>
    %2 = vector.broadcast %1 : vector<1x512xf32> to vector<112x512xf32>
    %3 = arith.mulf %0, %2 : vector<112x512xf32>
    %c0_3 = arith.constant 0 : index
    %c0_4 = arith.constant 0 : index
    %4 = vector.load %arg3[%c0_3, %c0_4] : memref<1x512xf32, #tpu.memory_space<vmem>>, vector<1x512xf32>
    %5 = vector.broadcast %4 : vector<1x512xf32> to vector<112x512xf32>
    %6 = arith.addf %3, %5 : vector<112x512xf32>
    %cst = arith.constant 0.000000e+00 : f32
    %7 = vector.broadcast %cst : f32 to vector<112x512xf32>
    %8 = arith.maximumf %6, %7 : vector<112x512xf32>
    %9 = arith.truncf %8 : vector<112x512xf32> to vector<112x512xbf16>
    %c0_5 = arith.constant 0 : index
    %c0_6 = arith.constant 0 : index
    %10 = vector.load %arg4[%c0_5, %c0_6] : memref<112x512xbf16, #tpu.memory_space<vmem>>, vector<112x512xbf16>
    tpu.vector_store %arg4[%c0_5, %c0_6], %9 {strides = array<i32>} : memref<112x512xbf16, #tpu.memory_space<vmem>>, vector<112x512xbf16>,
    return
  }
  func.func @transform_0(%arg0: i32) -> (i32, i32) {
    %c0_i32 = arith.constant 0 : i32
    %c0_i32_0 = arith.constant 0 : i32
    return %arg0, %c0_i32 : i32, i32
  }
  func.func @transform_1(%arg0: i32) -> (i32, i32) {
    %c0_i32 = arith.constant 0 : i32
    %c0_i32_0 = arith.constant 0 : i32
    %c0_i32_1 = arith.constant 0 : i32
    return %c0_i32, %c0_i32_0 : i32, i32
  }
  func.func @transform_2(%arg0: i32) -> (i32, i32) {
    %c0_i32 = arith.constant 0 : i32
    %c0_i32_0 = arith.constant 0 : i32
    %c0_i32_1 = arith.constant 0 : i32
    return %c0_i32, %c0_i32_0 : i32, i32
  }
  func.func @transform_3(%arg0: i32) -> (i32, i32) {
    %c0_i32 = arith.constant 0 : i32
    %c0_i32_0 = arith.constant 0 : i32
    return %arg0, %c0_i32 : i32, i32
  }
}

module attributes {stable_mosaic.version = 11 : i64} {
  func.func @_matmul_kernel(%arg0: i32, %arg1: memref<848x32xbf16, #tpu.memory_space<vmem>>, %arg2: memref<32x512xbf16, #tpu.memory_space<vmem>>, %arg3: memref<848x512xf32, #tpu.memory_space<vmem>>) attributes {dimension_semantics = [#tpu.dimension_semantics<parallel>], iteration_bounds = array<i64: 2>, scalar_prefetch = 0 : i64, scratch_operands = 0 : i64, tpu.core_type = #tpu.core_type<tc>, window_params = [{transform_indices = @transform_0, window_bounds = array<i64: 848, 32>}, {pipeline_mode = #tpu.pipeline_mode<synchronous>, transform_indices = @transform_1, window_bounds = array<i64: 32, 512>}, {transform_indices = @transform_2, window_bounds = array<i64: 848, 512>}]} {
    %c0 = arith.constant 0 : index
    %c0_0 = arith.constant 0 : index
    %0 = vector.load %arg1[%c0, %c0_0] : memref<848x32xbf16, #tpu.memory_space<vmem>>, vector<848x32xbf16>
    %c0_1 = arith.constant 0 : index
    %c0_2 = arith.constant 0 : index
    %1 = vector.load %arg2[%c0_1, %c0_2] : memref<32x512xbf16, #tpu.memory_space<vmem>>, vector<32x512xbf16>
    %cst = arith.constant dense<0.000000e+00> : vector<848x512xf32>
    %2 = tpu.matmul %0, %1, %cst {dimension_numbers = #tpu.dot_dimension_numbers<[1], [0], [0], [1], [0, 0, 1, 1], [], []>} : vector<848x32xbf16>, vector<32x512xbf16>, vector<848x512xf32> -> vector<848x512xf32>
    %c0_3 = arith.constant 0 : index
    %c0_4 = arith.constant 0 : index
    %3 = vector.load %arg3[%c0_3, %c0_4] : memref<848x512xf32, #tpu.memory_space<vmem>>, vector<848x512xf32>
    tpu.vector_store %arg3[%c0_3, %c0_4], %2 {strides = array<i32>} : memref<848x512xf32, #tpu.memory_space<vmem>>, vector<848x512xf32>,
    return
  }
  func.func @transform_0(%arg0: i32) -> (i32, i32) {
    %c0_i32 = arith.constant 0 : i32
    %c0_i32_0 = arith.constant 0 : i32
    return %arg0, %c0_i32 : i32, i32
  }
  func.func @transform_1(%arg0: i32) -> (i32, i32) {
    %c0_i32 = arith.constant 0 : i32
    %c0_i32_0 = arith.constant 0 : i32
    %c0_i32_1 = arith.constant 0 : i32
    return %c0_i32, %c0_i32_0 : i32, i32
  }
  func.func @transform_2(%arg0: i32) -> (i32, i32) {
    %c0_i32 = arith.constant 0 : i32
    %c0_i32_0 = arith.constant 0 : i32
    return %arg0, %c0_i32 : i32, i32
  }
}

module attributes {stable_mosaic.version = 11 : i64} {
  func.func @_stats_kernel(%arg0: i32, %arg1: memref<240x512xf32, #tpu.memory_space<vmem>>, %arg2: memref<1x512xf32, #tpu.memory_space<vmem>>, %arg3: memref<1x512xf32, #tpu.memory_space<vmem>>) attributes {dimension_semantics = [#tpu.dimension_semantics<arbitrary>], iteration_bounds = array<i64: 1>, scalar_prefetch = 0 : i64, scratch_operands = 0 : i64, tpu.core_type = #tpu.core_type<tc>, window_params = [{transform_indices = @transform_0, window_bounds = array<i64: 240, 512>}, {pipeline_mode = #tpu.pipeline_mode<synchronous>, transform_indices = @transform_1, window_bounds = array<i64: 1, 512>}, {pipeline_mode = #tpu.pipeline_mode<synchronous>, transform_indices = @transform_2, window_bounds = array<i64: 1, 512>}]} {
    %c0_i32 = arith.constant 0 : i32
    %0 = arith.cmpi eq, %arg0, %c0_i32 : i32
    %1 = arith.extui %0 : i1 to i32
    %c0_i32_0 = arith.constant 0 : i32
    %2 = arith.cmpi ne, %1, %c0_i32_0 : i32
    scf.if %2 {
      %cst_11 = arith.constant 0.000000e+00 : f32
      %15 = vector.broadcast %cst_11 : f32 to vector<1x512xf32>
      %c0_12 = arith.constant 0 : index
      %c0_13 = arith.constant 0 : index
      %16 = vector.load %arg2[%c0_12, %c0_13] : memref<1x512xf32, #tpu.memory_space<vmem>>, vector<1x512xf32>
      tpu.vector_store %arg2[%c0_12, %c0_13], %15 {strides = array<i32>} : memref<1x512xf32, #tpu.memory_space<vmem>>, vector<1x512xf32>,
      %cst_14 = arith.constant 0.000000e+00 : f32
      %17 = vector.broadcast %cst_14 : f32 to vector<1x512xf32>
      %c0_15 = arith.constant 0 : index
      %c0_16 = arith.constant 0 : index
      %18 = vector.load %arg3[%c0_15, %c0_16] : memref<1x512xf32, #tpu.memory_space<vmem>>, vector<1x512xf32>
      tpu.vector_store %arg3[%c0_15, %c0_16], %17 {strides = array<i32>} : memref<1x512xf32, #tpu.memory_space<vmem>>, vector<1x512xf32>,
    } else {
    }
    %c0 = arith.constant 0 : index
    %c0_1 = arith.constant 0 : index
    %3 = vector.load %arg1[%c0, %c0_1] : memref<240x512xf32, #tpu.memory_space<vmem>>, vector<240x512xf32>
    %c0_2 = arith.constant 0 : index
    %c0_3 = arith.constant 0 : index
    %4 = vector.load %arg2[%c0_2, %c0_3] : memref<1x512xf32, #tpu.memory_space<vmem>>, vector<1x512xf32>
    %cst = arith.constant dense<0.000000e+00> : vector<512xf32>
    %5 = vector.multi_reduction <add>, %3, %cst [0] : vector<240x512xf32> to vector<512xf32>
    %6 = vector.shape_cast %5 : vector<512xf32> to vector<1x512xf32>
    %7 = arith.addf %4, %6 : vector<1x512xf32>
    %c0_4 = arith.constant 0 : index
    %c0_5 = arith.constant 0 : index
    %8 = vector.load %arg2[%c0_4, %c0_5] : memref<1x512xf32, #tpu.memory_space<vmem>>, vector<1x512xf32>
    tpu.vector_store %arg2[%c0_4, %c0_5], %7 {strides = array<i32>} : memref<1x512xf32, #tpu.memory_space<vmem>>, vector<1x512xf32>,
    %c0_6 = arith.constant 0 : index
    %c0_7 = arith.constant 0 : index
    %9 = vector.load %arg3[%c0_6, %c0_7] : memref<1x512xf32, #tpu.memory_space<vmem>>, vector<1x512xf32>
    %10 = arith.mulf %3, %3 : vector<240x512xf32>
    %cst_8 = arith.constant dense<0.000000e+00> : vector<512xf32>
    %11 = vector.multi_reduction <add>, %10, %cst_8 [0] : vector<240x512xf32> to vector<512xf32>
    %12 = vector.shape_cast %11 : vector<512xf32> to vector<1x512xf32>
    %13 = arith.addf %9, %12 : vector<1x512xf32>
    %c0_9 = arith.constant 0 : index
    %c0_10 = arith.constant 0 : index
    %14 = vector.load %arg3[%c0_9, %c0_10] : memref<1x512xf32, #tpu.memory_space<vmem>>, vector<1x512xf32>
    tpu.vector_store %arg3[%c0_9, %c0_10], %13 {strides = array<i32>} : memref<1x512xf32, #tpu.memory_space<vmem>>, vector<1x512xf32>,
    return
  }
  func.func @transform_0(%arg0: i32) -> (i32, i32) {
    %c0_i32 = arith.constant 0 : i32
    %c0_i32_0 = arith.constant 0 : i32
    return %arg0, %c0_i32 : i32, i32
  }
  func.func @transform_1(%arg0: i32) -> (i32, i32) {
    %c0_i32 = arith.constant 0 : i32
    %c0_i32_0 = arith.constant 0 : i32
    %c0_i32_1 = arith.constant 0 : i32
    return %c0_i32, %c0_i32_0 : i32, i32
  }
  func.func @transform_2(%arg0: i32) -> (i32, i32) {
    %c0_i32 = arith.constant 0 : i32
    %c0_i32_0 = arith.constant 0 : i32
    %c0_i32_1 = arith.constant 0 : i32
    return %c0_i32, %c0_i32_0 : i32, i32
  }
}

module attributes {stable_mosaic.version = 11 : i64} {
  func.func @_scale_shift_relu_kernel(%arg0: i32, %arg1: memref<240x512xf32, #tpu.memory_space<vmem>>, %arg2: memref<1x512xf32, #tpu.memory_space<vmem>>, %arg3: memref<1x512xf32, #tpu.memory_space<vmem>>, %arg4: memref<240x512xbf16, #tpu.memory_space<vmem>>) attributes {dimension_semantics = [#tpu.dimension_semantics<parallel>], iteration_bounds = array<i64: 1>, scalar_prefetch = 0 : i64, scratch_operands = 0 : i64, tpu.core_type = #tpu.core_type<tc>, window_params = [{transform_indices = @transform_0, window_bounds = array<i64: 240, 512>}, {pipeline_mode = #tpu.pipeline_mode<synchronous>, transform_indices = @transform_1, window_bounds = array<i64: 1, 512>}, {pipeline_mode = #tpu.pipeline_mode<synchronous>, transform_indices = @transform_2, window_bounds = array<i64: 1, 512>}, {transform_indices = @transform_3, window_bounds = array<i64: 240, 512>}]} {
    %c0 = arith.constant 0 : index
    %c0_0 = arith.constant 0 : index
    %0 = vector.load %arg1[%c0, %c0_0] : memref<240x512xf32, #tpu.memory_space<vmem>>, vector<240x512xf32>
    %c0_1 = arith.constant 0 : index
    %c0_2 = arith.constant 0 : index
    %1 = vector.load %arg2[%c0_1, %c0_2] : memref<1x512xf32, #tpu.memory_space<vmem>>, vector<1x512xf32>
    %2 = vector.broadcast %1 : vector<1x512xf32> to vector<240x512xf32>
    %3 = arith.mulf %0, %2 : vector<240x512xf32>
    %c0_3 = arith.constant 0 : index
    %c0_4 = arith.constant 0 : index
    %4 = vector.load %arg3[%c0_3, %c0_4] : memref<1x512xf32, #tpu.memory_space<vmem>>, vector<1x512xf32>
    %5 = vector.broadcast %4 : vector<1x512xf32> to vector<240x512xf32>
    %6 = arith.addf %3, %5 : vector<240x512xf32>
    %cst = arith.constant 0.000000e+00 : f32
    %7 = vector.broadcast %cst : f32 to vector<240x512xf32>
    %8 = arith.maximumf %6, %7 : vector<240x512xf32>
    %9 = arith.truncf %8 : vector<240x512xf32> to vector<240x512xbf16>
    %c0_5 = arith.constant 0 : index
    %c0_6 = arith.constant 0 : index
    %10 = vector.load %arg4[%c0_5, %c0_6] : memref<240x512xbf16, #tpu.memory_space<vmem>>, vector<240x512xbf16>
    tpu.vector_store %arg4[%c0_5, %c0_6], %9 {strides = array<i32>} : memref<240x512xbf16, #tpu.memory_space<vmem>>, vector<240x512xbf16>,
    return
  }
  func.func @transform_0(%arg0: i32) -> (i32, i32) {
    %c0_i32 = arith.constant 0 : i32
    %c0_i32_0 = arith.constant 0 : i32
    return %arg0, %c0_i32 : i32, i32
  }
  func.func @transform_1(%arg0: i32) -> (i32, i32) {
    %c0_i32 = arith.constant 0 : i32
    %c0_i32_0 = arith.constant 0 : i32
    %c0_i32_1 = arith.constant 0 : i32
    return %c0_i32, %c0_i32_0 : i32, i32
  }
  func.func @transform_2(%arg0: i32) -> (i32, i32) {
    %c0_i32 = arith.constant 0 : i32
    %c0_i32_0 = arith.constant 0 : i32
    %c0_i32_1 = arith.constant 0 : i32
    return %c0_i32, %c0_i32_0 : i32, i32
  }
  func.func @transform_3(%arg0: i32) -> (i32, i32) {
    %c0_i32 = arith.constant 0 : i32
    %c0_i32_0 = arith.constant 0 : i32
    return %arg0, %c0_i32 : i32, i32
  }
}

module attributes {stable_mosaic.version = 11 : i64} {
  func.func @_matmul_kernel(%arg0: i32, %arg1: memref<936x16xbf16, #tpu.memory_space<vmem>>, %arg2: memref<16x128xbf16, #tpu.memory_space<vmem>>, %arg3: memref<936x128xf32, #tpu.memory_space<vmem>>) attributes {dimension_semantics = [#tpu.dimension_semantics<parallel>], iteration_bounds = array<i64: 8>, scalar_prefetch = 0 : i64, scratch_operands = 0 : i64, tpu.core_type = #tpu.core_type<tc>, window_params = [{transform_indices = @transform_0, window_bounds = array<i64: 936, 16>}, {pipeline_mode = #tpu.pipeline_mode<synchronous>, transform_indices = @transform_1, window_bounds = array<i64: 16, 128>}, {transform_indices = @transform_2, window_bounds = array<i64: 936, 128>}]} {
    %c0 = arith.constant 0 : index
    %c0_0 = arith.constant 0 : index
    %0 = vector.load %arg1[%c0, %c0_0] : memref<936x16xbf16, #tpu.memory_space<vmem>>, vector<936x16xbf16>
    %c0_1 = arith.constant 0 : index
    %c0_2 = arith.constant 0 : index
    %1 = vector.load %arg2[%c0_1, %c0_2] : memref<16x128xbf16, #tpu.memory_space<vmem>>, vector<16x128xbf16>
    %cst = arith.constant dense<0.000000e+00> : vector<936x128xf32>
    %2 = tpu.matmul %0, %1, %cst {dimension_numbers = #tpu.dot_dimension_numbers<[1], [0], [0], [1], [0, 0, 1, 1], [], []>} : vector<936x16xbf16>, vector<16x128xbf16>, vector<936x128xf32> -> vector<936x128xf32>
    %c0_3 = arith.constant 0 : index
    %c0_4 = arith.constant 0 : index
    %3 = vector.load %arg3[%c0_3, %c0_4] : memref<936x128xf32, #tpu.memory_space<vmem>>, vector<936x128xf32>
    tpu.vector_store %arg3[%c0_3, %c0_4], %2 {strides = array<i32>} : memref<936x128xf32, #tpu.memory_space<vmem>>, vector<936x128xf32>,
    return
  }
  func.func @transform_0(%arg0: i32) -> (i32, i32) {
    %c0_i32 = arith.constant 0 : i32
    %c0_i32_0 = arith.constant 0 : i32
    return %arg0, %c0_i32 : i32, i32
  }
  func.func @transform_1(%arg0: i32) -> (i32, i32) {
    %c0_i32 = arith.constant 0 : i32
    %c0_i32_0 = arith.constant 0 : i32
    %c0_i32_1 = arith.constant 0 : i32
    return %c0_i32, %c0_i32_0 : i32, i32
  }
  func.func @transform_2(%arg0: i32) -> (i32, i32) {
    %c0_i32 = arith.constant 0 : i32
    %c0_i32_0 = arith.constant 0 : i32
    return %arg0, %c0_i32 : i32, i32
  }
}

module attributes {stable_mosaic.version = 11 : i64} {
  func.func @_bias_tanh_kernel(%arg0: i32, %arg1: memref<64x512xf32, #tpu.memory_space<vmem>>, %arg2: memref<1x512xf32, #tpu.memory_space<vmem>>, %arg3: memref<64x512xf32, #tpu.memory_space<vmem>>) attributes {dimension_semantics = [#tpu.dimension_semantics<parallel>], iteration_bounds = array<i64: 1>, scalar_prefetch = 0 : i64, scratch_operands = 0 : i64, tpu.core_type = #tpu.core_type<tc>, window_params = [{transform_indices = @transform_0, window_bounds = array<i64: 64, 512>}, {pipeline_mode = #tpu.pipeline_mode<synchronous>, transform_indices = @transform_1, window_bounds = array<i64: 1, 512>}, {transform_indices = @transform_2, window_bounds = array<i64: 64, 512>}]} {
    %c0 = arith.constant 0 : index
    %c0_0 = arith.constant 0 : index
    %0 = vector.load %arg1[%c0, %c0_0] : memref<64x512xf32, #tpu.memory_space<vmem>>, vector<64x512xf32>
    %c0_1 = arith.constant 0 : index
    %c0_2 = arith.constant 0 : index
    %1 = vector.load %arg2[%c0_1, %c0_2] : memref<1x512xf32, #tpu.memory_space<vmem>>, vector<1x512xf32>
    %2 = vector.broadcast %1 : vector<1x512xf32> to vector<64x512xf32>
    %3 = arith.addf %0, %2 : vector<64x512xf32>
    %4 = math.tanh %3 : vector<64x512xf32>
    %c0_3 = arith.constant 0 : index
    %c0_4 = arith.constant 0 : index
    %5 = vector.load %arg3[%c0_3, %c0_4] : memref<64x512xf32, #tpu.memory_space<vmem>>, vector<64x512xf32>
    tpu.vector_store %arg3[%c0_3, %c0_4], %4 {strides = array<i32>} : memref<64x512xf32, #tpu.memory_space<vmem>>, vector<64x512xf32>,
    return
  }
  func.func @transform_0(%arg0: i32) -> (i32, i32) {
    %c0_i32 = arith.constant 0 : i32
    %c0_i32_0 = arith.constant 0 : i32
    return %arg0, %c0_i32 : i32, i32
  }
  func.func @transform_1(%arg0: i32) -> (i32, i32) {
    %c0_i32 = arith.constant 0 : i32
    %c0_i32_0 = arith.constant 0 : i32
    %c0_i32_1 = arith.constant 0 : i32
    return %c0_i32, %c0_i32_0 : i32, i32
  }
  func.func @transform_2(%arg0: i32) -> (i32, i32) {
    %c0_i32 = arith.constant 0 : i32
    %c0_i32_0 = arith.constant 0 : i32
    return %arg0, %c0_i32 : i32, i32
  }
}

</mosaic_0001>

<bundles_post_ra>
// kernel: tile.50
= control target key start
LH: loop header
LB: loop body
LE: loop exit
PB: predicated region body
PF: predicated region fallthrough
CT: control target
= control target key end

     0   :  { %s40_s0 = inlined_call_operand.vmem [shape: f32[16], index: 0, kind: input, shape index: {}]   ;;  %s41_s1 = inlined_call_operand.vmem [shape: f32[32,16], index: 1, kind: output, shape index: {}]  }
   0x1   :  { %v4_v0 = vld [vmem:[%s40_s0] ss:$0 sm:$0xff] }
   0x2   :  { %5 = vst [vmem:[%s41_s1] sm:$0xff] %v4_v0  ;;  %12 = vst [vmem:[%s41_s1 + $0x8] sm:$0xff] %v4_v0 }
   0x3   :  { %13 = vst [vmem:[%s41_s1 + $0x10] sm:$0xff] %v4_v0  ;;  %14 = vst [vmem:[%s41_s1 + $0x18] sm:$0xff] %v4_v0 }

// kernel: tile.51
= control target key start
LH: loop header
LB: loop body
LE: loop exit
PB: predicated region body
PF: predicated region fallthrough
CT: control target
= control target key end

     0   :  { %s94_s8 = smov 112   ;;  %s95_s11 = smov 80   ;;  %vm3_vm0 = vcmask 130048   ;;  %vm9_vm1 = vcmask 1048448   ;;  %vm15_vm2 = vcmask 917248   ;;  %vm21_vm3 = vcmask 786048   ;;  %s147_s0 = inlined_call_operand.vmem [shape: f32[32,16], index: 0, kind: input, shape index: {}]   ;;  %s148_s1 = inlined_call_operand.vmem [shape: f32[1,512], index: 1, kind: output, shape index: {}]  }
   0x1   :  { %v77_v0 = vld [vmem:[%s147_s0 + $0x7] ss:$8 sm:$0xf]   ;;  %v79_v1 = vld [vmem:[%s147_s0 + $0x5] ss:$8 sm:$0xf]  }
   0x2   :  { %7 = vrot.lane.b32.xlu0 %v77_v0, %s94_s8  ;;  %19 = vrot.lane.b32.xlu1 %v79_v1, %s95_s11  ;;  %v78_v2 = vld [vmem:[%s147_s0 + $0x6] ss:$8 sm:$0xf]   ;;  %v80_v3 = vld [vmem:[%s147_s0 + $0x4] ss:$8 sm:$0xf]  }
   0x3   :  { %s96_s16 = smov 96   ;;  %v2_v4 = vld [vmem:[%s147_s0] ss:$8 sm:$0xf]   ;;  %s97_s19 = smov 64   ;;  %vm27_vm4 = vcmask 654848  }
   0x4   :  { %v81_v5 = vld [vmem:[%s147_s0 + $0x3] ss:$8 sm:$0xf]   ;;  %4 = vst.msk [vmem:[#allocation0] ss:$8 sm:$0xf] %vm3_vm0, %v2_v4  }
   0x5   :  { %v82_v6 = vld [vmem:[%s147_s0 + $0x2] ss:$8 sm:$0xf]   ;;  %s98_s24 = smov 48   ;;  %s99_s25 = smov 32   ;;  %vm33_vm5 = vcmask 523648  }
   0x6   :  { %13 = vrot.lane.b32.xlu0 %v78_v2, %s96_s16  ;;  %25 = vrot.lane.b32.xlu1 %v80_v3, %s97_s19  ;;  %v83_v7 = vld [vmem:[%s147_s0 + $0x1] ss:$8 sm:$0xf]   ;;  %s100_s0 = smov 16   ;;  %vm39_vm6 = vcmask 392448   ;;  %vm45_vm7 = vcmask 261248  }
   0xa   :  { %31 = vrot.lane.b32.xlu0 %v81_v5, %s98_s24  ;;  %37 = vrot.lane.b32.xlu1 %v82_v6, %s99_s25 }
   0xe   :  { %43 = vrot.lane.b32.xlu0 %v83_v7, %s100_s0 }
  0x74   :  { %v8_v8 = vpop.permute.xlu0 %7   ;;  %v20_v9 = vpop.permute.xlu1 %19  }
  0x75   :  { %10 = vst.msk [vmem:[#allocation0] ss:$8 sm:$0xf] %vm9_vm1, %v8_v8  }
  0x78   :  { %v14_v10 = vpop.permute.xlu0 %13   ;;  %v26_v11 = vpop.permute.xlu1 %25  }
  0x79   :  { %16 = vst.msk [vmem:[#allocation0] ss:$8 sm:$0xf] %vm15_vm2, %v14_v10  }
  0x7a   :  { %22 = vst.msk [vmem:[#allocation0] ss:$8 sm:$0xf] %vm21_vm3, %v20_v9  }
  0x7b   :  { %28 = vst.msk [vmem:[#allocation0] ss:$8 sm:$0xf] %vm27_vm4, %v26_v11  }
  0x7c   :  { %v32_v12 = vpop.permute.xlu0 %31   ;;  %v38_v13 = vpop.permute.xlu1 %37  }
  0x7d   :  { %34 = vst.msk [vmem:[#allocation0] ss:$8 sm:$0xf] %vm33_vm5, %v32_v12  }
  0x7e   :  { %40 = vst.msk [vmem:[#allocation0] ss:$8 sm:$0xf] %vm39_vm6, %v38_v13  }
  0x80   :  { %v44_v14 = vpop.permute.xlu0 %43  }
  0x81   :  { %46 = vst.msk [vmem:[#allocation0] ss:$8 sm:$0xf] %vm45_vm7, %v44_v14  }
  0x88   :  { %v51_v15 = vld [vmem:[#allocation0] sm:$0x1]  ;;  %v56_v16 = vld [vmem:[#allocation0 + $0x8] sm:$0x1]  ;;  %v62_v17 = vld [vmem:[#allocation0 + $0x10] sm:$0x1] }
  0x89   :  { %54 = vst [vmem:[%s148_s1] sm:$0x1] %v51_v15  ;;  %84 = vst [vmem:[%s148_s1 + $0x1] sm:$0x1] %v56_v16  ;;  %v69_v18 = vld [vmem:[#allocation0 + $0x18] sm:$0x1] }
  0x8a   :  { %85 = vst [vmem:[%s148_s1 + $0x2] sm:$0x1] %v62_v17  ;;  %86 = vst [vmem:[%s148_s1 + $0x3] sm:$0x1] %v69_v18 }

// kernel: _lambda_.14
= control target key start
LH: loop header
LB: loop body
LE: loop exit
PB: predicated region body
PF: predicated region fallthrough
CT: control target
= control target key end

     0   :  { %7 = vsyncpa [#allocation3], 0  ;;  %s123_s9 = smov [#allocation2]   ;;  %s154_s0 = inlined_call_operand.vmem [shape: bf16[8,16], index: 0, kind: input, shape index: {}]   ;;  %s155_s1 = inlined_call_operand.hbm [shape: bf16[16,256], index: 1, kind: input, shape index: {}]   ;;  %s156_s2 = inlined_call_operand.vmem [shape: f32[8,256], index: 2, kind: output, shape index: {}]  }
   0x1   :  { %s15_s10 = sshll.u32 %s123_s9, 4  ;;  %s16_s10 = int_to_ptr.vmem [resolvable:$true] %s15_s10 }
   0x2   :  { %s109_s11 = scalar_lea.vmem %s16_s10, 256  ;;  %p114_p1 = scmp.lt.s32.totalorder %s16_s10, %s16_s10 }
   0x3   :  { %p110_p0 = scmp.ne.s32.totalorder %s16_s10, %s109_s11  ;;  %p115_p2 = scmp.lt.s32.totalorder %s109_s11, %s109_s11 }
   0x5   :  { %p116_p3 = por %p115_p2, %p114_p1 }
   0x7   :  { %p117_p4 = pnand %p116_p3, %p110_p0 }
   0x9   :  { %120 = shalt.err (!%p117_p4)
}
   0xa   :  { %s124_s12 = smov 128   ;;  %s125_s13 = smov 8  }
   0xb   :  { %21 = dma.hbm_to_vmem [thread:$0]  %s155_s1, 256, %s16_s10, [#allocation3], %s124_s12, %s124_s12, %s125_s13  }
   0xc   :  { %121 = dma.done.wait [#allocation3], 256  }
   0xd   :  { %122 = vsyncadd [#allocation3], 4294967040  ;;  %v126_v0 = vmov 0   ;;  %v98_v1 = vld [vmem:[#allocation2 + $0x4] ss:$8 sps:$4 sm:$0xff]   ;;  %vm39_vm0 = vcmask 130048  }
   0xe   :  { %75 = vmatprep.mubr.bf16.mxu0 %v126_v0  ;;  %v100_v2 = vld [vmem:[#allocation2] ss:$8 sps:$4 sm:$0xff]   ;;  %57 = vmatprep.subr.bf16.mxu0 %v98_v1 }
   0xf   :  { %58 = vmatpush1.bf16.msra.mxu0 %v100_v2  ;;  %v26_v3 = vld [vmem:[%s154_s0] sm:$0xf] }
  0x12   :  { %93 = vmatmul.mubr.msk.bf16.vlgmr.msra.gmra.mxu0 %vm39_vm0, %v26_v3 }
  0xd2   :  { %v77_v4 = vpop.f32.mrf.mxu0 }
  0xd3   :  { %84 = vst [vmem:[%s156_s2] sm:$0xff] %v77_v4 }
  0xd4   :  { %v79_v5 = vpop.f32.mrf.mxu0 }
  0xd5   :  { %85 = vst [vmem:[%s156_s2 + $0x8] sm:$0xff] %v79_v5 }
  0xd6   :  { %v81_v6 = vpop.f32.mrf.mxu0 }
  0xd8   :  { %v82_v7 = vpop.f32.mrf.mxu0 }
  0xd9   :  { %90 = vsyncpa [#allocation3], 1 }

// kernel: _lambda_.15
= control target key start
LH: loop header
LB: loop body
LE: loop exit
PB: predicated region body
PF: predicated region fallthrough
CT: control target
= control target key end

     0   :  { %v14_v0 = vlaneseq  ;;  %v154_v4 = vmov 1966171168   ;;  %v155_v11 = vmov 0.0   ;;  %s213_s0 = inlined_call_operand.vmem [shape: f32[8,512], index: 0, kind: input, shape index: {}]   ;;  %s214_s1 = inlined_call_operand.vmem [shape: f32[1,512], index: 1, kind: output, shape index: {0}]   ;;  %s215_s2 = inlined_call_operand.vmem [shape: f32[1,512], index: 2, kind: output, shape index: {1}]  }
   0x1   :  { %v20_v1 = vld [vmem:[%s213_s0] sm:$0xff]  ;;  %v21_v2 = vld [vmem:[%s213_s0 + $0x8] sm:$0xff]  ;;  %v22_v3 = vld [vmem:[%s213_s0 + $0x10] sm:$0xff]  ;;  %v56_v5 = vunpack.c.l.s4 %v154_v4 }
   0x2   :  { %vm180_vm0 = vcmp.lt.s32.totalorder %v14_v0, 512  ;;  %v23_v7 = vld [vmem:[%s213_s0 + $0x18] sm:$0xff]  ;;  %v25_v8 = vrot.slane %v20_v1, 4  ;;  %v31_v9 = vrot.slane %v21_v2, 4  ;;  %v37_v10 = vrot.slane %v22_v3, 4 }
   0x3   :  { %18 = vst.msk [vmem:[%s214_s1] sm:$0xf] %vm180_vm0, %v155_v11  ;;  %v43_v12 = vrot.slane %v23_v7, 4  ;;  %v57_v13 = vunpack.c.0.s8 %v56_v5  ;;  %v59_v14 = vshrl.u32 %v14_v0, 7  ;;  %19 = vst.msk [vmem:[%s215_s2] sm:$0xf] %vm180_vm0, %v155_v11  ;;  %v85_v15 = vmul.f32 %v20_v1, %v20_v1 }
   0x4   :  { %v26_v16 = vadd.f32 %v25_v8, %v20_v1  ;;  %v32_v17 = vadd.f32 %v31_v9, %v21_v2  ;;  %v38_v18 = vadd.f32 %v37_v10, %v22_v3  ;;  %v86_v19 = vmul.f32 %v21_v2, %v21_v2 }
   0x5   :  { %v44_v20 = vadd.f32 %v43_v12, %v23_v7  ;;  %v60_v21 = vsub.s32 %v57_v13, %v59_v14  ;;  %v87_v22 = vmul.f32 %v22_v3, %v22_v3  ;;  %v88_v23 = vmul.f32 %v23_v7, %v23_v7 }
   0x6   :  { %v27_v24 = vrot.slane %v26_v16, 2  ;;  %v33_v25 = vrot.slane %v32_v17, 2  ;;  %v39_v26 = vrot.slane %v38_v18, 2  ;;  %v89_v27 = vrot.slane %v85_v15, 4 }
   0x7   :  { %v45_v28 = vrot.slane %v44_v20, 2  ;;  %v95_v29 = vrot.slane %v86_v19, 4  ;;  %v101_v30 = vrot.slane %v87_v22, 4  ;;  %v107_v31 = vrot.slane %v88_v23, 4 }
   0x8   :  { %v28_v32 = vadd.f32 %v27_v24, %v26_v16  ;;  %v34_v33 = vadd.f32 %v33_v25, %v32_v17  ;;  %v40_v34 = vadd.f32 %v39_v26, %v38_v18  ;;  %v90_v35 = vadd.f32 %v89_v27, %v85_v15 }
   0x9   :  { %v46_v36 = vadd.f32 %v45_v28, %v44_v20  ;;  %v96_v37 = vadd.f32 %v95_v29, %v86_v19  ;;  %v102_v38 = vadd.f32 %v101_v30, %v87_v22  ;;  %v108_v39 = vadd.f32 %v107_v31, %v88_v23 }
   0xa   :  { %v29_v40 = vrot.slane %v28_v32, 1  ;;  %v35_v41 = vrot.slane %v34_v33, 1  ;;  %v41_v42 = vrot.slane %v40_v34, 1  ;;  %v91_v43 = vrot.slane %v90_v35, 2  ;;  %v24_v8 = vld [vmem:[%s214_s1] sm:$0xf] }
   0xb   :  { %v47_v44 = vrot.slane %v46_v36, 1  ;;  %v97_v45 = vrot.slane %v96_v37, 2  ;;  %v103_v46 = vrot.slane %v102_v38, 2  ;;  %v109_v47 = vrot.slane %v108_v39, 2  ;;  %v84_v14 = vld [vmem:[%s215_s2] sm:$0xf] }
   0xc   :  { %v30_v48 = vadd.f32 %v29_v40, %v28_v32  ;;  %v36_v49 = vadd.f32 %v35_v41, %v34_v33  ;;  %v42_v50 = vadd.f32 %v41_v42, %v40_v34  ;;  %v92_v51 = vadd.f32 %v91_v43, %v90_v35 }
   0xd   :  { %v48_v52 = vadd.f32 %v47_v44, %v46_v36  ;;  %v98_v53 = vadd.f32 %v97_v45, %v96_v37  ;;  %v104_v54 = vadd.f32 %v103_v46, %v102_v38  ;;  %v110_v55 = vadd.f32 %v109_v47, %v108_v39 }
   0xe   :  { %v53_v56 = vcombine.low %v30_v48, %v36_v49  ;;  %v93_v57 = vrot.slane %v92_v51, 1 }
   0xf   :  { %v54_v58 = vcombine.low %v42_v50, %v48_v52  ;;  %v99_v59 = vrot.slane %v98_v53, 1  ;;  %v105_v60 = vrot.slane %v104_v54, 1  ;;  %v111_v61 = vrot.slane %v110_v55, 1 }
  0x10   :  { %v61_v62 = vrot.slane %v53_v56, %v60_v21  ;;  %v94_v63 = vadd.f32 %v93_v57, %v92_v51 }
  0x11   :  { %v68_v0 = vrot.slane %v54_v58, %v60_v21  ;;  %v100_v1 = vadd.f32 %v99_v59, %v98_v53  ;;  %v106_v2 = vadd.f32 %v105_v60, %v104_v54  ;;  %v112_v3 = vadd.f32 %v111_v61, %v110_v55 }
  0x13   :  { %v69_v4 = vcombine.low %v61_v62, %v68_v0  ;;  %v117_v5 = vcombine.low %v94_v63, %v100_v1  ;;  %v118_v7 = vcombine.low %v106_v2, %v112_v3 }
  0x15   :  { %v76_v9 = vrot.slane %v69_v4, %v60_v21  ;;  %v125_v10 = vrot.slane %v117_v5, %v60_v21  ;;  %v132_v11 = vrot.slane %v118_v7, %v60_v21 }
  0x17   :  { %v78_v12 = vadd.f32 %v76_v9, %v24_v8  ;;  %v133_v13 = vcombine.low %v125_v10, %v132_v11 }
  0x19   :  { %83 = vst.msk [vmem:[%s214_s1] sm:$0xf] %vm180_vm0, %v78_v12  ;;  %v140_v15 = vrot.slane %v133_v13, %v60_v21 }
  0x1b   :  { %v142_v16 = vadd.f32 %v140_v15, %v84_v14 }
  0x1d   :  { %143 = vst.msk [vmem:[%s215_s2] sm:$0xf] %vm180_vm0, %v142_v16 }

// kernel: _lambda_.17
= control target key start
LH: loop header
LB: loop body
LE: loop exit
PB: predicated region body
PF: predicated region fallthrough
CT: control target
= control target key end

     0   :  { %7 = vsyncpa [#allocation3], 0  ;;  %s390_s9 = smov [#allocation2]   ;;  %s522_s0 = inlined_call_operand.vmem [shape: bf16[32,16], index: 0, kind: input, shape index: {}]   ;;  %s523_s1 = inlined_call_operand.hbm [shape: bf16[16,1024], index: 1, kind: input, shape index: {}]   ;;  %s524_s2 = inlined_call_operand.vmem [shape: f32[32,1024], index: 2, kind: output, shape index: {}]  }
   0x1   :  { %s15_s10 = sshll.u32 %s390_s9, 4  ;;  %s16_s10 = int_to_ptr.vmem [resolvable:$true] %s15_s10 }
   0x2   :  { %s376_s11 = scalar_lea.vmem %s16_s10, 1024  ;;  %p381_p1 = scmp.lt.s32.totalorder %s16_s10, %s16_s10 }
   0x3   :  { %p377_p0 = scmp.ne.s32.totalorder %s16_s10, %s376_s11  ;;  %p382_p2 = scmp.lt.s32.totalorder %s376_s11, %s376_s11 }
   0x5   :  { %p383_p3 = por %p382_p2, %p381_p1 }
   0x7   :  { %p384_p4 = pnand %p383_p3, %p377_p0 }
   0x9   :  { %387 = shalt.err (!%p384_p4)
}
   0xa   :  { %s391_s12 = smov 512   ;;  %s392_s13 = smov 32  }
   0xb   :  { %21 = dma.hbm_to_vmem [thread:$0]  %s523_s1, 1024, %s16_s10, [#allocation3], %s391_s12, %s391_s12, %s392_s13  }
   0xc   :  { %388 = dma.done.wait [#allocation3], 1024  }
   0xd   :  { %389 = vsyncadd [#allocation3], 4294966272  ;;  %v393_v0 = vmov 0   ;;  %v30_v1 = vld [vmem:[#allocation2] sm:$0xff]  ;;  %v31_v3 = vld [vmem:[#allocation2 + $0x8] sm:$0xff]  ;;  %vm88_vm0 = vcmask 130048  }
   0xe   :  { %127 = vmatprep.mubr.bf16.mxu0 %v393_v0  ;;  %180 = vmatprep.mubr.bf16.mxu1 %v393_v0  ;;  %v34_v2 = vld [vmem:[#allocation2 + $0x20] sm:$0xff]  ;;  %v35_v5 = vld [vmem:[#allocation2 + $0x28] sm:$0xff]  ;;  %v32_v10 = vld [vmem:[#allocation2 + $0x10] sm:$0xff] }
   0xf   :  { %v347_v4 = vcombine.high %v30_v1, %v34_v2  ;;  %v346_v6 = vcombine.low %v30_v1, %v34_v2  ;;  %v349_v7 = vcombine.high %v31_v3, %v35_v5  ;;  %v348_v8 = vcombine.low %v31_v3, %v35_v5  ;;  %v366_v9 = vld [vmem:[%s522_s0] sm:$0xff]   ;;  %v36_v11 = vld [vmem:[#allocation2 + $0x30] sm:$0xff]  ;;  %v33_v13 = vld [vmem:[#allocation2 + $0x18] sm:$0xff] }
  0x10   :  { %v351_v12 = vcombine.high %v32_v10, %v36_v11  ;;  %v37_v14 = vld [vmem:[#allocation2 + $0x38] sm:$0xff]  ;;  %v350_v15 = vcombine.low %v32_v10, %v36_v11  ;;  %v367_v18 = vld [vmem:[%s522_s0 + $0x8] sm:$0xff]  }
  0x11   :  { %109 = vmatprep.subr.bf16.mxu0 %v347_v4  ;;  %162 = vmatprep.subr.bf16.mxu1 %v349_v7  ;;  %v353_v16 = vcombine.high %v33_v13, %v37_v14  ;;  %v352_v17 = vcombine.low %v33_v13, %v37_v14 }
  0x12   :  { %110 = vmatpush1.bf16.msra.mxu0 %v346_v6  ;;  %163 = vmatpush1.bf16.msra.mxu1 %v348_v8 }
  0x13   :  { %215 = vmatprep.subr.bf16.mxu0 %v351_v12  ;;  %268 = vmatprep.subr.bf16.mxu1 %v353_v16 }
  0x15   :  { %354 = vmatmul.mubr.msk.bf16.vlgmr.msra.gmra.mxu0 %vm88_vm0, %v366_v9  ;;  %356 = vmatmul.mubr.msk.bf16.vlgmr.msra.gmra.mxu1 %vm88_vm0, %v366_v9 }
  0x16   :  { %216 = vmatpush1.bf16.msra.mxu0 %v350_v15  ;;  %269 = vmatpush1.bf16.msra.mxu1 %v352_v17 }
  0x17   :  { %137 = vmatprep.mubr.bf16.mxu0 %v393_v0  ;;  %190 = vmatprep.mubr.bf16.mxu1 %v393_v0 }
  0x1d   :  { %355 = vmatmul.mubr.msk.bf16.gmra.mxu0 %vm88_vm0, %v367_v18  ;;  %357 = vmatmul.mubr.msk.bf16.gmra.mxu1 %vm88_vm0, %v367_v18 }
  0x1e   :  { %233 = vmatprep.mubr.bf16.mxu0 %v393_v0  ;;  %286 = vmatprep.mubr.bf16.mxu1 %v393_v0 }
  0x25   :  { %358 = vmatmul.mubr.msk.bf16.vlgmr.msra.gmra.mxu0 %vm88_vm0, %v366_v9  ;;  %360 = vmatmul.mubr.msk.bf16.vlgmr.msra.gmra.mxu1 %vm88_vm0, %v366_v9 }
  0x26   :  { %243 = vmatprep.mubr.bf16.mxu0 %v393_v0  ;;  %296 = vmatprep.mubr.bf16.mxu1 %v393_v0 }
  0x2d   :  { %359 = vmatmul.mubr.msk.bf16.gmra.mxu0 %vm88_vm0, %v367_v18  ;;  %361 = vmatmul.mubr.msk.bf16.gmra.mxu1 %vm88_vm0, %v367_v18 }
  0xd5   :  { %v129_v19 = vpop.f32.mrf.mxu0  ;;  %v182_v20 = vpop.f32.mrf.mxu1 }
  0xd6   :  { %307 = vst [vmem:[%s524_s2] sm:$0xff] %v129_v19  ;;  %309 = vst [vmem:[%s524_s2 + $0x10] sm:$0xff] %v182_v20 }
  0xd7   :  { %v131_v21 = vpop.f32.mrf.mxu0  ;;  %v184_v22 = vpop.f32.mrf.mxu1 }
  0xd8   :  { %308 = vst [vmem:[%s524_s2 + $0x8] sm:$0xff] %v131_v21  ;;  %310 = vst [vmem:[%s524_s2 + $0x18] sm:$0xff] %v184_v22 }
  0xd9   :  { %v133_v23 = vpop.f32.mrf.mxu0  ;;  %v186_v24 = vpop.f32.mrf.mxu1 }
  0xda   :  { %315 = vst [vmem:[%s524_s2 + $0x40] sm:$0xff] %v133_v23  ;;  %317 = vst [vmem:[%s524_s2 + $0x50] sm:$0xff] %v186_v24 }
  0xdb   :  { %v135_v25 = vpop.f32.mrf.mxu0  ;;  %v188_v26 = vpop.f32.mrf.mxu1 }
  0xdc   :  { %316 = vst [vmem:[%s524_s2 + $0x48] sm:$0xff] %v135_v25  ;;  %318 = vst [vmem:[%s524_s2 + $0x58] sm:$0xff] %v188_v26 }
  0xdd   :  { %v139_v27 = vpop.f32.mrf.mxu0  ;;  %v192_v28 = vpop.f32.mrf.mxu1 }
  0xde   :  { %323 = vst [vmem:[%s524_s2 + $0x80] sm:$0xff] %v139_v27  ;;  %325 = vst [vmem:[%s524_s2 + $0x90] sm:$0xff] %v192_v28 }
  0xdf   :  { %v141_v29 = vpop.f32.mrf.mxu0  ;;  %v194_v30 = vpop.f32.mrf.mxu1 }
  0xe0   :  { %324 = vst [vmem:[%s524_s2 + $0x88] sm:$0xff] %v141_v29  ;;  %326 = vst [vmem:[%s524_s2 + $0x98] sm:$0xff] %v194_v30 }
  0xe1   :  { %v143_v31 = vpop.f32.mrf.mxu0  ;;  %v196_v32 = vpop.f32.mrf.mxu1 }
  0xe2   :  { %331 = vst [vmem:[%s524_s2 + $0xc0] sm:$0xff] %v143_v31  ;;  %333 = vst [vmem:[%s524_s2 + $0xd0] sm:$0xff] %v196_v32 }
  0xe3   :  { %v145_v33 = vpop.f32.mrf.mxu0  ;;  %v198_v34 = vpop.f32.mrf.mxu1 }
  0xe4   :  { %332 = vst [vmem:[%s524_s2 + $0xc8] sm:$0xff] %v145_v33  ;;  %334 = vst [vmem:[%s524_s2 + $0xd8] sm:$0xff] %v198_v34 }
  0xe5   :  { %v235_v35 = vpop.f32.mrf.mxu0  ;;  %v288_v36 = vpop.f32.mrf.mxu1 }
  0xe6   :  { %311 = vst [vmem:[%s524_s2 + $0x20] sm:$0xff] %v235_v35  ;;  %313 = vst [vmem:[%s524_s2 + $0x30] sm:$0xff] %v288_v36 }
  0xe7   :  { %v237_v37 = vpop.f32.mrf.mxu0  ;;  %v290_v38 = vpop.f32.mrf.mxu1 }
  0xe8   :  { %312 = vst [vmem:[%s524_s2 + $0x28] sm:$0xff] %v237_v37  ;;  %314 = vst [vmem:[%s524_s2 + $0x38] sm:$0xff] %v290_v38 }
  0xe9   :  { %v239_v39 = vpop.f32.mrf.mxu0  ;;  %v292_v40 = vpop.f32.mrf.mxu1 }
  0xea   :  { %319 = vst [vmem:[%s524_s2 + $0x60] sm:$0xff] %v239_v39  ;;  %321 = vst [vmem:[%s524_s2 + $0x70] sm:$0xff] %v292_v40 }
  0xeb   :  { %v241_v41 = vpop.f32.mrf.mxu0  ;;  %v294_v42 = vpop.f32.mrf.mxu1 }
  0xec   :  { %320 = vst [vmem:[%s524_s2 + $0x68] sm:$0xff] %v241_v41  ;;  %322 = vst [vmem:[%s524_s2 + $0x78] sm:$0xff] %v294_v42 }
  0xed   :  { %v245_v43 = vpop.f32.mrf.mxu0  ;;  %v298_v44 = vpop.f32.mrf.mxu1 }
  0xee   :  { %327 = vst [vmem:[%s524_s2 + $0xa0] sm:$0xff] %v245_v43  ;;  %329 = vst [vmem:[%s524_s2 + $0xb0] sm:$0xff] %v298_v44 }
  0xef   :  { %v247_v45 = vpop.f32.mrf.mxu0  ;;  %v300_v46 = vpop.f32.mrf.mxu1 }
  0xf0   :  { %328 = vst [vmem:[%s524_s2 + $0xa8] sm:$0xff] %v247_v45  ;;  %330 = vst [vmem:[%s524_s2 + $0xb8] sm:$0xff] %v300_v46 }
  0xf1   :  { %v249_v47 = vpop.f32.mrf.mxu0  ;;  %v302_v48 = vpop.f32.mrf.mxu1 }
  0xf2   :  { %335 = vst [vmem:[%s524_s2 + $0xe0] sm:$0xff] %v249_v47  ;;  %337 = vst [vmem:[%s524_s2 + $0xf0] sm:$0xff] %v302_v48 }
  0xf3   :  { %v251_v49 = vpop.f32.mrf.mxu0  ;;  %v304_v50 = vpop.f32.mrf.mxu1 }
  0xf4   :  { %336 = vst [vmem:[%s524_s2 + $0xe8] sm:$0xff] %v251_v49  ;;  %338 = vst [vmem:[%s524_s2 + $0xf8] sm:$0xff] %v304_v50 }
  0xf5   :  { %343 = vsyncpa [#allocation3], 1 }

// kernel: _lambda_.16
= control target key start
LH: loop header
LB: loop body
LE: loop exit
PB: predicated region body
PF: predicated region fallthrough
CT: control target
= control target key end

     0   :  { %v20_v0 = vlaneseq  ;;  %s144_s1 = inlined_call_operand.vmem [shape: f32[1,512], index: 1, kind: input, shape index: {}]   ;;  %s145_s2 = inlined_call_operand.vmem [shape: f32[1,512], index: 2, kind: input, shape index: {}]   ;;  %s146_s0 = inlined_call_operand.vmem [shape: f32[8,512], index: 0, kind: input, shape index: {}]   ;;  %s147_s3 = inlined_call_operand.vmem [shape: bf16[8,512], index: 3, kind: output, shape index: {}]  }
   0x1   :  { %v18_v2 = vld [vmem:[%s144_s1] sm:$0xf]  ;;  %v15_v9 = vld [vmem:[%s146_s0 + $0x8] sm:$0xff]  ;;  %v16_v14 = vld [vmem:[%s146_s0 + $0x10] sm:$0xff] }
   0x2   :  { %v21_v1 = vshrl.u32 %v20_v0, 7  ;;  %v44_v3 = vld [vmem:[%s145_s2] sm:$0xf]  ;;  %v17_v15 = vld [vmem:[%s146_s0 + $0x18] sm:$0xff] }
   0x3   :  { %v14_v8 = vld [vmem:[%s146_s0] sm:$0xff] }
   0x4   :  { %v22_v4 = vsub.s32 0, %v21_v1  ;;  %v26_v5 = vsub.s32 1, %v21_v1  ;;  %v30_v6 = vsub.s32 2, %v21_v1  ;;  %v34_v7 = vsub.s32 3, %v21_v1 }
   0x6   :  { %v23_v10 = vrot.slane %v18_v2, %v22_v4  ;;  %v27_v11 = vrot.slane %v18_v2, %v26_v5  ;;  %v49_v12 = vrot.slane %v44_v3, %v22_v4  ;;  %v53_v13 = vrot.slane %v44_v3, %v26_v5 }
   0x7   :  { %v31_v16 = vrot.slane %v18_v2, %v30_v6  ;;  %v35_v17 = vrot.slane %v18_v2, %v34_v7  ;;  %v57_v18 = vrot.slane %v44_v3, %v30_v6  ;;  %v61_v19 = vrot.slane %v44_v3, %v34_v7 }
   0x8   :  { %v40_v20 = vmul.f32 %v23_v10, %v14_v8  ;;  %v41_v21 = vmul.f32 %v27_v11, %v15_v9 }
   0x9   :  { %v42_v22 = vmul.f32 %v31_v16, %v16_v14  ;;  %v43_v23 = vmul.f32 %v35_v17, %v17_v15 }
   0xa   :  { %v66_v24 = vadd.f32 %v49_v12, %v40_v20  ;;  %v67_v25 = vadd.f32 %v53_v13, %v41_v21 }
   0xb   :  { %v68_v26 = vadd.f32 %v57_v18, %v42_v22  ;;  %v69_v27 = vadd.f32 %v61_v19, %v43_v23 }
   0xc   :  { %v70_v28 = vmax.f32 %v66_v24, 0.0  ;;  %v71_v29 = vmax.f32 %v67_v25, 0.0 }
   0xd   :  { %v72_v30 = vmax.f32 %v68_v26, 0.0  ;;  %v73_v31 = vmax.f32 %v69_v27, 0.0 }
   0xe   :  { %v98_v32 = vpack.c.bf16 %v71_v29, %v70_v28 }
   0xf   :  { %v99_v33 = vpack.c.bf16 %v73_v31, %v72_v30 }
  0x10   :  { %90 = vst [vmem:[%s147_s3] sm:$0xff] %v98_v32 }
  0x11   :  { %91 = vst [vmem:[%s147_s3 + $0x8] sm:$0xff] %v99_v33 }

// kernel: tile.60
= control target key start
LH: loop header
LB: loop body
LE: loop exit
PB: predicated region body
PF: predicated region fallthrough
CT: control target
= control target key end

     0   :  { %s22_s0 = inlined_call_operand.vmem [shape: f32[64], index: 0, kind: input, shape index: {}]   ;;  %s23_s1 = inlined_call_operand.vmem [shape: f32[8,64], index: 1, kind: output, shape index: {}]  }
   0x1   :  { %v4_v0 = vld [vmem:[%s22_s0] ss:$0 sm:$0xff] }
   0x2   :  { %5 = vst [vmem:[%s23_s1] sm:$0xff] %v4_v0 }

// kernel: tile.61
= control target key start
LH: loop header
LB: loop body
LE: loop exit
PB: predicated region body
PF: predicated region fallthrough
CT: control target
= control target key end

     0   :  { %vm3_vm0 = vcmask 523264   ;;  %s46_s8 = smov 64   ;;  %vm9_vm1 = vcmask 1048064   ;;  %s75_s0 = inlined_call_operand.vmem [shape: f32[8,64], index: 0, kind: input, shape index: {}]   ;;  %s76_s1 = inlined_call_operand.vmem [shape: f32[1,512], index: 1, kind: output, shape index: {}]  }
   0x1   :  { %v41_v0 = vld [vmem:[%s75_s0 + $0x1] ss:$2 sm:$0xf]   ;;  %v2_v1 = vld [vmem:[%s75_s0] ss:$2 sm:$0xf]  }
   0x2   :  { %7 = vrot.lane.b32.xlu0 %v41_v0, %s46_s8  ;;  %4 = vst.msk [vmem:[#allocation0] ss:$8 sm:$0xf] %vm3_vm0, %v2_v1  }
  0x74   :  { %v8_v2 = vpop.permute.xlu0 %7  }
  0x75   :  { %10 = vst.msk [vmem:[#allocation0] ss:$8 sm:$0xf] %vm9_vm1, %v8_v2  }
  0x7c   :  { %v15_v3 = vld [vmem:[#allocation0] sm:$0x1]  ;;  %v20_v4 = vld [vmem:[#allocation0 + $0x8] sm:$0x1]  ;;  %v26_v5 = vld [vmem:[#allocation0 + $0x10] sm:$0x1] }
  0x7d   :  { %18 = vst [vmem:[%s76_s1] sm:$0x1] %v15_v3  ;;  %42 = vst [vmem:[%s76_s1 + $0x1] sm:$0x1] %v20_v4  ;;  %v33_v6 = vld [vmem:[#allocation0 + $0x18] sm:$0x1] }
  0x7e   :  { %43 = vst [vmem:[%s76_s1 + $0x2] sm:$0x1] %v26_v5  ;;  %44 = vst [vmem:[%s76_s1 + $0x3] sm:$0x1] %v33_v6 }

// kernel: _lambda_.19
= control target key start
LH: loop header
LB: loop body
LE: loop exit
PB: predicated region body
PF: predicated region fallthrough
CT: control target
= control target key end

     0   :  { %v40_v0 = vlaneseq  ;;  %s464_s1 = inlined_call_operand.vmem [shape: f32[1,512], index: 1, kind: input, shape index: {}]   ;;  %s465_s2 = inlined_call_operand.vmem [shape: f32[1,512], index: 2, kind: input, shape index: {}]   ;;  %s466_s0 = inlined_call_operand.vmem [shape: f32[48,512], index: 0, kind: input, shape index: {}]   ;;  %s467_s3 = inlined_call_operand.vmem [shape: bf16[48,512], index: 3, kind: output, shape index: {}]  }
   0x1   :  { %v38_v2 = vld [vmem:[%s464_s1] sm:$0xf]  ;;  %v15_v5 = vld [vmem:[%s466_s0 + $0x8] sm:$0xff]  ;;  %v16_v10 = vld [vmem:[%s466_s0 + $0x10] sm:$0xff] }
   0x2   :  { %v41_v1 = vshrl.u32 %v40_v0, 7  ;;  %v84_v3 = vld [vmem:[%s465_s2] sm:$0xf]  ;;  %v19_v12 = vld [vmem:[%s466_s0 + $0x28] sm:$0xff]  ;;  %v17_v17 = vld [vmem:[%s466_s0 + $0x18] sm:$0xff] }
   0x3   :  { %v14_v4 = vld [vmem:[%s466_s0] sm:$0xff]  ;;  %v20_v18 = vld [vmem:[%s466_s0 + $0x30] sm:$0xff]  ;;  %v21_v19 = vld [vmem:[%s466_s0 + $0x38] sm:$0xff] }
   0x4   :  { %v42_v6 = vsub.s32 0, %v41_v1  ;;  %v46_v7 = vsub.s32 1, %v41_v1  ;;  %v50_v8 = vsub.s32 2, %v41_v1  ;;  %v54_v9 = vsub.s32 3, %v41_v1  ;;  %v18_v11 = vld [vmem:[%s466_s0 + $0x20] sm:$0xff]  ;;  %v23_v41 = vld [vmem:[%s466_s0 + $0x48] sm:$0xff] }
   0x5   :  { %v22_v40 = vld [vmem:[%s466_s0 + $0x40] sm:$0xff]  ;;  %v24_v46 = vld [vmem:[%s466_s0 + $0x50] sm:$0xff]  ;;  %v25_v47 = vld [vmem:[%s466_s0 + $0x58] sm:$0xff] }
   0x6   :  { %v307_v13 = vrot.slane %v38_v2, %v42_v6  ;;  %v309_v14 = vrot.slane %v38_v2, %v46_v7  ;;  %v311_v15 = vrot.slane %v84_v3, %v42_v6  ;;  %v313_v16 = vrot.slane %v84_v3, %v46_v7  ;;  %v26_v52 = vld [vmem:[%s466_s0 + $0x60] sm:$0xff]  ;;  %v27_v53 = vld [vmem:[%s466_s0 + $0x68] sm:$0xff]  ;;  %v28_v58 = vld [vmem:[%s466_s0 + $0x70] sm:$0xff] }
   0x7   :  { %v324_v20 = vrot.slane %v38_v2, %v50_v8  ;;  %v326_v21 = vrot.slane %v38_v2, %v54_v9  ;;  %v328_v22 = vrot.slane %v84_v3, %v50_v8  ;;  %v330_v23 = vrot.slane %v84_v3, %v54_v9  ;;  %v29_v59 = vld [vmem:[%s466_s0 + $0x78] sm:$0xff]  ;;  %v30_v8 = vld [vmem:[%s466_s0 + $0x80] sm:$0xff] }
   0x8   :  { %v60_v24 = vmul.f32 %v307_v13, %v14_v4  ;;  %v61_v25 = vmul.f32 %v309_v14, %v15_v5  ;;  %v64_v26 = vmul.f32 %v307_v13, %v18_v11  ;;  %v65_v27 = vmul.f32 %v309_v14, %v19_v12 }
   0x9   :  { %v62_v28 = vmul.f32 %v324_v20, %v16_v10  ;;  %v63_v29 = vmul.f32 %v326_v21, %v17_v17  ;;  %v66_v30 = vmul.f32 %v324_v20, %v20_v18  ;;  %v67_v31 = vmul.f32 %v326_v21, %v21_v19  ;;  %v31_v17 = vld [vmem:[%s466_s0 + $0x88] sm:$0xff] }
   0xa   :  { %v106_v32 = vadd.f32 %v311_v15, %v60_v24  ;;  %v107_v33 = vadd.f32 %v313_v16, %v61_v25  ;;  %v110_v34 = vadd.f32 %v311_v15, %v64_v26  ;;  %v111_v35 = vadd.f32 %v313_v16, %v65_v27  ;;  %v32_v26 = vld [vmem:[%s466_s0 + $0x90] sm:$0xff]  ;;  %v33_v27 = vld [vmem:[%s466_s0 + $0x98] sm:$0xff] }
   0xb   :  { %v108_v36 = vadd.f32 %v328_v22, %v62_v28  ;;  %v109_v37 = vadd.f32 %v330_v23, %v63_v29  ;;  %v112_v38 = vadd.f32 %v328_v22, %v66_v30  ;;  %v113_v39 = vadd.f32 %v330_v23, %v67_v31 }
   0xc   :  { %v130_v42 = vmax.f32 %v106_v32, 0.0  ;;  %v131_v43 = vmax.f32 %v107_v33, 0.0  ;;  %v134_v44 = vmax.f32 %v110_v34, 0.0  ;;  %v135_v45 = vmax.f32 %v111_v35, 0.0  ;;  %v34_v32 = vld [vmem:[%s466_s0 + $0xa0] sm:$0xff]  ;;  %v35_v33 = vld [vmem:[%s466_s0 + $0xa8] sm:$0xff] }
   0xd   :  { %v132_v48 = vmax.f32 %v108_v36, 0.0  ;;  %v133_v49 = vmax.f32 %v109_v37, 0.0  ;;  %v136_v50 = vmax.f32 %v112_v38, 0.0  ;;  %v137_v51 = vmax.f32 %v113_v39, 0.0  ;;  %v36_v38 = vld [vmem:[%s466_s0 + $0xb0] sm:$0xff] }
   0xe   :  { %v254_v54 = vpack.c.bf16 %v131_v43, %v130_v42  ;;  %v256_v55 = vpack.c.bf16 %v135_v45, %v134_v44  ;;  %v68_v56 = vmul.f32 %v307_v13, %v22_v40  ;;  %v69_v57 = vmul.f32 %v309_v14, %v23_v41  ;;  %v37_v43 = vld [vmem:[%s466_s0 + $0xb8] sm:$0xff] }
   0xf   :  { %v255_v60 = vpack.c.bf16 %v133_v49, %v132_v48  ;;  %v257_v61 = vpack.c.bf16 %v137_v51, %v136_v50  ;;  %v70_v62 = vmul.f32 %v324_v20, %v24_v46  ;;  %v71_v63 = vmul.f32 %v326_v21, %v25_v47 }
  0x10   :  { %226 = vst [vmem:[%s467_s3] sm:$0xff] %v254_v54  ;;  %228 = vst [vmem:[%s467_s3 + $0x10] sm:$0xff] %v256_v55  ;;  %v114_v0 = vadd.f32 %v311_v15, %v68_v56  ;;  %v115_v1 = vadd.f32 %v313_v16, %v69_v57  ;;  %v72_v2 = vmul.f32 %v307_v13, %v26_v52 }
  0x11   :  { %v73_v3 = vmul.f32 %v309_v14, %v27_v53  ;;  %227 = vst [vmem:[%s467_s3 + $0x8] sm:$0xff] %v255_v60  ;;  %229 = vst [vmem:[%s467_s3 + $0x18] sm:$0xff] %v257_v61  ;;  %v116_v4 = vadd.f32 %v328_v22, %v70_v62  ;;  %v117_v5 = vadd.f32 %v330_v23, %v71_v63 }
  0x12   :  { %v74_v6 = vmul.f32 %v324_v20, %v28_v58  ;;  %v75_v7 = vmul.f32 %v326_v21, %v29_v59  ;;  %v138_v9 = vmax.f32 %v114_v0, 0.0  ;;  %v139_v10 = vmax.f32 %v115_v1, 0.0 }
  0x13   :  { %v118_v11 = vadd.f32 %v311_v15, %v72_v2  ;;  %v119_v12 = vadd.f32 %v313_v16, %v73_v3  ;;  %v140_v18 = vmax.f32 %v116_v4, 0.0  ;;  %v141_v19 = vmax.f32 %v117_v5, 0.0 }
  0x14   :  { %v120_v24 = vadd.f32 %v328_v22, %v74_v6  ;;  %v121_v25 = vadd.f32 %v330_v23, %v75_v7  ;;  %v258_v28 = vpack.c.bf16 %v139_v10, %v138_v9  ;;  %v76_v31 = vmul.f32 %v307_v13, %v30_v8 }
  0x15   :  { %v142_v29 = vmax.f32 %v118_v11, 0.0  ;;  %v143_v30 = vmax.f32 %v119_v12, 0.0  ;;  %v259_v34 = vpack.c.bf16 %v141_v19, %v140_v18  ;;  %v77_v37 = vmul.f32 %v309_v14, %v31_v17 }
  0x16   :  { %v144_v35 = vmax.f32 %v120_v24, 0.0  ;;  %v145_v36 = vmax.f32 %v121_v25, 0.0  ;;  %230 = vst [vmem:[%s467_s3 + $0x20] sm:$0xff] %v258_v28  ;;  %v122_v40 = vadd.f32 %v311_v15, %v76_v31  ;;  %v78_v41 = vmul.f32 %v324_v20, %v32_v26 }
  0x17   :  { %v260_v39 = vpack.c.bf16 %v143_v30, %v142_v29  ;;  %v79_v42 = vmul.f32 %v326_v21, %v33_v27  ;;  %231 = vst [vmem:[%s467_s3 + $0x28] sm:$0xff] %v259_v34  ;;  %v123_v45 = vadd.f32 %v313_v16, %v77_v37  ;;  %v80_v46 = vmul.f32 %v307_v13, %v34_v32 }
  0x18   :  { %v261_v44 = vpack.c.bf16 %v145_v36, %v144_v35  ;;  %v81_v47 = vmul.f32 %v309_v14, %v35_v33  ;;  %v146_v48 = vmax.f32 %v122_v40, 0.0  ;;  %v124_v49 = vadd.f32 %v328_v22, %v78_v41 }
  0x19   :  { %232 = vst [vmem:[%s467_s3 + $0x30] sm:$0xff] %v260_v39  ;;  %v125_v50 = vadd.f32 %v330_v23, %v79_v42  ;;  %v82_v51 = vmul.f32 %v324_v20, %v36_v38  ;;  %v147_v52 = vmax.f32 %v123_v45, 0.0  ;;  %v126_v13 = vadd.f32 %v311_v15, %v80_v46 }
  0x1a   :  { %233 = vst [vmem:[%s467_s3 + $0x38] sm:$0xff] %v261_v44  ;;  %v127_v14 = vadd.f32 %v313_v16, %v81_v47  ;;  %v83_v53 = vmul.f32 %v326_v21, %v37_v43  ;;  %v148_v54 = vmax.f32 %v124_v49, 0.0 }
  0x1b   :  { %v149_v55 = vmax.f32 %v125_v50, 0.0  ;;  %v128_v56 = vadd.f32 %v328_v22, %v82_v51  ;;  %v262_v57 = vpack.c.bf16 %v147_v52, %v146_v48  ;;  %v150_v58 = vmax.f32 %v126_v13, 0.0 }
  0x1c   :  { %v151_v59 = vmax.f32 %v127_v14, 0.0  ;;  %v129_v20 = vadd.f32 %v330_v23, %v83_v53 }
  0x1d   :  { %v263_v60 = vpack.c.bf16 %v149_v55, %v148_v54  ;;  %v152_v61 = vmax.f32 %v128_v56, 0.0  ;;  %234 = vst [vmem:[%s467_s3 + $0x40] sm:$0xff] %v262_v57 }
  0x1e   :  { %v264_v15 = vpack.c.bf16 %v151_v59, %v150_v58  ;;  %v153_v62 = vmax.f32 %v129_v20, 0.0 }
  0x1f   :  { %235 = vst [vmem:[%s467_s3 + $0x48] sm:$0xff] %v263_v60 }
  0x20   :  { %236 = vst [vmem:[%s467_s3 + $0x50] sm:$0xff] %v264_v15  ;;  %v265_v16 = vpack.c.bf16 %v153_v62, %v152_v61 }
  0x22   :  { %237 = vst [vmem:[%s467_s3 + $0x58] sm:$0xff] %v265_v16 }

// kernel: _lambda_.18
= control target key start
LH: loop header
LB: loop body
LE: loop exit
PB: predicated region body
PF: predicated region fallthrough
CT: control target
= control target key end

     0   :  { %v14_v0 = vlaneseq  ;;  %v234_v4 = vmov 1966171168   ;;  %v235_v13 = vmov 0.0   ;;  %s373_s0 = inlined_call_operand.vmem [shape: f32[48,512], index: 0, kind: input, shape index: {}]   ;;  %s374_s1 = inlined_call_operand.vmem [shape: f32[1,512], index: 1, kind: output, shape index: {0}]   ;;  %s375_s2 = inlined_call_operand.vmem [shape: f32[1,512], index: 2, kind: output, shape index: {1}]  }
   0x1   :  { %v20_v1 = vld [vmem:[%s373_s0] sm:$0xff]  ;;  %v21_v2 = vld [vmem:[%s373_s0 + $0x8] sm:$0xff]  ;;  %v22_v3 = vld [vmem:[%s373_s0 + $0x10] sm:$0xff]  ;;  %v96_v5 = vunpack.c.l.s4 %v234_v4 }
   0x2   :  { %vm260_vm0 = vcmp.lt.s32.totalorder %v14_v0, 512  ;;  %v23_v7 = vld [vmem:[%s373_s0 + $0x18] sm:$0xff]  ;;  %v24_v8 = vld [vmem:[%s373_s0 + $0x20] sm:$0xff]  ;;  %v25_v9 = vld [vmem:[%s373_s0 + $0x28] sm:$0xff]  ;;  %v99_v10 = vshrl.u32 %v14_v0, 7  ;;  %v273_v11 = vmul.f32 %v20_v1, %v20_v1  ;;  %v275_v12 = vmul.f32 %v21_v2, %v21_v2 }
   0x3   :  { %18 = vst.msk [vmem:[%s374_s1] sm:$0xf] %vm260_vm0, %v235_v13  ;;  %v26_v14 = vld [vmem:[%s373_s0 + $0x30] sm:$0xff]  ;;  %v27_v15 = vld [vmem:[%s373_s0 + $0x38] sm:$0xff]  ;;  %v45_v16 = vadd.f32 %v24_v8, %v20_v1  ;;  %v56_v17 = vadd.f32 %v25_v9, %v21_v2  ;;  %v97_v18 = vunpack.c.0.s8 %v96_v5  ;;  %19 = vst.msk [vmem:[%s375_s2] sm:$0xf] %vm260_vm0, %v235_v13  ;;  %v293_v19 = vmul.f32 %v22_v3, %v22_v3 }
   0x4   :  { %v28_v20 = vld [vmem:[%s373_s0 + $0x40] sm:$0xff]  ;;  %v29_v21 = vld [vmem:[%s373_s0 + $0x48] sm:$0xff]  ;;  %v67_v22 = vadd.f32 %v26_v14, %v22_v3  ;;  %v78_v23 = vadd.f32 %v27_v15, %v23_v7  ;;  %v301_v24 = vmul.f32 %v23_v7, %v23_v7  ;;  %v129_v25 = vmul.f32 %v24_v8, %v24_v8  ;;  %v30_v26 = vld [vmem:[%s373_s0 + $0x50] sm:$0xff] }
   0x5   :  { %v31_v27 = vld [vmem:[%s373_s0 + $0x58] sm:$0xff]  ;;  %v46_v28 = vadd.f32 %v45_v16, %v28_v20  ;;  %v57_v29 = vadd.f32 %v56_v17, %v29_v21  ;;  %v309_v30 = vsub.s32 %v97_v18, %v99_v10  ;;  %v130_v31 = vmul.f32 %v25_v9, %v25_v9  ;;  %v32_v32 = vld [vmem:[%s373_s0 + $0x60] sm:$0xff]  ;;  %v33_v33 = vld [vmem:[%s373_s0 + $0x68] sm:$0xff] }
   0x6   :  { %v68_v34 = vadd.f32 %v67_v22, %v30_v26  ;;  %v79_v35 = vadd.f32 %v78_v23, %v31_v27  ;;  %v131_v36 = vmul.f32 %v26_v14, %v26_v14  ;;  %v132_v37 = vmul.f32 %v27_v15, %v27_v15  ;;  %v34_v38 = vld [vmem:[%s373_s0 + $0x70] sm:$0xff]  ;;  %v35_v39 = vld [vmem:[%s373_s0 + $0x78] sm:$0xff]  ;;  %v36_v44 = vld [vmem:[%s373_s0 + $0x80] sm:$0xff] }
   0x7   :  { %v47_v40 = vadd.f32 %v46_v28, %v32_v32  ;;  %v58_v41 = vadd.f32 %v57_v29, %v33_v33  ;;  %v133_v42 = vmul.f32 %v28_v20, %v28_v20  ;;  %v134_v43 = vmul.f32 %v29_v21, %v29_v21  ;;  %v37_v45 = vld [vmem:[%s373_s0 + $0x88] sm:$0xff]  ;;  %v38_v50 = vld [vmem:[%s373_s0 + $0x90] sm:$0xff]  ;;  %v39_v51 = vld [vmem:[%s373_s0 + $0x98] sm:$0xff] }
   0x8   :  { %v69_v46 = vadd.f32 %v68_v34, %v34_v38  ;;  %v80_v47 = vadd.f32 %v79_v35, %v35_v39  ;;  %v135_v48 = vmul.f32 %v30_v26, %v30_v26  ;;  %v136_v49 = vmul.f32 %v31_v27, %v31_v27  ;;  %v40_v56 = vld [vmem:[%s373_s0 + $0xa0] sm:$0xff]  ;;  %v41_v57 = vld [vmem:[%s373_s0 + $0xa8] sm:$0xff]  ;;  %v42_v62 = vld [vmem:[%s373_s0 + $0xb0] sm:$0xff] }
   0x9   :  { %v48_v52 = vadd.f32 %v47_v40, %v36_v44  ;;  %v59_v53 = vadd.f32 %v58_v41, %v37_v45  ;;  %v137_v54 = vmul.f32 %v32_v32, %v32_v32  ;;  %v138_v55 = vmul.f32 %v33_v33, %v33_v33  ;;  %v43_v63 = vld [vmem:[%s373_s0 + $0xb8] sm:$0xff] }
   0xa   :  { %v70_v58 = vadd.f32 %v69_v46, %v38_v50  ;;  %v81_v59 = vadd.f32 %v80_v47, %v39_v51  ;;  %v139_v60 = vmul.f32 %v34_v38, %v34_v38  ;;  %v140_v61 = vmul.f32 %v35_v39, %v35_v39 }
   0xb   :  { %v49_v0 = vadd.f32 %v48_v52, %v40_v56  ;;  %v60_v1 = vadd.f32 %v59_v53, %v41_v57  ;;  %v141_v2 = vmul.f32 %v36_v44, %v36_v44  ;;  %v142_v3 = vmul.f32 %v37_v45, %v37_v45 }
   0xc   :  { %v71_v4 = vadd.f32 %v70_v58, %v42_v62  ;;  %v82_v5 = vadd.f32 %v81_v59, %v43_v63  ;;  %v143_v7 = vmul.f32 %v38_v50, %v38_v50  ;;  %v144_v8 = vmul.f32 %v39_v51, %v39_v51 }
   0xd   :  { %v50_v9 = vrot.slane %v49_v0, 4  ;;  %v61_v10 = vrot.slane %v60_v1, 4  ;;  %v145_v13 = vmul.f32 %v40_v56, %v40_v56  ;;  %v146_v14 = vmul.f32 %v41_v57, %v41_v57 }
   0xe   :  { %v72_v15 = vrot.slane %v71_v4, 4  ;;  %v83_v16 = vrot.slane %v82_v5, 4  ;;  %v147_v17 = vmul.f32 %v42_v62, %v42_v62  ;;  %v148_v18 = vmul.f32 %v43_v63, %v43_v63 }
   0xf   :  { %v51_v20 = vadd.f32 %v50_v9, %v49_v0  ;;  %v62_v21 = vadd.f32 %v61_v10, %v60_v1  ;;  %v149_v22 = vadd.f32 %v129_v25, %v273_v11  ;;  %v160_v23 = vadd.f32 %v130_v31, %v275_v12 }
  0x10   :  { %v73_v26 = vadd.f32 %v72_v15, %v71_v4  ;;  %v84_v27 = vadd.f32 %v83_v16, %v82_v5  ;;  %v171_v28 = vadd.f32 %v131_v36, %v293_v19  ;;  %v182_v29 = vadd.f32 %v132_v37, %v301_v24 }
  0x11   :  { %v52_v32 = vrot.slane %v51_v20, 2  ;;  %v63_v33 = vrot.slane %v62_v21, 2  ;;  %v150_v34 = vadd.f32 %v149_v22, %v133_v42  ;;  %v161_v35 = vadd.f32 %v160_v23, %v134_v43 }
  0x12   :  { %v74_v38 = vrot.slane %v73_v26, 2  ;;  %v85_v39 = vrot.slane %v84_v27, 2  ;;  %v172_v40 = vadd.f32 %v171_v28, %v135_v48  ;;  %v183_v41 = vadd.f32 %v182_v29, %v136_v49 }
  0x13   :  { %v53_v44 = vadd.f32 %v52_v32, %v51_v20  ;;  %v64_v45 = vadd.f32 %v63_v33, %v62_v21  ;;  %v151_v46 = vadd.f32 %v150_v34, %v137_v54  ;;  %v162_v11 = vadd.f32 %v161_v35, %v138_v55 }
  0x14   :  { %v75_v25 = vadd.f32 %v74_v38, %v73_v26  ;;  %v86_v12 = vadd.f32 %v85_v39, %v84_v27  ;;  %v173_v31 = vadd.f32 %v172_v40, %v139_v60  ;;  %v184_v47 = vadd.f32 %v183_v41, %v140_v61  ;;  %v124_v41 = vld [vmem:[%s375_s2] sm:$0xf] }
  0x15   :  { %v54_v50 = vrot.slane %v53_v44, 1  ;;  %v65_v19 = vrot.slane %v64_v45, 1  ;;  %v152_v36 = vadd.f32 %v151_v46, %v141_v2  ;;  %v163_v24 = vadd.f32 %v162_v11, %v142_v3 }
  0x16   :  { %v76_v37 = vrot.slane %v75_v25, 1  ;;  %v87_v51 = vrot.slane %v86_v12, 1  ;;  %v174_v42 = vadd.f32 %v173_v31, %v143_v7  ;;  %v185_v43 = vadd.f32 %v184_v47, %v144_v8 }
  0x17   :  { %v55_v52 = vadd.f32 %v54_v50, %v53_v44  ;;  %v66_v53 = vadd.f32 %v65_v19, %v64_v45  ;;  %v153_v48 = vadd.f32 %v152_v36, %v145_v13  ;;  %v164_v49 = vadd.f32 %v163_v24, %v146_v14  ;;  %v44_v14 = vld [vmem:[%s374_s1] sm:$0xf] }
  0x18   :  { %v77_v56 = vadd.f32 %v76_v37, %v75_v25  ;;  %v88_v57 = vadd.f32 %v87_v51, %v86_v12  ;;  %v175_v54 = vadd.f32 %v174_v42, %v147_v17  ;;  %v186_v55 = vadd.f32 %v185_v43, %v148_v18 }
  0x19   :  { %v93_v58 = vcombine.low %v55_v52, %v66_v53  ;;  %v154_v59 = vrot.slane %v153_v48, 4  ;;  %v165_v60 = vrot.slane %v164_v49, 4 }
  0x1a   :  { %v94_v61 = vcombine.low %v77_v56, %v88_v57  ;;  %v176_v62 = vrot.slane %v175_v54, 4  ;;  %v187_v63 = vrot.slane %v186_v55, 4 }
  0x1b   :  { %v101_v0 = vrot.slane %v93_v58, %v309_v30  ;;  %v155_v1 = vadd.f32 %v154_v59, %v153_v48  ;;  %v166_v2 = vadd.f32 %v165_v60, %v164_v49 }
  0x1c   :  { %v108_v3 = vrot.slane %v94_v61, %v309_v30  ;;  %v177_v4 = vadd.f32 %v176_v62, %v175_v54  ;;  %v188_v5 = vadd.f32 %v187_v63, %v186_v55 }
  0x1d   :  { %v156_v7 = vrot.slane %v155_v1, 2  ;;  %v167_v8 = vrot.slane %v166_v2, 2 }
  0x1e   :  { %v109_v9 = vcombine.low %v101_v0, %v108_v3  ;;  %v178_v10 = vrot.slane %v177_v4, 2  ;;  %v189_v13 = vrot.slane %v188_v5, 2 }
  0x1f   :  { %v157_v15 = vadd.f32 %v156_v7, %v155_v1  ;;  %v168_v16 = vadd.f32 %v167_v8, %v166_v2 }
  0x20   :  { %v116_v17 = vrot.slane %v109_v9, %v309_v30  ;;  %v179_v18 = vadd.f32 %v178_v10, %v177_v4  ;;  %v190_v20 = vadd.f32 %v189_v13, %v188_v5 }
  0x21   :  { %v158_v21 = vrot.slane %v157_v15, 1  ;;  %v169_v22 = vrot.slane %v168_v16, 1 }
  0x22   :  { %v118_v23 = vadd.f32 %v116_v17, %v44_v14  ;;  %v180_v26 = vrot.slane %v179_v18, 1  ;;  %v191_v27 = vrot.slane %v190_v20, 1 }
  0x23   :  { %v159_v28 = vadd.f32 %v158_v21, %v157_v15  ;;  %v170_v29 = vadd.f32 %v169_v22, %v168_v16 }
  0x24   :  { %123 = vst.msk [vmem:[%s374_s1] sm:$0xf] %vm260_vm0, %v118_v23  ;;  %v181_v32 = vadd.f32 %v180_v26, %v179_v18  ;;  %v192_v33 = vadd.f32 %v191_v27, %v190_v20 }
  0x25   :  { %v197_v34 = vcombine.low %v159_v28, %v170_v29 }
  0x26   :  { %v198_v35 = vcombine.low %v181_v32, %v192_v33 }
  0x27   :  { %v205_v38 = vrot.slane %v197_v34, %v309_v30 }
  0x28   :  { %v212_v39 = vrot.slane %v198_v35, %v309_v30 }
  0x2a   :  { %v213_v40 = vcombine.low %v205_v38, %v212_v39 }
  0x2c   :  { %v220_v44 = vrot.slane %v213_v40, %v309_v30 }
  0x2e   :  { %v222_v45 = vadd.f32 %v220_v44, %v124_v41 }
  0x30   :  { %223 = vst.msk [vmem:[%s375_s2] sm:$0xf] %vm260_vm0, %v222_v45 }

// kernel: _lambda_.20
= control target key start
LH: loop header
LB: loop body
LE: loop exit
PB: predicated region body
PF: predicated region fallthrough
CT: control target
= control target key end

     0   :  { %v1959_v1 = vmov 0   ;;  %vm339_vm0 = vcmask 523264   ;;  %s3314_s1 = inlined_call_operand.vmem [shape: bf16[64,896], index: 1, kind: input, shape index: {}]   ;;  %s3315_s0 = inlined_call_operand.vmem [shape: bf16[344,64], index: 0, kind: input, shape index: {}]   ;;  %s3316_s2 = inlined_call_operand.vmem [shape: f32[344,896], index: 2, kind: output, shape index: {}]  }
   0x1   :  { %v1897_v0 = vld [vmem:[%s3314_s1 + $0xac] ss:$28 sps:$4 sm:$0xff]   ;;  %438 = vmatprep.mubr.bf16.mxu0 %v1959_v1  ;;  %608 = vmatprep.mubr.bf16.mxu1 %v1959_v1  ;;  %v1900_v3 = vld [vmem:[%s3314_s1 + $0x74] ss:$28 sps:$4 sm:$0xff]   ;;  %v1903_v5 = vld [vmem:[%s3314_s1 + $0x3c] ss:$28 sps:$4 sm:$0xff]  }
   0x2   :  { %v1899_v2 = vld [vmem:[%s3314_s1 + $0xa8] ss:$28 sps:$4 sm:$0xff]   ;;  %414 = vmatprep.subr.bf16.mxu0 %v1897_v0  ;;  %1888 = vmatprep.subr.bf16.mxu1 %v1897_v0  ;;  %v1902_v4 = vld [vmem:[%s3314_s1 + $0x70] ss:$28 sps:$4 sm:$0xff]   ;;  %v1905_v6 = vld [vmem:[%s3314_s1 + $0x38] ss:$28 sps:$4 sm:$0xff]  }
   0x3   :  { %415 = vmatpush1.bf16.msra.mxu0 %v1899_v2  ;;  %1892 = vmatpush1.bf16.msra.mxu1 %v1899_v2  ;;  %v1906_v7 = vld [vmem:[%s3314_s1 + $0x4] ss:$28 sps:$4 sm:$0xff]   ;;  %v1912_v9 = vld [vmem:[%s3314_s1 + $0xbc] ss:$28 sps:$4 sm:$0xff]   ;;  %v1916_v10 = vld [vmem:[%s3314_s1 + $0xb4] ss:$28 sps:$4 sm:$0xff]  }
   0x4   :  { %416 = vmatprep.subr.bf16.mxu0 %v1900_v3  ;;  %1889 = vmatprep.subr.bf16.mxu1 %v1900_v3  ;;  %v1908_v8 = vld [vmem:[%s3314_s1] ss:$28 sps:$4 sm:$0xff]   ;;  %v2015_v12 = vld [vmem:[%s3315_s0 + $0x88] sm:$0xff]   ;;  %v1910_v13 = vld [vmem:[%s3314_s1 + $0xb8] ss:$28 sps:$4 sm:$0xff]  }
   0x5   :  { %v2010_v11 = vld [vmem:[%s3315_s0] sm:$0xff]   ;;  %v1914_v14 = vld [vmem:[%s3314_s1 + $0xb0] ss:$28 sps:$4 sm:$0xff]   ;;  %v1922_v15 = vld [vmem:[%s3314_s1 + $0x7c] ss:$28 sps:$4 sm:$0xff]  }
   0x6   :  { %v1920_v16 = vld [vmem:[%s3314_s1 + $0x78] ss:$28 sps:$4 sm:$0xff]   ;;  %v1928_v17 = vld [vmem:[%s3314_s1 + $0x44] ss:$28 sps:$4 sm:$0xff]   ;;  %v2047_v20 = vld [vmem:[%s3315_s0 + $0x8] sm:$0xff]  }
   0x7   :  { %417 = vmatpush1.bf16.msra.mxu0 %v1902_v4  ;;  %1893 = vmatpush1.bf16.msra.mxu1 %v1902_v4  ;;  %v1931_v18 = vld [vmem:[%s3314_s1 + $0x80] ss:$28 sps:$4 sm:$0xff]   ;;  %v2052_v21 = vld [vmem:[%s3315_s0 + $0x90] sm:$0xff]   ;;  %v1936_v23 = vld [vmem:[%s3314_s1 + $0xc] ss:$28 sps:$4 sm:$0xff]  }
   0x8   :  { %418 = vmatprep.subr.bf16.mxu0 %v1903_v5  ;;  %1890 = vmatprep.subr.bf16.mxu1 %v1903_v5  ;;  %v1933_v19 = vld [vmem:[%s3314_s1 + $0x84] ss:$28 sps:$4 sm:$0xff]   ;;  %v2075_v26 = vld [vmem:[%s3315_s0 + $0x10] sm:$0xff]   ;;  %v1944_v28 = vld [vmem:[%s3314_s1 + $0x4c] ss:$28 sps:$4 sm:$0xff]  }
   0x9   :  { %v1926_v22 = vld [vmem:[%s3314_s1 + $0x40] ss:$28 sps:$4 sm:$0xff]   ;;  %v1934_v24 = vld [vmem:[%s3314_s1 + $0x8] ss:$28 sps:$4 sm:$0xff]   ;;  %v1950_v30 = vld [vmem:[%s3314_s1 + $0x10] ss:$28 sps:$4 sm:$0xff]  }
   0xa   :  { %v1938_v25 = vld [vmem:[%s3314_s1 + $0xc0] ss:$28 sps:$4 sm:$0xff]   ;;  %v1942_v27 = vld [vmem:[%s3314_s1 + $0x48] ss:$28 sps:$4 sm:$0xff]   ;;  %v1952_v31 = vld [vmem:[%s3314_s1 + $0x14] ss:$28 sps:$4 sm:$0xff]  }
   0xb   :  { %419 = vmatpush1.bf16.msra.mxu0 %v1905_v6  ;;  %1894 = vmatpush1.bf16.msra.mxu1 %v1905_v6  ;;  %v2086_v29 = vld [vmem:[%s3315_s0 + $0x98] sm:$0xff]   ;;  %v2108_v33 = vld [vmem:[%s3315_s0 + $0xa0] sm:$0xff]   ;;  %v2124_v35 = vld [vmem:[%s3315_s0 + $0xa8] ss:$0 sps:$4 sm:$0xff]  }
   0xc   :  { %420 = vmatprep.subr.bf16.mxu0 %v1906_v7  ;;  %1891 = vmatprep.subr.bf16.mxu1 %v1906_v7  ;;  %v2103_v32 = vld [vmem:[%s3315_s0 + $0x18] sm:$0xff]   ;;  %v2119_v34 = vld [vmem:[%s3315_s0 + $0x20] sm:$0xff]   ;;  %v2135_v36 = vld [vmem:[%s3315_s0 + $0x28] sm:$0xff]  }
   0xd   :  { %v1948_v37 = vld [vmem:[%s3314_s1 + $0x88] ss:$28 sps:$4 sm:$0xff]   ;;  %v1957_v38 = vld [vmem:[%s3314_s1 + $0x50] ss:$28 sps:$4 sm:$0xff]   ;;  %v1958_v40 = vld [vmem:[%s3314_s1 + $0x18] ss:$28 sps:$4 sm:$0xff]  }
   0xe   :  { %v2152_v39 = vld [vmem:[%s3315_s0 + $0x30] sm:$0xff]   ;;  %v2166_v41 = vld [vmem:[%s3315_s0 + $0x38] sm:$0xff]   ;;  %v2177_v42 = vld [vmem:[%s3315_s0 + $0x40] sm:$0xff]  }
   0xf   :  { %421 = vmatpush1.bf16.msra.mxu0 %v1908_v8  ;;  %1895 = vmatpush1.bf16.msra.mxu1 %v1908_v8  ;;  %v2188_v43 = vld [vmem:[%s3315_s0 + $0x48] sm:$0xff]   ;;  %v2199_v44 = vld [vmem:[%s3315_s0 + $0x50] sm:$0xff]   ;;  %v2210_v45 = vld [vmem:[%s3315_s0 + $0x58] sm:$0xff]  }
  0x10   :  { %916 = vmatprep.subr.bf16.mxu0 %v1912_v9  ;;  %665 = vmatprep.subr.bf16.mxu1 %v1916_v10  ;;  %v2221_v46 = vld [vmem:[%s3315_s0 + $0x60] sm:$0xff]   ;;  %v2232_v47 = vld [vmem:[%s3315_s0 + $0x68] sm:$0xff]   ;;  %v2243_v48 = vld [vmem:[%s3315_s0 + $0x70] sm:$0xff]  }
  0x11   :  { %v2254_v49 = vld [vmem:[%s3315_s0 + $0x78] sm:$0xff]   ;;  %v2265_v50 = vld [vmem:[%s3315_s0 + $0x80] sm:$0xff]  }
  0x12   :  { %1722 = vmatmul.mubr.msk.bf16.vlgmr.msra.gmra.mxu0 %vm339_vm0, %v2010_v11  ;;  %1739 = vmatmul.mubr.msk.bf16.vlgmr.msra.gmra.mxu1 %vm339_vm0, %v2015_v12 }
  0x13   :  { %917 = vmatpush1.bf16.msra.mxu0 %v1910_v13  ;;  %448 = vmatprep.mubr.bf16.mxu0 %v1959_v1 }
  0x14   :  { %666 = vmatpush1.bf16.msra.mxu1 %v1914_v14  ;;  %618 = vmatprep.mubr.bf16.mxu1 %v1959_v1 }
  0x15   :  { %667 = vmatprep.subr.bf16.mxu1 %v1922_v15  ;;  %918 = vmatprep.subr.bf16.mxu0 %v1933_v19 }
  0x17   :  { %919 = vmatpush1.bf16.msra.mxu0 %v1931_v18 }
  0x18   :  { %668 = vmatpush1.bf16.msra.mxu1 %v1920_v16  ;;  %920 = vmatprep.subr.bf16.mxu0 %v1944_v28 }
  0x19   :  { %669 = vmatprep.subr.bf16.mxu1 %v1928_v17 }
  0x1a   :  { %1723 = vmatmul.mubr.msk.bf16.gmra.mxu0 %vm339_vm0, %v2047_v20  ;;  %1740 = vmatmul.mubr.msk.bf16.gmra.mxu1 %vm339_vm0, %v2052_v21 }
  0x1b   :  { %458 = vmatprep.mubr.bf16.mxu0 %v1959_v1  ;;  %628 = vmatprep.mubr.bf16.mxu1 %v1959_v1 }
  0x1c   :  { %670 = vmatpush1.bf16.msra.mxu1 %v1926_v22  ;;  %921 = vmatpush1.bf16.msra.mxu0 %v1942_v27 }
  0x1d   :  { %671 = vmatprep.subr.bf16.mxu1 %v1936_v23  ;;  %922 = vmatprep.subr.bf16.mxu0 %v1952_v31 }
  0x20   :  { %672 = vmatpush1.bf16.msra.mxu1 %v1934_v24  ;;  %923 = vmatpush1.bf16.msra.mxu0 %v1950_v30 }
  0x21   :  { %1836 = vmatprep.subr.bf16.mxu1 %v1938_v25 }
  0x22   :  { %1724 = vmatmul.mubr.msk.bf16.gmra.mxu0 %vm339_vm0, %v2075_v26  ;;  %1741 = vmatmul.mubr.msk.bf16.gmra.mxu1 %vm339_vm0, %v2086_v29 }
  0x23   :  { %468 = vmatprep.mubr.bf16.mxu0 %v1959_v1  ;;  %638 = vmatprep.mubr.bf16.mxu1 %v1959_v1 }
  0x2a   :  { %1725 = vmatmul.mubr.msk.bf16.gmra.mxu0 %vm339_vm0, %v2103_v32  ;;  %1742 = vmatmul.mubr.msk.bf16.gmra.mxu1 %vm339_vm0, %v2108_v33 }
  0x2b   :  { %478 = vmatprep.mubr.bf16.mxu0 %v1959_v1  ;;  %648 = vmatprep.mubr.bf16.mxu1 %v1959_v1 }
  0x32   :  { %1726 = vmatmul.mubr.msk.bf16.gmra.mxu0 %vm339_vm0, %v2119_v34  ;;  %1743 = vmatmul.mubr.msk.bf16.gmra.mxu1 %vm339_vm0, %v2124_v35 }
  0x33   :  { %488 = vmatprep.mubr.bf16.mxu0 %v1959_v1  ;;  %689 = vmatprep.mubr.bf16.mxu1 %v1959_v1 }
  0x3a   :  { %1727 = vmatmul.mubr.msk.bf16.gmra.mxu0 %vm339_vm0, %v2135_v36  ;;  %1744 = vmatmul.mubr.msk.bf16.vlgmr.msra.gmra.mxu1 %vm339_vm0, %v2010_v11 }
  0x3b   :  { %498 = vmatprep.mubr.bf16.mxu0 %v1959_v1  ;;  %1837 = vmatpush3.bf16.msra.mxu1 %v1938_v25 }
  0x3c   :  { %699 = vmatprep.mubr.bf16.mxu1 %v1959_v1  ;;  %1838 = vmatprep.subr.bf16.mxu1 %v1948_v37 }
  0x3f   :  { %1839 = vmatpush3.bf16.msra.mxu1 %v1948_v37 }
  0x40   :  { %1840 = vmatprep.subr.bf16.mxu1 %v1957_v38 }
  0x42   :  { %1728 = vmatmul.mubr.msk.bf16.gmra.mxu0 %vm339_vm0, %v2152_v39  ;;  %1745 = vmatmul.mubr.msk.bf16.gmra.mxu1 %vm339_vm0, %v2047_v20 }
  0x43   :  { %508 = vmatprep.mubr.bf16.mxu0 %v1959_v1  ;;  %709 = vmatprep.mubr.bf16.mxu1 %v1959_v1 }
  0x44   :  { %1841 = vmatpush3.bf16.msra.mxu1 %v1957_v38 }
  0x45   :  { %1842 = vmatprep.subr.bf16.mxu1 %v1958_v40 }
  0x48   :  { %1843 = vmatpush3.bf16.msra.mxu1 %v1958_v40 }
  0x4a   :  { %1729 = vmatmul.mubr.msk.bf16.gmra.mxu0 %vm339_vm0, %v2166_v41  ;;  %1746 = vmatmul.mubr.msk.bf16.gmra.mxu1 %vm339_vm0, %v2075_v26 }
  0x4b   :  { %518 = vmatprep.mubr.bf16.mxu0 %v1959_v1  ;;  %719 = vmatprep.mubr.bf16.mxu1 %v1959_v1 }
  0x52   :  { %1730 = vmatmul.mubr.msk.bf16.gmra.mxu0 %vm339_vm0, %v2177_v42  ;;  %1747 = vmatmul.mubr.msk.bf16.gmra.mxu1 %vm339_vm0, %v2103_v32 }
  0x53   :  { %528 = vmatprep.mubr.bf16.mxu0 %v1959_v1  ;;  %729 = vmatprep.mubr.bf16.mxu1 %v1959_v1 }
  0x5a   :  { %1731 = vmatmul.mubr.msk.bf16.gmra.mxu0 %vm339_vm0, %v2188_v43  ;;  %1748 = vmatmul.mubr.msk.bf16.gmra.mxu1 %vm339_vm0, %v2119_v34 }
  0x5b   :  { %538 = vmatprep.mubr.bf16.mxu0 %v1959_v1  ;;  %739 = vmatprep.mubr.bf16.mxu1 %v1959_v1 }
  0x62   :  { %1732 = vmatmul.mubr.msk.bf16.gmra.mxu0 %vm339_vm0, %v2199_v44  ;;  %1749 = vmatmul.mubr.msk.bf16.gmra.mxu1 %vm339_vm0, %v2135_v36 }
  0x63   :  { %548 = vmatprep.mubr.bf16.mxu0 %v1959_v1  ;;  %749 = vmatprep.mubr.bf16.mxu1 %v1959_v1 }
  0x6a   :  { %1733 = vmatmul.mubr.msk.bf16.gmra.mxu0 %vm339_vm0, %v2210_v45  ;;  %1750 = vmatmul.mubr.msk.bf16.gmra.mxu1 %vm339_vm0, %v2152_v39 }
  0x6b   :  { %558 = vmatprep.mubr.bf16.mxu0 %v1959_v1  ;;  %759 = vmatprep.mubr.bf16.mxu1 %v1959_v1 }
  0x72   :  { %1734 = vmatmul.mubr.msk.bf16.gmra.mxu0 %vm339_vm0, %v2221_v46  ;;  %1751 = vmatmul.mubr.msk.bf16.gmra.mxu1 %vm339_vm0, %v2166_v41 }
  0x73   :  { %568 = vmatprep.mubr.bf16.mxu0 %v1959_v1  ;;  %769 = vmatprep.mubr.bf16.mxu1 %v1959_v1 }
  0x7a   :  { %1735 = vmatmul.mubr.msk.bf16.gmra.mxu0 %vm339_vm0, %v2232_v47  ;;  %1752 = vmatmul.mubr.msk.bf16.gmra.mxu1 %vm339_vm0, %v2177_v42 }
  0x7b   :  { %578 = vmatprep.mubr.bf16.mxu0 %v1959_v1  ;;  %779 = vmatprep.mubr.bf16.mxu1 %v1959_v1 }
  0x82   :  { %1736 = vmatmul.mubr.msk.bf16.gmra.mxu0 %vm339_vm0, %v2243_v48  ;;  %1753 = vmatmul.mubr.msk.bf16.gmra.mxu1 %vm339_vm0, %v2188_v43 }
  0x83   :  { %588 = vmatprep.mubr.bf16.mxu0 %v1959_v1  ;;  %789 = vmatprep.mubr.bf16.mxu1 %v1959_v1 }
  0x8a   :  { %1737 = vmatmul.mubr.msk.bf16.gmra.mxu0 %vm339_vm0, %v2254_v49  ;;  %1754 = vmatmul.mubr.msk.bf16.gmra.mxu1 %vm339_vm0, %v2199_v44 }
  0x8b   :  { %598 = vmatprep.mubr.bf16.mxu0 %v1959_v1  ;;  %799 = vmatprep.mubr.bf16.mxu1 %v1959_v1 }
  0x92   :  { %1738 = vmatmul.mubr.msk.bf16.gmra.mxu0 %vm339_vm0, %v2265_v50  ;;  %1755 = vmatmul.mubr.msk.bf16.gmra.mxu1 %vm339_vm0, %v2210_v45 }
  0x93   :  { %940 = vmatprep.mubr.bf16.mxu0 %v1959_v1  ;;  %809 = vmatprep.mubr.bf16.mxu1 %v1959_v1 }
  0x9a   :  { %1766 = vmatmul.mubr.msk.bf16.vlgmr.msra.gmra.mxu0 %vm339_vm0, %v2010_v11  ;;  %1756 = vmatmul.mubr.msk.bf16.gmra.mxu1 %vm339_vm0, %v2221_v46 }
  0x9b   :  { %950 = vmatprep.mubr.bf16.mxu0 %v1959_v1  ;;  %819 = vmatprep.mubr.bf16.mxu1 %v1959_v1 }
  0xa2   :  { %1767 = vmatmul.mubr.msk.bf16.gmra.mxu0 %vm339_vm0, %v2047_v20  ;;  %1757 = vmatmul.mubr.msk.bf16.gmra.mxu1 %vm339_vm0, %v2232_v47 }
  0xa3   :  { %960 = vmatprep.mubr.bf16.mxu0 %v1959_v1  ;;  %829 = vmatprep.mubr.bf16.mxu1 %v1959_v1 }
  0xaa   :  { %1768 = vmatmul.mubr.msk.bf16.gmra.mxu0 %vm339_vm0, %v2075_v26  ;;  %1758 = vmatmul.mubr.msk.bf16.gmra.mxu1 %vm339_vm0, %v2243_v48 }
  0xab   :  { %970 = vmatprep.mubr.bf16.mxu0 %v1959_v1  ;;  %839 = vmatprep.mubr.bf16.mxu1 %v1959_v1 }
  0xb2   :  { %1769 = vmatmul.mubr.msk.bf16.gmra.mxu0 %vm339_vm0, %v2103_v32  ;;  %1759 = vmatmul.mubr.msk.bf16.gmra.mxu1 %vm339_vm0, %v2254_v49 }
  0xb3   :  { %980 = vmatprep.mubr.bf16.mxu0 %v1959_v1  ;;  %849 = vmatprep.mubr.bf16.mxu1 %v1959_v1 }
  0xba   :  { %1770 = vmatmul.mubr.msk.bf16.gmra.mxu0 %vm339_vm0, %v2119_v34  ;;  %1760 = vmatmul.mubr.msk.bf16.gmra.mxu1 %vm339_vm0, %v2265_v50 }
  0xbb   :  { %990 = vmatprep.mubr.bf16.mxu0 %v1959_v1  ;;  %859 = vmatprep.mubr.bf16.mxu1 %v1959_v1 }
  0xc2   :  { %1771 = vmatmul.mubr.msk.bf16.gmra.mxu0 %vm339_vm0, %v2135_v36  ;;  %1761 = vmatmul.mubr.msk.bf16.gmra.mxu1 %vm339_vm0, %v2015_v12 }
  0xc3   :  { %1000 = vmatprep.mubr.bf16.mxu0 %v1959_v1  ;;  %869 = vmatprep.mubr.bf16.mxu1 %v1959_v1 }
  0xca   :  { %1772 = vmatmul.mubr.msk.bf16.gmra.mxu0 %vm339_vm0, %v2152_v39  ;;  %1762 = vmatmul.mubr.msk.bf16.gmra.mxu1 %vm339_vm0, %v2052_v21 }
  0xcb   :  { %1010 = vmatprep.mubr.bf16.mxu0 %v1959_v1  ;;  %879 = vmatprep.mubr.bf16.mxu1 %v1959_v1 }
  0xd2   :  { %v440_v51 = vpop.f32.mrf.mxu0  ;;  %1773 = vmatmul.mubr.msk.bf16.gmra.mxu0 %vm339_vm0, %v2166_v41  ;;  %v610_v52 = vpop.f32.mrf.mxu1  ;;  %1763 = vmatmul.mubr.msk.bf16.gmra.mxu1 %vm339_vm0, %v2086_v29 }
  0xd3   :  { %1367 = vst [vmem:[%s3316_s2] sm:$0xff] %v440_v51  ;;  %1605 = vst [vmem:[%s3316_s2 + $0x770] sm:$0xff] %v610_v52  ;;  %1020 = vmatprep.mubr.bf16.mxu0 %v1959_v1  ;;  %889 = vmatprep.mubr.bf16.mxu1 %v1959_v1 }
  0xd4   :  { %v442_v53 = vpop.f32.mrf.mxu0  ;;  %v612_v54 = vpop.f32.mrf.mxu1 }
  0xd5   :  { %1368 = vst [vmem:[%s3316_s2 + $0x8] sm:$0xff] %v442_v53  ;;  %1606 = vst [vmem:[%s3316_s2 + $0x778] sm:$0xff] %v612_v54 }
  0xd6   :  { %v444_v55 = vpop.f32.mrf.mxu0  ;;  %v614_v56 = vpop.f32.mrf.mxu1 }
  0xd7   :  { %1374 = vst [vmem:[%s3316_s2 + $0x38] sm:$0xff] %v444_v55  ;;  %1612 = vst [vmem:[%s3316_s2 + $0x7a8] sm:$0xff] %v614_v56 }
  0xd8   :  { %v446_v57 = vpop.f32.mrf.mxu0  ;;  %v616_v58 = vpop.f32.mrf.mxu1 }
  0xd9   :  { %1375 = vst [vmem:[%s3316_s2 + $0x40] sm:$0xff] %v446_v57  ;;  %1613 = vst [vmem:[%s3316_s2 + $0x7b0] sm:$0xff] %v616_v58 }
  0xda   :  { %v450_v59 = vpop.f32.mrf.mxu0  ;;  %1774 = vmatmul.mubr.msk.bf16.gmra.mxu0 %vm339_vm0, %v2177_v42  ;;  %v620_v60 = vpop.f32.mrf.mxu1  ;;  %1764 = vmatmul.mubr.msk.bf16.gmra.mxu1 %vm339_vm0, %v2108_v33 }
  0xdb   :  { %1381 = vst [vmem:[%s3316_s2 + $0x70] sm:$0xff] %v450_v59  ;;  %1619 = vst [vmem:[%s3316_s2 + $0x7e0] sm:$0xff] %v620_v60  ;;  %1030 = vmatprep.mubr.bf16.mxu0 %v1959_v1  ;;  %899 = vmatprep.mubr.bf16.mxu1 %v1959_v1 }
  0xdc   :  { %v452_v61 = vpop.f32.mrf.mxu0  ;;  %v622_v62 = vpop.f32.mrf.mxu1 }
  0xdd   :  { %1382 = vst [vmem:[%s3316_s2 + $0x78] sm:$0xff] %v452_v61  ;;  %1620 = vst [vmem:[%s3316_s2 + $0x7e8] sm:$0xff] %v622_v62 }
  0xde   :  { %v454_v63 = vpop.f32.mrf.mxu0  ;;  %v624_v0 = vpop.f32.mrf.mxu1 }
  0xdf   :  { %1388 = vst [vmem:[%s3316_s2 + $0xa8] sm:$0xff] %v454_v63  ;;  %1626 = vst [vmem:[%s3316_s2 + $0x818] sm:$0xff] %v624_v0 }
  0xe0   :  { %v456_v2 = vpop.f32.mrf.mxu0  ;;  %v626_v3 = vpop.f32.mrf.mxu1 }
  0xe1   :  { %1389 = vst [vmem:[%s3316_s2 + $0xb0] sm:$0xff] %v456_v2  ;;  %1627 = vst [vmem:[%s3316_s2 + $0x820] sm:$0xff] %v626_v3 }
  0xe2   :  { %v460_v4 = vpop.f32.mrf.mxu0  ;;  %1775 = vmatmul.mubr.msk.bf16.gmra.mxu0 %vm339_vm0, %v2188_v43  ;;  %v630_v5 = vpop.f32.mrf.mxu1  ;;  %1765 = vmatmul.mubr.msk.bf16.gmra.mxu1 %vm339_vm0, %v2124_v35 }
  0xe3   :  { %1395 = vst [vmem:[%s3316_s2 + $0xe0] sm:$0xff] %v460_v4  ;;  %1633 = vst [vmem:[%s3316_s2 + $0x850] sm:$0xff] %v630_v5  ;;  %1040 = vmatprep.mubr.bf16.mxu0 %v1959_v1  ;;  %1844 = vmatprep.mubr.msk.bf16.mxu1 %vm339_vm0, %v2010_v11 }
  0xe4   :  { %v462_v6 = vpop.f32.mrf.mxu0  ;;  %v632_v7 = vpop.f32.mrf.mxu1 }
  0xe5   :  { %1396 = vst [vmem:[%s3316_s2 + $0xe8] sm:$0xff] %v462_v6  ;;  %1634 = vst [vmem:[%s3316_s2 + $0x858] sm:$0xff] %v632_v7 }
  0xe6   :  { %v464_v8 = vpop.f32.mrf.mxu0  ;;  %v634_v9 = vpop.f32.mrf.mxu1 }
  0xe7   :  { %1402 = vst [vmem:[%s3316_s2 + $0x118] sm:$0xff] %v464_v8  ;;  %1640 = vst [vmem:[%s3316_s2 + $0x888] sm:$0xff] %v634_v9 }
  0xe8   :  { %v466_v10 = vpop.f32.mrf.mxu0  ;;  %v636_v11 = vpop.f32.mrf.mxu1 }
  0xe9   :  { %1403 = vst [vmem:[%s3316_s2 + $0x120] sm:$0xff] %v466_v10  ;;  %1641 = vst [vmem:[%s3316_s2 + $0x890] sm:$0xff] %v636_v11 }
  0xea   :  { %v470_v13 = vpop.f32.mrf.mxu0  ;;  %1776 = vmatmul.mubr.msk.bf16.gmra.mxu0 %vm339_vm0, %v2199_v44  ;;  %v640_v14 = vpop.f32.mrf.mxu1  ;;  %1845 = vmatmul.mubr.msk.bf16.vlgmr.msra.gmra.mxu1 %vm339_vm0, %v2047_v20 }
  0xeb   :  { %1409 = vst [vmem:[%s3316_s2 + $0x150] sm:$0xff] %v470_v13  ;;  %1647 = vst [vmem:[%s3316_s2 + $0x8c0] sm:$0xff] %v640_v14  ;;  %1050 = vmatprep.mubr.bf16.mxu0 %v1959_v1  ;;  %1848 = vmatprep.mubr.msk.bf16.mxu1 %vm339_vm0, %v2075_v26 }
  0xec   :  { %v472_v15 = vpop.f32.mrf.mxu0  ;;  %v642_v16 = vpop.f32.mrf.mxu1 }
  0xed   :  { %1410 = vst [vmem:[%s3316_s2 + $0x158] sm:$0xff] %v472_v15  ;;  %1648 = vst [vmem:[%s3316_s2 + $0x8c8] sm:$0xff] %v642_v16 }
  0xee   :  { %v474_v17 = vpop.f32.mrf.mxu0  ;;  %v644_v18 = vpop.f32.mrf.mxu1 }
  0xef   :  { %1416 = vst [vmem:[%s3316_s2 + $0x188] sm:$0xff] %v474_v17  ;;  %1654 = vst [vmem:[%s3316_s2 + $0x8f8] sm:$0xff] %v644_v18 }
  0xf0   :  { %v476_v19 = vpop.f32.mrf.mxu0  ;;  %v646_v20 = vpop.f32.mrf.mxu1 }
  0xf1   :  { %1417 = vst [vmem:[%s3316_s2 + $0x190] sm:$0xff] %v476_v19  ;;  %1655 = vst [vmem:[%s3316_s2 + $0x900] sm:$0xff] %v646_v20 }
  0xf2   :  { %v480_v22 = vpop.f32.mrf.mxu0  ;;  %1777 = vmatmul.mubr.msk.bf16.gmra.mxu0 %vm339_vm0, %v2210_v45  ;;  %v650_v23 = vpop.f32.mrf.mxu1  ;;  %1849 = vmatmul.mubr.msk.bf16.gmra.mxu1 %vm339_vm0, %v2103_v32 }
  0xf3   :  { %1423 = vst [vmem:[%s3316_s2 + $0x1c0] sm:$0xff] %v480_v22  ;;  %1661 = vst [vmem:[%s3316_s2 + $0x930] sm:$0xff] %v650_v23  ;;  %1060 = vmatprep.mubr.bf16.mxu0 %v1959_v1  ;;  %1852 = vmatprep.mubr.msk.bf16.mxu1 %vm339_vm0, %v2119_v34 }
  0xf4   :  { %v482_v24 = vpop.f32.mrf.mxu0  ;;  %v652_v25 = vpop.f32.mrf.mxu1 }
  0xf5   :  { %1424 = vst [vmem:[%s3316_s2 + $0x1c8] sm:$0xff] %v482_v24  ;;  %1662 = vst [vmem:[%s3316_s2 + $0x938] sm:$0xff] %v652_v25 }
  0xf6   :  { %v484_v26 = vpop.f32.mrf.mxu0  ;;  %v654_v27 = vpop.f32.mrf.mxu1 }
  0xf7   :  { %1430 = vst [vmem:[%s3316_s2 + $0x1f8] sm:$0xff] %v484_v26 }
  0xf8   :  { %v486_v28 = vpop.f32.mrf.mxu0  ;;  %v655_v30 = vpop.f32.mrf.mxu1 }
  0xf9   :  { %1431 = vst [vmem:[%s3316_s2 + $0x200] sm:$0xff] %v486_v28 }
  0xfa   :  { %v490_v31 = vpop.f32.mrf.mxu0  ;;  %1778 = vmatmul.mubr.msk.bf16.gmra.mxu0 %vm339_vm0, %v2221_v46  ;;  %v691_v32 = vpop.f32.mrf.mxu1  ;;  %1853 = vmatmul.mubr.msk.bf16.gmra.mxu1 %vm339_vm0, %v2135_v36 }
  0xfb   :  { %1437 = vst [vmem:[%s3316_s2 + $0x230] sm:$0xff] %v490_v31  ;;  %1369 = vst [vmem:[%s3316_s2 + $0x10] sm:$0xff] %v691_v32  ;;  %1070 = vmatprep.mubr.bf16.mxu0 %v1959_v1  ;;  %1856 = vmatprep.mubr.msk.bf16.mxu1 %vm339_vm0, %v2152_v39 }
  0xfc   :  { %v492_v34 = vpop.f32.mrf.mxu0  ;;  %v693_v37 = vpop.f32.mrf.mxu1 }
  0xfd   :  { %1438 = vst [vmem:[%s3316_s2 + $0x238] sm:$0xff] %v492_v34  ;;  %1370 = vst [vmem:[%s3316_s2 + $0x18] sm:$0xff] %v693_v37 }
  0xfe   :  { %v494_v36 = vpop.f32.mrf.mxu0  ;;  %v695_v38 = vpop.f32.mrf.mxu1 }
  0xff   :  { %1444 = vst [vmem:[%s3316_s2 + $0x268] sm:$0xff] %v494_v36  ;;  %1376 = vst [vmem:[%s3316_s2 + $0x48] sm:$0xff] %v695_v38 }
 0x100   :  { %v496_v39 = vpop.f32.mrf.mxu0  ;;  %v697_v40 = vpop.f32.mrf.mxu1 }
 0x101   :  { %1445 = vst [vmem:[%s3316_s2 + $0x270] sm:$0xff] %v496_v39  ;;  %1377 = vst [vmem:[%s3316_s2 + $0x50] sm:$0xff] %v697_v40 }
 0x102   :  { %v500_v51 = vpop.f32.mrf.mxu0  ;;  %1779 = vmatmul.mubr.msk.bf16.gmra.mxu0 %vm339_vm0, %v2232_v47  ;;  %v701_v52 = vpop.f32.mrf.mxu1  ;;  %1857 = vmatmul.mubr.msk.bf16.gmra.mxu1 %vm339_vm0, %v2166_v41 }
 0x103   :  { %1451 = vst [vmem:[%s3316_s2 + $0x2a0] sm:$0xff] %v500_v51  ;;  %1383 = vst [vmem:[%s3316_s2 + $0x80] sm:$0xff] %v701_v52  ;;  %1080 = vmatprep.mubr.bf16.mxu0 %v1959_v1  ;;  %1860 = vmatprep.mubr.msk.bf16.mxu1 %vm339_vm0, %v2177_v42 }
 0x104   :  { %v502_v53 = vpop.f32.mrf.mxu0  ;;  %v703_v54 = vpop.f32.mrf.mxu1 }
 0x105   :  { %1452 = vst [vmem:[%s3316_s2 + $0x2a8] sm:$0xff] %v502_v53  ;;  %1384 = vst [vmem:[%s3316_s2 + $0x88] sm:$0xff] %v703_v54 }
 0x106   :  { %v504_v41 = vpop.f32.mrf.mxu0  ;;  %v705_v55 = vpop.f32.mrf.mxu1 }
 0x107   :  { %1458 = vst [vmem:[%s3316_s2 + $0x2d8] sm:$0xff] %v504_v41  ;;  %1390 = vst [vmem:[%s3316_s2 + $0xb8] sm:$0xff] %v705_v55 }
 0x108   :  { %v506_v42 = vpop.f32.mrf.mxu0  ;;  %v707_v56 = vpop.f32.mrf.mxu1 }
 0x109   :  { %1459 = vst [vmem:[%s3316_s2 + $0x2e0] sm:$0xff] %v506_v42  ;;  %1391 = vst [vmem:[%s3316_s2 + $0xc0] sm:$0xff] %v707_v56 }
 0x10a   :  { %v510_v57 = vpop.f32.mrf.mxu0  ;;  %1780 = vmatmul.mubr.msk.bf16.gmra.mxu0 %vm339_vm0, %v2243_v48  ;;  %v711_v58 = vpop.f32.mrf.mxu1  ;;  %1861 = vmatmul.mubr.msk.bf16.gmra.mxu1 %vm339_vm0, %v2188_v43 }
 0x10b   :  { %1465 = vst [vmem:[%s3316_s2 + $0x310] sm:$0xff] %v510_v57  ;;  %1397 = vst [vmem:[%s3316_s2 + $0xf0] sm:$0xff] %v711_v58  ;;  %1090 = vmatprep.mubr.bf16.mxu0 %v1959_v1  ;;  %1864 = vmatprep.mubr.msk.bf16.mxu1 %vm339_vm0, %v2199_v44 }
 0x10c   :  { %v512_v59 = vpop.f32.mrf.mxu0  ;;  %v713_v60 = vpop.f32.mrf.mxu1 }
 0x10d   :  { %1466 = vst [vmem:[%s3316_s2 + $0x318] sm:$0xff] %v512_v59  ;;  %1398 = vst [vmem:[%s3316_s2 + $0xf8] sm:$0xff] %v713_v60 }
 0x10e   :  { %v514_v43 = vpop.f32.mrf.mxu0  ;;  %v715_v61 = vpop.f32.mrf.mxu1 }
 0x10f   :  { %1472 = vst [vmem:[%s3316_s2 + $0x348] sm:$0xff] %v514_v43  ;;  %1404 = vst [vmem:[%s3316_s2 + $0x128] sm:$0xff] %v715_v61 }
 0x110   :  { %v516_v44 = vpop.f32.mrf.mxu0  ;;  %v717_v62 = vpop.f32.mrf.mxu1 }
 0x111   :  { %1473 = vst [vmem:[%s3316_s2 + $0x350] sm:$0xff] %v516_v44  ;;  %1405 = vst [vmem:[%s3316_s2 + $0x130] sm:$0xff] %v717_v62 }
 0x112   :  { %v520_v63 = vpop.f32.mrf.mxu0  ;;  %1781 = vmatmul.mubr.msk.bf16.gmra.mxu0 %vm339_vm0, %v2254_v49  ;;  %v721_v0 = vpop.f32.mrf.mxu1  ;;  %1865 = vmatmul.mubr.msk.bf16.gmra.mxu1 %vm339_vm0, %v2210_v45 }
 0x113   :  { %1479 = vst [vmem:[%s3316_s2 + $0x380] sm:$0xff] %v520_v63  ;;  %1411 = vst [vmem:[%s3316_s2 + $0x160] sm:$0xff] %v721_v0  ;;  %1100 = vmatprep.mubr.bf16.mxu0 %v1959_v1  ;;  %1868 = vmatprep.mubr.msk.bf16.mxu1 %vm339_vm0, %v2221_v46 }
 0x114   :  { %v522_v2 = vpop.f32.mrf.mxu0  ;;  %v723_v3 = vpop.f32.mrf.mxu1 }
 0x115   :  { %1480 = vst [vmem:[%s3316_s2 + $0x388] sm:$0xff] %v522_v2  ;;  %1412 = vst [vmem:[%s3316_s2 + $0x168] sm:$0xff] %v723_v3 }
 0x116   :  { %v524_v45 = vpop.f32.mrf.mxu0  ;;  %v725_v4 = vpop.f32.mrf.mxu1 }
 0x117   :  { %1486 = vst [vmem:[%s3316_s2 + $0x3b8] sm:$0xff] %v524_v45  ;;  %1418 = vst [vmem:[%s3316_s2 + $0x198] sm:$0xff] %v725_v4 }
 0x118   :  { %v526_v46 = vpop.f32.mrf.mxu0  ;;  %v727_v5 = vpop.f32.mrf.mxu1 }
 0x119   :  { %1487 = vst [vmem:[%s3316_s2 + $0x3c0] sm:$0xff] %v526_v46  ;;  %1419 = vst [vmem:[%s3316_s2 + $0x1a0] sm:$0xff] %v727_v5 }
 0x11a   :  { %v530_v6 = vpop.f32.mrf.mxu0  ;;  %1782 = vmatmul.mubr.msk.bf16.gmra.mxu0 %vm339_vm0, %v2265_v50  ;;  %v731_v7 = vpop.f32.mrf.mxu1  ;;  %1869 = vmatmul.mubr.msk.bf16.gmra.mxu1 %vm339_vm0, %v2232_v47 }
 0x11b   :  { %1493 = vst [vmem:[%s3316_s2 + $0x3f0] sm:$0xff] %v530_v6  ;;  %1425 = vst [vmem:[%s3316_s2 + $0x1d0] sm:$0xff] %v731_v7  ;;  %1110 = vmatprep.mubr.bf16.mxu0 %v1959_v1  ;;  %1872 = vmatprep.mubr.msk.bf16.mxu1 %vm339_vm0, %v2243_v48 }
 0x11c   :  { %v532_v8 = vpop.f32.mrf.mxu0  ;;  %v733_v9 = vpop.f32.mrf.mxu1 }
 0x11d   :  { %1494 = vst [vmem:[%s3316_s2 + $0x3f8] sm:$0xff] %v532_v8  ;;  %1426 = vst [vmem:[%s3316_s2 + $0x1d8] sm:$0xff] %v733_v9 }
 0x11e   :  { %v534_v47 = vpop.f32.mrf.mxu0  ;;  %v735_v10 = vpop.f32.mrf.mxu1 }
 0x11f   :  { %1500 = vst [vmem:[%s3316_s2 + $0x428] sm:$0xff] %v534_v47  ;;  %1432 = vst [vmem:[%s3316_s2 + $0x208] sm:$0xff] %v735_v10 }
 0x120   :  { %v536_v48 = vpop.f32.mrf.mxu0  ;;  %v737_v11 = vpop.f32.mrf.mxu1 }
 0x121   :  { %1501 = vst [vmem:[%s3316_s2 + $0x430] sm:$0xff] %v536_v48  ;;  %1433 = vst [vmem:[%s3316_s2 + $0x210] sm:$0xff] %v737_v11 }
 0x122   :  { %v540_v13 = vpop.f32.mrf.mxu0  ;;  %1783 = vmatmul.mubr.msk.bf16.gmra.mxu0 %vm339_vm0, %v2015_v12  ;;  %v741_v14 = vpop.f32.mrf.mxu1  ;;  %1873 = vmatmul.mubr.msk.bf16.gmra.mxu1 %vm339_vm0, %v2254_v49 }
 0x123   :  { %1507 = vst [vmem:[%s3316_s2 + $0x460] sm:$0xff] %v540_v13  ;;  %1439 = vst [vmem:[%s3316_s2 + $0x240] sm:$0xff] %v741_v14  ;;  %1120 = vmatprep.mubr.bf16.mxu0 %v1959_v1  ;;  %1876 = vmatprep.mubr.msk.bf16.mxu1 %vm339_vm0, %v2265_v50 }
 0x124   :  { %v542_v15 = vpop.f32.mrf.mxu0  ;;  %v743_v16 = vpop.f32.mrf.mxu1 }
 0x125   :  { %1508 = vst [vmem:[%s3316_s2 + $0x468] sm:$0xff] %v542_v15  ;;  %1440 = vst [vmem:[%s3316_s2 + $0x248] sm:$0xff] %v743_v16 }
 0x126   :  { %v544_v49 = vpop.f32.mrf.mxu0  ;;  %v745_v17 = vpop.f32.mrf.mxu1 }
 0x127   :  { %1514 = vst [vmem:[%s3316_s2 + $0x498] sm:$0xff] %v544_v49  ;;  %1446 = vst [vmem:[%s3316_s2 + $0x278] sm:$0xff] %v745_v17 }
 0x128   :  { %v546_v50 = vpop.f32.mrf.mxu0  ;;  %v747_v18 = vpop.f32.mrf.mxu1 }
 0x129   :  { %1515 = vst [vmem:[%s3316_s2 + $0x4a0] sm:$0xff] %v546_v50  ;;  %1447 = vst [vmem:[%s3316_s2 + $0x280] sm:$0xff] %v747_v18 }
 0x12a   :  { %v550_v19 = vpop.f32.mrf.mxu0  ;;  %1784 = vmatmul.mubr.msk.bf16.gmra.mxu0 %vm339_vm0, %v2052_v21  ;;  %v751_v20 = vpop.f32.mrf.mxu1  ;;  %1877 = vmatmul.mubr.msk.bf16.gmra.mxu1 %vm339_vm0, %v2015_v12 }
 0x12b   :  { %1521 = vst [vmem:[%s3316_s2 + $0x4d0] sm:$0xff] %v550_v19  ;;  %1453 = vst [vmem:[%s3316_s2 + $0x2b0] sm:$0xff] %v751_v20  ;;  %1130 = vmatprep.mubr.bf16.mxu0 %v1959_v1  ;;  %1880 = vmatprep.mubr.msk.bf16.mxu1 %vm339_vm0, %v2052_v21 }
 0x12c   :  { %v552_v22 = vpop.f32.mrf.mxu0  ;;  %v753_v23 = vpop.f32.mrf.mxu1 }
 0x12d   :  { %1522 = vst [vmem:[%s3316_s2 + $0x4d8] sm:$0xff] %v552_v22  ;;  %1454 = vst [vmem:[%s3316_s2 + $0x2b8] sm:$0xff] %v753_v23 }
 0x12e   :  { %v554_v12 = vpop.f32.mrf.mxu0  ;;  %v755_v24 = vpop.f32.mrf.mxu1 }
 0x12f   :  { %1528 = vst [vmem:[%s3316_s2 + $0x508] sm:$0xff] %v554_v12  ;;  %1460 = vst [vmem:[%s3316_s2 + $0x2e8] sm:$0xff] %v755_v24 }
 0x130   :  { %v556_v21 = vpop.f32.mrf.mxu0  ;;  %v757_v25 = vpop.f32.mrf.mxu1 }
 0x131   :  { %1529 = vst [vmem:[%s3316_s2 + $0x510] sm:$0xff] %v556_v21  ;;  %1461 = vst [vmem:[%s3316_s2 + $0x2f0] sm:$0xff] %v757_v25 }
 0x132   :  { %v560_v26 = vpop.f32.mrf.mxu0  ;;  %1785 = vmatmul.mubr.msk.bf16.gmra.mxu0 %vm339_vm0, %v2086_v29  ;;  %v761_v27 = vpop.f32.mrf.mxu1  ;;  %1881 = vmatmul.mubr.msk.bf16.gmra.mxu1 %vm339_vm0, %v2086_v29 }
 0x133   :  { %1535 = vst [vmem:[%s3316_s2 + $0x540] sm:$0xff] %v560_v26  ;;  %1467 = vst [vmem:[%s3316_s2 + $0x320] sm:$0xff] %v761_v27  ;;  %1140 = vmatprep.mubr.bf16.mxu0 %v1959_v1  ;;  %1884 = vmatprep.mubr.msk.bf16.mxu1 %vm339_vm0, %v2108_v33 }
 0x134   :  { %v562_v28 = vpop.f32.mrf.mxu0  ;;  %v763_v30 = vpop.f32.mrf.mxu1 }
 0x135   :  { %1536 = vst [vmem:[%s3316_s2 + $0x548] sm:$0xff] %v562_v28  ;;  %1468 = vst [vmem:[%s3316_s2 + $0x328] sm:$0xff] %v763_v30 }
 0x136   :  { %v564_v29 = vpop.f32.mrf.mxu0  ;;  %v765_v31 = vpop.f32.mrf.mxu1 }
 0x137   :  { %1542 = vst [vmem:[%s3316_s2 + $0x578] sm:$0xff] %v564_v29  ;;  %1474 = vst [vmem:[%s3316_s2 + $0x358] sm:$0xff] %v765_v31 }
 0x138   :  { %v566_v32 = vpop.f32.mrf.mxu0  ;;  %v767_v34 = vpop.f32.mrf.mxu1 }
 0x139   :  { %1543 = vst [vmem:[%s3316_s2 + $0x580] sm:$0xff] %v566_v32  ;;  %1475 = vst [vmem:[%s3316_s2 + $0x360] sm:$0xff] %v767_v34 }
 0x13a   :  { %v570_v37 = vpop.f32.mrf.mxu0  ;;  %1786 = vmatmul.mubr.msk.bf16.gmra.mxu0 %vm339_vm0, %v2108_v33  ;;  %v771_v36 = vpop.f32.mrf.mxu1  ;;  %1885 = vmatmul.mubr.msk.bf16.gmra.mxu1 %vm339_vm0, %v2124_v35 }
 0x13b   :  { %1549 = vst [vmem:[%s3316_s2 + $0x5b0] sm:$0xff] %v570_v37  ;;  %1481 = vst [vmem:[%s3316_s2 + $0x390] sm:$0xff] %v771_v36  ;;  %1150 = vmatprep.mubr.bf16.mxu0 %v1959_v1 }
 0x13c   :  { %v572_v38 = vpop.f32.mrf.mxu0  ;;  %v773_v39 = vpop.f32.mrf.mxu1 }
 0x13d   :  { %1550 = vst [vmem:[%s3316_s2 + $0x5b8] sm:$0xff] %v572_v38  ;;  %1482 = vst [vmem:[%s3316_s2 + $0x398] sm:$0xff] %v773_v39 }
 0x13e   :  { %v574_v33 = vpop.f32.mrf.mxu0  ;;  %v775_v40 = vpop.f32.mrf.mxu1 }
 0x13f   :  { %1556 = vst [vmem:[%s3316_s2 + $0x5e8] sm:$0xff] %v574_v33  ;;  %1488 = vst [vmem:[%s3316_s2 + $0x3c8] sm:$0xff] %v775_v40 }
 0x140   :  { %v576_v1 = vpop.f32.mrf.mxu0  ;;  %v777_v51 = vpop.f32.mrf.mxu1 }
 0x141   :  { %1557 = vst [vmem:[%s3316_s2 + $0x5f0] sm:$0xff] %v576_v1  ;;  %1489 = vst [vmem:[%s3316_s2 + $0x3d0] sm:$0xff] %v777_v51 }
 0x142   :  { %v580_v52 = vpop.f32.mrf.mxu0  ;;  %1787 = vmatmul.mubr.msk.bf16.gmra.mxu0 %vm339_vm0, %v2124_v35  ;;  %v781_v53 = vpop.f32.mrf.mxu1 }
 0x143   :  { %1563 = vst [vmem:[%s3316_s2 + $0x620] sm:$0xff] %v580_v52  ;;  %1495 = vst [vmem:[%s3316_s2 + $0x400] sm:$0xff] %v781_v53 }
 0x144   :  { %v582_v54 = vpop.f32.mrf.mxu0  ;;  %v783_v41 = vpop.f32.mrf.mxu1 }
 0x145   :  { %1564 = vst [vmem:[%s3316_s2 + $0x628] sm:$0xff] %v582_v54  ;;  %1496 = vst [vmem:[%s3316_s2 + $0x408] sm:$0xff] %v783_v41 }
 0x146   :  { %v584_v35 = vpop.f32.mrf.mxu0  ;;  %v785_v55 = vpop.f32.mrf.mxu1 }
 0x147   :  { %1570 = vst [vmem:[%s3316_s2 + $0x658] sm:$0xff] %v584_v35  ;;  %1502 = vst [vmem:[%s3316_s2 + $0x438] sm:$0xff] %v785_v55 }
 0x148   :  { %v586_v42 = vpop.f32.mrf.mxu0  ;;  %v787_v56 = vpop.f32.mrf.mxu1 }
 0x149   :  { %1571 = vst [vmem:[%s3316_s2 + $0x660] sm:$0xff] %v586_v42  ;;  %1503 = vst [vmem:[%s3316_s2 + $0x440] sm:$0xff] %v787_v56 }
 0x14a   :  { %v590_v57 = vpop.f32.mrf.mxu0  ;;  %v791_v58 = vpop.f32.mrf.mxu1 }
 0x14b   :  { %1577 = vst [vmem:[%s3316_s2 + $0x690] sm:$0xff] %v590_v57  ;;  %1509 = vst [vmem:[%s3316_s2 + $0x470] sm:$0xff] %v791_v58 }
 0x14c   :  { %v592_v59 = vpop.f32.mrf.mxu0  ;;  %v793_v60 = vpop.f32.mrf.mxu1 }
 0x14d   :  { %1578 = vst [vmem:[%s3316_s2 + $0x698] sm:$0xff] %v592_v59  ;;  %1510 = vst [vmem:[%s3316_s2 + $0x478] sm:$0xff] %v793_v60 }
 0x14e   :  { %v594_v43 = vpop.f32.mrf.mxu0  ;;  %v795_v61 = vpop.f32.mrf.mxu1 }
 0x14f   :  { %1584 = vst [vmem:[%s3316_s2 + $0x6c8] sm:$0xff] %v594_v43  ;;  %1516 = vst [vmem:[%s3316_s2 + $0x4a8] sm:$0xff] %v795_v61 }
 0x150   :  { %v596_v44 = vpop.f32.mrf.mxu0  ;;  %v797_v62 = vpop.f32.mrf.mxu1 }
 0x151   :  { %1585 = vst [vmem:[%s3316_s2 + $0x6d0] sm:$0xff] %v596_v44  ;;  %1517 = vst [vmem:[%s3316_s2 + $0x4b0] sm:$0xff] %v797_v62 }
 0x152   :  { %v600_v63 = vpop.f32.mrf.mxu0  ;;  %v801_v0 = vpop.f32.mrf.mxu1 }
 0x153   :  { %1591 = vst [vmem:[%s3316_s2 + $0x700] sm:$0xff] %v600_v63  ;;  %1523 = vst [vmem:[%s3316_s2 + $0x4e0] sm:$0xff] %v801_v0 }
 0x154   :  { %v602_v2 = vpop.f32.mrf.mxu0  ;;  %v803_v3 = vpop.f32.mrf.mxu1 }
 0x155   :  { %1592 = vst [vmem:[%s3316_s2 + $0x708] sm:$0xff] %v602_v2  ;;  %1524 = vst [vmem:[%s3316_s2 + $0x4e8] sm:$0xff] %v803_v3 }
 0x156   :  { %v604_v45 = vpop.f32.mrf.mxu0  ;;  %v805_v4 = vpop.f32.mrf.mxu1 }
 0x157   :  { %1598 = vst [vmem:[%s3316_s2 + $0x738] sm:$0xff] %v604_v45  ;;  %1530 = vst [vmem:[%s3316_s2 + $0x518] sm:$0xff] %v805_v4 }
 0x158   :  { %v606_v46 = vpop.f32.mrf.mxu0  ;;  %v807_v5 = vpop.f32.mrf.mxu1 }
 0x159   :  { %1599 = vst [vmem:[%s3316_s2 + $0x740] sm:$0xff] %v606_v46  ;;  %1531 = vst [vmem:[%s3316_s2 + $0x520] sm:$0xff] %v807_v5 }
 0x15a   :  { %v942_v6 = vpop.f32.mrf.mxu0  ;;  %v811_v7 = vpop.f32.mrf.mxu1 }
 0x15b   :  { %1371 = vst [vmem:[%s3316_s2 + $0x20] sm:$0xff] %v942_v6  ;;  %1537 = vst [vmem:[%s3316_s2 + $0x550] sm:$0xff] %v811_v7 }
 0x15c   :  { %v944_v8 = vpop.f32.mrf.mxu0  ;;  %v813_v9 = vpop.f32.mrf.mxu1 }
 0x15d   :  { %1372 = vst [vmem:[%s3316_s2 + $0x28] sm:$0xff] %v944_v8  ;;  %1538 = vst [vmem:[%s3316_s2 + $0x558] sm:$0xff] %v813_v9 }
 0x15e   :  { %v946_v47 = vpop.f32.mrf.mxu0  ;;  %v815_v10 = vpop.f32.mrf.mxu1 }
 0x15f   :  { %1378 = vst [vmem:[%s3316_s2 + $0x58] sm:$0xff] %v946_v47  ;;  %1544 = vst [vmem:[%s3316_s2 + $0x588] sm:$0xff] %v815_v10 }
 0x160   :  { %v948_v48 = vpop.f32.mrf.mxu0  ;;  %v817_v11 = vpop.f32.mrf.mxu1 }
 0x161   :  { %1379 = vst [vmem:[%s3316_s2 + $0x60] sm:$0xff] %v948_v48  ;;  %1545 = vst [vmem:[%s3316_s2 + $0x590] sm:$0xff] %v817_v11 }
 0x162   :  { %v952_v13 = vpop.f32.mrf.mxu0  ;;  %v821_v14 = vpop.f32.mrf.mxu1 }
 0x163   :  { %1385 = vst [vmem:[%s3316_s2 + $0x90] sm:$0xff] %v952_v13  ;;  %1551 = vst [vmem:[%s3316_s2 + $0x5c0] sm:$0xff] %v821_v14 }
 0x164   :  { %v954_v15 = vpop.f32.mrf.mxu0  ;;  %v823_v16 = vpop.f32.mrf.mxu1 }
 0x165   :  { %1386 = vst [vmem:[%s3316_s2 + $0x98] sm:$0xff] %v954_v15  ;;  %1552 = vst [vmem:[%s3316_s2 + $0x5c8] sm:$0xff] %v823_v16 }
 0x166   :  { %v956_v49 = vpop.f32.mrf.mxu0  ;;  %v825_v17 = vpop.f32.mrf.mxu1 }
 0x167   :  { %1392 = vst [vmem:[%s3316_s2 + $0xc8] sm:$0xff] %v956_v49  ;;  %1558 = vst [vmem:[%s3316_s2 + $0x5f8] sm:$0xff] %v825_v17 }
 0x168   :  { %v958_v50 = vpop.f32.mrf.mxu0  ;;  %v827_v18 = vpop.f32.mrf.mxu1 }
 0x169   :  { %1393 = vst [vmem:[%s3316_s2 + $0xd0] sm:$0xff] %v958_v50  ;;  %1559 = vst [vmem:[%s3316_s2 + $0x600] sm:$0xff] %v827_v18 }
 0x16a   :  { %v962_v19 = vpop.f32.mrf.mxu0  ;;  %v831_v20 = vpop.f32.mrf.mxu1 }
 0x16b   :  { %1399 = vst [vmem:[%s3316_s2 + $0x100] sm:$0xff] %v962_v19  ;;  %1565 = vst [vmem:[%s3316_s2 + $0x630] sm:$0xff] %v831_v20 }
 0x16c   :  { %v964_v22 = vpop.f32.mrf.mxu0  ;;  %v833_v23 = vpop.f32.mrf.mxu1 }
 0x16d   :  { %1400 = vst [vmem:[%s3316_s2 + $0x108] sm:$0xff] %v964_v22  ;;  %1566 = vst [vmem:[%s3316_s2 + $0x638] sm:$0xff] %v833_v23 }
 0x16e   :  { %v966_v12 = vpop.f32.mrf.mxu0  ;;  %v835_v24 = vpop.f32.mrf.mxu1 }
 0x16f   :  { %1406 = vst [vmem:[%s3316_s2 + $0x138] sm:$0xff] %v966_v12  ;;  %1572 = vst [vmem:[%s3316_s2 + $0x668] sm:$0xff] %v835_v24 }
 0x170   :  { %v968_v21 = vpop.f32.mrf.mxu0  ;;  %v837_v25 = vpop.f32.mrf.mxu1 }
 0x171   :  { %1407 = vst [vmem:[%s3316_s2 + $0x140] sm:$0xff] %v968_v21  ;;  %1573 = vst [vmem:[%s3316_s2 + $0x670] sm:$0xff] %v837_v25 }
 0x172   :  { %v972_v26 = vpop.f32.mrf.mxu0  ;;  %v841_v27 = vpop.f32.mrf.mxu1 }
 0x173   :  { %1413 = vst [vmem:[%s3316_s2 + $0x170] sm:$0xff] %v972_v26  ;;  %1579 = vst [vmem:[%s3316_s2 + $0x6a0] sm:$0xff] %v841_v27 }
 0x174   :  { %v974_v28 = vpop.f32.mrf.mxu0  ;;  %v843_v30 = vpop.f32.mrf.mxu1 }
 0x175   :  { %1414 = vst [vmem:[%s3316_s2 + $0x178] sm:$0xff] %v974_v28  ;;  %1580 = vst [vmem:[%s3316_s2 + $0x6a8] sm:$0xff] %v843_v30 }
 0x176   :  { %v976_v29 = vpop.f32.mrf.mxu0  ;;  %v845_v31 = vpop.f32.mrf.mxu1 }
 0x177   :  { %1420 = vst [vmem:[%s3316_s2 + $0x1a8] sm:$0xff] %v976_v29  ;;  %1586 = vst [vmem:[%s3316_s2 + $0x6d8] sm:$0xff] %v845_v31 }
 0x178   :  { %v978_v32 = vpop.f32.mrf.mxu0  ;;  %v847_v34 = vpop.f32.mrf.mxu1 }
 0x179   :  { %1421 = vst [vmem:[%s3316_s2 + $0x1b0] sm:$0xff] %v978_v32  ;;  %1587 = vst [vmem:[%s3316_s2 + $0x6e0] sm:$0xff] %v847_v34 }
 0x17a   :  { %v982_v37 = vpop.f32.mrf.mxu0  ;;  %v851_v36 = vpop.f32.mrf.mxu1 }
 0x17b   :  { %1427 = vst [vmem:[%s3316_s2 + $0x1e0] sm:$0xff] %v982_v37  ;;  %1593 = vst [vmem:[%s3316_s2 + $0x710] sm:$0xff] %v851_v36 }
 0x17c   :  { %v984_v38 = vpop.f32.mrf.mxu0  ;;  %v853_v39 = vpop.f32.mrf.mxu1 }
 0x17d   :  { %1428 = vst [vmem:[%s3316_s2 + $0x1e8] sm:$0xff] %v984_v38  ;;  %1594 = vst [vmem:[%s3316_s2 + $0x718] sm:$0xff] %v853_v39 }
 0x17e   :  { %v986_v33 = vpop.f32.mrf.mxu0  ;;  %v855_v40 = vpop.f32.mrf.mxu1 }
 0x17f   :  { %1434 = vst [vmem:[%s3316_s2 + $0x218] sm:$0xff] %v986_v33  ;;  %1600 = vst [vmem:[%s3316_s2 + $0x748] sm:$0xff] %v855_v40 }
 0x180   :  { %v988_v1 = vpop.f32.mrf.mxu0  ;;  %v857_v51 = vpop.f32.mrf.mxu1 }
 0x181   :  { %1435 = vst [vmem:[%s3316_s2 + $0x220] sm:$0xff] %v988_v1  ;;  %1601 = vst [vmem:[%s3316_s2 + $0x750] sm:$0xff] %v857_v51 }
 0x182   :  { %v992_v52 = vpop.f32.mrf.mxu0  ;;  %v861_v53 = vpop.f32.mrf.mxu1 }
 0x183   :  { %1441 = vst [vmem:[%s3316_s2 + $0x250] sm:$0xff] %v992_v52  ;;  %1607 = vst [vmem:[%s3316_s2 + $0x780] sm:$0xff] %v861_v53 }
 0x184   :  { %v994_v54 = vpop.f32.mrf.mxu0  ;;  %v863_v41 = vpop.f32.mrf.mxu1 }
 0x185   :  { %1442 = vst [vmem:[%s3316_s2 + $0x258] sm:$0xff] %v994_v54  ;;  %1608 = vst [vmem:[%s3316_s2 + $0x788] sm:$0xff] %v863_v41 }
 0x186   :  { %v996_v35 = vpop.f32.mrf.mxu0  ;;  %v865_v55 = vpop.f32.mrf.mxu1 }
 0x187   :  { %1448 = vst [vmem:[%s3316_s2 + $0x288] sm:$0xff] %v996_v35  ;;  %1614 = vst [vmem:[%s3316_s2 + $0x7b8] sm:$0xff] %v865_v55 }
 0x188   :  { %v998_v42 = vpop.f32.mrf.mxu0  ;;  %v867_v56 = vpop.f32.mrf.mxu1 }
 0x189   :  { %1449 = vst [vmem:[%s3316_s2 + $0x290] sm:$0xff] %v998_v42  ;;  %1615 = vst [vmem:[%s3316_s2 + $0x7c0] sm:$0xff] %v867_v56 }
 0x18a   :  { %v1002_v57 = vpop.f32.mrf.mxu0  ;;  %v871_v58 = vpop.f32.mrf.mxu1 }
 0x18b   :  { %1455 = vst [vmem:[%s3316_s2 + $0x2c0] sm:$0xff] %v1002_v57  ;;  %1621 = vst [vmem:[%s3316_s2 + $0x7f0] sm:$0xff] %v871_v58 }
 0x18c   :  { %v1004_v59 = vpop.f32.mrf.mxu0  ;;  %v873_v60 = vpop.f32.mrf.mxu1 }
 0x18d   :  { %1456 = vst [vmem:[%s3316_s2 + $0x2c8] sm:$0xff] %v1004_v59  ;;  %1622 = vst [vmem:[%s3316_s2 + $0x7f8] sm:$0xff] %v873_v60 }
 0x18e   :  { %v1006_v43 = vpop.f32.mrf.mxu0  ;;  %v875_v61 = vpop.f32.mrf.mxu1 }
 0x18f   :  { %1462 = vst [vmem:[%s3316_s2 + $0x2f8] sm:$0xff] %v1006_v43  ;;  %1628 = vst [vmem:[%s3316_s2 + $0x828] sm:$0xff] %v875_v61 }
 0x190   :  { %v1008_v44 = vpop.f32.mrf.mxu0  ;;  %v877_v62 = vpop.f32.mrf.mxu1 }
 0x191   :  { %1463 = vst [vmem:[%s3316_s2 + $0x300] sm:$0xff] %v1008_v44  ;;  %1629 = vst [vmem:[%s3316_s2 + $0x830] sm:$0xff] %v877_v62 }
 0x192   :  { %v1012_v63 = vpop.f32.mrf.mxu0  ;;  %v881_v0 = vpop.f32.mrf.mxu1 }
 0x193   :  { %1469 = vst [vmem:[%s3316_s2 + $0x330] sm:$0xff] %v1012_v63  ;;  %1635 = vst [vmem:[%s3316_s2 + $0x860] sm:$0xff] %v881_v0 }
 0x194   :  { %v1014_v2 = vpop.f32.mrf.mxu0  ;;  %v883_v3 = vpop.f32.mrf.mxu1 }
 0x195   :  { %1470 = vst [vmem:[%s3316_s2 + $0x338] sm:$0xff] %v1014_v2  ;;  %1636 = vst [vmem:[%s3316_s2 + $0x868] sm:$0xff] %v883_v3 }
 0x196   :  { %v1016_v45 = vpop.f32.mrf.mxu0  ;;  %v885_v4 = vpop.f32.mrf.mxu1 }
 0x197   :  { %1476 = vst [vmem:[%s3316_s2 + $0x368] sm:$0xff] %v1016_v45  ;;  %1642 = vst [vmem:[%s3316_s2 + $0x898] sm:$0xff] %v885_v4 }
 0x198   :  { %v1018_v46 = vpop.f32.mrf.mxu0  ;;  %v887_v5 = vpop.f32.mrf.mxu1 }
 0x199   :  { %1477 = vst [vmem:[%s3316_s2 + $0x370] sm:$0xff] %v1018_v46  ;;  %1643 = vst [vmem:[%s3316_s2 + $0x8a0] sm:$0xff] %v887_v5 }
 0x19a   :  { %v1022_v6 = vpop.f32.mrf.mxu0  ;;  %v891_v7 = vpop.f32.mrf.mxu1 }
 0x19b   :  { %1483 = vst [vmem:[%s3316_s2 + $0x3a0] sm:$0xff] %v1022_v6  ;;  %1649 = vst [vmem:[%s3316_s2 + $0x8d0] sm:$0xff] %v891_v7 }
 0x19c   :  { %v1024_v8 = vpop.f32.mrf.mxu0  ;;  %v893_v9 = vpop.f32.mrf.mxu1 }
 0x19d   :  { %1484 = vst [vmem:[%s3316_s2 + $0x3a8] sm:$0xff] %v1024_v8  ;;  %1650 = vst [vmem:[%s3316_s2 + $0x8d8] sm:$0xff] %v893_v9 }
 0x19e   :  { %v1026_v47 = vpop.f32.mrf.mxu0  ;;  %v895_v10 = vpop.f32.mrf.mxu1 }
 0x19f   :  { %1490 = vst [vmem:[%s3316_s2 + $0x3d8] sm:$0xff] %v1026_v47  ;;  %1656 = vst [vmem:[%s3316_s2 + $0x908] sm:$0xff] %v895_v10 }
 0x1a0   :  { %v1028_v48 = vpop.f32.mrf.mxu0  ;;  %v897_v11 = vpop.f32.mrf.mxu1 }
 0x1a1   :  { %1491 = vst [vmem:[%s3316_s2 + $0x3e0] sm:$0xff] %v1028_v48  ;;  %1657 = vst [vmem:[%s3316_s2 + $0x910] sm:$0xff] %v897_v11 }
 0x1a2   :  { %v1032_v13 = vpop.f32.mrf.mxu0  ;;  %v901_v14 = vpop.f32.mrf.mxu1 }
 0x1a3   :  { %1497 = vst [vmem:[%s3316_s2 + $0x410] sm:$0xff] %v1032_v13  ;;  %1663 = vst [vmem:[%s3316_s2 + $0x940] sm:$0xff] %v901_v14 }
 0x1a4   :  { %v1034_v15 = vpop.f32.mrf.mxu0  ;;  %v903_v16 = vpop.f32.mrf.mxu1 }
 0x1a5   :  { %1498 = vst [vmem:[%s3316_s2 + $0x418] sm:$0xff] %v1034_v15  ;;  %1664 = vst [vmem:[%s3316_s2 + $0x948] sm:$0xff] %v903_v16 }
 0x1a6   :  { %v1036_v49 = vpop.f32.mrf.mxu0  ;;  %v905_v17 = vpop.f32.mrf.mxu1 }
 0x1a7   :  { %1504 = vst [vmem:[%s3316_s2 + $0x448] sm:$0xff] %v1036_v49 }
 0x1a8   :  { %v1038_v50 = vpop.f32.mrf.mxu0  ;;  %v906_v18 = vpop.f32.mrf.mxu1 }
 0x1a9   :  { %1505 = vst [vmem:[%s3316_s2 + $0x450] sm:$0xff] %v1038_v50 }
 0x1aa   :  { %v1042_v19 = vpop.f32.mrf.mxu0  ;;  %v1846_v20 = vpop.f32.mrf.mxu1 }
 0x1ab   :  { %1511 = vst [vmem:[%s3316_s2 + $0x480] sm:$0xff] %v1042_v19  ;;  %1387 = vst [vmem:[%s3316_s2 + $0xa0] sm:$0xff] %v1846_v20 }
 0x1ac   :  { %v1044_v22 = vpop.f32.mrf.mxu0  ;;  %v1193_v23 = vpop.f32.mrf.mxu1 }
 0x1ad   :  { %1512 = vst [vmem:[%s3316_s2 + $0x488] sm:$0xff] %v1044_v22  ;;  %1373 = vst [vmem:[%s3316_s2 + $0x30] sm:$0xff] %v1193_v23 }
 0x1ae   :  { %v1046_v12 = vpop.f32.mrf.mxu0  ;;  %v1847_v24 = vpop.f32.mrf.mxu1 }
 0x1af   :  { %1518 = vst [vmem:[%s3316_s2 + $0x4b8] sm:$0xff] %v1046_v12  ;;  %1394 = vst [vmem:[%s3316_s2 + $0xd8] sm:$0xff] %v1847_v24 }
 0x1b0   :  { %v1048_v21 = vpop.f32.mrf.mxu0  ;;  %v1196_v25 = vpop.f32.mrf.mxu1 }
 0x1b1   :  { %1519 = vst [vmem:[%s3316_s2 + $0x4c0] sm:$0xff] %v1048_v21  ;;  %1380 = vst [vmem:[%s3316_s2 + $0x68] sm:$0xff] %v1196_v25 }
 0x1b2   :  { %v1052_v26 = vpop.f32.mrf.mxu0  ;;  %v1850_v27 = vpop.f32.mrf.mxu1 }
 0x1b3   :  { %1525 = vst [vmem:[%s3316_s2 + $0x4f0] sm:$0xff] %v1052_v26  ;;  %1415 = vst [vmem:[%s3316_s2 + $0x180] sm:$0xff] %v1850_v27 }
 0x1b4   :  { %v1054_v28 = vpop.f32.mrf.mxu0  ;;  %v1209_v30 = vpop.f32.mrf.mxu1 }
 0x1b5   :  { %1526 = vst [vmem:[%s3316_s2 + $0x4f8] sm:$0xff] %v1054_v28  ;;  %1401 = vst [vmem:[%s3316_s2 + $0x110] sm:$0xff] %v1209_v30 }
 0x1b6   :  { %v1056_v29 = vpop.f32.mrf.mxu0  ;;  %v1851_v31 = vpop.f32.mrf.mxu1 }
 0x1b7   :  { %1532 = vst [vmem:[%s3316_s2 + $0x528] sm:$0xff] %v1056_v29  ;;  %1422 = vst [vmem:[%s3316_s2 + $0x1b8] sm:$0xff] %v1851_v31 }
 0x1b8   :  { %v1058_v32 = vpop.f32.mrf.mxu0  ;;  %v1212_v34 = vpop.f32.mrf.mxu1 }
 0x1b9   :  { %1533 = vst [vmem:[%s3316_s2 + $0x530] sm:$0xff] %v1058_v32  ;;  %1408 = vst [vmem:[%s3316_s2 + $0x148] sm:$0xff] %v1212_v34 }
 0x1ba   :  { %v1062_v37 = vpop.f32.mrf.mxu0  ;;  %v1854_v36 = vpop.f32.mrf.mxu1 }
 0x1bb   :  { %1539 = vst [vmem:[%s3316_s2 + $0x560] sm:$0xff] %v1062_v37  ;;  %1443 = vst [vmem:[%s3316_s2 + $0x260] sm:$0xff] %v1854_v36 }
 0x1bc   :  { %v1064_v38 = vpop.f32.mrf.mxu0  ;;  %v1225_v39 = vpop.f32.mrf.mxu1 }
 0x1bd   :  { %1540 = vst [vmem:[%s3316_s2 + $0x568] sm:$0xff] %v1064_v38  ;;  %1429 = vst [vmem:[%s3316_s2 + $0x1f0] sm:$0xff] %v1225_v39 }
 0x1be   :  { %v1066_v33 = vpop.f32.mrf.mxu0  ;;  %v1855_v40 = vpop.f32.mrf.mxu1 }
 0x1bf   :  { %1546 = vst [vmem:[%s3316_s2 + $0x598] sm:$0xff] %v1066_v33  ;;  %1450 = vst [vmem:[%s3316_s2 + $0x298] sm:$0xff] %v1855_v40 }
 0x1c0   :  { %v1068_v1 = vpop.f32.mrf.mxu0  ;;  %v1228_v51 = vpop.f32.mrf.mxu1 }
 0x1c1   :  { %1547 = vst [vmem:[%s3316_s2 + $0x5a0] sm:$0xff] %v1068_v1  ;;  %1436 = vst [vmem:[%s3316_s2 + $0x228] sm:$0xff] %v1228_v51 }
 0x1c2   :  { %v1072_v52 = vpop.f32.mrf.mxu0  ;;  %v1858_v53 = vpop.f32.mrf.mxu1 }
 0x1c3   :  { %1553 = vst [vmem:[%s3316_s2 + $0x5d0] sm:$0xff] %v1072_v52  ;;  %1471 = vst [vmem:[%s3316_s2 + $0x340] sm:$0xff] %v1858_v53 }
 0x1c4   :  { %v1074_v54 = vpop.f32.mrf.mxu0  ;;  %v1241_v41 = vpop.f32.mrf.mxu1 }
 0x1c5   :  { %1554 = vst [vmem:[%s3316_s2 + $0x5d8] sm:$0xff] %v1074_v54  ;;  %1457 = vst [vmem:[%s3316_s2 + $0x2d0] sm:$0xff] %v1241_v41 }
 0x1c6   :  { %v1076_v35 = vpop.f32.mrf.mxu0  ;;  %v1859_v55 = vpop.f32.mrf.mxu1 }
 0x1c7   :  { %1560 = vst [vmem:[%s3316_s2 + $0x608] sm:$0xff] %v1076_v35  ;;  %1478 = vst [vmem:[%s3316_s2 + $0x378] sm:$0xff] %v1859_v55 }
 0x1c8   :  { %v1078_v42 = vpop.f32.mrf.mxu0  ;;  %v1244_v56 = vpop.f32.mrf.mxu1 }
 0x1c9   :  { %1561 = vst [vmem:[%s3316_s2 + $0x610] sm:$0xff] %v1078_v42  ;;  %1464 = vst [vmem:[%s3316_s2 + $0x308] sm:$0xff] %v1244_v56 }
 0x1ca   :  { %v1082_v57 = vpop.f32.mrf.mxu0  ;;  %v1862_v58 = vpop.f32.mrf.mxu1 }
 0x1cb   :  { %1567 = vst [vmem:[%s3316_s2 + $0x640] sm:$0xff] %v1082_v57  ;;  %1499 = vst [vmem:[%s3316_s2 + $0x420] sm:$0xff] %v1862_v58 }
 0x1cc   :  { %v1084_v59 = vpop.f32.mrf.mxu0  ;;  %v1257_v60 = vpop.f32.mrf.mxu1 }
 0x1cd   :  { %1568 = vst [vmem:[%s3316_s2 + $0x648] sm:$0xff] %v1084_v59  ;;  %1485 = vst [vmem:[%s3316_s2 + $0x3b0] sm:$0xff] %v1257_v60 }
 0x1ce   :  { %v1086_v43 = vpop.f32.mrf.mxu0  ;;  %v1863_v61 = vpop.f32.mrf.mxu1 }
 0x1cf   :  { %1574 = vst [vmem:[%s3316_s2 + $0x678] sm:$0xff] %v1086_v43  ;;  %1506 = vst [vmem:[%s3316_s2 + $0x458] sm:$0xff] %v1863_v61 }
 0x1d0   :  { %v1088_v44 = vpop.f32.mrf.mxu0  ;;  %v1260_v62 = vpop.f32.mrf.mxu1 }
 0x1d1   :  { %1575 = vst [vmem:[%s3316_s2 + $0x680] sm:$0xff] %v1088_v44  ;;  %1492 = vst [vmem:[%s3316_s2 + $0x3e8] sm:$0xff] %v1260_v62 }
 0x1d2   :  { %v1092_v63 = vpop.f32.mrf.mxu0  ;;  %v1866_v0 = vpop.f32.mrf.mxu1 }
 0x1d3   :  { %1581 = vst [vmem:[%s3316_s2 + $0x6b0] sm:$0xff] %v1092_v63  ;;  %1527 = vst [vmem:[%s3316_s2 + $0x500] sm:$0xff] %v1866_v0 }
 0x1d4   :  { %v1094_v2 = vpop.f32.mrf.mxu0  ;;  %v1273_v3 = vpop.f32.mrf.mxu1 }
 0x1d5   :  { %1582 = vst [vmem:[%s3316_s2 + $0x6b8] sm:$0xff] %v1094_v2  ;;  %1513 = vst [vmem:[%s3316_s2 + $0x490] sm:$0xff] %v1273_v3 }
 0x1d6   :  { %v1096_v45 = vpop.f32.mrf.mxu0  ;;  %v1867_v4 = vpop.f32.mrf.mxu1 }
 0x1d7   :  { %1588 = vst [vmem:[%s3316_s2 + $0x6e8] sm:$0xff] %v1096_v45  ;;  %1534 = vst [vmem:[%s3316_s2 + $0x538] sm:$0xff] %v1867_v4 }
 0x1d8   :  { %v1098_v46 = vpop.f32.mrf.mxu0  ;;  %v1276_v5 = vpop.f32.mrf.mxu1 }
 0x1d9   :  { %1589 = vst [vmem:[%s3316_s2 + $0x6f0] sm:$0xff] %v1098_v46  ;;  %1520 = vst [vmem:[%s3316_s2 + $0x4c8] sm:$0xff] %v1276_v5 }
 0x1da   :  { %v1102_v6 = vpop.f32.mrf.mxu0  ;;  %v1870_v7 = vpop.f32.mrf.mxu1 }
 0x1db   :  { %1595 = vst [vmem:[%s3316_s2 + $0x720] sm:$0xff] %v1102_v6  ;;  %1555 = vst [vmem:[%s3316_s2 + $0x5e0] sm:$0xff] %v1870_v7 }
 0x1dc   :  { %v1104_v8 = vpop.f32.mrf.mxu0  ;;  %v1289_v9 = vpop.f32.mrf.mxu1 }
 0x1dd   :  { %1596 = vst [vmem:[%s3316_s2 + $0x728] sm:$0xff] %v1104_v8  ;;  %1541 = vst [vmem:[%s3316_s2 + $0x570] sm:$0xff] %v1289_v9 }
 0x1de   :  { %v1106_v47 = vpop.f32.mrf.mxu0  ;;  %v1871_v10 = vpop.f32.mrf.mxu1 }
 0x1df   :  { %1602 = vst [vmem:[%s3316_s2 + $0x758] sm:$0xff] %v1106_v47  ;;  %1562 = vst [vmem:[%s3316_s2 + $0x618] sm:$0xff] %v1871_v10 }
 0x1e0   :  { %v1108_v48 = vpop.f32.mrf.mxu0  ;;  %v1292_v11 = vpop.f32.mrf.mxu1 }
 0x1e1   :  { %1603 = vst [vmem:[%s3316_s2 + $0x760] sm:$0xff] %v1108_v48  ;;  %1548 = vst [vmem:[%s3316_s2 + $0x5a8] sm:$0xff] %v1292_v11 }
 0x1e2   :  { %v1112_v13 = vpop.f32.mrf.mxu0  ;;  %v1874_v14 = vpop.f32.mrf.mxu1 }
 0x1e3   :  { %1609 = vst [vmem:[%s3316_s2 + $0x790] sm:$0xff] %v1112_v13  ;;  %1583 = vst [vmem:[%s3316_s2 + $0x6c0] sm:$0xff] %v1874_v14 }
 0x1e4   :  { %v1114_v15 = vpop.f32.mrf.mxu0  ;;  %v1305_v16 = vpop.f32.mrf.mxu1 }
 0x1e5   :  { %1610 = vst [vmem:[%s3316_s2 + $0x798] sm:$0xff] %v1114_v15  ;;  %1569 = vst [vmem:[%s3316_s2 + $0x650] sm:$0xff] %v1305_v16 }
 0x1e6   :  { %v1116_v49 = vpop.f32.mrf.mxu0  ;;  %v1875_v17 = vpop.f32.mrf.mxu1 }
 0x1e7   :  { %1616 = vst [vmem:[%s3316_s2 + $0x7c8] sm:$0xff] %v1116_v49  ;;  %1590 = vst [vmem:[%s3316_s2 + $0x6f8] sm:$0xff] %v1875_v17 }
 0x1e8   :  { %v1118_v50 = vpop.f32.mrf.mxu0  ;;  %v1308_v18 = vpop.f32.mrf.mxu1 }
 0x1e9   :  { %1617 = vst [vmem:[%s3316_s2 + $0x7d0] sm:$0xff] %v1118_v50  ;;  %1576 = vst [vmem:[%s3316_s2 + $0x688] sm:$0xff] %v1308_v18 }
 0x1ea   :  { %v1122_v19 = vpop.f32.mrf.mxu0  ;;  %v1878_v20 = vpop.f32.mrf.mxu1 }
 0x1eb   :  { %1623 = vst [vmem:[%s3316_s2 + $0x800] sm:$0xff] %v1122_v19  ;;  %1611 = vst [vmem:[%s3316_s2 + $0x7a0] sm:$0xff] %v1878_v20 }
 0x1ec   :  { %v1124_v22 = vpop.f32.mrf.mxu0  ;;  %v1321_v23 = vpop.f32.mrf.mxu1 }
 0x1ed   :  { %1624 = vst [vmem:[%s3316_s2 + $0x808] sm:$0xff] %v1124_v22  ;;  %1597 = vst [vmem:[%s3316_s2 + $0x730] sm:$0xff] %v1321_v23 }
 0x1ee   :  { %v1126_v12 = vpop.f32.mrf.mxu0  ;;  %v1879_v24 = vpop.f32.mrf.mxu1 }
 0x1ef   :  { %1630 = vst [vmem:[%s3316_s2 + $0x838] sm:$0xff] %v1126_v12  ;;  %1618 = vst [vmem:[%s3316_s2 + $0x7d8] sm:$0xff] %v1879_v24 }
 0x1f0   :  { %v1128_v21 = vpop.f32.mrf.mxu0  ;;  %v1324_v25 = vpop.f32.mrf.mxu1 }
 0x1f1   :  { %1631 = vst [vmem:[%s3316_s2 + $0x840] sm:$0xff] %v1128_v21  ;;  %1604 = vst [vmem:[%s3316_s2 + $0x768] sm:$0xff] %v1324_v25 }
 0x1f2   :  { %v1132_v26 = vpop.f32.mrf.mxu0  ;;  %v1882_v27 = vpop.f32.mrf.mxu1 }
 0x1f3   :  { %1637 = vst [vmem:[%s3316_s2 + $0x870] sm:$0xff] %v1132_v26  ;;  %1639 = vst [vmem:[%s3316_s2 + $0x880] sm:$0xff] %v1882_v27 }
 0x1f4   :  { %v1134_v28 = vpop.f32.mrf.mxu0  ;;  %v1337_v30 = vpop.f32.mrf.mxu1 }
 0x1f5   :  { %1638 = vst [vmem:[%s3316_s2 + $0x878] sm:$0xff] %v1134_v28  ;;  %1625 = vst [vmem:[%s3316_s2 + $0x810] sm:$0xff] %v1337_v30 }
 0x1f6   :  { %v1136_v29 = vpop.f32.mrf.mxu0  ;;  %v1883_v31 = vpop.f32.mrf.mxu1 }
 0x1f7   :  { %1644 = vst [vmem:[%s3316_s2 + $0x8a8] sm:$0xff] %v1136_v29  ;;  %1646 = vst [vmem:[%s3316_s2 + $0x8b8] sm:$0xff] %v1883_v31 }
 0x1f8   :  { %v1138_v32 = vpop.f32.mrf.mxu0  ;;  %v1340_v34 = vpop.f32.mrf.mxu1 }
 0x1f9   :  { %1645 = vst [vmem:[%s3316_s2 + $0x8b0] sm:$0xff] %v1138_v32  ;;  %1632 = vst [vmem:[%s3316_s2 + $0x848] sm:$0xff] %v1340_v34 }
 0x1fa   :  { %v1142_v37 = vpop.f32.mrf.mxu0  ;;  %v1886_v36 = vpop.f32.mrf.mxu1 }
 0x1fb   :  { %1651 = vst [vmem:[%s3316_s2 + $0x8e0] sm:$0xff] %v1142_v37  ;;  %1667 = vst [vmem:[%s3316_s2 + $0x960] sm:$0xff] %v1886_v36 }
 0x1fc   :  { %v1144_v38 = vpop.f32.mrf.mxu0  ;;  %v1353_v39 = vpop.f32.mrf.mxu1 }
 0x1fd   :  { %1652 = vst [vmem:[%s3316_s2 + $0x8e8] sm:$0xff] %v1144_v38  ;;  %1653 = vst [vmem:[%s3316_s2 + $0x8f0] sm:$0xff] %v1353_v39 }
 0x1fe   :  { %v1146_v33 = vpop.f32.mrf.mxu0  ;;  %v1887_v40 = vpop.f32.mrf.mxu1 }
 0x1ff   :  { %1658 = vst [vmem:[%s3316_s2 + $0x918] sm:$0xff] %v1146_v33 }
 0x200   :  { %v1148_v1 = vpop.f32.mrf.mxu0  ;;  %v1356_v51 = vpop.f32.mrf.mxu1 }
 0x201   :  { %1659 = vst [vmem:[%s3316_s2 + $0x920] sm:$0xff] %v1148_v1  ;;  %1660 = vst [vmem:[%s3316_s2 + $0x928] sm:$0xff] %v1356_v51 }
 0x202   :  { %v1152_v52 = vpop.f32.mrf.mxu0 }
 0x203   :  { %1665 = vst [vmem:[%s3316_s2 + $0x950] sm:$0xff] %v1152_v52 }
 0x204   :  { %v1154_v53 = vpop.f32.mrf.mxu0 }
 0x205   :  { %1666 = vst [vmem:[%s3316_s2 + $0x958] sm:$0xff] %v1154_v53 }
 0x206   :  { %v1156_v54 = vpop.f32.mrf.mxu0 }
 0x208   :  { %v1157_v41 = vpop.f32.mrf.mxu0 }

// kernel: _lambda_.21
= control target key start
LH: loop header
LB: loop body
LE: loop exit
PB: predicated region body
PF: predicated region fallthrough
CT: control target
= control target key end

     0   :  { %v14_v0 = vlaneseq  ;;  %v962_v3 = vmov 0  ;;  %v362_v7 = vmov 0.0   ;;  %v363_v21 = vmov 1966171168   ;;  %s947_s0 = inlined_call_operand.vmem [shape: f32[112,512], index: 0, kind: input, shape index: {}]   ;;  %s948_s1 = inlined_call_operand.vmem [shape: f32[1,512], index: 1, kind: output, shape index: {0}]   ;;  %s949_s2 = inlined_call_operand.vmem [shape: f32[1,512], index: 2, kind: output, shape index: {1}]  }
   0x1   :  { %v20_v1 = vld [vmem:[%s947_s0] sm:$0xff]  ;;  %v21_v2 = vld [vmem:[%s947_s0 + $0x8] sm:$0xff]  ;;  %v22_v4 = vld [vmem:[%s947_s0 + $0x10] sm:$0xff]  ;;  %v160_v22 = vunpack.c.l.s4 %v363_v21 }
   0x2   :  { %vm385_vm0 = vcmp.lt.s32.totalorder %v14_v0, 512  ;;  %v24_v5 = vld [vmem:[%s947_s0 + $0x20] sm:$0xff]  ;;  %v398_v6 = vld [vmem:[%s947_s0 + $0x28] sm:$0xff]  ;;  %v23_v8 = vld [vmem:[%s947_s0 + $0x18] sm:$0xff]  ;;  %v163_v40 = vshrl.u32 %v14_v0, 7  ;;  %v514_v49 = vmul.f32 %v20_v1, %v20_v1  ;;  %v516_v50 = vmul.f32 %v21_v2, %v21_v2 }
   0x3   :  { %v963_v3 = vsel %vm385_vm0, 4294967295, %v962_v3  ;;  %18 = vst.msk [vmem:[%s948_s1] sm:$0xf] %vm385_vm0, %v362_v7  ;;  %19 = vst.msk [vmem:[%s949_s2] sm:$0xf] %vm385_vm0, %v362_v7  ;;  %v26_v9 = vld [vmem:[%s947_s0 + $0x30] sm:$0xff]  ;;  %v77_v11 = vadd.f32 %v24_v5, %v20_v1  ;;  %v96_v12 = vadd.f32 %v398_v6, %v21_v2  ;;  %v161_v39 = vunpack.c.0.s8 %v160_v22 }
   0x4   :  { %964 = vst [vmem:[#allocation2_spill] sm:$0xff] %v963_v3  ;;  %v419_v10 = vld [vmem:[%s947_s0 + $0x38] sm:$0xff]  ;;  %v28_v13 = vld [vmem:[%s947_s0 + $0x40] sm:$0xff]  ;;  %v428_v14 = vld [vmem:[%s947_s0 + $0x48] sm:$0xff]  ;;  %v115_v15 = vadd.f32 %v26_v9, %v22_v4  ;;  %v530_v55 = vmul.f32 %v22_v4, %v22_v4  ;;  %v532_v56 = vmul.f32 %v23_v8, %v23_v8  ;;  %v548_v62 = vmul.f32 %v24_v5, %v24_v5 }
   0x5   :  { %v134_v16 = vadd.f32 %v419_v10, %v23_v8  ;;  %v434_v17 = vld [vmem:[%s947_s0 + $0x50] sm:$0xff]  ;;  %v439_v18 = vld [vmem:[%s947_s0 + $0x58] sm:$0xff]  ;;  %v78_v19 = vadd.f32 %v77_v11, %v28_v13  ;;  %v97_v20 = vadd.f32 %v96_v12, %v428_v14  ;;  %v445_v23 = vld [vmem:[%s947_s0 + $0x60] sm:$0xff]  ;;  %v546_v61 = vsub.s32 %v161_v39, %v163_v40 }
   0x6   :  { %v450_v24 = vld [vmem:[%s947_s0 + $0x68] sm:$0xff]  ;;  %v116_v25 = vadd.f32 %v115_v15, %v434_v17  ;;  %v457_v27 = vld [vmem:[%s947_s0 + $0x70] sm:$0xff]  ;;  %v462_v28 = vld [vmem:[%s947_s0 + $0x78] sm:$0xff]  ;;  %v564_v4 = vmul.f32 %v398_v6, %v398_v6  ;;  %v566_v5 = vmul.f32 %v26_v9, %v26_v9  ;;  %v582_v6 = vmul.f32 %v419_v10, %v419_v10 }
   0x7   :  { %v135_v26 = vadd.f32 %v134_v16, %v439_v18  ;;  %v79_v29 = vadd.f32 %v78_v19, %v445_v23  ;;  %v98_v30 = vadd.f32 %v97_v20, %v450_v24  ;;  %v469_v31 = vld [vmem:[%s947_s0 + $0x80] sm:$0xff]  ;;  %v474_v32 = vld [vmem:[%s947_s0 + $0x88] sm:$0xff]  ;;  %v481_v35 = vld [vmem:[%s947_s0 + $0x90] sm:$0xff]  ;;  %v584_v9 = vmul.f32 %v28_v13, %v28_v13 }
   0x8   :  { %v117_v33 = vadd.f32 %v116_v25, %v457_v27  ;;  %v486_v36 = vld [vmem:[%s947_s0 + $0x98] sm:$0xff]  ;;  %v493_v41 = vld [vmem:[%s947_s0 + $0xa0] sm:$0xff]  ;;  %v498_v42 = vld [vmem:[%s947_s0 + $0xa8] sm:$0xff]  ;;  %v600_v10 = vmul.f32 %v428_v14, %v428_v14  ;;  %v604_v13 = vmul.f32 %v434_v17, %v434_v17  ;;  %v620_v14 = vmul.f32 %v439_v18, %v439_v18 }
   0x9   :  { %v136_v34 = vadd.f32 %v135_v26, %v462_v28  ;;  %v80_v37 = vadd.f32 %v79_v29, %v469_v31  ;;  %v99_v38 = vadd.f32 %v98_v30, %v474_v32  ;;  %v505_v45 = vld [vmem:[%s947_s0 + $0xb0] sm:$0xff]  ;;  %v510_v46 = vld [vmem:[%s947_s0 + $0xb8] sm:$0xff]  ;;  %v521_v51 = vld [vmem:[%s947_s0 + $0xc0] sm:$0xff]  ;;  %v624_v17 = vmul.f32 %v445_v23, %v445_v23 }
   0xa   :  { %v118_v43 = vadd.f32 %v117_v33, %v481_v35  ;;  %v526_v52 = vld [vmem:[%s947_s0 + $0xc8] sm:$0xff]  ;;  %v537_v57 = vld [vmem:[%s947_s0 + $0xd0] sm:$0xff]  ;;  %v542_v58 = vld [vmem:[%s947_s0 + $0xd8] sm:$0xff]  ;;  %v640_v18 = vmul.f32 %v450_v24, %v450_v24  ;;  %v644_v23 = vmul.f32 %v457_v27, %v457_v27  ;;  %v660_v24 = vmul.f32 %v462_v28, %v462_v28 }
   0xb   :  { %v137_v44 = vadd.f32 %v136_v34, %v486_v36  ;;  %v81_v47 = vadd.f32 %v80_v37, %v493_v41  ;;  %v100_v48 = vadd.f32 %v99_v38, %v498_v42  ;;  %v553_v63 = vld [vmem:[%s947_s0 + $0xe0] sm:$0xff]  ;;  %v558_v0 = vld [vmem:[%s947_s0 + $0xe8] sm:$0xff]  ;;  %v571_v7 = vld [vmem:[%s947_s0 + $0xf0] sm:$0xff]  ;;  %v664_v27 = vmul.f32 %v469_v31, %v469_v31 }
   0xc   :  { %v119_v53 = vadd.f32 %v118_v43, %v505_v45  ;;  %v576_v8 = vld [vmem:[%s947_s0 + $0xf8] sm:$0xff]  ;;  %v589_v15 = vld [vmem:[%s947_s0 + $0x100] sm:$0xff]  ;;  %v594_v16 = vld [vmem:[%s947_s0 + $0x108] sm:$0xff]  ;;  %v680_v28 = vmul.f32 %v474_v32, %v474_v32  ;;  %v684_v31 = vmul.f32 %v481_v35, %v481_v35  ;;  %v700_v32 = vmul.f32 %v486_v36, %v486_v36 }
   0xd   :  { %v138_v54 = vadd.f32 %v137_v44, %v510_v46  ;;  %v82_v59 = vadd.f32 %v81_v47, %v521_v51  ;;  %v101_v60 = vadd.f32 %v100_v48, %v526_v52  ;;  %v609_v21 = vld [vmem:[%s947_s0 + $0x110] sm:$0xff]  ;;  %v614_v22 = vld [vmem:[%s947_s0 + $0x118] sm:$0xff]  ;;  %v629_v29 = vld [vmem:[%s947_s0 + $0x120] sm:$0xff]  ;;  %v704_v35 = vmul.f32 %v493_v41, %v493_v41 }
   0xe   :  { %v120_v1 = vadd.f32 %v119_v53, %v537_v57  ;;  %v634_v30 = vld [vmem:[%s947_s0 + $0x128] sm:$0xff]  ;;  %v649_v37 = vld [vmem:[%s947_s0 + $0x130] sm:$0xff]  ;;  %v654_v38 = vld [vmem:[%s947_s0 + $0x138] sm:$0xff]  ;;  %v720_v36 = vmul.f32 %v498_v42, %v498_v42  ;;  %v724_v41 = vmul.f32 %v505_v45, %v505_v45  ;;  %v740_v42 = vmul.f32 %v510_v46, %v510_v46 }
   0xf   :  { %v139_v2 = vadd.f32 %v138_v54, %v542_v58  ;;  %v83_v11 = vadd.f32 %v82_v59, %v553_v63  ;;  %v102_v12 = vadd.f32 %v101_v60, %v558_v0  ;;  %v669_v43 = vld [vmem:[%s947_s0 + $0x140] sm:$0xff]  ;;  %v674_v44 = vld [vmem:[%s947_s0 + $0x148] sm:$0xff]  ;;  %v689_v53 = vld [vmem:[%s947_s0 + $0x150] sm:$0xff]  ;;  %v744_v45 = vmul.f32 %v521_v51, %v521_v51 }
  0x10   :  { %v121_v19 = vadd.f32 %v120_v1, %v571_v7  ;;  %v694_v54 = vld [vmem:[%s947_s0 + $0x158] sm:$0xff]  ;;  %v709_v1 = vld [vmem:[%s947_s0 + $0x160] sm:$0xff]  ;;  %v760_v46 = vmul.f32 %v526_v52, %v526_v52  ;;  %v764_v51 = vmul.f32 %v537_v57, %v537_v57  ;;  %v780_v52 = vmul.f32 %v542_v58, %v542_v58  ;;  %v809_v3 = vld [vmem:[%s947_s0 + $0x1b0] sm:$0xff] }
  0x11   :  { %v140_v20 = vadd.f32 %v139_v2, %v576_v8  ;;  %v84_v25 = vadd.f32 %v83_v11, %v589_v15  ;;  %v103_v26 = vadd.f32 %v102_v12, %v594_v16  ;;  %v714_v2 = vld [vmem:[%s947_s0 + $0x168] sm:$0xff]  ;;  %v784_v57 = vmul.f32 %v553_v63, %v553_v63  ;;  %973 = vst [vmem:[#allocation11_spill] sm:$0xff] %v809_v3 }
  0x12   :  { %v122_v33 = vadd.f32 %v121_v19, %v609_v21  ;;  %v729_v19 = vld [vmem:[%s947_s0 + $0x170] sm:$0xff]  ;;  %v800_v58 = vmul.f32 %v558_v0, %v558_v0  ;;  %v804_v63 = vmul.f32 %v571_v7, %v571_v7  ;;  %v820_v0 = vmul.f32 %v576_v8, %v576_v8 }
  0x13   :  { %v141_v34 = vadd.f32 %v140_v20, %v614_v22  ;;  %v85_v39 = vadd.f32 %v84_v25, %v629_v29  ;;  %v104_v40 = vadd.f32 %v103_v26, %v634_v30  ;;  %965 = vst [vmem:[#allocation3_spill] sm:$0xff] %v729_v19  ;;  %v734_v20 = vld [vmem:[%s947_s0 + $0x178] sm:$0xff]  ;;  %v824_v7 = vmul.f32 %v589_v15, %v589_v15 }
  0x14   :  { %v123_v47 = vadd.f32 %v122_v33, %v649_v37  ;;  %966 = vst [vmem:[#allocation4_spill] sm:$0xff] %v734_v20  ;;  %v749_v33 = vld [vmem:[%s947_s0 + $0x180] sm:$0xff]  ;;  %v838_v8 = vmul.f32 %v614_v22, %v614_v22  ;;  %v842_v15 = vmul.f32 %v629_v29, %v629_v29  ;;  %v245_v22 = vadd.f32 %v548_v62, %v514_v49 }
  0x15   :  { %v142_v48 = vadd.f32 %v141_v34, %v654_v38  ;;  %v86_v59 = vadd.f32 %v85_v39, %v669_v43  ;;  %v105_v60 = vadd.f32 %v104_v40, %v674_v44  ;;  %967 = vst [vmem:[#allocation5_spill] sm:$0xff] %v749_v33  ;;  %v754_v34 = vld [vmem:[%s947_s0 + $0x188] sm:$0xff] }
  0x16   :  { %v124_v11 = vadd.f32 %v123_v47, %v689_v53  ;;  %968 = vst [vmem:[#allocation6_spill] sm:$0xff] %v754_v34  ;;  %v769_v47 = vld [vmem:[%s947_s0 + $0x190] sm:$0xff]  ;;  %975 = vst [vmem:[#allocation13_spill] sm:$0xff] %v842_v15 }
  0x17   :  { %v143_v12 = vadd.f32 %v142_v48, %v694_v54  ;;  %v87_v25 = vadd.f32 %v86_v59, %v709_v1  ;;  %v106_v26 = vadd.f32 %v105_v60, %v714_v2  ;;  %969 = vst [vmem:[#allocation7_spill] sm:$0xff] %v769_v47  ;;  %v774_v48 = vld [vmem:[%s947_s0 + $0x198] sm:$0xff] }
  0x18   :  { %v125_v39 = vadd.f32 %v124_v11, %v729_v19  ;;  %970 = vst [vmem:[#allocation8_spill] sm:$0xff] %v774_v48  ;;  %v789_v11 = vld [vmem:[%s947_s0 + $0x1a0] sm:$0xff] }
  0x19   :  { %v144_v40 = vadd.f32 %v143_v12, %v734_v20  ;;  %v88_v59 = vadd.f32 %v87_v25, %v749_v33  ;;  %v107_v60 = vadd.f32 %v106_v26, %v754_v34  ;;  %971 = vst [vmem:[#allocation9_spill] sm:$0xff] %v789_v11  ;;  %v794_v12 = vld [vmem:[%s947_s0 + $0x1a8] sm:$0xff]  ;;  %v814_v34 = vld [vmem:[%s947_s0 + $0x1b8] sm:$0xff]  ;;  %v830_v33 = vmul.f32 %v594_v16, %v594_v16 }
  0x1a   :  { %972 = vst [vmem:[#allocation10_spill] sm:$0xff] %v794_v12  ;;  %v126_v25 = vadd.f32 %v125_v39, %v769_v47  ;;  %974 = vst [vmem:[#allocation12_spill] sm:$0xff] %v814_v34  ;;  %v846_v16 = vmul.f32 %v634_v30, %v634_v30  ;;  %v283_v20 = vadd.f32 %v566_v5, %v530_v55 }
  0x1b   :  { %v145_v26 = vadd.f32 %v144_v40, %v774_v48  ;;  %v89_v39 = vadd.f32 %v88_v59, %v789_v11  ;;  %v108_v40 = vadd.f32 %v107_v60, %v794_v12  ;;  %v834_v59 = vmul.f32 %v609_v21, %v609_v21 }
  0x1c   :  { %v127_v48 = vadd.f32 %v126_v25, %v809_v3  ;;  %976 = vst [vmem:[#allocation14_spill] sm:$0xff] %v846_v16  ;;  %v850_v21 = vmul.f32 %v649_v37, %v649_v37  ;;  %v264_v11 = vadd.f32 %v564_v4, %v516_v50  ;;  %v302_v30 = vadd.f32 %v582_v6, %v532_v56 }
  0x1d   :  { %v146_v47 = vadd.f32 %v145_v26, %v814_v34  ;;  %v90_v60 = vrot.slane %v89_v39, 4  ;;  %v109_v12 = vrot.slane %v108_v40, 4  ;;  %v246_v37 = vadd.f32 %v245_v22, %v584_v9 }
  0x1e   :  { %v128_v25 = vrot.slane %v127_v48, 4  ;;  %v284_v49 = vadd.f32 %v283_v20, %v604_v13  ;;  %v303_v50 = vadd.f32 %v302_v30, %v620_v14  ;;  %v234_v30 = vmul.f32 %v714_v2, %v714_v2 }
  0x1f   :  { %v147_v26 = vrot.slane %v146_v47, 4  ;;  %v91_v34 = vadd.f32 %v90_v60, %v89_v39  ;;  %v110_v3 = vadd.f32 %v109_v12, %v108_v40  ;;  %v265_v12 = vadd.f32 %v264_v11, %v600_v10 }
  0x20   :  { %v129_v29 = vadd.f32 %v128_v25, %v127_v48  ;;  %v285_v6 = vadd.f32 %v284_v49, %v644_v23  ;;  %v304_v9 = vadd.f32 %v303_v50, %v660_v24  ;;  %v981_v49 = vld [vmem:[#allocation5_spill] sm:$0xff] }
  0x21   :  { %v148_v15 = vadd.f32 %v147_v26, %v146_v47  ;;  %v92_v16 = vrot.slane %v91_v34, 2  ;;  %v111_v19 = vrot.slane %v110_v3, 2  ;;  %v247_v47 = vadd.f32 %v246_v37, %v624_v17 }
  0x22   :  { %v130_v39 = vrot.slane %v129_v29, 2  ;;  %v266_v55 = vadd.f32 %v265_v12, %v640_v18  ;;  %v305_v17 = vadd.f32 %v304_v9, %v700_v32  ;;  %v979_v12 = vld [vmem:[#allocation13_spill] sm:$0xff]  ;;  %v984_v9 = vld [vmem:[#allocation8_spill] sm:$0xff] }
  0x23   :  { %v149_v40 = vrot.slane %v148_v15, 2  ;;  %v93_v62 = vadd.f32 %v92_v16, %v91_v34  ;;  %v112_v4 = vadd.f32 %v111_v19, %v110_v3  ;;  %v248_v11 = vadd.f32 %v247_v47, %v664_v27  ;;  %v983_v47 = vld [vmem:[#allocation7_spill] sm:$0xff] }
  0x24   :  { %v131_v5 = vadd.f32 %v130_v39, %v129_v29  ;;  %v267_v13 = vadd.f32 %v266_v55, %v680_v28  ;;  %v286_v3 = vadd.f32 %v285_v6, %v684_v31  ;;  %v306_v27 = vadd.f32 %v305_v17, %v740_v42  ;;  %v980_v39 = vld [vmem:[#allocation14_spill] sm:$0xff] }
  0x25   :  { %v150_v56 = vadd.f32 %v149_v40, %v148_v15  ;;  %v94_v48 = vrot.slane %v93_v62, 1  ;;  %v113_v10 = vrot.slane %v112_v4, 1  ;;  %v249_v34 = vadd.f32 %v248_v11, %v704_v35 }
  0x26   :  { %v132_v20 = vrot.slane %v131_v5, 1  ;;  %v268_v23 = vadd.f32 %v267_v13, %v720_v36  ;;  %v287_v15 = vadd.f32 %v286_v3, %v724_v41  ;;  %v228_v28 = vmul.f32 %v654_v38, %v654_v38  ;;  %v985_v13 = vld [vmem:[#allocation9_spill] sm:$0xff] }
  0x27   :  { %v151_v14 = vrot.slane %v150_v56, 1  ;;  %v95_v19 = vadd.f32 %v94_v48, %v93_v62  ;;  %v114_v18 = vadd.f32 %v113_v10, %v112_v4  ;;  %v250_v31 = vadd.f32 %v249_v34, %v744_v45  ;;  %v982_v62 = vld [vmem:[#allocation6_spill] sm:$0xff] }
  0x28   :  { %v133_v60 = vadd.f32 %v132_v20, %v131_v5  ;;  %v269_v32 = vadd.f32 %v268_v23, %v760_v46  ;;  %v229_v35 = vmul.f32 %v669_v43, %v669_v43  ;;  %v288_v36 = vadd.f32 %v287_v15, %v764_v51  ;;  %v989_v23 = vld [vmem:[#allocation12_spill] sm:$0xff] }
  0x29   :  { %v152_v24 = vadd.f32 %v151_v14, %v150_v56  ;;  %v157_v25 = vcombine.low %v95_v19, %v114_v18  ;;  %v307_v16 = vadd.f32 %v306_v27, %v780_v52  ;;  %v230_v42 = vmul.f32 %v674_v44, %v674_v44  ;;  %v986_v14 = vld [vmem:[#allocation10_spill] sm:$0xff]  ;;  %v988_v18 = vld [vmem:[#allocation11_spill] sm:$0xff] }
  0x2a   :  { %v251_v22 = vadd.f32 %v250_v31, %v784_v57  ;;  %v270_v38 = vadd.f32 %v269_v32, %v800_v58  ;;  %v231_v46 = vmul.f32 %v689_v53, %v689_v53  ;;  %v289_v43 = vadd.f32 %v288_v36, %v804_v63 }
  0x2b   :  { %v158_v26 = vcombine.low %v133_v60, %v152_v24  ;;  %v165_v41 = vrot.slane %v157_v25, %v546_v61  ;;  %v308_v51 = vadd.f32 %v307_v16, %v820_v0  ;;  %v232_v52 = vmul.f32 %v694_v54, %v694_v54  ;;  %v76_v0 = vld [vmem:[%s948_s1] sm:$0xf]  ;;  %v977_v54 = vld [vmem:[#allocation3_spill] sm:$0xff] }
  0x2c   :  { %v233_v29 = vmul.f32 %v709_v1, %v709_v1  ;;  %v252_v44 = vadd.f32 %v251_v22, %v824_v7  ;;  %v271_v57 = vadd.f32 %v270_v38, %v830_v33  ;;  %v290_v53 = vadd.f32 %v289_v43, %v834_v59  ;;  %v978_v1 = vld [vmem:[#allocation4_spill] sm:$0xff] }
  0x2d   :  { %v172_v45 = vrot.slane %v158_v26, %v546_v61  ;;  %v309_v63 = vadd.f32 %v308_v51, %v838_v8  ;;  %v235_v37 = vmul.f32 %v977_v54, %v977_v54  ;;  %v236_v7 = vmul.f32 %v978_v1, %v978_v1 }
  0x2e   :  { %v253_v33 = vadd.f32 %v252_v44, %v979_v12  ;;  %v272_v40 = vadd.f32 %v271_v57, %v980_v39  ;;  %v237_v59 = vmul.f32 %v981_v49, %v981_v49  ;;  %v291_v8 = vadd.f32 %v290_v53, %v850_v21 }
  0x2f   :  { %v173_v58 = vcombine.low %v165_v41, %v172_v45  ;;  %v310_v50 = vadd.f32 %v309_v63, %v228_v28  ;;  %v238_v4 = vmul.f32 %v982_v62, %v982_v62  ;;  %v239_v55 = vmul.f32 %v983_v47, %v983_v47 }
  0x30   :  { %v254_v5 = vadd.f32 %v253_v33, %v229_v35  ;;  %v273_v56 = vadd.f32 %v272_v40, %v230_v42  ;;  %v240_v48 = vmul.f32 %v984_v9, %v984_v9  ;;  %v292_v10 = vadd.f32 %v291_v8, %v231_v46  ;;  %v188_v8 = vld [vmem:[%s949_s2] sm:$0xf] }
  0x31   :  { %v180_v2 = vrot.slane %v173_v58, %v546_v61  ;;  %v311_v11 = vadd.f32 %v310_v50, %v232_v52  ;;  %v241_v20 = vmul.f32 %v985_v13, %v985_v13  ;;  %v242_v21 = vmul.f32 %v986_v14, %v986_v14 }
  0x32   :  { %v255_v3 = vadd.f32 %v254_v5, %v233_v29  ;;  %v274_v17 = vadd.f32 %v273_v56, %v234_v30  ;;  %v243_v34 = vmul.f32 %v988_v18, %v988_v18  ;;  %v244_v60 = vmul.f32 %v989_v23, %v989_v23 }
  0x33   :  { %v182_v6 = vadd.f32 %v180_v2, %v76_v0  ;;  %v293_v24 = vadd.f32 %v292_v10, %v235_v37  ;;  %v312_v15 = vadd.f32 %v311_v11, %v236_v7 }
  0x34   :  { %v256_v27 = vadd.f32 %v255_v3, %v237_v59  ;;  %v275_v25 = vadd.f32 %v274_v17, %v238_v4 }
  0x35   :  { %187 = vst.msk [vmem:[%s948_s1] sm:$0xf] %vm385_vm0, %v182_v6  ;;  %v294_v28 = vadd.f32 %v293_v24, %v239_v55  ;;  %v313_v31 = vadd.f32 %v312_v15, %v240_v48 }
  0x36   :  { %v257_v32 = vadd.f32 %v256_v27, %v241_v20  ;;  %v276_v26 = vadd.f32 %v275_v25, %v242_v21 }
  0x37   :  { %v295_v35 = vadd.f32 %v294_v28, %v243_v34  ;;  %v314_v36 = vadd.f32 %v313_v31, %v244_v60 }
  0x38   :  { %v258_v16 = vrot.slane %v257_v32, 4  ;;  %v277_v41 = vrot.slane %v276_v26, 4 }
  0x39   :  { %v296_v42 = vrot.slane %v295_v35, 4  ;;  %v315_v22 = vrot.slane %v314_v36, 4 }
  0x3a   :  { %v259_v38 = vadd.f32 %v258_v16, %v257_v32  ;;  %v278_v45 = vadd.f32 %v277_v41, %v276_v26 }
  0x3b   :  { %v297_v46 = vadd.f32 %v296_v42, %v295_v35  ;;  %v316_v43 = vadd.f32 %v315_v22, %v314_v36 }
  0x3c   :  { %v260_v51 = vrot.slane %v259_v38, 2  ;;  %v279_v52 = vrot.slane %v278_v45, 2 }
  0x3d   :  { %v298_v29 = vrot.slane %v297_v46, 2  ;;  %v317_v44 = vrot.slane %v316_v43, 2 }
  0x3e   :  { %v261_v57 = vadd.f32 %v260_v51, %v259_v38  ;;  %v280_v58 = vadd.f32 %v279_v52, %v278_v45 }
  0x3f   :  { %v299_v30 = vadd.f32 %v298_v29, %v297_v46  ;;  %v318_v53 = vadd.f32 %v317_v44, %v316_v43 }
  0x40   :  { %v262_v63 = vrot.slane %v261_v57, 1  ;;  %v281_v0 = vrot.slane %v280_v58, 1 }
  0x41   :  { %v300_v54 = vrot.slane %v299_v30, 1  ;;  %v319_v37 = vrot.slane %v318_v53, 1 }
  0x42   :  { %v263_v1 = vadd.f32 %v262_v63, %v261_v57  ;;  %v282_v7 = vadd.f32 %v281_v0, %v280_v58 }
  0x43   :  { %v301_v12 = vadd.f32 %v300_v54, %v299_v30  ;;  %v320_v33 = vadd.f32 %v319_v37, %v318_v53 }
  0x44   :  { %v325_v39 = vcombine.low %v263_v1, %v282_v7 }
  0x45   :  { %v326_v40 = vcombine.low %v301_v12, %v320_v33 }
  0x46   :  { %v333_v2 = vrot.slane %v325_v39, %v546_v61 }
  0x47   :  { %v340_v49 = vrot.slane %v326_v40, %v546_v61 }
  0x49   :  { %v341_v59 = vcombine.low %v333_v2, %v340_v49 }
  0x4b   :  { %v348_v50 = vrot.slane %v341_v59, %v546_v61 }
  0x4d   :  { %v350_v62 = vadd.f32 %v348_v50, %v188_v8 }
  0x4f   :  { %351 = vst.msk [vmem:[%s949_s2] sm:$0xf] %vm385_vm0, %v350_v62 }

// kernel: tile.70
= control target key start
LH: loop header
LB: loop body
LE: loop exit
PB: predicated region body
PF: predicated region fallthrough
CT: control target
= control target key end

     0   :  { %s28_s0 = inlined_call_operand.vmem [shape: f32[32], index: 0, kind: input, shape index: {}]   ;;  %s29_s1 = inlined_call_operand.vmem [shape: f32[16,32], index: 1, kind: output, shape index: {}]  }
   0x1   :  { %v4_v0 = vld [vmem:[%s28_s0] ss:$0 sm:$0xff] }
   0x2   :  { %5 = vst [vmem:[%s29_s1] sm:$0xff] %v4_v0  ;;  %8 = vst [vmem:[%s29_s1 + $0x8] sm:$0xff] %v4_v0 }

// kernel: tile.71
= control target key start
LH: loop header
LB: loop body
LE: loop exit
PB: predicated region body
PF: predicated region fallthrough
CT: control target
= control target key end

     0   :  { %s62_s8 = smov 96   ;;  %vm3_vm0 = vcmask 261120   ;;  %s64_s15 = smov 64   ;;  %vm9_vm1 = vcmask 1048320   ;;  %vm15_vm2 = vcmask 785920   ;;  %vm21_vm3 = vcmask 523520   ;;  %s99_s0 = inlined_call_operand.vmem [shape: f32[16,32], index: 0, kind: input, shape index: {}]   ;;  %s100_s1 = inlined_call_operand.vmem [shape: f32[1,512], index: 1, kind: output, shape index: {}]  }
   0x1   :  { %v53_v0 = vld [vmem:[%s99_s0 + $0x3] ss:$4 sm:$0xf]   ;;  %v54_v1 = vld [vmem:[%s99_s0 + $0x2] ss:$4 sm:$0xf]  }
   0x2   :  { %7 = vrot.lane.b32.xlu0 %v53_v0, %s62_s8  ;;  %v55_v2 = vld [vmem:[%s99_s0 + $0x1] ss:$4 sm:$0xf]   ;;  %v2_v3 = vld [vmem:[%s99_s0] ss:$4 sm:$0xf]  }
   0x3   :  { %s63_s0 = smov 32   ;;  %4 = vst.msk [vmem:[#allocation0] ss:$8 sm:$0xf] %vm3_vm0, %v2_v3  }
   0x4   :  { %19 = vrot.lane.b32.xlu1 %v55_v2, %s63_s0 }
   0x6   :  { %13 = vrot.lane.b32.xlu0 %v54_v1, %s64_s15 }
  0x74   :  { %v8_v4 = vpop.permute.xlu0 %7  }
  0x75   :  { %10 = vst.msk [vmem:[#allocation0] ss:$8 sm:$0xf] %vm9_vm1, %v8_v4  }
  0x76   :  { %v20_v5 = vpop.permute.xlu1 %19  }
  0x78   :  { %v14_v6 = vpop.permute.xlu0 %13  }
  0x79   :  { %16 = vst.msk [vmem:[#allocation0] ss:$8 sm:$0xf] %vm15_vm2, %v14_v6  }
  0x7a   :  { %22 = vst.msk [vmem:[#allocation0] ss:$8 sm:$0xf] %vm21_vm3, %v20_v5  }
  0x81   :  { %v27_v7 = vld [vmem:[#allocation0] sm:$0x1]  ;;  %v32_v8 = vld [vmem:[#allocation0 + $0x8] sm:$0x1]  ;;  %v38_v9 = vld [vmem:[#allocation0 + $0x10] sm:$0x1] }
  0x82   :  { %30 = vst [vmem:[%s100_s1] sm:$0x1] %v27_v7  ;;  %56 = vst [vmem:[%s100_s1 + $0x1] sm:$0x1] %v32_v8  ;;  %v45_v10 = vld [vmem:[#allocation0 + $0x18] sm:$0x1] }
  0x83   :  { %57 = vst [vmem:[%s100_s1 + $0x2] sm:$0x1] %v38_v9  ;;  %58 = vst [vmem:[%s100_s1 + $0x3] sm:$0x1] %v45_v10 }

// kernel: _lambda_.22
= control target key start
LH: loop header
LB: loop body
LE: loop exit
PB: predicated region body
PF: predicated region fallthrough
CT: control target
= control target key end

     0   :  { %v72_v0 = vlaneseq  ;;  %s944_s1 = inlined_call_operand.vmem [shape: f32[1,512], index: 1, kind: input, shape index: {}]   ;;  %s945_s2 = inlined_call_operand.vmem [shape: f32[1,512], index: 2, kind: input, shape index: {}]   ;;  %s946_s0 = inlined_call_operand.vmem [shape: f32[112,512], index: 0, kind: input, shape index: {}]   ;;  %s947_s3 = inlined_call_operand.vmem [shape: bf16[112,512], index: 3, kind: output, shape index: {}]  }
   0x1   :  { %v70_v2 = vld [vmem:[%s944_s1] sm:$0xf]  ;;  %v15_v5 = vld [vmem:[%s946_s0 + $0x8] sm:$0xff]  ;;  %v16_v10 = vld [vmem:[%s946_s0 + $0x10] sm:$0xff] }
   0x2   :  { %v73_v1 = vshrl.u32 %v72_v0, 7  ;;  %v148_v3 = vld [vmem:[%s945_s2] sm:$0xf]  ;;  %v19_v12 = vld [vmem:[%s946_s0 + $0x28] sm:$0xff]  ;;  %v17_v17 = vld [vmem:[%s946_s0 + $0x18] sm:$0xff] }
   0x3   :  { %v14_v4 = vld [vmem:[%s946_s0] sm:$0xff]  ;;  %v20_v18 = vld [vmem:[%s946_s0 + $0x30] sm:$0xff]  ;;  %v21_v19 = vld [vmem:[%s946_s0 + $0x38] sm:$0xff] }
   0x4   :  { %v74_v6 = vsub.s32 0, %v73_v1  ;;  %v78_v7 = vsub.s32 1, %v73_v1  ;;  %v82_v8 = vsub.s32 2, %v73_v1  ;;  %v86_v9 = vsub.s32 3, %v73_v1  ;;  %v18_v11 = vld [vmem:[%s946_s0 + $0x20] sm:$0xff]  ;;  %v23_v41 = vld [vmem:[%s946_s0 + $0x48] sm:$0xff] }
   0x5   :  { %v22_v40 = vld [vmem:[%s946_s0 + $0x40] sm:$0xff]  ;;  %v24_v46 = vld [vmem:[%s946_s0 + $0x50] sm:$0xff]  ;;  %v25_v47 = vld [vmem:[%s946_s0 + $0x58] sm:$0xff] }
   0x6   :  { %v579_v13 = vrot.slane %v70_v2, %v74_v6  ;;  %v581_v14 = vrot.slane %v70_v2, %v78_v7  ;;  %v583_v15 = vrot.slane %v148_v3, %v74_v6  ;;  %v585_v16 = vrot.slane %v148_v3, %v78_v7  ;;  %v26_v52 = vld [vmem:[%s946_s0 + $0x60] sm:$0xff]  ;;  %v27_v53 = vld [vmem:[%s946_s0 + $0x68] sm:$0xff]  ;;  %v28_v58 = vld [vmem:[%s946_s0 + $0x70] sm:$0xff] }
   0x7   :  { %v596_v20 = vrot.slane %v70_v2, %v82_v8  ;;  %v598_v21 = vrot.slane %v70_v2, %v86_v9  ;;  %v600_v22 = vrot.slane %v148_v3, %v82_v8  ;;  %v602_v23 = vrot.slane %v148_v3, %v86_v9  ;;  %v29_v59 = vld [vmem:[%s946_s0 + $0x78] sm:$0xff]  ;;  %v30_v8 = vld [vmem:[%s946_s0 + $0x80] sm:$0xff] }
   0x8   :  { %v92_v24 = vmul.f32 %v579_v13, %v14_v4  ;;  %v93_v25 = vmul.f32 %v581_v14, %v15_v5  ;;  %v96_v26 = vmul.f32 %v579_v13, %v18_v11  ;;  %v97_v27 = vmul.f32 %v581_v14, %v19_v12 }
   0x9   :  { %v94_v28 = vmul.f32 %v596_v20, %v16_v10  ;;  %v95_v29 = vmul.f32 %v598_v21, %v17_v17  ;;  %v98_v30 = vmul.f32 %v596_v20, %v20_v18  ;;  %v99_v31 = vmul.f32 %v598_v21, %v21_v19  ;;  %v31_v17 = vld [vmem:[%s946_s0 + $0x88] sm:$0xff] }
   0xa   :  { %v170_v32 = vadd.f32 %v583_v15, %v92_v24  ;;  %v171_v33 = vadd.f32 %v585_v16, %v93_v25  ;;  %v174_v34 = vadd.f32 %v583_v15, %v96_v26  ;;  %v175_v35 = vadd.f32 %v585_v16, %v97_v27  ;;  %v32_v26 = vld [vmem:[%s946_s0 + $0x90] sm:$0xff]  ;;  %v33_v27 = vld [vmem:[%s946_s0 + $0x98] sm:$0xff] }
   0xb   :  { %v172_v36 = vadd.f32 %v600_v22, %v94_v28  ;;  %v173_v37 = vadd.f32 %v602_v23, %v95_v29  ;;  %v176_v38 = vadd.f32 %v600_v22, %v98_v30  ;;  %v177_v39 = vadd.f32 %v602_v23, %v99_v31 }
   0xc   :  { %v226_v42 = vmax.f32 %v170_v32, 0.0  ;;  %v227_v43 = vmax.f32 %v171_v33, 0.0  ;;  %v230_v44 = vmax.f32 %v174_v34, 0.0  ;;  %v231_v45 = vmax.f32 %v175_v35, 0.0  ;;  %v34_v32 = vld [vmem:[%s946_s0 + $0xa0] sm:$0xff]  ;;  %v35_v33 = vld [vmem:[%s946_s0 + $0xa8] sm:$0xff] }
   0xd   :  { %v228_v48 = vmax.f32 %v172_v36, 0.0  ;;  %v229_v49 = vmax.f32 %v173_v37, 0.0  ;;  %v232_v50 = vmax.f32 %v176_v38, 0.0  ;;  %v233_v51 = vmax.f32 %v177_v39, 0.0  ;;  %v36_v38 = vld [vmem:[%s946_s0 + $0xb0] sm:$0xff] }
   0xe   :  { %v510_v54 = vpack.c.bf16 %v227_v43, %v226_v42  ;;  %v512_v55 = vpack.c.bf16 %v231_v45, %v230_v44  ;;  %v100_v56 = vmul.f32 %v579_v13, %v22_v40  ;;  %v101_v57 = vmul.f32 %v581_v14, %v23_v41  ;;  %v37_v43 = vld [vmem:[%s946_s0 + $0xb8] sm:$0xff] }
   0xf   :  { %v511_v60 = vpack.c.bf16 %v229_v49, %v228_v48  ;;  %v513_v61 = vpack.c.bf16 %v233_v51, %v232_v50  ;;  %v102_v62 = vmul.f32 %v596_v20, %v24_v46  ;;  %v103_v63 = vmul.f32 %v598_v21, %v25_v47  ;;  %v38_v48 = vld [vmem:[%s946_s0 + $0xc0] sm:$0xff] }
  0x10   :  { %450 = vst [vmem:[%s947_s3] sm:$0xff] %v510_v54  ;;  %452 = vst [vmem:[%s947_s3 + $0x10] sm:$0xff] %v512_v55  ;;  %v178_v0 = vadd.f32 %v583_v15, %v100_v56  ;;  %v179_v1 = vadd.f32 %v585_v16, %v101_v57  ;;  %v104_v2 = vmul.f32 %v579_v13, %v26_v52  ;;  %v39_v57 = vld [vmem:[%s946_s0 + $0xc8] sm:$0xff] }
  0x11   :  { %v105_v3 = vmul.f32 %v581_v14, %v27_v53  ;;  %451 = vst [vmem:[%s947_s3 + $0x8] sm:$0xff] %v511_v60  ;;  %453 = vst [vmem:[%s947_s3 + $0x18] sm:$0xff] %v513_v61  ;;  %v180_v4 = vadd.f32 %v600_v22, %v102_v62  ;;  %v181_v5 = vadd.f32 %v602_v23, %v103_v63  ;;  %v40_v62 = vld [vmem:[%s946_s0 + $0xd0] sm:$0xff]  ;;  %v41_v63 = vld [vmem:[%s946_s0 + $0xd8] sm:$0xff] }
  0x12   :  { %v106_v6 = vmul.f32 %v596_v20, %v28_v58  ;;  %v107_v7 = vmul.f32 %v598_v21, %v29_v59  ;;  %v234_v9 = vmax.f32 %v178_v0, 0.0  ;;  %v235_v10 = vmax.f32 %v179_v1, 0.0 }
  0x13   :  { %v182_v11 = vadd.f32 %v583_v15, %v104_v2  ;;  %v183_v12 = vadd.f32 %v585_v16, %v105_v3  ;;  %v236_v18 = vmax.f32 %v180_v4, 0.0  ;;  %v237_v19 = vmax.f32 %v181_v5, 0.0  ;;  %v42_v4 = vld [vmem:[%s946_s0 + $0xe0] sm:$0xff]  ;;  %v43_v5 = vld [vmem:[%s946_s0 + $0xe8] sm:$0xff] }
  0x14   :  { %v184_v24 = vadd.f32 %v600_v22, %v106_v6  ;;  %v185_v25 = vadd.f32 %v602_v23, %v107_v7  ;;  %v514_v28 = vpack.c.bf16 %v235_v10, %v234_v9  ;;  %v108_v31 = vmul.f32 %v579_v13, %v30_v8  ;;  %v44_v10 = vld [vmem:[%s946_s0 + $0xf0] sm:$0xff] }
  0x15   :  { %v238_v29 = vmax.f32 %v182_v11, 0.0  ;;  %v239_v30 = vmax.f32 %v183_v12, 0.0  ;;  %v515_v34 = vpack.c.bf16 %v237_v19, %v236_v18  ;;  %v109_v37 = vmul.f32 %v581_v14, %v31_v17  ;;  %v45_v19 = vld [vmem:[%s946_s0 + $0xf8] sm:$0xff] }
  0x16   :  { %v240_v35 = vmax.f32 %v184_v24, 0.0  ;;  %v241_v36 = vmax.f32 %v185_v25, 0.0  ;;  %454 = vst [vmem:[%s947_s3 + $0x20] sm:$0xff] %v514_v28  ;;  %v186_v40 = vadd.f32 %v583_v15, %v108_v31  ;;  %v110_v41 = vmul.f32 %v596_v20, %v32_v26  ;;  %v46_v28 = vld [vmem:[%s946_s0 + $0x100] sm:$0xff] }
  0x17   :  { %v516_v39 = vpack.c.bf16 %v239_v30, %v238_v29  ;;  %v111_v42 = vmul.f32 %v598_v21, %v33_v27  ;;  %455 = vst [vmem:[%s947_s3 + $0x28] sm:$0xff] %v515_v34  ;;  %v187_v45 = vadd.f32 %v585_v16, %v109_v37  ;;  %v112_v46 = vmul.f32 %v579_v13, %v34_v32  ;;  %v47_v37 = vld [vmem:[%s946_s0 + $0x108] sm:$0xff] }
  0x18   :  { %v517_v44 = vpack.c.bf16 %v241_v36, %v240_v35  ;;  %v113_v47 = vmul.f32 %v581_v14, %v35_v33  ;;  %v242_v49 = vmax.f32 %v186_v40, 0.0  ;;  %v188_v50 = vadd.f32 %v600_v22, %v110_v41 }
  0x19   :  { %456 = vst [vmem:[%s947_s3 + $0x30] sm:$0xff] %v516_v39  ;;  %v189_v51 = vadd.f32 %v602_v23, %v111_v42  ;;  %v114_v52 = vmul.f32 %v596_v20, %v36_v38  ;;  %v243_v53 = vmax.f32 %v187_v45, 0.0  ;;  %v190_v54 = vadd.f32 %v583_v15, %v112_v46  ;;  %v48_v42 = vld [vmem:[%s946_s0 + $0x110] sm:$0xff] }
  0x1a   :  { %457 = vst [vmem:[%s947_s3 + $0x38] sm:$0xff] %v517_v44  ;;  %v191_v55 = vadd.f32 %v585_v16, %v113_v47  ;;  %v115_v56 = vmul.f32 %v598_v21, %v37_v43  ;;  %v244_v58 = vmax.f32 %v188_v50, 0.0  ;;  %v116_v61 = vmul.f32 %v579_v13, %v38_v48  ;;  %v49_v43 = vld [vmem:[%s946_s0 + $0x118] sm:$0xff]  ;;  %v50_v48 = vld [vmem:[%s946_s0 + $0x120] sm:$0xff] }
  0x1b   :  { %v245_v59 = vmax.f32 %v189_v51, 0.0  ;;  %v192_v60 = vadd.f32 %v600_v22, %v114_v52  ;;  %v518_v0 = vpack.c.bf16 %v243_v53, %v242_v49  ;;  %v246_v1 = vmax.f32 %v190_v54, 0.0  ;;  %v51_v49 = vld [vmem:[%s946_s0 + $0x128] sm:$0xff]  ;;  %v52_v54 = vld [vmem:[%s946_s0 + $0x130] sm:$0xff] }
  0x1c   :  { %v247_v2 = vmax.f32 %v191_v55, 0.0  ;;  %v193_v3 = vadd.f32 %v602_v23, %v115_v56  ;;  %v117_v8 = vmul.f32 %v581_v14, %v39_v57  ;;  %v194_v9 = vadd.f32 %v583_v15, %v116_v61 }
  0x1d   :  { %v519_v6 = vpack.c.bf16 %v245_v59, %v244_v58  ;;  %v248_v7 = vmax.f32 %v192_v60, 0.0  ;;  %458 = vst [vmem:[%s947_s3 + $0x40] sm:$0xff] %v518_v0  ;;  %v118_v17 = vmul.f32 %v596_v20, %v40_v62  ;;  %v119_v18 = vmul.f32 %v598_v21, %v41_v63  ;;  %v53_v59 = vld [vmem:[%s946_s0 + $0x138] sm:$0xff]  ;;  %v54_v0 = vld [vmem:[%s946_s0 + $0x140] sm:$0xff] }
  0x1e   :  { %v520_v11 = vpack.c.bf16 %v247_v2, %v246_v1  ;;  %v249_v12 = vmax.f32 %v193_v3, 0.0  ;;  %v195_v24 = vadd.f32 %v585_v16, %v117_v8  ;;  %v250_v25 = vmax.f32 %v194_v9, 0.0  ;;  %v55_v9 = vld [vmem:[%s946_s0 + $0x148] sm:$0xff] }
  0x1f   :  { %459 = vst [vmem:[%s947_s3 + $0x48] sm:$0xff] %v519_v6  ;;  %v120_v26 = vmul.f32 %v579_v13, %v42_v4  ;;  %v121_v27 = vmul.f32 %v581_v14, %v43_v5  ;;  %v196_v30 = vadd.f32 %v600_v22, %v118_v17  ;;  %v197_v31 = vadd.f32 %v602_v23, %v119_v18  ;;  %v56_v18 = vld [vmem:[%s946_s0 + $0x150] sm:$0xff] }
  0x20   :  { %460 = vst [vmem:[%s947_s3 + $0x50] sm:$0xff] %v520_v11  ;;  %v521_v29 = vpack.c.bf16 %v249_v12, %v248_v7  ;;  %v122_v32 = vmul.f32 %v596_v20, %v44_v10  ;;  %v251_v33 = vmax.f32 %v195_v24, 0.0  ;;  %v123_v36 = vmul.f32 %v598_v21, %v45_v19  ;;  %v57_v19 = vld [vmem:[%s946_s0 + $0x158] sm:$0xff] }
  0x21   :  { %v198_v34 = vadd.f32 %v583_v15, %v120_v26  ;;  %v199_v35 = vadd.f32 %v585_v16, %v121_v27  ;;  %v252_v38 = vmax.f32 %v196_v30, 0.0  ;;  %v253_v39 = vmax.f32 %v197_v31, 0.0 }
  0x22   :  { %461 = vst [vmem:[%s947_s3 + $0x58] sm:$0xff] %v521_v29  ;;  %v200_v40 = vadd.f32 %v600_v22, %v122_v32  ;;  %v124_v41 = vmul.f32 %v579_v13, %v46_v28  ;;  %v522_v44 = vpack.c.bf16 %v251_v33, %v250_v25  ;;  %v201_v47 = vadd.f32 %v602_v23, %v123_v36  ;;  %v58_v28 = vld [vmem:[%s946_s0 + $0x160] sm:$0xff]  ;;  %v59_v29 = vld [vmem:[%s946_s0 + $0x168] sm:$0xff] }
  0x23   :  { %v254_v45 = vmax.f32 %v198_v34, 0.0  ;;  %v255_v46 = vmax.f32 %v199_v35, 0.0  ;;  %v523_v50 = vpack.c.bf16 %v253_v39, %v252_v38  ;;  %v125_v52 = vmul.f32 %v581_v14, %v47_v37  ;;  %v60_v34 = vld [vmem:[%s946_s0 + $0x170] sm:$0xff]  ;;  %v61_v39 = vld [vmem:[%s946_s0 + $0x178] sm:$0xff] }
  0x24   :  { %v256_v51 = vmax.f32 %v200_v40, 0.0  ;;  %v202_v53 = vadd.f32 %v583_v15, %v124_v41  ;;  %462 = vst [vmem:[%s947_s3 + $0x60] sm:$0xff] %v522_v44  ;;  %v257_v56 = vmax.f32 %v201_v47, 0.0  ;;  %v126_v57 = vmul.f32 %v596_v20, %v48_v42  ;;  %v62_v44 = vld [vmem:[%s946_s0 + $0x180] sm:$0xff] }
  0x25   :  { %v524_v55 = vpack.c.bf16 %v255_v46, %v254_v45  ;;  %v127_v58 = vmul.f32 %v598_v21, %v49_v43  ;;  %463 = vst [vmem:[%s947_s3 + $0x68] sm:$0xff] %v523_v50  ;;  %v203_v60 = vadd.f32 %v585_v16, %v125_v52  ;;  %v128_v62 = vmul.f32 %v579_v13, %v50_v48 }
  0x26   :  { %v258_v61 = vmax.f32 %v202_v53, 0.0  ;;  %v129_v63 = vmul.f32 %v581_v14, %v51_v49  ;;  %v525_v1 = vpack.c.bf16 %v257_v56, %v256_v51  ;;  %v204_v2 = vadd.f32 %v600_v22, %v126_v57  ;;  %v63_v53 = vld [vmem:[%s946_s0 + $0x188] sm:$0xff] }
  0x27   :  { %464 = vst [vmem:[%s947_s3 + $0x70] sm:$0xff] %v524_v55  ;;  %v205_v3 = vadd.f32 %v602_v23, %v127_v58  ;;  %v130_v4 = vmul.f32 %v596_v20, %v52_v54  ;;  %v259_v5 = vmax.f32 %v203_v60, 0.0  ;;  %v206_v6 = vadd.f32 %v583_v15, %v128_v62  ;;  %v64_v58 = vld [vmem:[%s946_s0 + $0x190] sm:$0xff] }
  0x28   :  { %v207_v7 = vadd.f32 %v585_v16, %v129_v63  ;;  %v131_v8 = vmul.f32 %v598_v21, %v53_v59  ;;  %465 = vst [vmem:[%s947_s3 + $0x78] sm:$0xff] %v525_v1  ;;  %v260_v10 = vmax.f32 %v204_v2, 0.0  ;;  %v132_v17 = vmul.f32 %v579_v13, %v54_v0  ;;  %v65_v59 = vld [vmem:[%s946_s0 + $0x198] sm:$0xff]  ;;  %v66_v0 = vld [vmem:[%s946_s0 + $0x1a0] sm:$0xff]  ;;  %v67_v1 = vld [vmem:[%s946_s0 + $0x1a8] sm:$0xff] }
  0x29   :  { %v261_v11 = vmax.f32 %v205_v3, 0.0  ;;  %v208_v12 = vadd.f32 %v600_v22, %v130_v4  ;;  %v526_v24 = vpack.c.bf16 %v259_v5, %v258_v61  ;;  %v262_v25 = vmax.f32 %v206_v6, 0.0  ;;  %v68_v6 = vld [vmem:[%s946_s0 + $0x1b0] sm:$0xff] }
  0x2a   :  { %v263_v26 = vmax.f32 %v207_v7, 0.0  ;;  %v209_v27 = vadd.f32 %v602_v23, %v131_v8  ;;  %v133_v32 = vmul.f32 %v581_v14, %v55_v9  ;;  %v210_v33 = vadd.f32 %v583_v15, %v132_v17 }
  0x2b   :  { %v527_v30 = vpack.c.bf16 %v261_v11, %v260_v10  ;;  %v264_v31 = vmax.f32 %v208_v12, 0.0  ;;  %466 = vst [vmem:[%s947_s3 + $0x80] sm:$0xff] %v526_v24  ;;  %v134_v37 = vmul.f32 %v596_v20, %v56_v18  ;;  %v135_v38 = vmul.f32 %v598_v21, %v57_v19  ;;  %v69_v11 = vld [vmem:[%s946_s0 + $0x1b8] sm:$0xff] }
  0x2c   :  { %v528_v35 = vpack.c.bf16 %v263_v26, %v262_v25  ;;  %v265_v36 = vmax.f32 %v209_v27, 0.0  ;;  %v211_v40 = vadd.f32 %v585_v16, %v133_v32  ;;  %v266_v41 = vmax.f32 %v210_v33, 0.0 }
  0x2d   :  { %467 = vst [vmem:[%s947_s3 + $0x88] sm:$0xff] %v527_v30  ;;  %v136_v42 = vmul.f32 %v579_v13, %v58_v28  ;;  %v137_v43 = vmul.f32 %v581_v14, %v59_v29  ;;  %v212_v46 = vadd.f32 %v600_v22, %v134_v37  ;;  %v213_v47 = vadd.f32 %v602_v23, %v135_v38 }
  0x2e   :  { %468 = vst [vmem:[%s947_s3 + $0x90] sm:$0xff] %v528_v35  ;;  %v529_v45 = vpack.c.bf16 %v265_v36, %v264_v31  ;;  %v138_v48 = vmul.f32 %v596_v20, %v60_v34  ;;  %v267_v49 = vmax.f32 %v211_v40, 0.0  ;;  %v139_v52 = vmul.f32 %v598_v21, %v61_v39 }
  0x2f   :  { %v214_v50 = vadd.f32 %v583_v15, %v136_v42  ;;  %v215_v51 = vadd.f32 %v585_v16, %v137_v43  ;;  %v268_v54 = vmax.f32 %v212_v46, 0.0  ;;  %v269_v55 = vmax.f32 %v213_v47, 0.0 }
  0x30   :  { %469 = vst [vmem:[%s947_s3 + $0x98] sm:$0xff] %v529_v45  ;;  %v216_v56 = vadd.f32 %v600_v22, %v138_v48  ;;  %v140_v57 = vmul.f32 %v579_v13, %v62_v44  ;;  %v530_v60 = vpack.c.bf16 %v267_v49, %v266_v41  ;;  %v217_v63 = vadd.f32 %v602_v23, %v139_v52 }
  0x31   :  { %v270_v61 = vmax.f32 %v214_v50, 0.0  ;;  %v271_v62 = vmax.f32 %v215_v51, 0.0  ;;  %v531_v2 = vpack.c.bf16 %v269_v55, %v268_v54  ;;  %v141_v4 = vmul.f32 %v581_v14, %v63_v53 }
  0x32   :  { %v272_v3 = vmax.f32 %v216_v56, 0.0  ;;  %v218_v5 = vadd.f32 %v583_v15, %v140_v57  ;;  %470 = vst [vmem:[%s947_s3 + $0xa0] sm:$0xff] %v530_v60  ;;  %v273_v8 = vmax.f32 %v217_v63, 0.0  ;;  %v142_v9 = vmul.f32 %v596_v20, %v64_v58 }
  0x33   :  { %v532_v7 = vpack.c.bf16 %v271_v62, %v270_v61  ;;  %v143_v10 = vmul.f32 %v598_v21, %v65_v59  ;;  %471 = vst [vmem:[%s947_s3 + $0xa8] sm:$0xff] %v531_v2  ;;  %v219_v12 = vadd.f32 %v585_v16, %v141_v4  ;;  %v144_v18 = vmul.f32 %v579_v13, %v66_v0 }
  0x34   :  { %v274_v17 = vmax.f32 %v218_v5, 0.0  ;;  %v145_v19 = vmul.f32 %v581_v14, %v67_v1  ;;  %v533_v24 = vpack.c.bf16 %v273_v8, %v272_v3  ;;  %v220_v25 = vadd.f32 %v600_v22, %v142_v9 }
  0x35   :  { %472 = vst [vmem:[%s947_s3 + $0xb0] sm:$0xff] %v532_v7  ;;  %v221_v26 = vadd.f32 %v602_v23, %v143_v10  ;;  %v146_v27 = vmul.f32 %v596_v20, %v68_v6  ;;  %v275_v28 = vmax.f32 %v219_v12, 0.0  ;;  %v222_v29 = vadd.f32 %v583_v15, %v144_v18 }
  0x36   :  { %v223_v30 = vadd.f32 %v585_v16, %v145_v19  ;;  %v147_v13 = vmul.f32 %v598_v21, %v69_v11  ;;  %473 = vst [vmem:[%s947_s3 + $0xb8] sm:$0xff] %v533_v24  ;;  %v276_v14 = vmax.f32 %v220_v25, 0.0 }
  0x37   :  { %v277_v31 = vmax.f32 %v221_v26, 0.0  ;;  %v224_v32 = vadd.f32 %v600_v22, %v146_v27  ;;  %v534_v33 = vpack.c.bf16 %v275_v28, %v274_v17  ;;  %v278_v34 = vmax.f32 %v222_v29, 0.0 }
  0x38   :  { %v279_v35 = vmax.f32 %v223_v30, 0.0  ;;  %v225_v20 = vadd.f32 %v602_v23, %v147_v13 }
  0x39   :  { %v535_v36 = vpack.c.bf16 %v277_v31, %v276_v14  ;;  %v280_v37 = vmax.f32 %v224_v32, 0.0  ;;  %474 = vst [vmem:[%s947_s3 + $0xc0] sm:$0xff] %v534_v33 }
  0x3a   :  { %v536_v15 = vpack.c.bf16 %v279_v35, %v278_v34  ;;  %v281_v16 = vmax.f32 %v225_v20, 0.0 }
  0x3b   :  { %475 = vst [vmem:[%s947_s3 + $0xc8] sm:$0xff] %v535_v36 }
  0x3c   :  { %476 = vst [vmem:[%s947_s3 + $0xd0] sm:$0xff] %v536_v15  ;;  %v537_v21 = vpack.c.bf16 %v281_v16, %v280_v37 }
  0x3e   :  { %477 = vst [vmem:[%s947_s3 + $0xd8] sm:$0xff] %v537_v21 }

// kernel: _lambda_.23
= control target key start
LH: loop header
LB: loop body
LE: loop exit
PB: predicated region body
PF: predicated region fallthrough
CT: control target
= control target key end

     0   :  { %s2613_s9 = smov 0   ;;  %s3351_s0 = inlined_call_operand.vmem [shape: bf16[1696,32], index: 0, kind: input, shape index: {}]   ;;  %s3352_s1 = inlined_call_operand.vmem [shape: bf16[32,512], index: 1, kind: input, shape index: {}]   ;;  %s3353_s2 = inlined_call_operand.vmem [shape: f32[1696,512], index: 2, kind: output, shape index: {}]  }
   0x1 LB: > { %s2337_s10 = sadd.s32 4294967295, %s2595_s9   ;;  %p2341_p0 = scmp.ge.s32.totalorder %s2595_s9, 1  ;;  %s2595_s9 = sphi %s2613_s9, %s12_s9  }
   0x2   : > { %p113_p1 = scmp.lt.s32.totalorder %s2595_s9, 3 }
   0x4   : > { %p114_p2 = pnand %p2341_p0, %p113_p1 }
   0x5   : > { %s136_s13 = smul.u32 (!%p114_p2), 106, %s2337_s10 }
   0x6   : > { %117 = sbr.rel (%p114_p2) target bundleno = 637 (0x27d), region = 28 }
   0x7   : > { %p137_p3 = scmp.lt.s32.totalorder (!%p114_p2), %s136_s13, 211 }
   0xb   : > { %v2524_v0 = vld [vmem:[%s3352_s1 + $0x24] ss:$16 sps:$4 sm:$0xff]   ;;  %v2526_v1 = vld [vmem:[%s3352_s1 + $0x2c] ss:$16 sps:$4 sm:$0xff]   ;;  %v2597_v2 = vmov 0   ;;  %s3355_s13 = smov (!%p137_p3, %s136_s13), 211 }
   0xc   : > { %761 = vmatprep.mubr.bf16.mxu0 %v2597_v2  ;;  %1324 = vmatprep.mubr.bf16.mxu1 %v2597_v2  ;;  %v2528_v3 = vld [vmem:[%s3352_s1 + $0x20] ss:$16 sps:$4 sm:$0xff]   ;;  %v2529_v4 = vld [vmem:[%s3352_s1 + $0x28] ss:$16 sps:$4 sm:$0xff]   ;;  %v2530_v5 = vld [vmem:[%s3352_s1 + $0x4] ss:$16 sps:$4 sm:$0xff]  }
   0xd   : > { %741 = vmatprep.subr.bf16.mxu0 %v2524_v0  ;;  %1304 = vmatprep.subr.bf16.mxu1 %v2526_v1  ;;  %v2532_v6 = vld [vmem:[%s3352_s1 + $0xc] ss:$16 sps:$4 sm:$0xff]   ;;  %v2534_v7 = vld [vmem:[%s3352_s1] ss:$16 sps:$4 sm:$0xff]   ;;  %v2535_v8 = vld [vmem:[%s3352_s1 + $0x8] ss:$16 sps:$4 sm:$0xff]  }
   0xe   : > { %742 = vmatpush1.bf16.msra.mxu0 %v2528_v3  ;;  %1305 = vmatpush1.bf16.msra.mxu1 %v2529_v4  ;;  %s2342_s28 = sshll.u32 %s3355_s13, 2  ;;  %vm569_vm0 = vcmask 261120   ;;  %s2514_s4 = sshll.u32 %s3355_s13, 5 }
   0xf   : > { %743 = vmatprep.subr.bf16.mxu0 %v2530_v5  ;;  %1306 = vmatprep.subr.bf16.mxu1 %v2532_v6  ;;  %s2653_s3 = scalar_lea.vmem %s3351_s0, %s2342_s28  ;;  %s2780_s7 = scalar_lea.vmem %s3353_s2, %s2514_s4 }
  0x10   : > { %v2536_v9 = vld [vmem:[%s2653_s3] sm:$0xff]   ;;  %v2537_v10 = vld [vmem:[%s2653_s3 + $0x8] sm:$0xff]   ;;  %v2538_v11 = vld [vmem:[%s2653_s3 + $0x10] sm:$0xff]  }
  0x11   : > { %v2539_v12 = vld [vmem:[%s2653_s3 + $0x18] sm:$0xff]   ;;  %v2540_v13 = vld [vmem:[%s2653_s3 + $0x20] sm:$0xff]   ;;  %v2541_v14 = vld [vmem:[%s2653_s3 + $0x28] sm:$0xff]  }
  0x12   : > { %744 = vmatpush1.bf16.msra.mxu0 %v2534_v7  ;;  %1307 = vmatpush1.bf16.msra.mxu1 %v2535_v8  ;;  %v2542_v15 = vld [vmem:[%s2653_s3 + $0x30] sm:$0xff]   ;;  %v2543_v16 = vld [vmem:[%s2653_s3 + $0x38] sm:$0xff]   ;;  %v2544_v17 = vld [vmem:[%s2653_s3 + $0x40] sm:$0xff]  }
  0x13   : > { %v2545_v18 = vld [vmem:[%s2653_s3 + $0x48] sm:$0xff]   ;;  %v2546_v19 = vld [vmem:[%s2653_s3 + $0x50] sm:$0xff]   ;;  %v2547_v20 = vld [vmem:[%s2653_s3 + $0x58] sm:$0xff]  }
  0x14   : > { %v2548_v21 = vld [vmem:[%s2653_s3 + $0x60] sm:$0xff]   ;;  %v2549_v22 = vld [vmem:[%s2653_s3 + $0x68] sm:$0xff]   ;;  %v2550_v23 = vld [vmem:[%s2653_s3 + $0x70] sm:$0xff]  }
  0x15   : > { %2406 = vmatmul.mubr.msk.bf16.vlgmr.msra.gmra.mxu0 %vm569_vm0, %v2536_v9  ;;  %2459 = vmatmul.mubr.msk.bf16.vlgmr.msra.gmra.mxu1 %vm569_vm0, %v2536_v9  ;;  %v2551_v24 = vld [vmem:[%s2653_s3 + $0x78] sm:$0xff]   ;;  %v2552_v25 = vld [vmem:[%s2653_s3 + $0x80] sm:$0xff]   ;;  %v2553_v26 = vld [vmem:[%s2653_s3 + $0x88] sm:$0xff]  }
  0x16   : > { %771 = vmatprep.mubr.bf16.mxu0 %v2597_v2  ;;  %1334 = vmatprep.mubr.bf16.mxu1 %v2597_v2  ;;  %v2554_v27 = vld [vmem:[%s2653_s3 + $0x90] sm:$0xff]   ;;  %v2555_v28 = vld [vmem:[%s2653_s3 + $0x98] sm:$0xff]   ;;  %v2556_v29 = vld [vmem:[%s2653_s3 + $0xa0] sm:$0xff]  }
  0x17   : > { %v2557_v30 = vld [vmem:[%s2653_s3 + $0xa8] sm:$0xff]   ;;  %v2558_v31 = vld [vmem:[%s2653_s3 + $0xb0] sm:$0xff]   ;;  %v2559_v32 = vld [vmem:[%s2653_s3 + $0xb8] sm:$0xff]  }
  0x18   : > { %v2560_v33 = vld [vmem:[%s2653_s3 + $0xc0] sm:$0xff]   ;;  %v2561_v40 = vld [vmem:[%s2653_s3 + $0xc8] sm:$0xff]   ;;  %v2562_v49 = vld [vmem:[%s2653_s3 + $0xd0] sm:$0xff]  }
  0x19   : > { %v2563_v58 = vld [vmem:[%s2653_s3 + $0xd8] sm:$0xff]   ;;  %v2564_v4 = vld [vmem:[%s2653_s3 + $0xe0] sm:$0xff]  }
  0x1d   : > { %2407 = vmatmul.mubr.msk.bf16.gmra.mxu0 %vm569_vm0, %v2537_v10  ;;  %2460 = vmatmul.mubr.msk.bf16.gmra.mxu1 %vm569_vm0, %v2537_v10 }
  0x1e   : > { %781 = vmatprep.mubr.bf16.mxu0 %v2597_v2  ;;  %1344 = vmatprep.mubr.bf16.mxu1 %v2597_v2 }
  0x25   : > { %2408 = vmatmul.mubr.msk.bf16.gmra.mxu0 %vm569_vm0, %v2538_v11  ;;  %2461 = vmatmul.mubr.msk.bf16.gmra.mxu1 %vm569_vm0, %v2538_v11 }
  0x26   : > { %791 = vmatprep.mubr.bf16.mxu0 %v2597_v2  ;;  %1354 = vmatprep.mubr.bf16.mxu1 %v2597_v2 }
  0x2d   : > { %2409 = vmatmul.mubr.msk.bf16.gmra.mxu0 %vm569_vm0, %v2539_v12  ;;  %2462 = vmatmul.mubr.msk.bf16.gmra.mxu1 %vm569_vm0, %v2539_v12 }
  0x2e   : > { %801 = vmatprep.mubr.bf16.mxu0 %v2597_v2  ;;  %1364 = vmatprep.mubr.bf16.mxu1 %v2597_v2 }
  0x35   : > { %2410 = vmatmul.mubr.msk.bf16.gmra.mxu0 %vm569_vm0, %v2540_v13  ;;  %2463 = vmatmul.mubr.msk.bf16.gmra.mxu1 %vm569_vm0, %v2540_v13  ;;  %v2565_v13 = vld [vmem:[%s2653_s3 + $0xe8] sm:$0xff]  }
  0x36   : > { %811 = vmatprep.mubr.bf16.mxu0 %v2597_v2  ;;  %1374 = vmatprep.mubr.bf16.mxu1 %v2597_v2 }
  0x3d   : > { %2411 = vmatmul.mubr.msk.bf16.gmra.mxu0 %vm569_vm0, %v2541_v14  ;;  %2464 = vmatmul.mubr.msk.bf16.gmra.mxu1 %vm569_vm0, %v2541_v14 }
  0x3e   : > { %821 = vmatprep.mubr.bf16.mxu0 %v2597_v2  ;;  %1384 = vmatprep.mubr.bf16.mxu1 %v2597_v2 }
  0x45   : > { %2412 = vmatmul.mubr.msk.bf16.gmra.mxu0 %vm569_vm0, %v2542_v15  ;;  %2465 = vmatmul.mubr.msk.bf16.gmra.mxu1 %vm569_vm0, %v2542_v15 }
  0x46   : > { %831 = vmatprep.mubr.bf16.mxu0 %v2597_v2  ;;  %1394 = vmatprep.mubr.bf16.mxu1 %v2597_v2 }
  0x4d   : > { %2413 = vmatmul.mubr.msk.bf16.gmra.mxu0 %vm569_vm0, %v2543_v16  ;;  %2466 = vmatmul.mubr.msk.bf16.gmra.mxu1 %vm569_vm0, %v2543_v16 }
  0x4e   : > { %841 = vmatprep.mubr.bf16.mxu0 %v2597_v2  ;;  %1404 = vmatprep.mubr.bf16.mxu1 %v2597_v2 }
  0x55   : > { %2414 = vmatmul.mubr.msk.bf16.gmra.mxu0 %vm569_vm0, %v2544_v17  ;;  %2467 = vmatmul.mubr.msk.bf16.gmra.mxu1 %vm569_vm0, %v2544_v17 }
  0x56   : > { %851 = vmatprep.mubr.bf16.mxu0 %v2597_v2  ;;  %1414 = vmatprep.mubr.bf16.mxu1 %v2597_v2 }
  0x5d   : > { %2415 = vmatmul.mubr.msk.bf16.gmra.mxu0 %vm569_vm0, %v2545_v18  ;;  %2468 = vmatmul.mubr.msk.bf16.gmra.mxu1 %vm569_vm0, %v2545_v18 }
  0x5e   : > { %861 = vmatprep.mubr.bf16.mxu0 %v2597_v2  ;;  %1424 = vmatprep.mubr.bf16.mxu1 %v2597_v2 }
  0x65   : > { %2416 = vmatmul.mubr.msk.bf16.gmra.mxu0 %vm569_vm0, %v2546_v19  ;;  %2469 = vmatmul.mubr.msk.bf16.gmra.mxu1 %vm569_vm0, %v2546_v19 }
  0x66   : > { %871 = vmatprep.mubr.bf16.mxu0 %v2597_v2  ;;  %1434 = vmatprep.mubr.bf16.mxu1 %v2597_v2 }
  0x6d   : > { %2417 = vmatmul.mubr.msk.bf16.gmra.mxu0 %vm569_vm0, %v2547_v20  ;;  %2470 = vmatmul.mubr.msk.bf16.gmra.mxu1 %vm569_vm0, %v2547_v20 }
  0x6e   : > { %881 = vmatprep.mubr.bf16.mxu0 %v2597_v2  ;;  %1444 = vmatprep.mubr.bf16.mxu1 %v2597_v2 }
  0x75   : > { %2418 = vmatmul.mubr.msk.bf16.gmra.mxu0 %vm569_vm0, %v2548_v21  ;;  %2471 = vmatmul.mubr.msk.bf16.gmra.mxu1 %vm569_vm0, %v2548_v21 }
  0x76   : > { %891 = vmatprep.mubr.bf16.mxu0 %v2597_v2  ;;  %1454 = vmatprep.mubr.bf16.mxu1 %v2597_v2 }
  0x7d   : > { %2419 = vmatmul.mubr.msk.bf16.gmra.mxu0 %vm569_vm0, %v2549_v22  ;;  %2472 = vmatmul.mubr.msk.bf16.gmra.mxu1 %vm569_vm0, %v2549_v22  ;;  %v2566_v22 = vld [vmem:[%s2653_s3 + $0xf0] sm:$0xff]  }
  0x7e   : > { %901 = vmatprep.mubr.bf16.mxu0 %v2597_v2  ;;  %1464 = vmatprep.mubr.bf16.mxu1 %v2597_v2 }
  0x85   : > { %2420 = vmatmul.mubr.msk.bf16.gmra.mxu0 %vm569_vm0, %v2550_v23  ;;  %2473 = vmatmul.mubr.msk.bf16.gmra.mxu1 %vm569_vm0, %v2550_v23 }
  0x86   : > { %911 = vmatprep.mubr.bf16.mxu0 %v2597_v2  ;;  %1474 = vmatprep.mubr.bf16.mxu1 %v2597_v2 }
  0x8d   : > { %2421 = vmatmul.mubr.msk.bf16.gmra.mxu0 %vm569_vm0, %v2551_v24  ;;  %2474 = vmatmul.mubr.msk.bf16.gmra.mxu1 %vm569_vm0, %v2551_v24 }
  0x8e   : > { %921 = vmatprep.mubr.bf16.mxu0 %v2597_v2  ;;  %1484 = vmatprep.mubr.bf16.mxu1 %v2597_v2 }
  0x95   : > { %2422 = vmatmul.mubr.msk.bf16.gmra.mxu0 %vm569_vm0, %v2552_v25  ;;  %2475 = vmatmul.mubr.msk.bf16.gmra.mxu1 %vm569_vm0, %v2552_v25 }
  0x96   : > { %931 = vmatprep.mubr.bf16.mxu0 %v2597_v2  ;;  %1494 = vmatprep.mubr.bf16.mxu1 %v2597_v2 }
  0x9d   : > { %2423 = vmatmul.mubr.msk.bf16.gmra.mxu0 %vm569_vm0, %v2553_v26  ;;  %2476 = vmatmul.mubr.msk.bf16.gmra.mxu1 %vm569_vm0, %v2553_v26 }
  0x9e   : > { %941 = vmatprep.mubr.bf16.mxu0 %v2597_v2  ;;  %1504 = vmatprep.mubr.bf16.mxu1 %v2597_v2 }
  0xa5   : > { %2424 = vmatmul.mubr.msk.bf16.gmra.mxu0 %vm569_vm0, %v2554_v27  ;;  %2477 = vmatmul.mubr.msk.bf16.gmra.mxu1 %vm569_vm0, %v2554_v27 }
  0xa6   : > { %951 = vmatprep.mubr.bf16.mxu0 %v2597_v2  ;;  %1514 = vmatprep.mubr.bf16.mxu1 %v2597_v2 }
  0xad   : > { %2425 = vmatmul.mubr.msk.bf16.gmra.mxu0 %vm569_vm0, %v2555_v28  ;;  %2478 = vmatmul.mubr.msk.bf16.gmra.mxu1 %vm569_vm0, %v2555_v28 }
  0xae   : > { %961 = vmatprep.mubr.bf16.mxu0 %v2597_v2  ;;  %1524 = vmatprep.mubr.bf16.mxu1 %v2597_v2 }
  0xb5   : > { %2426 = vmatmul.mubr.msk.bf16.gmra.mxu0 %vm569_vm0, %v2556_v29  ;;  %2479 = vmatmul.mubr.msk.bf16.gmra.mxu1 %vm569_vm0, %v2556_v29 }
  0xb6   : > { %971 = vmatprep.mubr.bf16.mxu0 %v2597_v2  ;;  %1534 = vmatprep.mubr.bf16.mxu1 %v2597_v2 }
  0xbd   : > { %2427 = vmatmul.mubr.msk.bf16.gmra.mxu0 %vm569_vm0, %v2557_v30  ;;  %2480 = vmatmul.mubr.msk.bf16.gmra.mxu1 %vm569_vm0, %v2557_v30 }
  0xbe   : > { %981 = vmatprep.mubr.bf16.mxu0 %v2597_v2  ;;  %1544 = vmatprep.mubr.bf16.mxu1 %v2597_v2 }
  0xc5   : > { %2428 = vmatmul.mubr.msk.bf16.gmra.mxu0 %vm569_vm0, %v2558_v31  ;;  %2481 = vmatmul.mubr.msk.bf16.gmra.mxu1 %vm569_vm0, %v2558_v31  ;;  %v2567_v31 = vld [vmem:[%s2653_s3 + $0xf8] sm:$0xff]  }
  0xc6   : > { %991 = vmatprep.mubr.bf16.mxu0 %v2597_v2  ;;  %1554 = vmatprep.mubr.bf16.mxu1 %v2597_v2 }
  0xcd   : > { %2429 = vmatmul.mubr.msk.bf16.gmra.mxu0 %vm569_vm0, %v2559_v32  ;;  %2482 = vmatmul.mubr.msk.bf16.gmra.mxu1 %vm569_vm0, %v2559_v32 }
  0xce   : > { %1001 = vmatprep.mubr.bf16.mxu0 %v2597_v2  ;;  %1564 = vmatprep.mubr.bf16.mxu1 %v2597_v2 }
  0xd5   : > { %v763_v34 = vpop.f32.mrf.mxu0  ;;  %2430 = vmatmul.mubr.msk.bf16.gmra.mxu0 %vm569_vm0, %v2560_v33  ;;  %v1326_v35 = vpop.f32.mrf.mxu1  ;;  %2483 = vmatmul.mubr.msk.bf16.gmra.mxu1 %vm569_vm0, %v2560_v33 }
  0xd6   : > { %1855 = vst [vmem:[%s2780_s7] sm:$0xff] %v763_v34  ;;  %1857 = vst [vmem:[%s2780_s7 + $0x10] sm:$0xff] %v1326_v35  ;;  %1011 = vmatprep.mubr.bf16.mxu0 %v2597_v2  ;;  %1574 = vmatprep.mubr.bf16.mxu1 %v2597_v2 }
  0xd7   : > { %v765_v36 = vpop.f32.mrf.mxu0  ;;  %v1328_v37 = vpop.f32.mrf.mxu1 }
  0xd8   : > { %1856 = vst [vmem:[%s2780_s7 + $0x8] sm:$0xff] %v765_v36  ;;  %1858 = vst [vmem:[%s2780_s7 + $0x18] sm:$0xff] %v1328_v37 }
  0xd9   : > { %v767_v38 = vpop.f32.mrf.mxu0  ;;  %v1330_v39 = vpop.f32.mrf.mxu1 }
  0xda   : > { %1859 = vst [vmem:[%s2780_s7 + $0x20] sm:$0xff] %v767_v38  ;;  %1861 = vst [vmem:[%s2780_s7 + $0x30] sm:$0xff] %v1330_v39 }
  0xdb   : > { %v769_v41 = vpop.f32.mrf.mxu0  ;;  %v1332_v42 = vpop.f32.mrf.mxu1 }
  0xdc   : > { %1860 = vst [vmem:[%s2780_s7 + $0x28] sm:$0xff] %v769_v41  ;;  %1862 = vst [vmem:[%s2780_s7 + $0x38] sm:$0xff] %v1332_v42 }
  0xdd   : > { %v773_v43 = vpop.f32.mrf.mxu0  ;;  %2431 = vmatmul.mubr.msk.bf16.gmra.mxu0 %vm569_vm0, %v2561_v40  ;;  %v1336_v44 = vpop.f32.mrf.mxu1  ;;  %2484 = vmatmul.mubr.msk.bf16.gmra.mxu1 %vm569_vm0, %v2561_v40  ;;  %v2568_v40 = vld [vmem:[%s2653_s3 + $0x100] sm:$0xff]  }
  0xde   : > { %1863 = vst [vmem:[%s2780_s7 + $0x40] sm:$0xff] %v773_v43  ;;  %1865 = vst [vmem:[%s2780_s7 + $0x50] sm:$0xff] %v1336_v44  ;;  %1021 = vmatprep.mubr.bf16.mxu0 %v2597_v2  ;;  %1584 = vmatprep.mubr.bf16.mxu1 %v2597_v2 }
  0xdf   : > { %v775_v45 = vpop.f32.mrf.mxu0  ;;  %v1338_v46 = vpop.f32.mrf.mxu1 }
  0xe0   : > { %1864 = vst [vmem:[%s2780_s7 + $0x48] sm:$0xff] %v775_v45  ;;  %1866 = vst [vmem:[%s2780_s7 + $0x58] sm:$0xff] %v1338_v46 }
  0xe1   : > { %v777_v47 = vpop.f32.mrf.mxu0  ;;  %v1340_v48 = vpop.f32.mrf.mxu1 }
  0xe2   : > { %1867 = vst [vmem:[%s2780_s7 + $0x60] sm:$0xff] %v777_v47  ;;  %1869 = vst [vmem:[%s2780_s7 + $0x70] sm:$0xff] %v1340_v48 }
  0xe3   : > { %v779_v50 = vpop.f32.mrf.mxu0  ;;  %v1342_v51 = vpop.f32.mrf.mxu1 }
  0xe4   : > { %1868 = vst [vmem:[%s2780_s7 + $0x68] sm:$0xff] %v779_v50  ;;  %1870 = vst [vmem:[%s2780_s7 + $0x78] sm:$0xff] %v1342_v51 }
  0xe5   : > { %v783_v52 = vpop.f32.mrf.mxu0  ;;  %2432 = vmatmul.mubr.msk.bf16.gmra.mxu0 %vm569_vm0, %v2562_v49  ;;  %v1346_v53 = vpop.f32.mrf.mxu1  ;;  %2485 = vmatmul.mubr.msk.bf16.gmra.mxu1 %vm569_vm0, %v2562_v49  ;;  %v2569_v49 = vld [vmem:[%s2653_s3 + $0x108] sm:$0xff]  }
  0xe6   : > { %1871 = vst [vmem:[%s2780_s7 + $0x80] sm:$0xff] %v783_v52  ;;  %1873 = vst [vmem:[%s2780_s7 + $0x90] sm:$0xff] %v1346_v53  ;;  %1031 = vmatprep.mubr.bf16.mxu0 %v2597_v2  ;;  %1594 = vmatprep.mubr.bf16.mxu1 %v2597_v2 }
  0xe7   : > { %v785_v54 = vpop.f32.mrf.mxu0  ;;  %v1348_v55 = vpop.f32.mrf.mxu1 }
  0xe8   : > { %1872 = vst [vmem:[%s2780_s7 + $0x88] sm:$0xff] %v785_v54  ;;  %1874 = vst [vmem:[%s2780_s7 + $0x98] sm:$0xff] %v1348_v55 }
  0xe9   : > { %v787_v56 = vpop.f32.mrf.mxu0  ;;  %v1350_v57 = vpop.f32.mrf.mxu1 }
  0xea   : > { %1875 = vst [vmem:[%s2780_s7 + $0xa0] sm:$0xff] %v787_v56  ;;  %1877 = vst [vmem:[%s2780_s7 + $0xb0] sm:$0xff] %v1350_v57 }
  0xeb   : > { %v789_v59 = vpop.f32.mrf.mxu0  ;;  %v1352_v60 = vpop.f32.mrf.mxu1 }
  0xec   : > { %1876 = vst [vmem:[%s2780_s7 + $0xa8] sm:$0xff] %v789_v59  ;;  %1878 = vst [vmem:[%s2780_s7 + $0xb8] sm:$0xff] %v1352_v60 }
  0xed   : > { %v793_v61 = vpop.f32.mrf.mxu0  ;;  %2433 = vmatmul.mubr.msk.bf16.gmra.mxu0 %vm569_vm0, %v2563_v58  ;;  %v1356_v62 = vpop.f32.mrf.mxu1  ;;  %2486 = vmatmul.mubr.msk.bf16.gmra.mxu1 %vm569_vm0, %v2563_v58  ;;  %v2570_v58 = vld [vmem:[%s2653_s3 + $0x110] sm:$0xff]  }
  0xee   : > { %1879 = vst [vmem:[%s2780_s7 + $0xc0] sm:$0xff] %v793_v61  ;;  %1881 = vst [vmem:[%s2780_s7 + $0xd0] sm:$0xff] %v1356_v62  ;;  %1041 = vmatprep.mubr.bf16.mxu0 %v2597_v2  ;;  %1604 = vmatprep.mubr.bf16.mxu1 %v2597_v2 }
  0xef   : > { %v795_v63 = vpop.f32.mrf.mxu0  ;;  %v1358_v0 = vpop.f32.mrf.mxu1 }
  0xf0   : > { %1880 = vst [vmem:[%s2780_s7 + $0xc8] sm:$0xff] %v795_v63  ;;  %1882 = vst [vmem:[%s2780_s7 + $0xd8] sm:$0xff] %v1358_v0 }
  0xf1   : > { %v797_v1 = vpop.f32.mrf.mxu0  ;;  %v1360_v3 = vpop.f32.mrf.mxu1 }
  0xf2   : > { %1883 = vst [vmem:[%s2780_s7 + $0xe0] sm:$0xff] %v797_v1  ;;  %1885 = vst [vmem:[%s2780_s7 + $0xf0] sm:$0xff] %v1360_v3 }
  0xf3   : > { %v799_v5 = vpop.f32.mrf.mxu0  ;;  %v1362_v6 = vpop.f32.mrf.mxu1 }
  0xf4   : > { %1884 = vst [vmem:[%s2780_s7 + $0xe8] sm:$0xff] %v799_v5  ;;  %1886 = vst [vmem:[%s2780_s7 + $0xf8] sm:$0xff] %v1362_v6 }
  0xf5   : > { %v803_v7 = vpop.f32.mrf.mxu0  ;;  %2434 = vmatmul.mubr.msk.bf16.gmra.mxu0 %vm569_vm0, %v2564_v4  ;;  %v1366_v8 = vpop.f32.mrf.mxu1  ;;  %2487 = vmatmul.mubr.msk.bf16.gmra.mxu1 %vm569_vm0, %v2564_v4  ;;  %v2571_v4 = vld [vmem:[%s2653_s3 + $0x118] sm:$0xff]  }
  0xf6   : > { %1887 = vst [vmem:[%s2780_s7 + $0x100] sm:$0xff] %v803_v7  ;;  %1889 = vst [vmem:[%s2780_s7 + $0x110] sm:$0xff] %v1366_v8  ;;  %1051 = vmatprep.mubr.bf16.mxu0 %v2597_v2  ;;  %1614 = vmatprep.mubr.bf16.mxu1 %v2597_v2 }
  0xf7   : > { %v805_v9 = vpop.f32.mrf.mxu0  ;;  %v1368_v10 = vpop.f32.mrf.mxu1 }
  0xf8   : > { %1888 = vst [vmem:[%s2780_s7 + $0x108] sm:$0xff] %v805_v9  ;;  %1890 = vst [vmem:[%s2780_s7 + $0x118] sm:$0xff] %v1368_v10 }
  0xf9   : > { %v807_v11 = vpop.f32.mrf.mxu0  ;;  %v1370_v12 = vpop.f32.mrf.mxu1 }
  0xfa   : > { %1891 = vst [vmem:[%s2780_s7 + $0x120] sm:$0xff] %v807_v11  ;;  %1893 = vst [vmem:[%s2780_s7 + $0x130] sm:$0xff] %v1370_v12 }
  0xfb   : > { %v809_v14 = vpop.f32.mrf.mxu0  ;;  %v1372_v15 = vpop.f32.mrf.mxu1 }
  0xfc   : > { %1892 = vst [vmem:[%s2780_s7 + $0x128] sm:$0xff] %v809_v14  ;;  %1894 = vst [vmem:[%s2780_s7 + $0x138] sm:$0xff] %v1372_v15 }
  0xfd   : > { %v813_v16 = vpop.f32.mrf.mxu0  ;;  %2435 = vmatmul.mubr.msk.bf16.gmra.mxu0 %vm569_vm0, %v2565_v13  ;;  %v1376_v17 = vpop.f32.mrf.mxu1  ;;  %2488 = vmatmul.mubr.msk.bf16.gmra.mxu1 %vm569_vm0, %v2565_v13  ;;  %v2572_v13 = vld [vmem:[%s2653_s3 + $0x120] sm:$0xff]  }
  0xfe   : > { %1895 = vst [vmem:[%s2780_s7 + $0x140] sm:$0xff] %v813_v16  ;;  %1897 = vst [vmem:[%s2780_s7 + $0x150] sm:$0xff] %v1376_v17  ;;  %1061 = vmatprep.mubr.bf16.mxu0 %v2597_v2  ;;  %1624 = vmatprep.mubr.bf16.mxu1 %v2597_v2 }
  0xff   : > { %v815_v18 = vpop.f32.mrf.mxu0  ;;  %v1378_v19 = vpop.f32.mrf.mxu1 }
 0x100   : > { %1896 = vst [vmem:[%s2780_s7 + $0x148] sm:$0xff] %v815_v18  ;;  %1898 = vst [vmem:[%s2780_s7 + $0x158] sm:$0xff] %v1378_v19 }
 0x101   : > { %v817_v20 = vpop.f32.mrf.mxu0  ;;  %v1380_v21 = vpop.f32.mrf.mxu1 }
 0x102   : > { %1899 = vst [vmem:[%s2780_s7 + $0x160] sm:$0xff] %v817_v20  ;;  %1901 = vst [vmem:[%s2780_s7 + $0x170] sm:$0xff] %v1380_v21 }
 0x103   : > { %v819_v23 = vpop.f32.mrf.mxu0  ;;  %v1382_v24 = vpop.f32.mrf.mxu1 }
 0x104   : > { %1900 = vst [vmem:[%s2780_s7 + $0x168] sm:$0xff] %v819_v23  ;;  %1902 = vst [vmem:[%s2780_s7 + $0x178] sm:$0xff] %v1382_v24 }
 0x105   : > { %v823_v25 = vpop.f32.mrf.mxu0  ;;  %2436 = vmatmul.mubr.msk.bf16.gmra.mxu0 %vm569_vm0, %v2566_v22  ;;  %v1386_v26 = vpop.f32.mrf.mxu1  ;;  %2489 = vmatmul.mubr.msk.bf16.gmra.mxu1 %vm569_vm0, %v2566_v22  ;;  %v2573_v22 = vld [vmem:[%s2653_s3 + $0x128] sm:$0xff]  }
 0x106   : > { %1903 = vst [vmem:[%s2780_s7 + $0x180] sm:$0xff] %v823_v25  ;;  %1905 = vst [vmem:[%s2780_s7 + $0x190] sm:$0xff] %v1386_v26  ;;  %1071 = vmatprep.mubr.bf16.mxu0 %v2597_v2  ;;  %1634 = vmatprep.mubr.bf16.mxu1 %v2597_v2 }
 0x107   : > { %v825_v27 = vpop.f32.mrf.mxu0  ;;  %v1388_v28 = vpop.f32.mrf.mxu1 }
 0x108   : > { %1904 = vst [vmem:[%s2780_s7 + $0x188] sm:$0xff] %v825_v27  ;;  %1906 = vst [vmem:[%s2780_s7 + $0x198] sm:$0xff] %v1388_v28 }
 0x109   : > { %v827_v29 = vpop.f32.mrf.mxu0  ;;  %v1390_v30 = vpop.f32.mrf.mxu1 }
 0x10a   : > { %1907 = vst [vmem:[%s2780_s7 + $0x1a0] sm:$0xff] %v827_v29  ;;  %1909 = vst [vmem:[%s2780_s7 + $0x1b0] sm:$0xff] %v1390_v30 }
 0x10b   : > { %v829_v32 = vpop.f32.mrf.mxu0  ;;  %v1392_v33 = vpop.f32.mrf.mxu1 }
 0x10c   : > { %1908 = vst [vmem:[%s2780_s7 + $0x1a8] sm:$0xff] %v829_v32  ;;  %1910 = vst [vmem:[%s2780_s7 + $0x1b8] sm:$0xff] %v1392_v33 }
 0x10d   : > { %v833_v34 = vpop.f32.mrf.mxu0  ;;  %2437 = vmatmul.mubr.msk.bf16.gmra.mxu0 %vm569_vm0, %v2567_v31  ;;  %v1396_v35 = vpop.f32.mrf.mxu1  ;;  %2490 = vmatmul.mubr.msk.bf16.gmra.mxu1 %vm569_vm0, %v2567_v31  ;;  %v2574_v31 = vld [vmem:[%s2653_s3 + $0x130] sm:$0xff]  }
 0x10e   : > { %1911 = vst [vmem:[%s2780_s7 + $0x1c0] sm:$0xff] %v833_v34  ;;  %1913 = vst [vmem:[%s2780_s7 + $0x1d0] sm:$0xff] %v1396_v35  ;;  %1081 = vmatprep.mubr.bf16.mxu0 %v2597_v2  ;;  %1644 = vmatprep.mubr.bf16.mxu1 %v2597_v2 }
 0x10f   : > { %v835_v36 = vpop.f32.mrf.mxu0  ;;  %v1398_v37 = vpop.f32.mrf.mxu1 }
 0x110   : > { %1912 = vst [vmem:[%s2780_s7 + $0x1c8] sm:$0xff] %v835_v36  ;;  %1914 = vst [vmem:[%s2780_s7 + $0x1d8] sm:$0xff] %v1398_v37 }
 0x111   : > { %v837_v38 = vpop.f32.mrf.mxu0  ;;  %v1400_v39 = vpop.f32.mrf.mxu1 }
 0x112   : > { %1915 = vst [vmem:[%s2780_s7 + $0x1e0] sm:$0xff] %v837_v38  ;;  %1917 = vst [vmem:[%s2780_s7 + $0x1f0] sm:$0xff] %v1400_v39 }
 0x113   : > { %v839_v41 = vpop.f32.mrf.mxu0  ;;  %v1402_v42 = vpop.f32.mrf.mxu1 }
 0x114   : > { %1916 = vst [vmem:[%s2780_s7 + $0x1e8] sm:$0xff] %v839_v41  ;;  %1918 = vst [vmem:[%s2780_s7 + $0x1f8] sm:$0xff] %v1402_v42 }
 0x115   : > { %v843_v43 = vpop.f32.mrf.mxu0  ;;  %2438 = vmatmul.mubr.msk.bf16.gmra.mxu0 %vm569_vm0, %v2568_v40  ;;  %v1406_v44 = vpop.f32.mrf.mxu1  ;;  %2491 = vmatmul.mubr.msk.bf16.gmra.mxu1 %vm569_vm0, %v2568_v40  ;;  %v2575_v40 = vld [vmem:[%s2653_s3 + $0x138] sm:$0xff]  }
 0x116   : > { %1919 = vst [vmem:[%s2780_s7 + $0x200] sm:$0xff] %v843_v43  ;;  %1921 = vst [vmem:[%s2780_s7 + $0x210] sm:$0xff] %v1406_v44  ;;  %1091 = vmatprep.mubr.bf16.mxu0 %v2597_v2  ;;  %1654 = vmatprep.mubr.bf16.mxu1 %v2597_v2 }
 0x117   : > { %v845_v45 = vpop.f32.mrf.mxu0  ;;  %v1408_v46 = vpop.f32.mrf.mxu1 }
 0x118   : > { %1920 = vst [vmem:[%s2780_s7 + $0x208] sm:$0xff] %v845_v45  ;;  %1922 = vst [vmem:[%s2780_s7 + $0x218] sm:$0xff] %v1408_v46 }
 0x119   : > { %v847_v47 = vpop.f32.mrf.mxu0  ;;  %v1410_v48 = vpop.f32.mrf.mxu1 }
 0x11a   : > { %1923 = vst [vmem:[%s2780_s7 + $0x220] sm:$0xff] %v847_v47  ;;  %1925 = vst [vmem:[%s2780_s7 + $0x230] sm:$0xff] %v1410_v48 }
 0x11b   : > { %v849_v50 = vpop.f32.mrf.mxu0  ;;  %v1412_v51 = vpop.f32.mrf.mxu1 }
 0x11c   : > { %1924 = vst [vmem:[%s2780_s7 + $0x228] sm:$0xff] %v849_v50  ;;  %1926 = vst [vmem:[%s2780_s7 + $0x238] sm:$0xff] %v1412_v51 }
 0x11d   : > { %v853_v52 = vpop.f32.mrf.mxu0  ;;  %2439 = vmatmul.mubr.msk.bf16.gmra.mxu0 %vm569_vm0, %v2569_v49  ;;  %v1416_v53 = vpop.f32.mrf.mxu1  ;;  %2492 = vmatmul.mubr.msk.bf16.gmra.mxu1 %vm569_vm0, %v2569_v49  ;;  %v2576_v49 = vld [vmem:[%s2653_s3 + $0x140] sm:$0xff]  }
 0x11e   : > { %1927 = vst [vmem:[%s2780_s7 + $0x240] sm:$0xff] %v853_v52  ;;  %1929 = vst [vmem:[%s2780_s7 + $0x250] sm:$0xff] %v1416_v53  ;;  %1101 = vmatprep.mubr.bf16.mxu0 %v2597_v2  ;;  %1664 = vmatprep.mubr.bf16.mxu1 %v2597_v2 }
 0x11f   : > { %v855_v54 = vpop.f32.mrf.mxu0  ;;  %v1418_v55 = vpop.f32.mrf.mxu1 }
 0x120   : > { %1928 = vst [vmem:[%s2780_s7 + $0x248] sm:$0xff] %v855_v54  ;;  %1930 = vst [vmem:[%s2780_s7 + $0x258] sm:$0xff] %v1418_v55 }
 0x121   : > { %v857_v56 = vpop.f32.mrf.mxu0  ;;  %v1420_v57 = vpop.f32.mrf.mxu1 }
 0x122   : > { %1931 = vst [vmem:[%s2780_s7 + $0x260] sm:$0xff] %v857_v56  ;;  %1933 = vst [vmem:[%s2780_s7 + $0x270] sm:$0xff] %v1420_v57 }
 0x123   : > { %v859_v59 = vpop.f32.mrf.mxu0  ;;  %v1422_v60 = vpop.f32.mrf.mxu1 }
 0x124   : > { %1932 = vst [vmem:[%s2780_s7 + $0x268] sm:$0xff] %v859_v59  ;;  %1934 = vst [vmem:[%s2780_s7 + $0x278] sm:$0xff] %v1422_v60 }
 0x125   : > { %v863_v61 = vpop.f32.mrf.mxu0  ;;  %2440 = vmatmul.mubr.msk.bf16.gmra.mxu0 %vm569_vm0, %v2570_v58  ;;  %v1426_v62 = vpop.f32.mrf.mxu1  ;;  %2493 = vmatmul.mubr.msk.bf16.gmra.mxu1 %vm569_vm0, %v2570_v58  ;;  %v2577_v58 = vld [vmem:[%s2653_s3 + $0x148] sm:$0xff]  }
 0x126   : > { %1935 = vst [vmem:[%s2780_s7 + $0x280] sm:$0xff] %v863_v61  ;;  %1937 = vst [vmem:[%s2780_s7 + $0x290] sm:$0xff] %v1426_v62  ;;  %1111 = vmatprep.mubr.bf16.mxu0 %v2597_v2  ;;  %1674 = vmatprep.mubr.bf16.mxu1 %v2597_v2 }
 0x127   : > { %v865_v63 = vpop.f32.mrf.mxu0  ;;  %v1428_v0 = vpop.f32.mrf.mxu1 }
 0x128   : > { %1936 = vst [vmem:[%s2780_s7 + $0x288] sm:$0xff] %v865_v63  ;;  %1938 = vst [vmem:[%s2780_s7 + $0x298] sm:$0xff] %v1428_v0 }
 0x129   : > { %v867_v1 = vpop.f32.mrf.mxu0  ;;  %v1430_v3 = vpop.f32.mrf.mxu1 }
 0x12a   : > { %1939 = vst [vmem:[%s2780_s7 + $0x2a0] sm:$0xff] %v867_v1  ;;  %1941 = vst [vmem:[%s2780_s7 + $0x2b0] sm:$0xff] %v1430_v3 }
 0x12b   : > { %v869_v5 = vpop.f32.mrf.mxu0  ;;  %v1432_v6 = vpop.f32.mrf.mxu1 }
 0x12c   : > { %1940 = vst [vmem:[%s2780_s7 + $0x2a8] sm:$0xff] %v869_v5  ;;  %1942 = vst [vmem:[%s2780_s7 + $0x2b8] sm:$0xff] %v1432_v6 }
 0x12d   : > { %v873_v7 = vpop.f32.mrf.mxu0  ;;  %2441 = vmatmul.mubr.msk.bf16.gmra.mxu0 %vm569_vm0, %v2571_v4  ;;  %v1436_v8 = vpop.f32.mrf.mxu1  ;;  %2494 = vmatmul.mubr.msk.bf16.gmra.mxu1 %vm569_vm0, %v2571_v4  ;;  %v2578_v4 = vld [vmem:[%s2653_s3 + $0x150] sm:$0xff]  }
 0x12e   : > { %1943 = vst [vmem:[%s2780_s7 + $0x2c0] sm:$0xff] %v873_v7  ;;  %1945 = vst [vmem:[%s2780_s7 + $0x2d0] sm:$0xff] %v1436_v8  ;;  %1121 = vmatprep.mubr.bf16.mxu0 %v2597_v2  ;;  %1684 = vmatprep.mubr.bf16.mxu1 %v2597_v2 }
 0x12f   : > { %v875_v9 = vpop.f32.mrf.mxu0  ;;  %v1438_v10 = vpop.f32.mrf.mxu1 }
 0x130   : > { %1944 = vst [vmem:[%s2780_s7 + $0x2c8] sm:$0xff] %v875_v9  ;;  %1946 = vst [vmem:[%s2780_s7 + $0x2d8] sm:$0xff] %v1438_v10 }
 0x131   : > { %v877_v11 = vpop.f32.mrf.mxu0  ;;  %v1440_v12 = vpop.f32.mrf.mxu1 }
 0x132   : > { %1947 = vst [vmem:[%s2780_s7 + $0x2e0] sm:$0xff] %v877_v11  ;;  %1949 = vst [vmem:[%s2780_s7 + $0x2f0] sm:$0xff] %v1440_v12 }
 0x133   : > { %v879_v14 = vpop.f32.mrf.mxu0  ;;  %v1442_v15 = vpop.f32.mrf.mxu1 }
 0x134   : > { %1948 = vst [vmem:[%s2780_s7 + $0x2e8] sm:$0xff] %v879_v14  ;;  %1950 = vst [vmem:[%s2780_s7 + $0x2f8] sm:$0xff] %v1442_v15 }
 0x135   : > { %v883_v16 = vpop.f32.mrf.mxu0  ;;  %2442 = vmatmul.mubr.msk.bf16.gmra.mxu0 %vm569_vm0, %v2572_v13  ;;  %v1446_v17 = vpop.f32.mrf.mxu1  ;;  %2495 = vmatmul.mubr.msk.bf16.gmra.mxu1 %vm569_vm0, %v2572_v13  ;;  %v2579_v13 = vld [vmem:[%s2653_s3 + $0x158] sm:$0xff]  }
 0x136   : > { %1951 = vst [vmem:[%s2780_s7 + $0x300] sm:$0xff] %v883_v16  ;;  %1953 = vst [vmem:[%s2780_s7 + $0x310] sm:$0xff] %v1446_v17  ;;  %1131 = vmatprep.mubr.bf16.mxu0 %v2597_v2  ;;  %1694 = vmatprep.mubr.bf16.mxu1 %v2597_v2 }
 0x137   : > { %v885_v18 = vpop.f32.mrf.mxu0  ;;  %v1448_v19 = vpop.f32.mrf.mxu1 }
 0x138   : > { %1952 = vst [vmem:[%s2780_s7 + $0x308] sm:$0xff] %v885_v18  ;;  %1954 = vst [vmem:[%s2780_s7 + $0x318] sm:$0xff] %v1448_v19 }
 0x139   : > { %v887_v20 = vpop.f32.mrf.mxu0  ;;  %v1450_v21 = vpop.f32.mrf.mxu1 }
 0x13a   : > { %1955 = vst [vmem:[%s2780_s7 + $0x320] sm:$0xff] %v887_v20  ;;  %1957 = vst [vmem:[%s2780_s7 + $0x330] sm:$0xff] %v1450_v21 }
 0x13b   : > { %v889_v23 = vpop.f32.mrf.mxu0  ;;  %v1452_v24 = vpop.f32.mrf.mxu1 }
 0x13c   : > { %1956 = vst [vmem:[%s2780_s7 + $0x328] sm:$0xff] %v889_v23  ;;  %1958 = vst [vmem:[%s2780_s7 + $0x338] sm:$0xff] %v1452_v24 }
 0x13d   : > { %v893_v25 = vpop.f32.mrf.mxu0  ;;  %2443 = vmatmul.mubr.msk.bf16.gmra.mxu0 %vm569_vm0, %v2573_v22  ;;  %v1456_v26 = vpop.f32.mrf.mxu1  ;;  %2496 = vmatmul.mubr.msk.bf16.gmra.mxu1 %vm569_vm0, %v2573_v22  ;;  %v2580_v22 = vld [vmem:[%s2653_s3 + $0x160] sm:$0xff]  }
 0x13e   : > { %1959 = vst [vmem:[%s2780_s7 + $0x340] sm:$0xff] %v893_v25  ;;  %1961 = vst [vmem:[%s2780_s7 + $0x350] sm:$0xff] %v1456_v26  ;;  %1141 = vmatprep.mubr.bf16.mxu0 %v2597_v2  ;;  %1704 = vmatprep.mubr.bf16.mxu1 %v2597_v2 }
 0x13f   : > { %v895_v27 = vpop.f32.mrf.mxu0  ;;  %v1458_v28 = vpop.f32.mrf.mxu1 }
 0x140   : > { %1960 = vst [vmem:[%s2780_s7 + $0x348] sm:$0xff] %v895_v27  ;;  %1962 = vst [vmem:[%s2780_s7 + $0x358] sm:$0xff] %v1458_v28 }
 0x141   : > { %v897_v29 = vpop.f32.mrf.mxu0  ;;  %v1460_v30 = vpop.f32.mrf.mxu1 }
 0x142   : > { %1963 = vst [vmem:[%s2780_s7 + $0x360] sm:$0xff] %v897_v29  ;;  %1965 = vst [vmem:[%s2780_s7 + $0x370] sm:$0xff] %v1460_v30 }
 0x143   : > { %v899_v32 = vpop.f32.mrf.mxu0  ;;  %v1462_v33 = vpop.f32.mrf.mxu1 }
 0x144   : > { %1964 = vst [vmem:[%s2780_s7 + $0x368] sm:$0xff] %v899_v32  ;;  %1966 = vst [vmem:[%s2780_s7 + $0x378] sm:$0xff] %v1462_v33 }
 0x145   : > { %v903_v34 = vpop.f32.mrf.mxu0  ;;  %2444 = vmatmul.mubr.msk.bf16.gmra.mxu0 %vm569_vm0, %v2574_v31  ;;  %v1466_v35 = vpop.f32.mrf.mxu1  ;;  %2497 = vmatmul.mubr.msk.bf16.gmra.mxu1 %vm569_vm0, %v2574_v31  ;;  %v2581_v31 = vld [vmem:[%s2653_s3 + $0x168] sm:$0xff]  }
 0x146   : > { %1967 = vst [vmem:[%s2780_s7 + $0x380] sm:$0xff] %v903_v34  ;;  %1969 = vst [vmem:[%s2780_s7 + $0x390] sm:$0xff] %v1466_v35  ;;  %1151 = vmatprep.mubr.bf16.mxu0 %v2597_v2  ;;  %1714 = vmatprep.mubr.bf16.mxu1 %v2597_v2 }
 0x147   : > { %v905_v36 = vpop.f32.mrf.mxu0  ;;  %v1468_v37 = vpop.f32.mrf.mxu1 }
 0x148   : > { %1968 = vst [vmem:[%s2780_s7 + $0x388] sm:$0xff] %v905_v36  ;;  %1970 = vst [vmem:[%s2780_s7 + $0x398] sm:$0xff] %v1468_v37 }
 0x149   : > { %v907_v38 = vpop.f32.mrf.mxu0  ;;  %v1470_v39 = vpop.f32.mrf.mxu1 }
 0x14a   : > { %1971 = vst [vmem:[%s2780_s7 + $0x3a0] sm:$0xff] %v907_v38  ;;  %1973 = vst [vmem:[%s2780_s7 + $0x3b0] sm:$0xff] %v1470_v39 }
 0x14b   : > { %v909_v41 = vpop.f32.mrf.mxu0  ;;  %v1472_v42 = vpop.f32.mrf.mxu1 }
 0x14c   : > { %1972 = vst [vmem:[%s2780_s7 + $0x3a8] sm:$0xff] %v909_v41  ;;  %1974 = vst [vmem:[%s2780_s7 + $0x3b8] sm:$0xff] %v1472_v42 }
 0x14d   : > { %v913_v43 = vpop.f32.mrf.mxu0  ;;  %2445 = vmatmul.mubr.msk.bf16.gmra.mxu0 %vm569_vm0, %v2575_v40  ;;  %v1476_v44 = vpop.f32.mrf.mxu1  ;;  %2498 = vmatmul.mubr.msk.bf16.gmra.mxu1 %vm569_vm0, %v2575_v40  ;;  %v2582_v40 = vld [vmem:[%s2653_s3 + $0x170] sm:$0xff]  }
 0x14e   : > { %1975 = vst [vmem:[%s2780_s7 + $0x3c0] sm:$0xff] %v913_v43  ;;  %1977 = vst [vmem:[%s2780_s7 + $0x3d0] sm:$0xff] %v1476_v44  ;;  %1161 = vmatprep.mubr.bf16.mxu0 %v2597_v2  ;;  %1724 = vmatprep.mubr.bf16.mxu1 %v2597_v2 }
 0x14f   : > { %v915_v45 = vpop.f32.mrf.mxu0  ;;  %v1478_v46 = vpop.f32.mrf.mxu1 }
 0x150   : > { %1976 = vst [vmem:[%s2780_s7 + $0x3c8] sm:$0xff] %v915_v45  ;;  %1978 = vst [vmem:[%s2780_s7 + $0x3d8] sm:$0xff] %v1478_v46 }
 0x151   : > { %v917_v47 = vpop.f32.mrf.mxu0  ;;  %v1480_v48 = vpop.f32.mrf.mxu1 }
 0x152   : > { %1979 = vst [vmem:[%s2780_s7 + $0x3e0] sm:$0xff] %v917_v47  ;;  %1981 = vst [vmem:[%s2780_s7 + $0x3f0] sm:$0xff] %v1480_v48 }
 0x153   : > { %v919_v50 = vpop.f32.mrf.mxu0  ;;  %v1482_v51 = vpop.f32.mrf.mxu1 }
 0x154   : > { %1980 = vst [vmem:[%s2780_s7 + $0x3e8] sm:$0xff] %v919_v50  ;;  %1982 = vst [vmem:[%s2780_s7 + $0x3f8] sm:$0xff] %v1482_v51 }
 0x155   : > { %v923_v52 = vpop.f32.mrf.mxu0  ;;  %2446 = vmatmul.mubr.msk.bf16.gmra.mxu0 %vm569_vm0, %v2576_v49  ;;  %v1486_v53 = vpop.f32.mrf.mxu1  ;;  %2499 = vmatmul.mubr.msk.bf16.gmra.mxu1 %vm569_vm0, %v2576_v49  ;;  %v2583_v49 = vld [vmem:[%s2653_s3 + $0x178] sm:$0xff]  }
 0x156   : > { %1983 = vst [vmem:[%s2780_s7 + $0x400] sm:$0xff] %v923_v52  ;;  %1985 = vst [vmem:[%s2780_s7 + $0x410] sm:$0xff] %v1486_v53  ;;  %1171 = vmatprep.mubr.bf16.mxu0 %v2597_v2  ;;  %1734 = vmatprep.mubr.bf16.mxu1 %v2597_v2 }
 0x157   : > { %v925_v54 = vpop.f32.mrf.mxu0  ;;  %v1488_v55 = vpop.f32.mrf.mxu1 }
 0x158   : > { %1984 = vst [vmem:[%s2780_s7 + $0x408] sm:$0xff] %v925_v54  ;;  %1986 = vst [vmem:[%s2780_s7 + $0x418] sm:$0xff] %v1488_v55 }
 0x159   : > { %v927_v56 = vpop.f32.mrf.mxu0  ;;  %v1490_v57 = vpop.f32.mrf.mxu1 }
 0x15a   : > { %1987 = vst [vmem:[%s2780_s7 + $0x420] sm:$0xff] %v927_v56  ;;  %1989 = vst [vmem:[%s2780_s7 + $0x430] sm:$0xff] %v1490_v57 }
 0x15b   : > { %v929_v59 = vpop.f32.mrf.mxu0  ;;  %v1492_v60 = vpop.f32.mrf.mxu1 }
 0x15c   : > { %1988 = vst [vmem:[%s2780_s7 + $0x428] sm:$0xff] %v929_v59  ;;  %1990 = vst [vmem:[%s2780_s7 + $0x438] sm:$0xff] %v1492_v60 }
 0x15d   : > { %v933_v61 = vpop.f32.mrf.mxu0  ;;  %2447 = vmatmul.mubr.msk.bf16.gmra.mxu0 %vm569_vm0, %v2577_v58  ;;  %v1496_v62 = vpop.f32.mrf.mxu1  ;;  %2500 = vmatmul.mubr.msk.bf16.gmra.mxu1 %vm569_vm0, %v2577_v58  ;;  %v2584_v58 = vld [vmem:[%s2653_s3 + $0x180] sm:$0xff]  }
 0x15e   : > { %1991 = vst [vmem:[%s2780_s7 + $0x440] sm:$0xff] %v933_v61  ;;  %1993 = vst [vmem:[%s2780_s7 + $0x450] sm:$0xff] %v1496_v62  ;;  %1181 = vmatprep.mubr.bf16.mxu0 %v2597_v2  ;;  %1744 = vmatprep.mubr.bf16.mxu1 %v2597_v2 }
 0x15f   : > { %v935_v63 = vpop.f32.mrf.mxu0  ;;  %v1498_v0 = vpop.f32.mrf.mxu1 }
 0x160   : > { %1992 = vst [vmem:[%s2780_s7 + $0x448] sm:$0xff] %v935_v63  ;;  %1994 = vst [vmem:[%s2780_s7 + $0x458] sm:$0xff] %v1498_v0 }
 0x161   : > { %v937_v1 = vpop.f32.mrf.mxu0  ;;  %v1500_v3 = vpop.f32.mrf.mxu1 }
 0x162   : > { %1995 = vst [vmem:[%s2780_s7 + $0x460] sm:$0xff] %v937_v1  ;;  %1997 = vst [vmem:[%s2780_s7 + $0x470] sm:$0xff] %v1500_v3 }
 0x163   : > { %v939_v5 = vpop.f32.mrf.mxu0  ;;  %v1502_v6 = vpop.f32.mrf.mxu1 }
 0x164   : > { %1996 = vst [vmem:[%s2780_s7 + $0x468] sm:$0xff] %v939_v5  ;;  %1998 = vst [vmem:[%s2780_s7 + $0x478] sm:$0xff] %v1502_v6 }
 0x165   : > { %v943_v7 = vpop.f32.mrf.mxu0  ;;  %2448 = vmatmul.mubr.msk.bf16.gmra.mxu0 %vm569_vm0, %v2578_v4  ;;  %v1506_v8 = vpop.f32.mrf.mxu1  ;;  %2501 = vmatmul.mubr.msk.bf16.gmra.mxu1 %vm569_vm0, %v2578_v4  ;;  %v2585_v4 = vld [vmem:[%s2653_s3 + $0x188] sm:$0xff]  }
 0x166   : > { %1999 = vst [vmem:[%s2780_s7 + $0x480] sm:$0xff] %v943_v7  ;;  %2001 = vst [vmem:[%s2780_s7 + $0x490] sm:$0xff] %v1506_v8  ;;  %1191 = vmatprep.mubr.bf16.mxu0 %v2597_v2  ;;  %1754 = vmatprep.mubr.bf16.mxu1 %v2597_v2 }
 0x167   : > { %v945_v9 = vpop.f32.mrf.mxu0  ;;  %v1508_v10 = vpop.f32.mrf.mxu1 }
 0x168   : > { %2000 = vst [vmem:[%s2780_s7 + $0x488] sm:$0xff] %v945_v9  ;;  %2002 = vst [vmem:[%s2780_s7 + $0x498] sm:$0xff] %v1508_v10 }
 0x169   : > { %v947_v11 = vpop.f32.mrf.mxu0  ;;  %v1510_v12 = vpop.f32.mrf.mxu1 }
 0x16a   : > { %2003 = vst [vmem:[%s2780_s7 + $0x4a0] sm:$0xff] %v947_v11  ;;  %2005 = vst [vmem:[%s2780_s7 + $0x4b0] sm:$0xff] %v1510_v12 }
 0x16b   : > { %v949_v14 = vpop.f32.mrf.mxu0  ;;  %v1512_v15 = vpop.f32.mrf.mxu1 }
 0x16c   : > { %2004 = vst [vmem:[%s2780_s7 + $0x4a8] sm:$0xff] %v949_v14  ;;  %2006 = vst [vmem:[%s2780_s7 + $0x4b8] sm:$0xff] %v1512_v15 }
 0x16d   : > { %v953_v16 = vpop.f32.mrf.mxu0  ;;  %2449 = vmatmul.mubr.msk.bf16.gmra.mxu0 %vm569_vm0, %v2579_v13  ;;  %v1516_v17 = vpop.f32.mrf.mxu1  ;;  %2502 = vmatmul.mubr.msk.bf16.gmra.mxu1 %vm569_vm0, %v2579_v13  ;;  %v2586_v13 = vld [vmem:[%s2653_s3 + $0x190] sm:$0xff]  }
 0x16e   : > { %2007 = vst [vmem:[%s2780_s7 + $0x4c0] sm:$0xff] %v953_v16  ;;  %2009 = vst [vmem:[%s2780_s7 + $0x4d0] sm:$0xff] %v1516_v17  ;;  %1201 = vmatprep.mubr.bf16.mxu0 %v2597_v2  ;;  %1764 = vmatprep.mubr.bf16.mxu1 %v2597_v2 }
 0x16f   : > { %v955_v18 = vpop.f32.mrf.mxu0  ;;  %v1518_v19 = vpop.f32.mrf.mxu1 }
 0x170   : > { %2008 = vst [vmem:[%s2780_s7 + $0x4c8] sm:$0xff] %v955_v18  ;;  %2010 = vst [vmem:[%s2780_s7 + $0x4d8] sm:$0xff] %v1518_v19 }
 0x171   : > { %v957_v20 = vpop.f32.mrf.mxu0  ;;  %v1520_v21 = vpop.f32.mrf.mxu1 }
 0x172   : > { %2011 = vst [vmem:[%s2780_s7 + $0x4e0] sm:$0xff] %v957_v20  ;;  %2013 = vst [vmem:[%s2780_s7 + $0x4f0] sm:$0xff] %v1520_v21 }
 0x173   : > { %v959_v23 = vpop.f32.mrf.mxu0  ;;  %v1522_v24 = vpop.f32.mrf.mxu1 }
 0x174   : > { %2012 = vst [vmem:[%s2780_s7 + $0x4e8] sm:$0xff] %v959_v23  ;;  %2014 = vst [vmem:[%s2780_s7 + $0x4f8] sm:$0xff] %v1522_v24 }
 0x175   : > { %v963_v25 = vpop.f32.mrf.mxu0  ;;  %2450 = vmatmul.mubr.msk.bf16.gmra.mxu0 %vm569_vm0, %v2580_v22  ;;  %v1526_v26 = vpop.f32.mrf.mxu1  ;;  %2503 = vmatmul.mubr.msk.bf16.gmra.mxu1 %vm569_vm0, %v2580_v22  ;;  %v2587_v22 = vld [vmem:[%s2653_s3 + $0x198] sm:$0xff]  }
 0x176   : > { %2015 = vst [vmem:[%s2780_s7 + $0x500] sm:$0xff] %v963_v25  ;;  %2017 = vst [vmem:[%s2780_s7 + $0x510] sm:$0xff] %v1526_v26  ;;  %1211 = vmatprep.mubr.bf16.mxu0 %v2597_v2  ;;  %1774 = vmatprep.mubr.bf16.mxu1 %v2597_v2 }
 0x177   : > { %v965_v27 = vpop.f32.mrf.mxu0  ;;  %v1528_v28 = vpop.f32.mrf.mxu1 }
 0x178   : > { %2016 = vst [vmem:[%s2780_s7 + $0x508] sm:$0xff] %v965_v27  ;;  %2018 = vst [vmem:[%s2780_s7 + $0x518] sm:$0xff] %v1528_v28 }
 0x179   : > { %v967_v29 = vpop.f32.mrf.mxu0  ;;  %v1530_v30 = vpop.f32.mrf.mxu1 }
 0x17a   : > { %2019 = vst [vmem:[%s2780_s7 + $0x520] sm:$0xff] %v967_v29  ;;  %2021 = vst [vmem:[%s2780_s7 + $0x530] sm:$0xff] %v1530_v30 }
 0x17b   : > { %v969_v32 = vpop.f32.mrf.mxu0  ;;  %v1532_v33 = vpop.f32.mrf.mxu1 }
 0x17c   : > { %2020 = vst [vmem:[%s2780_s7 + $0x528] sm:$0xff] %v969_v32  ;;  %2022 = vst [vmem:[%s2780_s7 + $0x538] sm:$0xff] %v1532_v33 }
 0x17d   : > { %v973_v34 = vpop.f32.mrf.mxu0  ;;  %2451 = vmatmul.mubr.msk.bf16.gmra.mxu0 %vm569_vm0, %v2581_v31  ;;  %v1536_v35 = vpop.f32.mrf.mxu1  ;;  %2504 = vmatmul.mubr.msk.bf16.gmra.mxu1 %vm569_vm0, %v2581_v31  ;;  %v2588_v31 = vld [vmem:[%s2653_s3 + $0x1a0] sm:$0xff]  }
 0x17e   : > { %2023 = vst [vmem:[%s2780_s7 + $0x540] sm:$0xff] %v973_v34  ;;  %2025 = vst [vmem:[%s2780_s7 + $0x550] sm:$0xff] %v1536_v35  ;;  %1221 = vmatprep.mubr.bf16.mxu0 %v2597_v2  ;;  %1784 = vmatprep.mubr.bf16.mxu1 %v2597_v2 }
 0x17f   : > { %v975_v36 = vpop.f32.mrf.mxu0  ;;  %v1538_v37 = vpop.f32.mrf.mxu1 }
 0x180   : > { %2024 = vst [vmem:[%s2780_s7 + $0x548] sm:$0xff] %v975_v36  ;;  %2026 = vst [vmem:[%s2780_s7 + $0x558] sm:$0xff] %v1538_v37 }
 0x181   : > { %v977_v38 = vpop.f32.mrf.mxu0  ;;  %v1540_v39 = vpop.f32.mrf.mxu1 }
 0x182   : > { %2027 = vst [vmem:[%s2780_s7 + $0x560] sm:$0xff] %v977_v38  ;;  %2029 = vst [vmem:[%s2780_s7 + $0x570] sm:$0xff] %v1540_v39 }
 0x183   : > { %v979_v41 = vpop.f32.mrf.mxu0  ;;  %v1542_v42 = vpop.f32.mrf.mxu1 }
 0x184   : > { %2028 = vst [vmem:[%s2780_s7 + $0x568] sm:$0xff] %v979_v41  ;;  %2030 = vst [vmem:[%s2780_s7 + $0x578] sm:$0xff] %v1542_v42 }
 0x185   : > { %v983_v43 = vpop.f32.mrf.mxu0  ;;  %2452 = vmatmul.mubr.msk.bf16.gmra.mxu0 %vm569_vm0, %v2582_v40  ;;  %v1546_v44 = vpop.f32.mrf.mxu1  ;;  %2505 = vmatmul.mubr.msk.bf16.gmra.mxu1 %vm569_vm0, %v2582_v40 }
 0x186   : > { %2031 = vst [vmem:[%s2780_s7 + $0x580] sm:$0xff] %v983_v43  ;;  %2033 = vst [vmem:[%s2780_s7 + $0x590] sm:$0xff] %v1546_v44  ;;  %1231 = vmatprep.mubr.bf16.mxu0 %v2597_v2  ;;  %1794 = vmatprep.mubr.bf16.mxu1 %v2597_v2 }
 0x187   : > { %v985_v45 = vpop.f32.mrf.mxu0  ;;  %v1548_v46 = vpop.f32.mrf.mxu1 }
 0x188   : > { %2032 = vst [vmem:[%s2780_s7 + $0x588] sm:$0xff] %v985_v45  ;;  %2034 = vst [vmem:[%s2780_s7 + $0x598] sm:$0xff] %v1548_v46 }
 0x189   : > { %v987_v47 = vpop.f32.mrf.mxu0  ;;  %v1550_v48 = vpop.f32.mrf.mxu1 }
 0x18a   : > { %2035 = vst [vmem:[%s2780_s7 + $0x5a0] sm:$0xff] %v987_v47  ;;  %2037 = vst [vmem:[%s2780_s7 + $0x5b0] sm:$0xff] %v1550_v48 }
 0x18b   : > { %v989_v50 = vpop.f32.mrf.mxu0  ;;  %v1552_v51 = vpop.f32.mrf.mxu1 }
 0x18c   : > { %2036 = vst [vmem:[%s2780_s7 + $0x5a8] sm:$0xff] %v989_v50  ;;  %2038 = vst [vmem:[%s2780_s7 + $0x5b8] sm:$0xff] %v1552_v51 }
 0x18d   : > { %v993_v52 = vpop.f32.mrf.mxu0  ;;  %2453 = vmatmul.mubr.msk.bf16.gmra.mxu0 %vm569_vm0, %v2583_v49  ;;  %v1556_v53 = vpop.f32.mrf.mxu1  ;;  %2506 = vmatmul.mubr.msk.bf16.gmra.mxu1 %vm569_vm0, %v2583_v49 }
 0x18e   : > { %2039 = vst [vmem:[%s2780_s7 + $0x5c0] sm:$0xff] %v993_v52  ;;  %2041 = vst [vmem:[%s2780_s7 + $0x5d0] sm:$0xff] %v1556_v53  ;;  %1241 = vmatprep.mubr.bf16.mxu0 %v2597_v2  ;;  %1804 = vmatprep.mubr.bf16.mxu1 %v2597_v2 }
 0x18f   : > { %v995_v54 = vpop.f32.mrf.mxu0  ;;  %v1558_v55 = vpop.f32.mrf.mxu1 }
 0x190   : > { %2040 = vst [vmem:[%s2780_s7 + $0x5c8] sm:$0xff] %v995_v54  ;;  %2042 = vst [vmem:[%s2780_s7 + $0x5d8] sm:$0xff] %v1558_v55 }
 0x191   : > { %v997_v56 = vpop.f32.mrf.mxu0  ;;  %v1560_v57 = vpop.f32.mrf.mxu1 }
 0x192   : > { %2043 = vst [vmem:[%s2780_s7 + $0x5e0] sm:$0xff] %v997_v56  ;;  %2045 = vst [vmem:[%s2780_s7 + $0x5f0] sm:$0xff] %v1560_v57 }
 0x193   : > { %v999_v59 = vpop.f32.mrf.mxu0  ;;  %v1562_v60 = vpop.f32.mrf.mxu1 }
 0x194   : > { %2044 = vst [vmem:[%s2780_s7 + $0x5e8] sm:$0xff] %v999_v59  ;;  %2046 = vst [vmem:[%s2780_s7 + $0x5f8] sm:$0xff] %v1562_v60 }
 0x195   : > { %v1003_v61 = vpop.f32.mrf.mxu0  ;;  %2454 = vmatmul.mubr.msk.bf16.gmra.mxu0 %vm569_vm0, %v2584_v58  ;;  %v1566_v62 = vpop.f32.mrf.mxu1  ;;  %2507 = vmatmul.mubr.msk.bf16.gmra.mxu1 %vm569_vm0, %v2584_v58 }
 0x196   : > { %2047 = vst [vmem:[%s2780_s7 + $0x600] sm:$0xff] %v1003_v61  ;;  %2049 = vst [vmem:[%s2780_s7 + $0x610] sm:$0xff] %v1566_v62  ;;  %1251 = vmatprep.mubr.bf16.mxu0 %v2597_v2  ;;  %1814 = vmatprep.mubr.bf16.mxu1 %v2597_v2 }
 0x197   : > { %v1005_v63 = vpop.f32.mrf.mxu0  ;;  %v1568_v0 = vpop.f32.mrf.mxu1 }
 0x198   : > { %2048 = vst [vmem:[%s2780_s7 + $0x608] sm:$0xff] %v1005_v63  ;;  %2050 = vst [vmem:[%s2780_s7 + $0x618] sm:$0xff] %v1568_v0 }
 0x199   : > { %v1007_v1 = vpop.f32.mrf.mxu0  ;;  %v1570_v3 = vpop.f32.mrf.mxu1 }
 0x19a   : > { %2051 = vst [vmem:[%s2780_s7 + $0x620] sm:$0xff] %v1007_v1  ;;  %2053 = vst [vmem:[%s2780_s7 + $0x630] sm:$0xff] %v1570_v3 }
 0x19b   : > { %v1009_v5 = vpop.f32.mrf.mxu0  ;;  %v1572_v6 = vpop.f32.mrf.mxu1 }
 0x19c   : > { %2052 = vst [vmem:[%s2780_s7 + $0x628] sm:$0xff] %v1009_v5  ;;  %2054 = vst [vmem:[%s2780_s7 + $0x638] sm:$0xff] %v1572_v6 }
 0x19d   : > { %v1013_v7 = vpop.f32.mrf.mxu0  ;;  %2455 = vmatmul.mubr.msk.bf16.gmra.mxu0 %vm569_vm0, %v2585_v4  ;;  %v1576_v8 = vpop.f32.mrf.mxu1  ;;  %2508 = vmatmul.mubr.msk.bf16.gmra.mxu1 %vm569_vm0, %v2585_v4 }
 0x19e   : > { %2055 = vst [vmem:[%s2780_s7 + $0x640] sm:$0xff] %v1013_v7  ;;  %2057 = vst [vmem:[%s2780_s7 + $0x650] sm:$0xff] %v1576_v8  ;;  %1261 = vmatprep.mubr.bf16.mxu0 %v2597_v2  ;;  %1824 = vmatprep.mubr.bf16.mxu1 %v2597_v2 }
 0x19f   : > { %v1015_v9 = vpop.f32.mrf.mxu0  ;;  %v1578_v10 = vpop.f32.mrf.mxu1 }
 0x1a0   : > { %2056 = vst [vmem:[%s2780_s7 + $0x648] sm:$0xff] %v1015_v9  ;;  %2058 = vst [vmem:[%s2780_s7 + $0x658] sm:$0xff] %v1578_v10 }
 0x1a1   : > { %v1017_v11 = vpop.f32.mrf.mxu0  ;;  %v1580_v12 = vpop.f32.mrf.mxu1 }
 0x1a2   : > { %2059 = vst [vmem:[%s2780_s7 + $0x660] sm:$0xff] %v1017_v11  ;;  %2061 = vst [vmem:[%s2780_s7 + $0x670] sm:$0xff] %v1580_v12 }
 0x1a3   : > { %v1019_v14 = vpop.f32.mrf.mxu0  ;;  %v1582_v15 = vpop.f32.mrf.mxu1 }
 0x1a4   : > { %2060 = vst [vmem:[%s2780_s7 + $0x668] sm:$0xff] %v1019_v14  ;;  %2062 = vst [vmem:[%s2780_s7 + $0x678] sm:$0xff] %v1582_v15 }
 0x1a5   : > { %v1023_v16 = vpop.f32.mrf.mxu0  ;;  %2456 = vmatmul.mubr.msk.bf16.gmra.mxu0 %vm569_vm0, %v2586_v13  ;;  %v1586_v17 = vpop.f32.mrf.mxu1  ;;  %2509 = vmatmul.mubr.msk.bf16.gmra.mxu1 %vm569_vm0, %v2586_v13 }
 0x1a6   : > { %2063 = vst [vmem:[%s2780_s7 + $0x680] sm:$0xff] %v1023_v16  ;;  %2065 = vst [vmem:[%s2780_s7 + $0x690] sm:$0xff] %v1586_v17  ;;  %1271 = vmatprep.mubr.bf16.mxu0 %v2597_v2  ;;  %1834 = vmatprep.mubr.bf16.mxu1 %v2597_v2 }
 0x1a7   : > { %v1025_v18 = vpop.f32.mrf.mxu0  ;;  %v1588_v19 = vpop.f32.mrf.mxu1 }
 0x1a8   : > { %2064 = vst [vmem:[%s2780_s7 + $0x688] sm:$0xff] %v1025_v18  ;;  %2066 = vst [vmem:[%s2780_s7 + $0x698] sm:$0xff] %v1588_v19 }
 0x1a9   : > { %v1027_v20 = vpop.f32.mrf.mxu0  ;;  %v1590_v21 = vpop.f32.mrf.mxu1 }
 0x1aa   : > { %2067 = vst [vmem:[%s2780_s7 + $0x6a0] sm:$0xff] %v1027_v20  ;;  %2069 = vst [vmem:[%s2780_s7 + $0x6b0] sm:$0xff] %v1590_v21 }
 0x1ab   : > { %v1029_v23 = vpop.f32.mrf.mxu0  ;;  %v1592_v24 = vpop.f32.mrf.mxu1 }
 0x1ac   : > { %2068 = vst [vmem:[%s2780_s7 + $0x6a8] sm:$0xff] %v1029_v23  ;;  %2070 = vst [vmem:[%s2780_s7 + $0x6b8] sm:$0xff] %v1592_v24 }
 0x1ad   : > { %v1033_v25 = vpop.f32.mrf.mxu0  ;;  %2457 = vmatmul.mubr.msk.bf16.gmra.mxu0 %vm569_vm0, %v2587_v22  ;;  %v1596_v26 = vpop.f32.mrf.mxu1  ;;  %2510 = vmatmul.mubr.msk.bf16.gmra.mxu1 %vm569_vm0, %v2587_v22 }
 0x1ae   : > { %2071 = vst [vmem:[%s2780_s7 + $0x6c0] sm:$0xff] %v1033_v25  ;;  %2073 = vst [vmem:[%s2780_s7 + $0x6d0] sm:$0xff] %v1596_v26  ;;  %1281 = vmatprep.mubr.bf16.mxu0 %v2597_v2  ;;  %1844 = vmatprep.mubr.bf16.mxu1 %v2597_v2 }
 0x1af   : > { %v1035_v27 = vpop.f32.mrf.mxu0  ;;  %v1598_v28 = vpop.f32.mrf.mxu1 }
 0x1b0   : > { %2072 = vst [vmem:[%s2780_s7 + $0x6c8] sm:$0xff] %v1035_v27  ;;  %2074 = vst [vmem:[%s2780_s7 + $0x6d8] sm:$0xff] %v1598_v28 }
 0x1b1   : > { %v1037_v29 = vpop.f32.mrf.mxu0  ;;  %v1600_v30 = vpop.f32.mrf.mxu1 }
 0x1b2   : > { %2075 = vst [vmem:[%s2780_s7 + $0x6e0] sm:$0xff] %v1037_v29  ;;  %2077 = vst [vmem:[%s2780_s7 + $0x6f0] sm:$0xff] %v1600_v30 }
 0x1b3   : > { %v1039_v32 = vpop.f32.mrf.mxu0  ;;  %v1602_v33 = vpop.f32.mrf.mxu1 }
 0x1b4   : > { %2076 = vst [vmem:[%s2780_s7 + $0x6e8] sm:$0xff] %v1039_v32  ;;  %2078 = vst [vmem:[%s2780_s7 + $0x6f8] sm:$0xff] %v1602_v33 }
 0x1b5   : > { %v1043_v2 = vpop.f32.mrf.mxu0  ;;  %2458 = vmatmul.mubr.msk.bf16.gmra.mxu0 %vm569_vm0, %v2588_v31  ;;  %v1606_v34 = vpop.f32.mrf.mxu1  ;;  %2511 = vmatmul.mubr.msk.bf16.gmra.mxu1 %vm569_vm0, %v2588_v31 }
 0x1b6   : > { %2079 = vst [vmem:[%s2780_s7 + $0x700] sm:$0xff] %v1043_v2  ;;  %2081 = vst [vmem:[%s2780_s7 + $0x710] sm:$0xff] %v1606_v34 }
 0x1b7   : > { %v1045_v35 = vpop.f32.mrf.mxu0  ;;  %v1608_v36 = vpop.f32.mrf.mxu1 }
 0x1b8   : > { %2080 = vst [vmem:[%s2780_s7 + $0x708] sm:$0xff] %v1045_v35  ;;  %2082 = vst [vmem:[%s2780_s7 + $0x718] sm:$0xff] %v1608_v36 }
 0x1b9   : > { %v1047_v37 = vpop.f32.mrf.mxu0  ;;  %v1610_v38 = vpop.f32.mrf.mxu1 }
 0x1ba   : > { %2083 = vst [vmem:[%s2780_s7 + $0x720] sm:$0xff] %v1047_v37  ;;  %2085 = vst [vmem:[%s2780_s7 + $0x730] sm:$0xff] %v1610_v38 }
 0x1bb   : > { %v1049_v39 = vpop.f32.mrf.mxu0  ;;  %v1612_v40 = vpop.f32.mrf.mxu1 }
 0x1bc   : > { %2084 = vst [vmem:[%s2780_s7 + $0x728] sm:$0xff] %v1049_v39  ;;  %2086 = vst [vmem:[%s2780_s7 + $0x738] sm:$0xff] %v1612_v40 }
 0x1bd   : > { %v1053_v41 = vpop.f32.mrf.mxu0  ;;  %v1616_v42 = vpop.f32.mrf.mxu1 }
 0x1be   : > { %2087 = vst [vmem:[%s2780_s7 + $0x740] sm:$0xff] %v1053_v41  ;;  %2089 = vst [vmem:[%s2780_s7 + $0x750] sm:$0xff] %v1616_v42 }
 0x1bf   : > { %v1055_v43 = vpop.f32.mrf.mxu0  ;;  %v1618_v44 = vpop.f32.mrf.mxu1 }
 0x1c0   : > { %2088 = vst [vmem:[%s2780_s7 + $0x748] sm:$0xff] %v1055_v43  ;;  %2090 = vst [vmem:[%s2780_s7 + $0x758] sm:$0xff] %v1618_v44 }
 0x1c1   : > { %v1057_v45 = vpop.f32.mrf.mxu0  ;;  %v1620_v46 = vpop.f32.mrf.mxu1 }
 0x1c2   : > { %2091 = vst [vmem:[%s2780_s7 + $0x760] sm:$0xff] %v1057_v45  ;;  %2093 = vst [vmem:[%s2780_s7 + $0x770] sm:$0xff] %v1620_v46 }
 0x1c3   : > { %v1059_v47 = vpop.f32.mrf.mxu0  ;;  %v1622_v48 = vpop.f32.mrf.mxu1 }
 0x1c4   : > { %2092 = vst [vmem:[%s2780_s7 + $0x768] sm:$0xff] %v1059_v47  ;;  %2094 = vst [vmem:[%s2780_s7 + $0x778] sm:$0xff] %v1622_v48 }
 0x1c5   : > { %v1063_v49 = vpop.f32.mrf.mxu0  ;;  %v1626_v50 = vpop.f32.mrf.mxu1 }
 0x1c6   : > { %2095 = vst [vmem:[%s2780_s7 + $0x780] sm:$0xff] %v1063_v49  ;;  %2097 = vst [vmem:[%s2780_s7 + $0x790] sm:$0xff] %v1626_v50 }
 0x1c7   : > { %v1065_v51 = vpop.f32.mrf.mxu0  ;;  %v1628_v52 = vpop.f32.mrf.mxu1 }
 0x1c8   : > { %2096 = vst [vmem:[%s2780_s7 + $0x788] sm:$0xff] %v1065_v51  ;;  %2098 = vst [vmem:[%s2780_s7 + $0x798] sm:$0xff] %v1628_v52 }
 0x1c9   : > { %v1067_v53 = vpop.f32.mrf.mxu0  ;;  %v1630_v54 = vpop.f32.mrf.mxu1 }
 0x1ca   : > { %2099 = vst [vmem:[%s2780_s7 + $0x7a0] sm:$0xff] %v1067_v53  ;;  %2101 = vst [vmem:[%s2780_s7 + $0x7b0] sm:$0xff] %v1630_v54 }
 0x1cb   : > { %v1069_v55 = vpop.f32.mrf.mxu0  ;;  %v1632_v56 = vpop.f32.mrf.mxu1 }
 0x1cc   : > { %2100 = vst [vmem:[%s2780_s7 + $0x7a8] sm:$0xff] %v1069_v55  ;;  %2102 = vst [vmem:[%s2780_s7 + $0x7b8] sm:$0xff] %v1632_v56 }
 0x1cd   : > { %v1073_v57 = vpop.f32.mrf.mxu0  ;;  %v1636_v58 = vpop.f32.mrf.mxu1 }
 0x1ce   : > { %2103 = vst [vmem:[%s2780_s7 + $0x7c0] sm:$0xff] %v1073_v57  ;;  %2105 = vst [vmem:[%s2780_s7 + $0x7d0] sm:$0xff] %v1636_v58 }
 0x1cf   : > { %v1075_v59 = vpop.f32.mrf.mxu0  ;;  %v1638_v60 = vpop.f32.mrf.mxu1 }
 0x1d0   : > { %2104 = vst [vmem:[%s2780_s7 + $0x7c8] sm:$0xff] %v1075_v59  ;;  %2106 = vst [vmem:[%s2780_s7 + $0x7d8] sm:$0xff] %v1638_v60 }
 0x1d1   : > { %v1077_v61 = vpop.f32.mrf.mxu0  ;;  %v1640_v62 = vpop.f32.mrf.mxu1 }
 0x1d2   : > { %2107 = vst [vmem:[%s2780_s7 + $0x7e0] sm:$0xff] %v1077_v61  ;;  %2109 = vst [vmem:[%s2780_s7 + $0x7f0] sm:$0xff] %v1640_v62 }
 0x1d3   : > { %v1079_v63 = vpop.f32.mrf.mxu0  ;;  %v1642_v0 = vpop.f32.mrf.mxu1 }
 0x1d4   : > { %2108 = vst [vmem:[%s2780_s7 + $0x7e8] sm:$0xff] %v1079_v63  ;;  %2110 = vst [vmem:[%s2780_s7 + $0x7f8] sm:$0xff] %v1642_v0 }
 0x1d5   : > { %v1083_v1 = vpop.f32.mrf.mxu0  ;;  %v1646_v3 = vpop.f32.mrf.mxu1 }
 0x1d6   : > { %2111 = vst [vmem:[%s2780_s7 + $0x800] sm:$0xff] %v1083_v1  ;;  %2113 = vst [vmem:[%s2780_s7 + $0x810] sm:$0xff] %v1646_v3 }
 0x1d7   : > { %v1085_v4 = vpop.f32.mrf.mxu0  ;;  %v1648_v5 = vpop.f32.mrf.mxu1 }
 0x1d8   : > { %2112 = vst [vmem:[%s2780_s7 + $0x808] sm:$0xff] %v1085_v4  ;;  %2114 = vst [vmem:[%s2780_s7 + $0x818] sm:$0xff] %v1648_v5 }
 0x1d9   : > { %v1087_v6 = vpop.f32.mrf.mxu0  ;;  %v1650_v7 = vpop.f32.mrf.mxu1 }
 0x1da   : > { %2115 = vst [vmem:[%s2780_s7 + $0x820] sm:$0xff] %v1087_v6  ;;  %2117 = vst [vmem:[%s2780_s7 + $0x830] sm:$0xff] %v1650_v7 }
 0x1db   : > { %v1089_v8 = vpop.f32.mrf.mxu0  ;;  %v1652_v9 = vpop.f32.mrf.mxu1 }
 0x1dc   : > { %2116 = vst [vmem:[%s2780_s7 + $0x828] sm:$0xff] %v1089_v8  ;;  %2118 = vst [vmem:[%s2780_s7 + $0x838] sm:$0xff] %v1652_v9 }
 0x1dd   : > { %v1093_v10 = vpop.f32.mrf.mxu0  ;;  %v1656_v11 = vpop.f32.mrf.mxu1 }
 0x1de   : > { %2119 = vst [vmem:[%s2780_s7 + $0x840] sm:$0xff] %v1093_v10  ;;  %2121 = vst [vmem:[%s2780_s7 + $0x850] sm:$0xff] %v1656_v11 }
 0x1df   : > { %v1095_v12 = vpop.f32.mrf.mxu0  ;;  %v1658_v13 = vpop.f32.mrf.mxu1 }
 0x1e0   : > { %2120 = vst [vmem:[%s2780_s7 + $0x848] sm:$0xff] %v1095_v12  ;;  %2122 = vst [vmem:[%s2780_s7 + $0x858] sm:$0xff] %v1658_v13 }
 0x1e1   : > { %v1097_v14 = vpop.f32.mrf.mxu0  ;;  %v1660_v15 = vpop.f32.mrf.mxu1 }
 0x1e2   : > { %2123 = vst [vmem:[%s2780_s7 + $0x860] sm:$0xff] %v1097_v14  ;;  %2125 = vst [vmem:[%s2780_s7 + $0x870] sm:$0xff] %v1660_v15 }
 0x1e3   : > { %v1099_v16 = vpop.f32.mrf.mxu0  ;;  %v1662_v17 = vpop.f32.mrf.mxu1 }
 0x1e4   : > { %2124 = vst [vmem:[%s2780_s7 + $0x868] sm:$0xff] %v1099_v16  ;;  %2126 = vst [vmem:[%s2780_s7 + $0x878] sm:$0xff] %v1662_v17 }
 0x1e5   : > { %v1103_v18 = vpop.f32.mrf.mxu0  ;;  %v1666_v19 = vpop.f32.mrf.mxu1 }
 0x1e6   : > { %2127 = vst [vmem:[%s2780_s7 + $0x880] sm:$0xff] %v1103_v18  ;;  %2129 = vst [vmem:[%s2780_s7 + $0x890] sm:$0xff] %v1666_v19 }
 0x1e7   : > { %v1105_v20 = vpop.f32.mrf.mxu0  ;;  %v1668_v21 = vpop.f32.mrf.mxu1 }
 0x1e8   : > { %2128 = vst [vmem:[%s2780_s7 + $0x888] sm:$0xff] %v1105_v20  ;;  %2130 = vst [vmem:[%s2780_s7 + $0x898] sm:$0xff] %v1668_v21 }
 0x1e9   : > { %v1107_v22 = vpop.f32.mrf.mxu0  ;;  %v1670_v23 = vpop.f32.mrf.mxu1 }
 0x1ea   : > { %2131 = vst [vmem:[%s2780_s7 + $0x8a0] sm:$0xff] %v1107_v22  ;;  %2133 = vst [vmem:[%s2780_s7 + $0x8b0] sm:$0xff] %v1670_v23 }
 0x1eb   : > { %v1109_v24 = vpop.f32.mrf.mxu0  ;;  %v1672_v25 = vpop.f32.mrf.mxu1 }
 0x1ec   : > { %2132 = vst [vmem:[%s2780_s7 + $0x8a8] sm:$0xff] %v1109_v24  ;;  %2134 = vst [vmem:[%s2780_s7 + $0x8b8] sm:$0xff] %v1672_v25 }
 0x1ed   : > { %v1113_v26 = vpop.f32.mrf.mxu0  ;;  %v1676_v27 = vpop.f32.mrf.mxu1 }
 0x1ee   : > { %2135 = vst [vmem:[%s2780_s7 + $0x8c0] sm:$0xff] %v1113_v26  ;;  %2137 = vst [vmem:[%s2780_s7 + $0x8d0] sm:$0xff] %v1676_v27 }
 0x1ef   : > { %v1115_v28 = vpop.f32.mrf.mxu0  ;;  %v1678_v29 = vpop.f32.mrf.mxu1 }
 0x1f0   : > { %2136 = vst [vmem:[%s2780_s7 + $0x8c8] sm:$0xff] %v1115_v28  ;;  %2138 = vst [vmem:[%s2780_s7 + $0x8d8] sm:$0xff] %v1678_v29 }
 0x1f1   : > { %v1117_v30 = vpop.f32.mrf.mxu0  ;;  %v1680_v31 = vpop.f32.mrf.mxu1 }
 0x1f2   : > { %2139 = vst [vmem:[%s2780_s7 + $0x8e0] sm:$0xff] %v1117_v30  ;;  %2141 = vst [vmem:[%s2780_s7 + $0x8f0] sm:$0xff] %v1680_v31 }
 0x1f3   : > { %v1119_v32 = vpop.f32.mrf.mxu0  ;;  %v1682_v33 = vpop.f32.mrf.mxu1 }
 0x1f4   : > { %2140 = vst [vmem:[%s2780_s7 + $0x8e8] sm:$0xff] %v1119_v32  ;;  %2142 = vst [vmem:[%s2780_s7 + $0x8f8] sm:$0xff] %v1682_v33 }
 0x1f5   : > { %v1123_v2 = vpop.f32.mrf.mxu0  ;;  %v1686_v34 = vpop.f32.mrf.mxu1 }
 0x1f6   : > { %2143 = vst [vmem:[%s2780_s7 + $0x900] sm:$0xff] %v1123_v2  ;;  %2145 = vst [vmem:[%s2780_s7 + $0x910] sm:$0xff] %v1686_v34 }
 0x1f7   : > { %v1125_v35 = vpop.f32.mrf.mxu0  ;;  %v1688_v36 = vpop.f32.mrf.mxu1 }
 0x1f8   : > { %2144 = vst [vmem:[%s2780_s7 + $0x908] sm:$0xff] %v1125_v35  ;;  %2146 = vst [vmem:[%s2780_s7 + $0x918] sm:$0xff] %v1688_v36 }
 0x1f9   : > { %v1127_v37 = vpop.f32.mrf.mxu0  ;;  %v1690_v38 = vpop.f32.mrf.mxu1 }
 0x1fa   : > { %2147 = vst [vmem:[%s2780_s7 + $0x920] sm:$0xff] %v1127_v37  ;;  %2149 = vst [vmem:[%s2780_s7 + $0x930] sm:$0xff] %v1690_v38 }
 0x1fb   : > { %v1129_v39 = vpop.f32.mrf.mxu0  ;;  %v1692_v40 = vpop.f32.mrf.mxu1 }
 0x1fc   : > { %2148 = vst [vmem:[%s2780_s7 + $0x928] sm:$0xff] %v1129_v39  ;;  %2150 = vst [vmem:[%s2780_s7 + $0x938] sm:$0xff] %v1692_v40 }
 0x1fd   : > { %v1133_v41 = vpop.f32.mrf.mxu0  ;;  %v1696_v42 = vpop.f32.mrf.mxu1 }
 0x1fe   : > { %2151 = vst [vmem:[%s2780_s7 + $0x940] sm:$0xff] %v1133_v41  ;;  %2153 = vst [vmem:[%s2780_s7 + $0x950] sm:$0xff] %v1696_v42 }
 0x1ff   : > { %v1135_v43 = vpop.f32.mrf.mxu0  ;;  %v1698_v44 = vpop.f32.mrf.mxu1 }
 0x200   : > { %2152 = vst [vmem:[%s2780_s7 + $0x948] sm:$0xff] %v1135_v43  ;;  %2154 = vst [vmem:[%s2780_s7 + $0x958] sm:$0xff] %v1698_v44 }
 0x201   : > { %v1137_v45 = vpop.f32.mrf.mxu0  ;;  %v1700_v46 = vpop.f32.mrf.mxu1 }
 0x202   : > { %2155 = vst [vmem:[%s2780_s7 + $0x960] sm:$0xff] %v1137_v45  ;;  %2157 = vst [vmem:[%s2780_s7 + $0x970] sm:$0xff] %v1700_v46 }
 0x203   : > { %v1139_v47 = vpop.f32.mrf.mxu0  ;;  %v1702_v48 = vpop.f32.mrf.mxu1 }
 0x204   : > { %2156 = vst [vmem:[%s2780_s7 + $0x968] sm:$0xff] %v1139_v47  ;;  %2158 = vst [vmem:[%s2780_s7 + $0x978] sm:$0xff] %v1702_v48 }
 0x205   : > { %v1143_v49 = vpop.f32.mrf.mxu0  ;;  %v1706_v50 = vpop.f32.mrf.mxu1 }
 0x206   : > { %2159 = vst [vmem:[%s2780_s7 + $0x980] sm:$0xff] %v1143_v49  ;;  %2161 = vst [vmem:[%s2780_s7 + $0x990] sm:$0xff] %v1706_v50 }
 0x207   : > { %v1145_v51 = vpop.f32.mrf.mxu0  ;;  %v1708_v52 = vpop.f32.mrf.mxu1 }
 0x208   : > { %2160 = vst [vmem:[%s2780_s7 + $0x988] sm:$0xff] %v1145_v51  ;;  %2162 = vst [vmem:[%s2780_s7 + $0x998] sm:$0xff] %v1708_v52 }
 0x209   : > { %v1147_v53 = vpop.f32.mrf.mxu0  ;;  %v1710_v54 = vpop.f32.mrf.mxu1 }
 0x20a   : > { %2163 = vst [vmem:[%s2780_s7 + $0x9a0] sm:$0xff] %v1147_v53  ;;  %2165 = vst [vmem:[%s2780_s7 + $0x9b0] sm:$0xff] %v1710_v54 }
 0x20b   : > { %v1149_v55 = vpop.f32.mrf.mxu0  ;;  %v1712_v56 = vpop.f32.mrf.mxu1 }
 0x20c   : > { %2164 = vst [vmem:[%s2780_s7 + $0x9a8] sm:$0xff] %v1149_v55  ;;  %2166 = vst [vmem:[%s2780_s7 + $0x9b8] sm:$0xff] %v1712_v56 }
 0x20d   : > { %v1153_v57 = vpop.f32.mrf.mxu0  ;;  %v1716_v58 = vpop.f32.mrf.mxu1 }
 0x20e   : > { %2167 = vst [vmem:[%s2780_s7 + $0x9c0] sm:$0xff] %v1153_v57  ;;  %2169 = vst [vmem:[%s2780_s7 + $0x9d0] sm:$0xff] %v1716_v58 }
 0x20f   : > { %v1155_v59 = vpop.f32.mrf.mxu0  ;;  %v1718_v60 = vpop.f32.mrf.mxu1 }
 0x210   : > { %2168 = vst [vmem:[%s2780_s7 + $0x9c8] sm:$0xff] %v1155_v59  ;;  %2170 = vst [vmem:[%s2780_s7 + $0x9d8] sm:$0xff] %v1718_v60 }
 0x211   : > { %v1157_v61 = vpop.f32.mrf.mxu0  ;;  %v1720_v62 = vpop.f32.mrf.mxu1 }
 0x212   : > { %2171 = vst [vmem:[%s2780_s7 + $0x9e0] sm:$0xff] %v1157_v61  ;;  %2173 = vst [vmem:[%s2780_s7 + $0x9f0] sm:$0xff] %v1720_v62 }
 0x213   : > { %v1159_v63 = vpop.f32.mrf.mxu0  ;;  %v1722_v0 = vpop.f32.mrf.mxu1 }
 0x214   : > { %2172 = vst [vmem:[%s2780_s7 + $0x9e8] sm:$0xff] %v1159_v63  ;;  %2174 = vst [vmem:[%s2780_s7 + $0x9f8] sm:$0xff] %v1722_v0 }
 0x215   : > { %v1163_v1 = vpop.f32.mrf.mxu0  ;;  %v1726_v3 = vpop.f32.mrf.mxu1 }
 0x216   : > { %2175 = vst [vmem:[%s2780_s7 + $0xa00] sm:$0xff] %v1163_v1  ;;  %2177 = vst [vmem:[%s2780_s7 + $0xa10] sm:$0xff] %v1726_v3 }
 0x217   : > { %v1165_v4 = vpop.f32.mrf.mxu0  ;;  %v1728_v5 = vpop.f32.mrf.mxu1 }
 0x218   : > { %2176 = vst [vmem:[%s2780_s7 + $0xa08] sm:$0xff] %v1165_v4  ;;  %2178 = vst [vmem:[%s2780_s7 + $0xa18] sm:$0xff] %v1728_v5 }
 0x219   : > { %v1167_v6 = vpop.f32.mrf.mxu0  ;;  %v1730_v7 = vpop.f32.mrf.mxu1 }
 0x21a   : > { %2179 = vst [vmem:[%s2780_s7 + $0xa20] sm:$0xff] %v1167_v6  ;;  %2181 = vst [vmem:[%s2780_s7 + $0xa30] sm:$0xff] %v1730_v7 }
 0x21b   : > { %v1169_v8 = vpop.f32.mrf.mxu0  ;;  %v1732_v9 = vpop.f32.mrf.mxu1 }
 0x21c   : > { %2180 = vst [vmem:[%s2780_s7 + $0xa28] sm:$0xff] %v1169_v8  ;;  %2182 = vst [vmem:[%s2780_s7 + $0xa38] sm:$0xff] %v1732_v9 }
 0x21d   : > { %v1173_v10 = vpop.f32.mrf.mxu0  ;;  %v1736_v11 = vpop.f32.mrf.mxu1 }
 0x21e   : > { %2183 = vst [vmem:[%s2780_s7 + $0xa40] sm:$0xff] %v1173_v10  ;;  %2185 = vst [vmem:[%s2780_s7 + $0xa50] sm:$0xff] %v1736_v11 }
 0x21f   : > { %v1175_v12 = vpop.f32.mrf.mxu0  ;;  %v1738_v13 = vpop.f32.mrf.mxu1 }
 0x220   : > { %2184 = vst [vmem:[%s2780_s7 + $0xa48] sm:$0xff] %v1175_v12  ;;  %2186 = vst [vmem:[%s2780_s7 + $0xa58] sm:$0xff] %v1738_v13 }
 0x221   : > { %v1177_v14 = vpop.f32.mrf.mxu0  ;;  %v1740_v15 = vpop.f32.mrf.mxu1 }
 0x222   : > { %2187 = vst [vmem:[%s2780_s7 + $0xa60] sm:$0xff] %v1177_v14  ;;  %2189 = vst [vmem:[%s2780_s7 + $0xa70] sm:$0xff] %v1740_v15 }
 0x223   : > { %v1179_v16 = vpop.f32.mrf.mxu0  ;;  %v1742_v17 = vpop.f32.mrf.mxu1 }
 0x224   : > { %2188 = vst [vmem:[%s2780_s7 + $0xa68] sm:$0xff] %v1179_v16  ;;  %2190 = vst [vmem:[%s2780_s7 + $0xa78] sm:$0xff] %v1742_v17 }
 0x225   : > { %v1183_v18 = vpop.f32.mrf.mxu0  ;;  %v1746_v19 = vpop.f32.mrf.mxu1 }
 0x226   : > { %2191 = vst [vmem:[%s2780_s7 + $0xa80] sm:$0xff] %v1183_v18  ;;  %2193 = vst [vmem:[%s2780_s7 + $0xa90] sm:$0xff] %v1746_v19 }
 0x227   : > { %v1185_v20 = vpop.f32.mrf.mxu0  ;;  %v1748_v21 = vpop.f32.mrf.mxu1 }
 0x228   : > { %2192 = vst [vmem:[%s2780_s7 + $0xa88] sm:$0xff] %v1185_v20  ;;  %2194 = vst [vmem:[%s2780_s7 + $0xa98] sm:$0xff] %v1748_v21 }
 0x229   : > { %v1187_v22 = vpop.f32.mrf.mxu0  ;;  %v1750_v23 = vpop.f32.mrf.mxu1 }
 0x22a   : > { %2195 = vst [vmem:[%s2780_s7 + $0xaa0] sm:$0xff] %v1187_v22  ;;  %2197 = vst [vmem:[%s2780_s7 + $0xab0] sm:$0xff] %v1750_v23 }
 0x22b   : > { %v1189_v24 = vpop.f32.mrf.mxu0  ;;  %v1752_v25 = vpop.f32.mrf.mxu1 }
 0x22c   : > { %2196 = vst [vmem:[%s2780_s7 + $0xaa8] sm:$0xff] %v1189_v24  ;;  %2198 = vst [vmem:[%s2780_s7 + $0xab8] sm:$0xff] %v1752_v25 }
 0x22d   : > { %v1193_v26 = vpop.f32.mrf.mxu0  ;;  %v1756_v27 = vpop.f32.mrf.mxu1 }
 0x22e   : > { %2199 = vst [vmem:[%s2780_s7 + $0xac0] sm:$0xff] %v1193_v26  ;;  %2201 = vst [vmem:[%s2780_s7 + $0xad0] sm:$0xff] %v1756_v27 }
 0x22f   : > { %v1195_v28 = vpop.f32.mrf.mxu0  ;;  %v1758_v29 = vpop.f32.mrf.mxu1 }
 0x230   : > { %2200 = vst [vmem:[%s2780_s7 + $0xac8] sm:$0xff] %v1195_v28  ;;  %2202 = vst [vmem:[%s2780_s7 + $0xad8] sm:$0xff] %v1758_v29 }
 0x231   : > { %v1197_v30 = vpop.f32.mrf.mxu0  ;;  %v1760_v31 = vpop.f32.mrf.mxu1 }
 0x232   : > { %2203 = vst [vmem:[%s2780_s7 + $0xae0] sm:$0xff] %v1197_v30  ;;  %2205 = vst [vmem:[%s2780_s7 + $0xaf0] sm:$0xff] %v1760_v31 }
 0x233   : > { %v1199_v32 = vpop.f32.mrf.mxu0  ;;  %v1762_v33 = vpop.f32.mrf.mxu1 }
 0x234   : > { %2204 = vst [vmem:[%s2780_s7 + $0xae8] sm:$0xff] %v1199_v32  ;;  %2206 = vst [vmem:[%s2780_s7 + $0xaf8] sm:$0xff] %v1762_v33 }
 0x235   : > { %v1203_v2 = vpop.f32.mrf.mxu0  ;;  %v1766_v34 = vpop.f32.mrf.mxu1 }
 0x236   : > { %2207 = vst [vmem:[%s2780_s7 + $0xb00] sm:$0xff] %v1203_v2  ;;  %2209 = vst [vmem:[%s2780_s7 + $0xb10] sm:$0xff] %v1766_v34 }
 0x237   : > { %v1205_v35 = vpop.f32.mrf.mxu0  ;;  %v1768_v36 = vpop.f32.mrf.mxu1 }
 0x238   : > { %2208 = vst [vmem:[%s2780_s7 + $0xb08] sm:$0xff] %v1205_v35  ;;  %2210 = vst [vmem:[%s2780_s7 + $0xb18] sm:$0xff] %v1768_v36 }
 0x239   : > { %v1207_v37 = vpop.f32.mrf.mxu0  ;;  %v1770_v38 = vpop.f32.mrf.mxu1 }
 0x23a   : > { %2211 = vst [vmem:[%s2780_s7 + $0xb20] sm:$0xff] %v1207_v37  ;;  %2213 = vst [vmem:[%s2780_s7 + $0xb30] sm:$0xff] %v1770_v38 }
 0x23b   : > { %v1209_v39 = vpop.f32.mrf.mxu0  ;;  %v1772_v40 = vpop.f32.mrf.mxu1 }
 0x23c   : > { %2212 = vst [vmem:[%s2780_s7 + $0xb28] sm:$0xff] %v1209_v39  ;;  %2214 = vst [vmem:[%s2780_s7 + $0xb38] sm:$0xff] %v1772_v40 }
 0x23d   : > { %v1213_v41 = vpop.f32.mrf.mxu0  ;;  %v1776_v42 = vpop.f32.mrf.mxu1 }
 0x23e   : > { %2215 = vst [vmem:[%s2780_s7 + $0xb40] sm:$0xff] %v1213_v41  ;;  %2217 = vst [vmem:[%s2780_s7 + $0xb50] sm:$0xff] %v1776_v42 }
 0x23f   : > { %v1215_v43 = vpop.f32.mrf.mxu0  ;;  %v1778_v44 = vpop.f32.mrf.mxu1 }
 0x240   : > { %2216 = vst [vmem:[%s2780_s7 + $0xb48] sm:$0xff] %v1215_v43  ;;  %2218 = vst [vmem:[%s2780_s7 + $0xb58] sm:$0xff] %v1778_v44 }
 0x241   : > { %v1217_v45 = vpop.f32.mrf.mxu0  ;;  %v1780_v46 = vpop.f32.mrf.mxu1 }
 0x242   : > { %2219 = vst [vmem:[%s2780_s7 + $0xb60] sm:$0xff] %v1217_v45  ;;  %2221 = vst [vmem:[%s2780_s7 + $0xb70] sm:$0xff] %v1780_v46 }
 0x243   : > { %v1219_v47 = vpop.f32.mrf.mxu0  ;;  %v1782_v48 = vpop.f32.mrf.mxu1 }
 0x244   : > { %2220 = vst [vmem:[%s2780_s7 + $0xb68] sm:$0xff] %v1219_v47  ;;  %2222 = vst [vmem:[%s2780_s7 + $0xb78] sm:$0xff] %v1782_v48 }
 0x245   : > { %v1223_v49 = vpop.f32.mrf.mxu0  ;;  %v1786_v50 = vpop.f32.mrf.mxu1 }
 0x246   : > { %2223 = vst [vmem:[%s2780_s7 + $0xb80] sm:$0xff] %v1223_v49  ;;  %2225 = vst [vmem:[%s2780_s7 + $0xb90] sm:$0xff] %v1786_v50 }
 0x247   : > { %v1225_v51 = vpop.f32.mrf.mxu0  ;;  %v1788_v52 = vpop.f32.mrf.mxu1 }
 0x248   : > { %2224 = vst [vmem:[%s2780_s7 + $0xb88] sm:$0xff] %v1225_v51  ;;  %2226 = vst [vmem:[%s2780_s7 + $0xb98] sm:$0xff] %v1788_v52 }
 0x249   : > { %v1227_v53 = vpop.f32.mrf.mxu0  ;;  %v1790_v54 = vpop.f32.mrf.mxu1 }
 0x24a   : > { %2227 = vst [vmem:[%s2780_s7 + $0xba0] sm:$0xff] %v1227_v53  ;;  %2229 = vst [vmem:[%s2780_s7 + $0xbb0] sm:$0xff] %v1790_v54 }
 0x24b   : > { %v1229_v55 = vpop.f32.mrf.mxu0  ;;  %v1792_v56 = vpop.f32.mrf.mxu1 }
 0x24c   : > { %2228 = vst [vmem:[%s2780_s7 + $0xba8] sm:$0xff] %v1229_v55  ;;  %2230 = vst [vmem:[%s2780_s7 + $0xbb8] sm:$0xff] %v1792_v56 }
 0x24d   : > { %v1233_v57 = vpop.f32.mrf.mxu0  ;;  %v1796_v58 = vpop.f32.mrf.mxu1 }
 0x24e   : > { %2231 = vst [vmem:[%s2780_s7 + $0xbc0] sm:$0xff] %v1233_v57  ;;  %2233 = vst [vmem:[%s2780_s7 + $0xbd0] sm:$0xff] %v1796_v58 }
 0x24f   : > { %v1235_v59 = vpop.f32.mrf.mxu0  ;;  %v1798_v60 = vpop.f32.mrf.mxu1 }
 0x250   : > { %2232 = vst [vmem:[%s2780_s7 + $0xbc8] sm:$0xff] %v1235_v59  ;;  %2234 = vst [vmem:[%s2780_s7 + $0xbd8] sm:$0xff] %v1798_v60 }
 0x251   : > { %v1237_v61 = vpop.f32.mrf.mxu0  ;;  %v1800_v62 = vpop.f32.mrf.mxu1 }
 0x252   : > { %2235 = vst [vmem:[%s2780_s7 + $0xbe0] sm:$0xff] %v1237_v61  ;;  %2237 = vst [vmem:[%s2780_s7 + $0xbf0] sm:$0xff] %v1800_v62 }
 0x253   : > { %v1239_v63 = vpop.f32.mrf.mxu0  ;;  %v1802_v0 = vpop.f32.mrf.mxu1 }
 0x254   : > { %2236 = vst [vmem:[%s2780_s7 + $0xbe8] sm:$0xff] %v1239_v63  ;;  %2238 = vst [vmem:[%s2780_s7 + $0xbf8] sm:$0xff] %v1802_v0 }
 0x255   : > { %v1243_v1 = vpop.f32.mrf.mxu0  ;;  %v1806_v3 = vpop.f32.mrf.mxu1 }
 0x256   : > { %2239 = vst [vmem:[%s2780_s7 + $0xc00] sm:$0xff] %v1243_v1  ;;  %2241 = vst [vmem:[%s2780_s7 + $0xc10] sm:$0xff] %v1806_v3 }
 0x257   : > { %v1245_v4 = vpop.f32.mrf.mxu0  ;;  %v1808_v5 = vpop.f32.mrf.mxu1 }
 0x258   : > { %2240 = vst [vmem:[%s2780_s7 + $0xc08] sm:$0xff] %v1245_v4  ;;  %2242 = vst [vmem:[%s2780_s7 + $0xc18] sm:$0xff] %v1808_v5 }
 0x259   : > { %v1247_v6 = vpop.f32.mrf.mxu0  ;;  %v1810_v7 = vpop.f32.mrf.mxu1 }
 0x25a   : > { %2243 = vst [vmem:[%s2780_s7 + $0xc20] sm:$0xff] %v1247_v6  ;;  %2245 = vst [vmem:[%s2780_s7 + $0xc30] sm:$0xff] %v1810_v7 }
 0x25b   : > { %v1249_v8 = vpop.f32.mrf.mxu0  ;;  %v1812_v9 = vpop.f32.mrf.mxu1 }
 0x25c   : > { %2244 = vst [vmem:[%s2780_s7 + $0xc28] sm:$0xff] %v1249_v8  ;;  %2246 = vst [vmem:[%s2780_s7 + $0xc38] sm:$0xff] %v1812_v9 }
 0x25d   : > { %v1253_v10 = vpop.f32.mrf.mxu0  ;;  %v1816_v11 = vpop.f32.mrf.mxu1 }
 0x25e   : > { %2247 = vst [vmem:[%s2780_s7 + $0xc40] sm:$0xff] %v1253_v10  ;;  %2249 = vst [vmem:[%s2780_s7 + $0xc50] sm:$0xff] %v1816_v11 }
 0x25f   : > { %v1255_v12 = vpop.f32.mrf.mxu0  ;;  %v1818_v13 = vpop.f32.mrf.mxu1 }
 0x260   : > { %2248 = vst [vmem:[%s2780_s7 + $0xc48] sm:$0xff] %v1255_v12  ;;  %2250 = vst [vmem:[%s2780_s7 + $0xc58] sm:$0xff] %v1818_v13 }
 0x261   : > { %v1257_v14 = vpop.f32.mrf.mxu0  ;;  %v1820_v15 = vpop.f32.mrf.mxu1 }
 0x262   : > { %2251 = vst [vmem:[%s2780_s7 + $0xc60] sm:$0xff] %v1257_v14  ;;  %2253 = vst [vmem:[%s2780_s7 + $0xc70] sm:$0xff] %v1820_v15 }
 0x263   : > { %v1259_v16 = vpop.f32.mrf.mxu0  ;;  %v1822_v17 = vpop.f32.mrf.mxu1 }
 0x264   : > { %2252 = vst [vmem:[%s2780_s7 + $0xc68] sm:$0xff] %v1259_v16  ;;  %2254 = vst [vmem:[%s2780_s7 + $0xc78] sm:$0xff] %v1822_v17 }
 0x265   : > { %v1263_v18 = vpop.f32.mrf.mxu0  ;;  %v1826_v19 = vpop.f32.mrf.mxu1 }
 0x266   : > { %2255 = vst [vmem:[%s2780_s7 + $0xc80] sm:$0xff] %v1263_v18  ;;  %2257 = vst [vmem:[%s2780_s7 + $0xc90] sm:$0xff] %v1826_v19 }
 0x267   : > { %v1265_v20 = vpop.f32.mrf.mxu0  ;;  %v1828_v21 = vpop.f32.mrf.mxu1 }
 0x268   : > { %2256 = vst [vmem:[%s2780_s7 + $0xc88] sm:$0xff] %v1265_v20  ;;  %2258 = vst [vmem:[%s2780_s7 + $0xc98] sm:$0xff] %v1828_v21 }
 0x269   : > { %v1267_v22 = vpop.f32.mrf.mxu0  ;;  %v1830_v23 = vpop.f32.mrf.mxu1 }
 0x26a   : > { %2259 = vst [vmem:[%s2780_s7 + $0xca0] sm:$0xff] %v1267_v22  ;;  %2261 = vst [vmem:[%s2780_s7 + $0xcb0] sm:$0xff] %v1830_v23 }
 0x26b   : > { %v1269_v24 = vpop.f32.mrf.mxu0  ;;  %v1832_v25 = vpop.f32.mrf.mxu1 }
 0x26c   : > { %2260 = vst [vmem:[%s2780_s7 + $0xca8] sm:$0xff] %v1269_v24  ;;  %2262 = vst [vmem:[%s2780_s7 + $0xcb8] sm:$0xff] %v1832_v25 }
 0x26d   : > { %v1273_v26 = vpop.f32.mrf.mxu0  ;;  %v1836_v27 = vpop.f32.mrf.mxu1 }
 0x26e   : > { %2263 = vst [vmem:[%s2780_s7 + $0xcc0] sm:$0xff] %v1273_v26  ;;  %2265 = vst [vmem:[%s2780_s7 + $0xcd0] sm:$0xff] %v1836_v27 }
 0x26f   : > { %v1275_v28 = vpop.f32.mrf.mxu0  ;;  %v1838_v29 = vpop.f32.mrf.mxu1 }
 0x270   : > { %2264 = vst [vmem:[%s2780_s7 + $0xcc8] sm:$0xff] %v1275_v28  ;;  %2266 = vst [vmem:[%s2780_s7 + $0xcd8] sm:$0xff] %v1838_v29 }
 0x271   : > { %v1277_v30 = vpop.f32.mrf.mxu0  ;;  %v1840_v31 = vpop.f32.mrf.mxu1 }
 0x272   : > { %2267 = vst [vmem:[%s2780_s7 + $0xce0] sm:$0xff] %v1277_v30  ;;  %2269 = vst [vmem:[%s2780_s7 + $0xcf0] sm:$0xff] %v1840_v31 }
 0x273   : > { %v1279_v32 = vpop.f32.mrf.mxu0  ;;  %v1842_v33 = vpop.f32.mrf.mxu1 }
 0x274   : > { %2268 = vst [vmem:[%s2780_s7 + $0xce8] sm:$0xff] %v1279_v32  ;;  %2270 = vst [vmem:[%s2780_s7 + $0xcf8] sm:$0xff] %v1842_v33 }
 0x275   : > { %v1283_v2 = vpop.f32.mrf.mxu0  ;;  %v1846_v34 = vpop.f32.mrf.mxu1 }
 0x276   : > { %2271 = vst [vmem:[%s2780_s7 + $0xd00] sm:$0xff] %v1283_v2  ;;  %2273 = vst [vmem:[%s2780_s7 + $0xd10] sm:$0xff] %v1846_v34 }
 0x277   : > { %v1285_v35 = vpop.f32.mrf.mxu0  ;;  %v1848_v36 = vpop.f32.mrf.mxu1 }
 0x278   : > { %2272 = vst [vmem:[%s2780_s7 + $0xd08] sm:$0xff] %v1285_v35  ;;  %2274 = vst [vmem:[%s2780_s7 + $0xd18] sm:$0xff] %v1848_v36 }
 0x279   : > { %v1287_v37 = vpop.f32.mrf.mxu0  ;;  %v1850_v38 = vpop.f32.mrf.mxu1 }
 0x27a   : > { %2275 = vst [vmem:[%s2780_s7 + $0xd20] sm:$0xff] %v1287_v37  ;;  %2277 = vst [vmem:[%s2780_s7 + $0xd30] sm:$0xff] %v1850_v38 }
 0x27b   : > { %v1289_v39 = vpop.f32.mrf.mxu0  ;;  %v1852_v40 = vpop.f32.mrf.mxu1 }
 0x27c   : > { %2276 = vst [vmem:[%s2780_s7 + $0xd28] sm:$0xff] %v1289_v39  ;;  %2278 = vst [vmem:[%s2780_s7 + $0xd38] sm:$0xff] %v1852_v40 }
 0x27d PF: > { %s12_s9 = sadd.s32 1, %s2595_s9  }
 0x27e   : > { %p9_p4 = scmp.ge.s32.totalorder %s12_s9, 4  }
 0x280   :  { %11 = sbr.rel (!%p9_p4) target bundleno = 1 (0x1), region = 58 }

// kernel: _lambda_.24
= control target key start
LH: loop header
LB: loop body
LE: loop exit
PB: predicated region body
PF: predicated region fallthrough
CT: control target
= control target key end

     0   :  { %v1755_v0 = vlaneseq  ;;  %v1832_v3 = vmov 0  ;;  %v618_v7 = vmov 0.0   ;;  %s1752_s0 = inlined_call_operand.vmem [shape: f32[240,512], index: 0, kind: input, shape index: {}]   ;;  %s1753_s1 = inlined_call_operand.vmem [shape: f32[1,512], index: 1, kind: output, shape index: {0}]   ;;  %s1754_s2 = inlined_call_operand.vmem [shape: f32[1,512], index: 2, kind: output, shape index: {1}]  }
   0x1   :  { %v638_v1 = vld [vmem:[%s1752_s0] sm:$0xff]  ;;  %v643_v2 = vld [vmem:[%s1752_s0 + $0x8] sm:$0xff]  ;;  %v653_v4 = vld [vmem:[%s1752_s0 + $0x10] sm:$0xff] }
   0x2   :  { %vm646_vm0 = vcmp.lt.s32.totalorder %v1755_v0, 512  ;;  %v658_v5 = vld [vmem:[%s1752_s0 + $0x20] sm:$0xff]  ;;  %v663_v6 = vld [vmem:[%s1752_s0 + $0x28] sm:$0xff]  ;;  %v678_v8 = vld [vmem:[%s1752_s0 + $0x18] sm:$0xff] }
   0x3   :  { %v1833_v3 = vsel %vm646_vm0, 4294967295, %v1832_v3  ;;  %18 = vst.msk [vmem:[%s1753_s1] sm:$0xf] %vm646_vm0, %v618_v7  ;;  %19 = vst.msk [vmem:[%s1754_s2] sm:$0xf] %vm646_vm0, %v618_v7  ;;  %v683_v9 = vld [vmem:[%s1752_s0 + $0x30] sm:$0xff]  ;;  %v141_v11 = vadd.f32 %v658_v5, %v638_v1  ;;  %v176_v12 = vadd.f32 %v663_v6, %v643_v2 }
   0x4   :  { %1834 = vst [vmem:[#allocation2_spill] sm:$0xff] %v1833_v3  ;;  %v688_v10 = vld [vmem:[%s1752_s0 + $0x38] sm:$0xff]  ;;  %v697_v13 = vld [vmem:[%s1752_s0 + $0x40] sm:$0xff]  ;;  %v702_v14 = vld [vmem:[%s1752_s0 + $0x48] sm:$0xff]  ;;  %v211_v15 = vadd.f32 %v683_v9, %v653_v4 }
   0x5   :  { %v246_v16 = vadd.f32 %v688_v10, %v678_v8  ;;  %v711_v17 = vld [vmem:[%s1752_s0 + $0x50] sm:$0xff]  ;;  %v716_v18 = vld [vmem:[%s1752_s0 + $0x58] sm:$0xff]  ;;  %v142_v19 = vadd.f32 %v141_v11, %v697_v13  ;;  %v177_v20 = vadd.f32 %v176_v12, %v702_v14  ;;  %v723_v21 = vld [vmem:[%s1752_s0 + $0x60] sm:$0xff] }
   0x6   :  { %v728_v22 = vld [vmem:[%s1752_s0 + $0x68] sm:$0xff]  ;;  %v212_v23 = vadd.f32 %v211_v15, %v711_v17  ;;  %v735_v25 = vld [vmem:[%s1752_s0 + $0x70] sm:$0xff]  ;;  %v740_v26 = vld [vmem:[%s1752_s0 + $0x78] sm:$0xff] }
   0x7   :  { %v247_v24 = vadd.f32 %v246_v16, %v716_v18  ;;  %v143_v27 = vadd.f32 %v142_v19, %v723_v21  ;;  %v178_v28 = vadd.f32 %v177_v20, %v728_v22  ;;  %v747_v29 = vld [vmem:[%s1752_s0 + $0x80] sm:$0xff]  ;;  %v752_v30 = vld [vmem:[%s1752_s0 + $0x88] sm:$0xff]  ;;  %v759_v33 = vld [vmem:[%s1752_s0 + $0x90] sm:$0xff] }
   0x8   :  { %v213_v31 = vadd.f32 %v212_v23, %v735_v25  ;;  %v764_v34 = vld [vmem:[%s1752_s0 + $0x98] sm:$0xff]  ;;  %v771_v37 = vld [vmem:[%s1752_s0 + $0xa0] sm:$0xff]  ;;  %v776_v38 = vld [vmem:[%s1752_s0 + $0xa8] sm:$0xff] }
   0x9   :  { %v248_v32 = vadd.f32 %v247_v24, %v740_v26  ;;  %v144_v35 = vadd.f32 %v143_v27, %v747_v29  ;;  %v179_v36 = vadd.f32 %v178_v28, %v752_v30  ;;  %v783_v41 = vld [vmem:[%s1752_s0 + $0xb0] sm:$0xff]  ;;  %v788_v42 = vld [vmem:[%s1752_s0 + $0xb8] sm:$0xff]  ;;  %v795_v45 = vld [vmem:[%s1752_s0 + $0xc0] sm:$0xff] }
   0xa   :  { %v214_v39 = vadd.f32 %v213_v31, %v759_v33  ;;  %v800_v46 = vld [vmem:[%s1752_s0 + $0xc8] sm:$0xff]  ;;  %v807_v49 = vld [vmem:[%s1752_s0 + $0xd0] sm:$0xff]  ;;  %v812_v50 = vld [vmem:[%s1752_s0 + $0xd8] sm:$0xff] }
   0xb   :  { %v249_v40 = vadd.f32 %v248_v32, %v764_v34  ;;  %v145_v43 = vadd.f32 %v144_v35, %v771_v37  ;;  %v180_v44 = vadd.f32 %v179_v36, %v776_v38  ;;  %v819_v53 = vld [vmem:[%s1752_s0 + $0xe0] sm:$0xff]  ;;  %v824_v54 = vld [vmem:[%s1752_s0 + $0xe8] sm:$0xff]  ;;  %v831_v57 = vld [vmem:[%s1752_s0 + $0xf0] sm:$0xff] }
   0xc   :  { %v215_v47 = vadd.f32 %v214_v39, %v783_v41  ;;  %v836_v58 = vld [vmem:[%s1752_s0 + $0xf8] sm:$0xff]  ;;  %v843_v61 = vld [vmem:[%s1752_s0 + $0x100] sm:$0xff]  ;;  %v848_v62 = vld [vmem:[%s1752_s0 + $0x108] sm:$0xff] }
   0xd   :  { %v250_v48 = vadd.f32 %v249_v40, %v788_v42  ;;  %v146_v51 = vadd.f32 %v145_v43, %v795_v45  ;;  %v181_v52 = vadd.f32 %v180_v44, %v800_v46  ;;  %v855_v11 = vld [vmem:[%s1752_s0 + $0x110] sm:$0xff]  ;;  %v860_v12 = vld [vmem:[%s1752_s0 + $0x118] sm:$0xff]  ;;  %v867_v19 = vld [vmem:[%s1752_s0 + $0x120] sm:$0xff] }
   0xe   :  { %v216_v55 = vadd.f32 %v215_v47, %v807_v49  ;;  %v872_v20 = vld [vmem:[%s1752_s0 + $0x128] sm:$0xff]  ;;  %v879_v27 = vld [vmem:[%s1752_s0 + $0x130] sm:$0xff]  ;;  %v884_v28 = vld [vmem:[%s1752_s0 + $0x138] sm:$0xff] }
   0xf   :  { %v251_v56 = vadd.f32 %v250_v48, %v812_v50  ;;  %v147_v59 = vadd.f32 %v146_v51, %v819_v53  ;;  %v182_v60 = vadd.f32 %v181_v52, %v824_v54  ;;  %v891_v35 = vld [vmem:[%s1752_s0 + $0x140] sm:$0xff]  ;;  %v896_v36 = vld [vmem:[%s1752_s0 + $0x148] sm:$0xff]  ;;  %v903_v43 = vld [vmem:[%s1752_s0 + $0x150] sm:$0xff] }
  0x10   :  { %v217_v63 = vadd.f32 %v216_v55, %v831_v57  ;;  %v908_v44 = vld [vmem:[%s1752_s0 + $0x158] sm:$0xff]  ;;  %v915_v51 = vld [vmem:[%s1752_s0 + $0x160] sm:$0xff]  ;;  %v920_v52 = vld [vmem:[%s1752_s0 + $0x168] sm:$0xff] }
  0x11   :  { %v252_v7 = vadd.f32 %v251_v56, %v836_v58  ;;  %v148_v15 = vadd.f32 %v147_v59, %v843_v61  ;;  %v183_v16 = vadd.f32 %v182_v60, %v848_v62  ;;  %v927_v59 = vld [vmem:[%s1752_s0 + $0x170] sm:$0xff]  ;;  %v932_v60 = vld [vmem:[%s1752_s0 + $0x178] sm:$0xff] }
  0x12   :  { %v218_v23 = vadd.f32 %v217_v63, %v855_v11  ;;  %1835 = vst [vmem:[#allocation3_spill] sm:$0xff] %v927_v59  ;;  %1836 = vst [vmem:[#allocation4_spill] sm:$0xff] %v932_v60 }
  0x13   :  { %v253_v24 = vadd.f32 %v252_v7, %v860_v12  ;;  %v149_v31 = vadd.f32 %v148_v15, %v867_v19  ;;  %v184_v32 = vadd.f32 %v183_v16, %v872_v20  ;;  %v939_v15 = vld [vmem:[%s1752_s0 + $0x180] sm:$0xff]  ;;  %v944_v16 = vld [vmem:[%s1752_s0 + $0x188] sm:$0xff] }
  0x14   :  { %v219_v39 = vadd.f32 %v218_v23, %v879_v27  ;;  %1837 = vst [vmem:[#allocation5_spill] sm:$0xff] %v939_v15  ;;  %1838 = vst [vmem:[#allocation6_spill] sm:$0xff] %v944_v16 }
  0x15   :  { %v254_v40 = vadd.f32 %v253_v24, %v884_v28  ;;  %v150_v47 = vadd.f32 %v149_v31, %v891_v35  ;;  %v185_v48 = vadd.f32 %v184_v32, %v896_v36  ;;  %v951_v31 = vld [vmem:[%s1752_s0 + $0x190] sm:$0xff]  ;;  %v956_v32 = vld [vmem:[%s1752_s0 + $0x198] sm:$0xff] }
  0x16   :  { %v220_v55 = vadd.f32 %v219_v39, %v903_v43  ;;  %1839 = vst [vmem:[#allocation7_spill] sm:$0xff] %v951_v31  ;;  %1840 = vst [vmem:[#allocation8_spill] sm:$0xff] %v956_v32 }
  0x17   :  { %v255_v56 = vadd.f32 %v254_v40, %v908_v44  ;;  %v151_v63 = vadd.f32 %v150_v47, %v915_v51  ;;  %v186_v7 = vadd.f32 %v185_v48, %v920_v52  ;;  %v963_v47 = vld [vmem:[%s1752_s0 + $0x1a0] sm:$0xff]  ;;  %v968_v48 = vld [vmem:[%s1752_s0 + $0x1a8] sm:$0xff] }
  0x18   :  { %v221_v23 = vadd.f32 %v220_v55, %v927_v59  ;;  %1841 = vst [vmem:[#allocation9_spill] sm:$0xff] %v963_v47  ;;  %1842 = vst [vmem:[#allocation10_spill] sm:$0xff] %v968_v48 }
  0x19   :  { %v256_v24 = vadd.f32 %v255_v56, %v932_v60  ;;  %v152_v39 = vadd.f32 %v151_v63, %v939_v15  ;;  %v187_v40 = vadd.f32 %v186_v7, %v944_v16  ;;  %v975_v63 = vld [vmem:[%s1752_s0 + $0x1b0] sm:$0xff]  ;;  %v980_v7 = vld [vmem:[%s1752_s0 + $0x1b8] sm:$0xff]  ;;  %v619_v16 = vmov 1966171168  }
  0x1a   :  { %v222_v55 = vadd.f32 %v221_v23, %v951_v31  ;;  %1843 = vst [vmem:[#allocation11_spill] sm:$0xff] %v975_v63  ;;  %1844 = vst [vmem:[#allocation12_spill] sm:$0xff] %v980_v7  ;;  %v987_v23 = vld [vmem:[%s1752_s0 + $0x1c0] sm:$0xff]  ;;  %v288_v15 = vunpack.c.l.s4 %v619_v16  ;;  %v1124_v16 = vld [vmem:[%s1752_s0 + $0x278] sm:$0xff]  ;;  %v1873_v60 = vlaneseq }
  0x1b   :  { %v257_v56 = vadd.f32 %v256_v24, %v956_v32  ;;  %v153_v0 = vadd.f32 %v152_v39, %v963_v47  ;;  %v188_v3 = vadd.f32 %v187_v40, %v968_v48  ;;  %1845 = vst [vmem:[#allocation13_spill] sm:$0xff] %v987_v23  ;;  %v992_v24 = vld [vmem:[%s1752_s0 + $0x1c8] sm:$0xff]  ;;  %v999_v39 = vld [vmem:[%s1752_s0 + $0x1d0] sm:$0xff]  ;;  %v1004_v40 = vld [vmem:[%s1752_s0 + $0x1d8] sm:$0xff] }
  0x1c   :  { %1846 = vst [vmem:[#allocation14_spill] sm:$0xff] %v992_v24  ;;  %v223_v32 = vadd.f32 %v222_v55, %v975_v63  ;;  %1847 = vst [vmem:[#allocation15_spill] sm:$0xff] %v999_v39  ;;  %v1011_v55 = vld [vmem:[%s1752_s0 + $0x1e0] sm:$0xff]  ;;  %v291_v59 = vshrl.u32 %v1873_v60, 7  ;;  %v1173_v60 = vld [vmem:[%s1752_s0 + $0x2b8] sm:$0xff] }
  0x1d   :  { %v258_v31 = vadd.f32 %v257_v56, %v980_v7  ;;  %1848 = vst [vmem:[#allocation16_spill] sm:$0xff] %v1004_v40  ;;  %v154_v48 = vadd.f32 %v153_v0, %v987_v23  ;;  %v189_v47 = vadd.f32 %v188_v3, %v992_v24  ;;  %1849 = vst [vmem:[#allocation17_spill] sm:$0xff] %v1011_v55  ;;  %v1016_v56 = vld [vmem:[%s1752_s0 + $0x1e8] sm:$0xff]  ;;  %v1023_v0 = vld [vmem:[%s1752_s0 + $0x1f0] sm:$0xff] }
  0x1e   :  { %1850 = vst [vmem:[#allocation18_spill] sm:$0xff] %v1016_v56  ;;  %v224_v7 = vadd.f32 %v223_v32, %v999_v39  ;;  %1851 = vst [vmem:[#allocation19_spill] sm:$0xff] %v1023_v0  ;;  %v1028_v3 = vld [vmem:[%s1752_s0 + $0x1f8] sm:$0xff]  ;;  %v1035_v32 = vld [vmem:[%s1752_s0 + $0x200] sm:$0xff] }
  0x1f   :  { %v259_v63 = vadd.f32 %v258_v31, %v1004_v40  ;;  %1852 = vst [vmem:[#allocation20_spill] sm:$0xff] %v1028_v3  ;;  %v155_v24 = vadd.f32 %v154_v48, %v1011_v55  ;;  %v190_v23 = vadd.f32 %v189_v47, %v1016_v56  ;;  %1853 = vst [vmem:[#allocation21_spill] sm:$0xff] %v1035_v32  ;;  %v1040_v31 = vld [vmem:[%s1752_s0 + $0x208] sm:$0xff]  ;;  %v1047_v48 = vld [vmem:[%s1752_s0 + $0x210] sm:$0xff] }
  0x20   :  { %1854 = vst [vmem:[#allocation22_spill] sm:$0xff] %v1040_v31  ;;  %v225_v40 = vadd.f32 %v224_v7, %v1023_v0  ;;  %1855 = vst [vmem:[#allocation23_spill] sm:$0xff] %v1047_v48  ;;  %v1052_v47 = vld [vmem:[%s1752_s0 + $0x218] sm:$0xff]  ;;  %v1059_v7 = vld [vmem:[%s1752_s0 + $0x220] sm:$0xff] }
  0x21   :  { %v260_v39 = vadd.f32 %v259_v63, %v1028_v3  ;;  %1856 = vst [vmem:[#allocation24_spill] sm:$0xff] %v1052_v47  ;;  %v156_v56 = vadd.f32 %v155_v24, %v1035_v32  ;;  %v191_v55 = vadd.f32 %v190_v23, %v1040_v31  ;;  %1857 = vst [vmem:[#allocation25_spill] sm:$0xff] %v1059_v7  ;;  %v1064_v63 = vld [vmem:[%s1752_s0 + $0x228] sm:$0xff]  ;;  %v1071_v24 = vld [vmem:[%s1752_s0 + $0x230] sm:$0xff] }
  0x22   :  { %1858 = vst [vmem:[#allocation26_spill] sm:$0xff] %v1064_v63  ;;  %v226_v3 = vadd.f32 %v225_v40, %v1047_v48  ;;  %1859 = vst [vmem:[#allocation27_spill] sm:$0xff] %v1071_v24  ;;  %v1076_v23 = vld [vmem:[%s1752_s0 + $0x238] sm:$0xff]  ;;  %v1083_v40 = vld [vmem:[%s1752_s0 + $0x240] sm:$0xff] }
  0x23   :  { %v261_v0 = vadd.f32 %v260_v39, %v1052_v47  ;;  %1860 = vst [vmem:[#allocation28_spill] sm:$0xff] %v1076_v23  ;;  %v157_v31 = vadd.f32 %v156_v56, %v1059_v7  ;;  %v192_v32 = vadd.f32 %v191_v55, %v1064_v63  ;;  %1861 = vst [vmem:[#allocation29_spill] sm:$0xff] %v1083_v40  ;;  %v1088_v39 = vld [vmem:[%s1752_s0 + $0x248] sm:$0xff]  ;;  %v1095_v56 = vld [vmem:[%s1752_s0 + $0x250] sm:$0xff] }
  0x24   :  { %1862 = vst [vmem:[#allocation30_spill] sm:$0xff] %v1088_v39  ;;  %v227_v47 = vadd.f32 %v226_v3, %v1071_v24  ;;  %1863 = vst [vmem:[#allocation31_spill] sm:$0xff] %v1095_v56  ;;  %v1100_v55 = vld [vmem:[%s1752_s0 + $0x258] sm:$0xff]  ;;  %v1112_v3 = vld [vmem:[%s1752_s0 + $0x268] sm:$0xff] }
  0x25   :  { %v262_v48 = vadd.f32 %v261_v0, %v1076_v23  ;;  %1864 = vst [vmem:[#allocation32_spill] sm:$0xff] %v1100_v55  ;;  %v158_v63 = vadd.f32 %v157_v31, %v1083_v40  ;;  %v193_v7 = vadd.f32 %v192_v32, %v1088_v39  ;;  %v1107_v0 = vld [vmem:[%s1752_s0 + $0x260] sm:$0xff]  ;;  %1866 = vst [vmem:[#allocation34_spill] sm:$0xff] %v1112_v3  ;;  %v1119_v32 = vld [vmem:[%s1752_s0 + $0x270] sm:$0xff]  ;;  %v289_v40 = vunpack.c.0.s8 %v288_v15 }
  0x26   :  { %1865 = vst [vmem:[#allocation33_spill] sm:$0xff] %v1107_v0  ;;  %v228_v23 = vadd.f32 %v227_v47, %v1095_v56  ;;  %1867 = vst [vmem:[#allocation35_spill] sm:$0xff] %v1119_v32  ;;  %v1131_v47 = vld [vmem:[%s1752_s0 + $0x280] sm:$0xff]  ;;  %v1168_v15 = vld [vmem:[%s1752_s0 + $0x2b0] sm:$0xff] }
  0x27   :  { %v263_v24 = vadd.f32 %v262_v48, %v1100_v55  ;;  %1868 = vst [vmem:[#allocation36_spill] sm:$0xff] %v1124_v16  ;;  %v159_v31 = vadd.f32 %v158_v63, %v1107_v0  ;;  %v194_v39 = vadd.f32 %v193_v7, %v1112_v3  ;;  %1869 = vst [vmem:[#allocation37_spill] sm:$0xff] %v1131_v47  ;;  %v1136_v48 = vld [vmem:[%s1752_s0 + $0x288] sm:$0xff]  ;;  %v1143_v63 = vld [vmem:[%s1752_s0 + $0x290] sm:$0xff] }
  0x28   :  { %1870 = vst [vmem:[#allocation38_spill] sm:$0xff] %v1136_v48  ;;  %v229_v55 = vadd.f32 %v228_v23, %v1119_v32  ;;  %1871 = vst [vmem:[#allocation39_spill] sm:$0xff] %v1143_v63  ;;  %v1148_v7 = vld [vmem:[%s1752_s0 + $0x298] sm:$0xff]  ;;  %v1161_v23 = vld [vmem:[%s1752_s0 + $0x2a8] sm:$0xff] }
  0x29   :  { %v264_v56 = vadd.f32 %v263_v24, %v1124_v16  ;;  %1872 = vst [vmem:[#allocation40_spill] sm:$0xff] %v1148_v7  ;;  %v160_v3 = vadd.f32 %v159_v31, %v1131_v47  ;;  %v195_v0 = vadd.f32 %v194_v39, %v1136_v48  ;;  %v1156_v24 = vld [vmem:[%s1752_s0 + $0x2a0] sm:$0xff]  ;;  %1875 = vst [vmem:[#allocation42_spill] sm:$0xff] %v1161_v23 }
  0x2a   :  { %1874 = vst [vmem:[#allocation41_spill] sm:$0xff] %v1156_v24  ;;  %v230_v16 = vadd.f32 %v229_v55, %v1143_v63  ;;  %1876 = vst [vmem:[#allocation43_spill] sm:$0xff] %v1168_v15  ;;  %v1179_v48 = vmul.f32 %v638_v1, %v638_v1  ;;  %v1188_v55 = vld [vmem:[%s1752_s0 + $0x2c0] sm:$0xff]  ;;  %v1199_v1 = vmul.f32 %v653_v4, %v653_v4 }
  0x2b   :  { %v265_v32 = vadd.f32 %v264_v56, %v1148_v7  ;;  %1877 = vst [vmem:[#allocation44_spill] sm:$0xff] %v1173_v60  ;;  %v161_v39 = vadd.f32 %v160_v3, %v1156_v24  ;;  %v196_v31 = vadd.f32 %v195_v0, %v1161_v23  ;;  %v1183_v56 = vmul.f32 %v643_v2, %v643_v2  ;;  %v1193_v7 = vld [vmem:[%s1752_s0 + $0x2c8] sm:$0xff]  ;;  %v1208_v23 = vld [vmem:[%s1752_s0 + $0x2d0] sm:$0xff]  ;;  %v1213_v24 = vld [vmem:[%s1752_s0 + $0x2d8] sm:$0xff] }
  0x2c   :  { %1878 = vst [vmem:[#allocation45_spill] sm:$0xff] %v1188_v55  ;;  %1879 = vst [vmem:[#allocation46_spill] sm:$0xff] %v1193_v7  ;;  %v231_v0 = vadd.f32 %v230_v16, %v1168_v15  ;;  %v1203_v2 = vmul.f32 %v678_v8, %v678_v8  ;;  %v1217_v4 = vsub.s32 %v289_v40, %v291_v59  ;;  %v1231_v15 = vld [vmem:[%s1752_s0 + $0x2e8] sm:$0xff]  ;;  %v1246_v40 = vld [vmem:[%s1752_s0 + $0x2f0] sm:$0xff] }
  0x2d   :  { %v266_v3 = vadd.f32 %v265_v32, %v1173_v60  ;;  %1880 = vst [vmem:[#allocation47_spill] sm:$0xff] %v1208_v23  ;;  %1881 = vst [vmem:[#allocation48_spill] sm:$0xff] %v1213_v24  ;;  %v162_v32 = vadd.f32 %v161_v39, %v1188_v55  ;;  %v197_v16 = vadd.f32 %v196_v31, %v1193_v7  ;;  %v1226_v60 = vld [vmem:[%s1752_s0 + $0x2e0] sm:$0xff]  ;;  %v1251_v7 = vld [vmem:[%s1752_s0 + $0x2f8] sm:$0xff] }
  0x2e   :  { %v1221_v8 = vmul.f32 %v658_v5, %v658_v5  ;;  %1882 = vst [vmem:[#allocation49_spill] sm:$0xff] %v1226_v60  ;;  %1883 = vst [vmem:[#allocation50_spill] sm:$0xff] %v1231_v15  ;;  %v232_v39 = vadd.f32 %v231_v0, %v1208_v23  ;;  %v1237_v59 = vmul.f32 %v663_v6, %v663_v6  ;;  %v1271_v23 = vld [vmem:[%s1752_s0 + $0x308] sm:$0xff] }
  0x2f   :  { %v267_v31 = vadd.f32 %v266_v3, %v1213_v24  ;;  %v1241_v5 = vmul.f32 %v683_v9, %v683_v9  ;;  %1884 = vst [vmem:[#allocation51_spill] sm:$0xff] %v1246_v40  ;;  %1885 = vst [vmem:[#allocation52_spill] sm:$0xff] %v1251_v7  ;;  %v163_v0 = vadd.f32 %v162_v32, %v1226_v60  ;;  %v1266_v24 = vld [vmem:[%s1752_s0 + $0x300] sm:$0xff]  ;;  %v1291_v60 = vld [vmem:[%s1752_s0 + $0x318] sm:$0xff] }
  0x30   :  { %v198_v3 = vadd.f32 %v197_v16, %v1231_v15  ;;  %v1257_v6 = vmul.f32 %v688_v10, %v688_v10  ;;  %v1261_v9 = vmul.f32 %v697_v13, %v697_v13  ;;  %1886 = vst [vmem:[#allocation53_spill] sm:$0xff] %v1266_v24  ;;  %1887 = vst [vmem:[#allocation54_spill] sm:$0xff] %v1271_v23  ;;  %v1286_v15 = vld [vmem:[%s1752_s0 + $0x310] sm:$0xff] }
  0x31   :  { %v233_v32 = vadd.f32 %v232_v39, %v1246_v40  ;;  %v268_v16 = vadd.f32 %v267_v31, %v1251_v7  ;;  %v1277_v10 = vmul.f32 %v702_v14, %v702_v14  ;;  %v1281_v13 = vmul.f32 %v711_v17, %v711_v17  ;;  %1888 = vst [vmem:[#allocation55_spill] sm:$0xff] %v1286_v15  ;;  %v1306_v7 = vld [vmem:[%s1752_s0 + $0x320] sm:$0xff]  ;;  %v1311_v40 = vld [vmem:[%s1752_s0 + $0x328] sm:$0xff] }
  0x32   :  { %1889 = vst [vmem:[#allocation56_spill] sm:$0xff] %v1291_v60  ;;  %v164_v39 = vadd.f32 %v163_v0, %v1266_v24  ;;  %v199_v31 = vadd.f32 %v198_v3, %v1271_v23  ;;  %v1297_v14 = vmul.f32 %v716_v18, %v716_v18  ;;  %v1301_v17 = vmul.f32 %v723_v21, %v723_v21  ;;  %v1326_v23 = vld [vmem:[%s1752_s0 + $0x330] sm:$0xff]  ;;  %v1331_v24 = vld [vmem:[%s1752_s0 + $0x338] sm:$0xff] }
  0x33   :  { %1890 = vst [vmem:[#allocation57_spill] sm:$0xff] %v1306_v7  ;;  %1891 = vst [vmem:[#allocation58_spill] sm:$0xff] %v1311_v40  ;;  %v234_v0 = vadd.f32 %v233_v32, %v1286_v15  ;;  %v269_v3 = vadd.f32 %v268_v16, %v1291_v60  ;;  %v1317_v18 = vmul.f32 %v728_v22, %v728_v22  ;;  %v1346_v60 = vld [vmem:[%s1752_s0 + $0x340] sm:$0xff]  ;;  %v1351_v15 = vld [vmem:[%s1752_s0 + $0x348] sm:$0xff] }
  0x34   :  { %v1321_v21 = vmul.f32 %v735_v25, %v735_v25  ;;  %1892 = vst [vmem:[#allocation59_spill] sm:$0xff] %v1326_v23  ;;  %1893 = vst [vmem:[#allocation60_spill] sm:$0xff] %v1331_v24  ;;  %v165_v32 = vadd.f32 %v164_v39, %v1306_v7  ;;  %v200_v16 = vadd.f32 %v199_v31, %v1311_v40  ;;  %v1366_v40 = vld [vmem:[%s1752_s0 + $0x350] sm:$0xff]  ;;  %v1371_v7 = vld [vmem:[%s1752_s0 + $0x358] sm:$0xff] }
  0x35   :  { %v1337_v22 = vmul.f32 %v740_v26, %v740_v26  ;;  %v1341_v25 = vmul.f32 %v747_v29, %v747_v29  ;;  %1894 = vst [vmem:[#allocation61_spill] sm:$0xff] %v1346_v60  ;;  %1895 = vst [vmem:[#allocation62_spill] sm:$0xff] %v1351_v15  ;;  %v235_v39 = vadd.f32 %v234_v0, %v1326_v23  ;;  %v1391_v23 = vld [vmem:[%s1752_s0 + $0x368] sm:$0xff] }
  0x36   :  { %v270_v31 = vadd.f32 %v269_v3, %v1331_v24  ;;  %v1357_v26 = vmul.f32 %v752_v30, %v752_v30  ;;  %v1361_v29 = vmul.f32 %v759_v33, %v759_v33  ;;  %1896 = vst [vmem:[#allocation63_spill] sm:$0xff] %v1366_v40  ;;  %1897 = vst [vmem:[#allocation64_spill] sm:$0xff] %v1371_v7  ;;  %v1386_v24 = vld [vmem:[%s1752_s0 + $0x360] sm:$0xff] }
  0x37   :  { %v166_v0 = vadd.f32 %v165_v32, %v1346_v60  ;;  %v201_v3 = vadd.f32 %v200_v16, %v1351_v15  ;;  %v1377_v30 = vmul.f32 %v764_v34, %v764_v34  ;;  %v1381_v33 = vmul.f32 %v771_v37, %v771_v37  ;;  %1898 = vst [vmem:[#allocation65_spill] sm:$0xff] %v1386_v24  ;;  %v1406_v15 = vld [vmem:[%s1752_s0 + $0x370] sm:$0xff]  ;;  %v1411_v60 = vld [vmem:[%s1752_s0 + $0x378] sm:$0xff] }
  0x38   :  { %1899 = vst [vmem:[#allocation66_spill] sm:$0xff] %v1391_v23  ;;  %v236_v32 = vadd.f32 %v235_v39, %v1366_v40  ;;  %v271_v16 = vadd.f32 %v270_v31, %v1371_v7  ;;  %v1397_v34 = vmul.f32 %v776_v38, %v776_v38  ;;  %v1401_v37 = vmul.f32 %v783_v41, %v783_v41  ;;  %v1426_v7 = vld [vmem:[%s1752_s0 + $0x380] sm:$0xff]  ;;  %v1431_v40 = vld [vmem:[%s1752_s0 + $0x388] sm:$0xff] }
  0x39   :  { %1900 = vst [vmem:[#allocation67_spill] sm:$0xff] %v1406_v15  ;;  %1901 = vst [vmem:[#allocation68_spill] sm:$0xff] %v1411_v60  ;;  %v167_v39 = vadd.f32 %v166_v0, %v1386_v24  ;;  %v202_v31 = vadd.f32 %v201_v3, %v1391_v23  ;;  %v1417_v38 = vmul.f32 %v788_v42, %v788_v42  ;;  %v1446_v23 = vld [vmem:[%s1752_s0 + $0x390] sm:$0xff]  ;;  %v1451_v24 = vld [vmem:[%s1752_s0 + $0x398] sm:$0xff] }
  0x3a   :  { %v1421_v41 = vmul.f32 %v795_v45, %v795_v45  ;;  %1902 = vst [vmem:[#allocation69_spill] sm:$0xff] %v1426_v7  ;;  %1903 = vst [vmem:[#allocation70_spill] sm:$0xff] %v1431_v40  ;;  %v237_v0 = vadd.f32 %v236_v32, %v1406_v15  ;;  %v272_v3 = vadd.f32 %v271_v16, %v1411_v60  ;;  %v1466_v60 = vld [vmem:[%s1752_s0 + $0x3a0] sm:$0xff]  ;;  %v1471_v15 = vld [vmem:[%s1752_s0 + $0x3a8] sm:$0xff] }
  0x3b   :  { %v1437_v42 = vmul.f32 %v800_v46, %v800_v46  ;;  %v1441_v45 = vmul.f32 %v807_v49, %v807_v49  ;;  %1904 = vst [vmem:[#allocation71_spill] sm:$0xff] %v1446_v23  ;;  %1905 = vst [vmem:[#allocation72_spill] sm:$0xff] %v1451_v24  ;;  %v168_v32 = vadd.f32 %v167_v39, %v1426_v7  ;;  %v1491_v7 = vld [vmem:[%s1752_s0 + $0x3b8] sm:$0xff] }
  0x3c   :  { %v203_v16 = vadd.f32 %v202_v31, %v1431_v40  ;;  %v1457_v46 = vmul.f32 %v812_v50, %v812_v50  ;;  %v1461_v49 = vmul.f32 %v819_v53, %v819_v53  ;;  %1906 = vst [vmem:[#allocation73_spill] sm:$0xff] %v1466_v60  ;;  %1907 = vst [vmem:[#allocation74_spill] sm:$0xff] %v1471_v15  ;;  %v1486_v40 = vld [vmem:[%s1752_s0 + $0x3b0] sm:$0xff] }
  0x3d   :  { %v238_v39 = vadd.f32 %v237_v0, %v1446_v23  ;;  %v273_v31 = vadd.f32 %v272_v3, %v1451_v24  ;;  %v1477_v50 = vmul.f32 %v824_v54, %v824_v54  ;;  %v1481_v53 = vmul.f32 %v831_v57, %v831_v57  ;;  %1908 = vst [vmem:[#allocation75_spill] sm:$0xff] %v1486_v40 }
  0x3e   :  { %1909 = vst [vmem:[#allocation76_spill] sm:$0xff] %v1491_v7  ;;  %v169_v0 = vadd.f32 %v168_v32, %v1466_v60  ;;  %v204_v3 = vadd.f32 %v203_v16, %v1471_v15  ;;  %v1497_v54 = vmul.f32 %v836_v58, %v836_v58  ;;  %v1501_v57 = vmul.f32 %v843_v61, %v843_v61 }
  0x3f   :  { %v239_v24 = vadd.f32 %v238_v39, %v1486_v40  ;;  %v274_v23 = vadd.f32 %v273_v31, %v1491_v7  ;;  %v1507_v55 = vmul.f32 %v848_v62, %v848_v62  ;;  %v1511_v32 = vmul.f32 %v855_v11, %v855_v11 }
  0x40   :  { %v170_v16 = vrot.slane %v169_v0, 4  ;;  %v205_v15 = vrot.slane %v204_v3, 4  ;;  %v1515_v58 = vmul.f32 %v860_v12, %v860_v12  ;;  %v1519_v61 = vmul.f32 %v867_v19, %v867_v19 }
  0x41   :  { %v240_v39 = vrot.slane %v239_v24, 4  ;;  %v275_v31 = vrot.slane %v274_v23, 4  ;;  %v1523_v62 = vmul.f32 %v872_v20, %v872_v20  ;;  %v1527_v11 = vmul.f32 %v879_v27, %v879_v27 }
  0x42   :  { %1910 = vst [vmem:[#allocation77_spill] sm:$0xff] %v1519_v61  ;;  %v171_v7 = vadd.f32 %v170_v16, %v169_v0  ;;  %v206_v40 = vadd.f32 %v205_v15, %v204_v3  ;;  %v437_v12 = vadd.f32 %v1221_v8, %v1179_v48  ;;  %v472_v60 = vadd.f32 %v1237_v59, %v1183_v56 }
  0x43   :  { %1911 = vst [vmem:[#allocation78_spill] sm:$0xff] %v1523_v62  ;;  %v241_v19 = vadd.f32 %v240_v39, %v239_v24  ;;  %v276_v63 = vadd.f32 %v275_v31, %v274_v23  ;;  %v507_v47 = vadd.f32 %v1241_v5, %v1199_v1  ;;  %v542_v20 = vadd.f32 %v1257_v6, %v1203_v2 }
  0x44   :  { %v172_v62 = vrot.slane %v171_v7, 2  ;;  %v207_v61 = vrot.slane %v206_v40, 2  ;;  %v438_v27 = vadd.f32 %v437_v12, %v1261_v9  ;;  %v473_v15 = vadd.f32 %v472_v60, %v1277_v10 }
  0x45   :  { %v242_v0 = vrot.slane %v241_v19, 2  ;;  %v277_v3 = vrot.slane %v276_v63, 2  ;;  %v508_v48 = vadd.f32 %v507_v47, %v1281_v13  ;;  %v543_v56 = vadd.f32 %v542_v20, %v1297_v14 }
  0x46   :  { %v173_v24 = vadd.f32 %v172_v62, %v171_v7  ;;  %v208_v23 = vadd.f32 %v207_v61, %v206_v40  ;;  %v439_v8 = vadd.f32 %v438_v27, %v1301_v17  ;;  %v474_v1 = vadd.f32 %v473_v15, %v1317_v18 }
  0x47   :  { %v243_v59 = vadd.f32 %v242_v0, %v241_v19  ;;  %v278_v2 = vadd.f32 %v277_v3, %v276_v63  ;;  %v509_v5 = vadd.f32 %v508_v48, %v1321_v21  ;;  %v544_v6 = vadd.f32 %v543_v56, %v1337_v22  ;;  %v1916_v48 = vld [vmem:[#allocation5_spill] sm:$0xff] }
  0x48   :  { %v174_v9 = vrot.slane %v173_v24, 1  ;;  %v209_v60 = vrot.slane %v208_v23, 1  ;;  %v440_v10 = vadd.f32 %v439_v8, %v1341_v25  ;;  %v475_v47 = vadd.f32 %v474_v1, %v1357_v26  ;;  %v1918_v8 = vld [vmem:[#allocation7_spill] sm:$0xff] }
  0x49   :  { %v244_v13 = vrot.slane %v243_v59, 1  ;;  %v279_v14 = vrot.slane %v278_v2, 1  ;;  %v510_v7 = vadd.f32 %v509_v5, %v1361_v29  ;;  %v545_v40 = vadd.f32 %v544_v6, %v1377_v30  ;;  %v1914_v15 = vld [vmem:[#allocation77_spill] sm:$0xff]  ;;  %v1919_v6 = vld [vmem:[#allocation8_spill] sm:$0xff] }
  0x4a   :  { %v175_v17 = vadd.f32 %v174_v9, %v173_v24  ;;  %v210_v18 = vadd.f32 %v209_v60, %v208_v23  ;;  %v441_v63 = vadd.f32 %v440_v10, %v1381_v33  ;;  %v476_v21 = vadd.f32 %v475_v47, %v1397_v34  ;;  %v1915_v0 = vld [vmem:[#allocation78_spill] sm:$0xff]  ;;  %v1920_v47 = vld [vmem:[#allocation9_spill] sm:$0xff] }
  0x4b   :  { %v245_v16 = vadd.f32 %v244_v13, %v243_v59  ;;  %v280_v22 = vadd.f32 %v279_v14, %v278_v2  ;;  %v511_v61 = vadd.f32 %v510_v7, %v1401_v37  ;;  %v546_v25 = vadd.f32 %v545_v40, %v1417_v38  ;;  %v1917_v24 = vld [vmem:[#allocation6_spill] sm:$0xff] }
  0x4c   :  { %v285_v39 = vcombine.low %v175_v17, %v210_v18  ;;  %v356_v26 = vmul.f32 %v884_v28, %v884_v28  ;;  %v442_v29 = vadd.f32 %v441_v63, %v1421_v41  ;;  %v477_v30 = vadd.f32 %v476_v21, %v1437_v42  ;;  %v1921_v14 = vld [vmem:[#allocation10_spill] sm:$0xff]  ;;  %v1923_v18 = vld [vmem:[#allocation11_spill] sm:$0xff]  ;;  %v1924_v21 = vld [vmem:[#allocation12_spill] sm:$0xff] }
  0x4d   :  { %v286_v31 = vcombine.low %v245_v16, %v280_v22  ;;  %v357_v33 = vmul.f32 %v891_v35, %v891_v35  ;;  %v512_v34 = vadd.f32 %v511_v61, %v1441_v45  ;;  %v547_v62 = vadd.f32 %v546_v25, %v1457_v46  ;;  %v1925_v25 = vld [vmem:[#allocation13_spill] sm:$0xff] }
  0x4e   :  { %v293_v37 = vrot.slane %v285_v39, %v1217_v4  ;;  %v358_v38 = vmul.f32 %v896_v36, %v896_v36  ;;  %v443_v12 = vadd.f32 %v442_v29, %v1461_v49  ;;  %v478_v28 = vadd.f32 %v477_v30, %v1477_v50 }
  0x4f   :  { %v300_v41 = vrot.slane %v286_v31, %v1217_v4  ;;  %v359_v42 = vmul.f32 %v903_v43, %v903_v43  ;;  %v513_v35 = vadd.f32 %v512_v34, %v1481_v53  ;;  %v548_v45 = vadd.f32 %v547_v62, %v1497_v54  ;;  %v140_v54 = vld [vmem:[%s1753_s1] sm:$0xf]  ;;  %v1928_v62 = vld [vmem:[#allocation16_spill] sm:$0xff] }
  0x50   :  { %v360_v46 = vmul.f32 %v908_v44, %v908_v44  ;;  %v361_v19 = vmul.f32 %v915_v51, %v915_v51  ;;  %v444_v36 = vadd.f32 %v443_v12, %v1501_v57  ;;  %v479_v49 = vadd.f32 %v478_v28, %v1507_v55  ;;  %v1912_v44 = vld [vmem:[#allocation3_spill] sm:$0xff]  ;;  %v1913_v51 = vld [vmem:[#allocation4_spill] sm:$0xff]  ;;  %v1929_v28 = vld [vmem:[#allocation17_spill] sm:$0xff] }
  0x51   :  { %v301_v50 = vcombine.low %v293_v37, %v300_v41  ;;  %v362_v20 = vmul.f32 %v920_v52, %v920_v52  ;;  %v514_v43 = vadd.f32 %v513_v35, %v1511_v32  ;;  %v549_v53 = vadd.f32 %v548_v45, %v1515_v58 }
  0x52   :  { %v363_v27 = vmul.f32 %v1912_v44, %v1912_v44  ;;  %v364_v57 = vmul.f32 %v1913_v51, %v1913_v51  ;;  %v445_v55 = vadd.f32 %v444_v36, %v1914_v15  ;;  %v480_v3 = vadd.f32 %v479_v49, %v1915_v0  ;;  %v1932_v49 = vld [vmem:[#allocation20_spill] sm:$0xff]  ;;  %v1934_v44 = vld [vmem:[#allocation22_spill] sm:$0xff]  ;;  %v1935_v15 = vld [vmem:[#allocation23_spill] sm:$0xff] }
  0x53   :  { %v308_v52 = vrot.slane %v301_v50, %v1217_v4  ;;  %v365_v32 = vmul.f32 %v1916_v48, %v1916_v48  ;;  %v515_v58 = vadd.f32 %v514_v43, %v1527_v11  ;;  %v550_v56 = vadd.f32 %v549_v53, %v356_v26  ;;  %v1926_v26 = vld [vmem:[#allocation14_spill] sm:$0xff]  ;;  %v1933_v53 = vld [vmem:[#allocation21_spill] sm:$0xff]  ;;  %v1936_v0 = vld [vmem:[#allocation24_spill] sm:$0xff] }
  0x54   :  { %v366_v23 = vmul.f32 %v1917_v24, %v1917_v24  ;;  %v367_v1 = vmul.f32 %v1918_v8, %v1918_v8  ;;  %v446_v59 = vadd.f32 %v445_v55, %v357_v33  ;;  %v481_v2 = vadd.f32 %v480_v3, %v358_v38  ;;  %v1927_v33 = vld [vmem:[#allocation15_spill] sm:$0xff] }
  0x55   :  { %v310_v5 = vadd.f32 %v308_v52, %v140_v54  ;;  %v368_v9 = vmul.f32 %v1919_v6, %v1919_v6  ;;  %v516_v60 = vadd.f32 %v515_v58, %v359_v42  ;;  %v551_v10 = vadd.f32 %v550_v56, %v360_v46  ;;  %v1930_v42 = vld [vmem:[#allocation18_spill] sm:$0xff] }
  0x56   :  { %v369_v13 = vmul.f32 %v1920_v47, %v1920_v47  ;;  %v370_v11 = vmul.f32 %v1921_v14, %v1921_v14  ;;  %v447_v7 = vadd.f32 %v446_v59, %v361_v19  ;;  %v482_v40 = vadd.f32 %v481_v2, %v362_v20  ;;  %v1931_v19 = vld [vmem:[#allocation19_spill] sm:$0xff]  ;;  %v1938_v56 = vld [vmem:[#allocation26_spill] sm:$0xff]  ;;  %v1940_v2 = vld [vmem:[#allocation28_spill] sm:$0xff] }
  0x57   :  { %315 = vst.msk [vmem:[%s1753_s1] sm:$0xf] %vm646_vm0, %v310_v5  ;;  %v371_v63 = vmul.f32 %v1923_v18, %v1923_v18  ;;  %v372_v16 = vmul.f32 %v1924_v21, %v1924_v21  ;;  %v517_v22 = vadd.f32 %v516_v60, %v363_v27  ;;  %v552_v61 = vadd.f32 %v551_v10, %v364_v57  ;;  %v1941_v60 = vld [vmem:[#allocation29_spill] sm:$0xff]  ;;  %v1942_v47 = vld [vmem:[#allocation30_spill] sm:$0xff]  ;;  %v1944_v18 = vld [vmem:[#allocation32_spill] sm:$0xff] }
  0x58   :  { %v373_v39 = vmul.f32 %v1925_v25, %v1925_v25  ;;  %v374_v29 = vmul.f32 %v1926_v26, %v1926_v26  ;;  %v448_v30 = vadd.f32 %v447_v7, %v365_v32  ;;  %v483_v31 = vadd.f32 %v482_v40, %v366_v23  ;;  %v1937_v32 = vld [vmem:[#allocation25_spill] sm:$0xff]  ;;  %v1943_v7 = vld [vmem:[#allocation31_spill] sm:$0xff]  ;;  %v1946_v25 = vld [vmem:[#allocation34_spill] sm:$0xff] }
  0x59   :  { %v375_v34 = vmul.f32 %v1927_v33, %v1927_v33  ;;  %v376_v37 = vmul.f32 %v1928_v62, %v1928_v62  ;;  %v518_v38 = vadd.f32 %v517_v22, %v367_v1  ;;  %v553_v12 = vadd.f32 %v552_v61, %v368_v9  ;;  %v1939_v1 = vld [vmem:[#allocation27_spill] sm:$0xff]  ;;  %v1945_v22 = vld [vmem:[#allocation33_spill] sm:$0xff]  ;;  %v1948_v33 = vld [vmem:[#allocation36_spill] sm:$0xff] }
  0x5a   :  { %v377_v41 = vmul.f32 %v1929_v28, %v1929_v28  ;;  %v378_v35 = vmul.f32 %v1930_v42, %v1930_v42  ;;  %v449_v45 = vadd.f32 %v448_v30, %v369_v13  ;;  %v484_v46 = vadd.f32 %v483_v31, %v370_v11  ;;  %v1947_v30 = vld [vmem:[#allocation35_spill] sm:$0xff]  ;;  %v1950_v28 = vld [vmem:[#allocation38_spill] sm:$0xff] }
  0x5b   :  { %v379_v36 = vmul.f32 %v1931_v19, %v1931_v19  ;;  %v380_v50 = vmul.f32 %v1932_v49, %v1932_v49  ;;  %v519_v20 = vadd.f32 %v518_v38, %v371_v63  ;;  %v554_v43 = vadd.f32 %v553_v12, %v372_v16  ;;  %v1949_v38 = vld [vmem:[#allocation37_spill] sm:$0xff]  ;;  %v1952_v19 = vld [vmem:[#allocation40_spill] sm:$0xff] }
  0x5c   :  { %v381_v54 = vmul.f32 %v1933_v53, %v1933_v53  ;;  %v382_v27 = vmul.f32 %v1934_v44, %v1934_v44  ;;  %v450_v51 = vadd.f32 %v449_v45, %v373_v39  ;;  %v485_v57 = vadd.f32 %v484_v46, %v374_v29  ;;  %v1951_v45 = vld [vmem:[#allocation39_spill] sm:$0xff]  ;;  %v1954_v53 = vld [vmem:[#allocation42_spill] sm:$0xff] }
  0x5d   :  { %v383_v55 = vmul.f32 %v1935_v15, %v1935_v15  ;;  %v384_v3 = vmul.f32 %v1936_v0, %v1936_v0  ;;  %v520_v52 = vadd.f32 %v519_v20, %v375_v34  ;;  %v555_v48 = vadd.f32 %v554_v43, %v376_v37  ;;  %v1953_v20 = vld [vmem:[#allocation41_spill] sm:$0xff]  ;;  %v1956_v15 = vld [vmem:[#allocation44_spill] sm:$0xff] }
  0x5e   :  { %v385_v58 = vmul.f32 %v1937_v32, %v1937_v32  ;;  %v386_v24 = vmul.f32 %v1938_v56, %v1938_v56  ;;  %v451_v23 = vadd.f32 %v450_v51, %v377_v41  ;;  %v486_v8 = vadd.f32 %v485_v57, %v378_v35  ;;  %v1955_v51 = vld [vmem:[#allocation43_spill] sm:$0xff]  ;;  %v1958_v32 = vld [vmem:[#allocation46_spill] sm:$0xff] }
  0x5f   :  { %v387_v59 = vmul.f32 %v1939_v1, %v1939_v1  ;;  %v388_v5 = vmul.f32 %v1940_v2, %v1940_v2  ;;  %v521_v6 = vadd.f32 %v520_v52, %v379_v36  ;;  %v556_v9 = vadd.f32 %v555_v48, %v380_v50  ;;  %v1957_v52 = vld [vmem:[#allocation45_spill] sm:$0xff]  ;;  %v1960_v1 = vld [vmem:[#allocation48_spill] sm:$0xff] }
  0x60   :  { %v389_v10 = vmul.f32 %v1941_v60, %v1941_v60  ;;  %v390_v13 = vmul.f32 %v1942_v47, %v1942_v47  ;;  %v452_v14 = vadd.f32 %v451_v23, %v381_v54  ;;  %v487_v11 = vadd.f32 %v486_v8, %v382_v27  ;;  %v1959_v23 = vld [vmem:[#allocation47_spill] sm:$0xff]  ;;  %v1962_v60 = vld [vmem:[#allocation50_spill] sm:$0xff] }
  0x61   :  { %v391_v40 = vmul.f32 %v1943_v7, %v1943_v7  ;;  %v392_v63 = vmul.f32 %v1944_v18, %v1944_v18  ;;  %v522_v21 = vadd.f32 %v521_v6, %v383_v55  ;;  %v557_v16 = vadd.f32 %v556_v9, %v384_v3  ;;  %v1961_v6 = vld [vmem:[#allocation49_spill] sm:$0xff]  ;;  %v1964_v7 = vld [vmem:[#allocation52_spill] sm:$0xff] }
  0x62   :  { %v393_v61 = vmul.f32 %v1945_v22, %v1945_v22  ;;  %v394_v39 = vmul.f32 %v1946_v25, %v1946_v25  ;;  %v453_v26 = vadd.f32 %v452_v14, %v385_v58  ;;  %v488_v29 = vadd.f32 %v487_v11, %v386_v24  ;;  %v1963_v14 = vld [vmem:[#allocation51_spill] sm:$0xff]  ;;  %v1966_v22 = vld [vmem:[#allocation54_spill] sm:$0xff] }
  0x63   :  { %v395_v31 = vmul.f32 %v1947_v30, %v1947_v30  ;;  %v396_v34 = vmul.f32 %v1948_v33, %v1948_v33  ;;  %v523_v62 = vadd.f32 %v522_v21, %v387_v59  ;;  %v558_v37 = vadd.f32 %v557_v16, %v388_v5  ;;  %v1965_v21 = vld [vmem:[#allocation53_spill] sm:$0xff]  ;;  %v1968_v30 = vld [vmem:[#allocation56_spill] sm:$0xff] }
  0x64   :  { %v397_v12 = vmul.f32 %v1949_v38, %v1949_v38  ;;  %v398_v41 = vmul.f32 %v1950_v28, %v1950_v28  ;;  %v454_v42 = vadd.f32 %v453_v26, %v389_v10  ;;  %v489_v35 = vadd.f32 %v488_v29, %v390_v13  ;;  %v1967_v26 = vld [vmem:[#allocation55_spill] sm:$0xff]  ;;  %v1970_v38 = vld [vmem:[#allocation58_spill] sm:$0xff] }
  0x65   :  { %v399_v46 = vmul.f32 %v1951_v45, %v1951_v45  ;;  %v400_v36 = vmul.f32 %v1952_v19, %v1952_v19  ;;  %v524_v49 = vadd.f32 %v523_v62, %v391_v40  ;;  %v559_v50 = vadd.f32 %v558_v37, %v392_v63  ;;  %v1969_v62 = vld [vmem:[#allocation57_spill] sm:$0xff]  ;;  %v1972_v45 = vld [vmem:[#allocation60_spill] sm:$0xff] }
  0x66   :  { %v401_v43 = vmul.f32 %v1953_v20, %v1953_v20  ;;  %v402_v54 = vmul.f32 %v1954_v53, %v1954_v53  ;;  %v455_v44 = vadd.f32 %v454_v42, %v393_v61  ;;  %v490_v27 = vadd.f32 %v489_v35, %v394_v39  ;;  %v1971_v42 = vld [vmem:[#allocation59_spill] sm:$0xff]  ;;  %v1974_v20 = vld [vmem:[#allocation62_spill] sm:$0xff] }
  0x67   :  { %v403_v57 = vmul.f32 %v1955_v51, %v1955_v51  ;;  %v404_v55 = vmul.f32 %v1956_v15, %v1956_v15  ;;  %v525_v0 = vadd.f32 %v524_v49, %v395_v31  ;;  %v560_v3 = vadd.f32 %v559_v50, %v396_v34  ;;  %v1973_v49 = vld [vmem:[#allocation61_spill] sm:$0xff]  ;;  %v1976_v51 = vld [vmem:[#allocation64_spill] sm:$0xff] }
  0x68   :  { %v405_v48 = vmul.f32 %v1957_v52, %v1957_v52  ;;  %v406_v58 = vmul.f32 %v1958_v32, %v1958_v32  ;;  %v456_v56 = vadd.f32 %v455_v44, %v397_v12  ;;  %v491_v24 = vadd.f32 %v490_v27, %v398_v41  ;;  %v1975_v44 = vld [vmem:[#allocation63_spill] sm:$0xff]  ;;  %v1978_v52 = vld [vmem:[#allocation66_spill] sm:$0xff] }
  0x69   :  { %v407_v8 = vmul.f32 %v1959_v23, %v1959_v23  ;;  %v408_v59 = vmul.f32 %v1960_v1, %v1960_v1  ;;  %v526_v2 = vadd.f32 %v525_v0, %v399_v46  ;;  %v561_v5 = vadd.f32 %v560_v3, %v400_v36  ;;  %v1977_v0 = vld [vmem:[#allocation65_spill] sm:$0xff]  ;;  %v1980_v23 = vld [vmem:[#allocation68_spill] sm:$0xff] }
  0x6a   :  { %v409_v9 = vmul.f32 %v1961_v6, %v1961_v6  ;;  %v410_v10 = vmul.f32 %v1962_v60, %v1962_v60  ;;  %v457_v47 = vadd.f32 %v456_v56, %v401_v43  ;;  %v492_v13 = vadd.f32 %v491_v24, %v402_v54  ;;  %v1979_v56 = vld [vmem:[#allocation67_spill] sm:$0xff]  ;;  %v1982_v6 = vld [vmem:[#allocation70_spill] sm:$0xff] }
  0x6b   :  { %v411_v11 = vmul.f32 %v1963_v14, %v1963_v14  ;;  %v412_v40 = vmul.f32 %v1964_v7, %v1964_v7  ;;  %v527_v18 = vadd.f32 %v526_v2, %v403_v57  ;;  %v562_v63 = vadd.f32 %v561_v5, %v404_v55  ;;  %v1981_v2 = vld [vmem:[#allocation69_spill] sm:$0xff]  ;;  %v1984_v14 = vld [vmem:[#allocation72_spill] sm:$0xff] }
  0x6c   :  { %v413_v16 = vmul.f32 %v1965_v21, %v1965_v21  ;;  %v414_v61 = vmul.f32 %v1966_v22, %v1966_v22  ;;  %v458_v25 = vadd.f32 %v457_v47, %v405_v48  ;;  %v493_v39 = vadd.f32 %v492_v13, %v406_v58  ;;  %v1983_v47 = vld [vmem:[#allocation71_spill] sm:$0xff]  ;;  %v1986_v21 = vld [vmem:[#allocation74_spill] sm:$0xff] }
  0x6d   :  { %v415_v29 = vmul.f32 %v1967_v26, %v1967_v26  ;;  %v416_v31 = vmul.f32 %v1968_v30, %v1968_v30  ;;  %v528_v33 = vadd.f32 %v527_v18, %v407_v8  ;;  %v563_v34 = vadd.f32 %v562_v63, %v408_v59  ;;  %v1985_v18 = vld [vmem:[#allocation73_spill] sm:$0xff]  ;;  %v1988_v26 = vld [vmem:[#allocation76_spill] sm:$0xff] }
  0x6e   :  { %v417_v37 = vmul.f32 %v1969_v62, %v1969_v62  ;;  %v418_v12 = vmul.f32 %v1970_v38, %v1970_v38  ;;  %v459_v28 = vadd.f32 %v458_v25, %v409_v9  ;;  %v494_v41 = vadd.f32 %v493_v39, %v410_v10  ;;  %v1987_v25 = vld [vmem:[#allocation75_spill] sm:$0xff] }
  0x6f   :  { %v419_v35 = vmul.f32 %v1971_v42, %v1971_v42  ;;  %v420_v46 = vmul.f32 %v1972_v45, %v1972_v45  ;;  %v529_v19 = vadd.f32 %v528_v33, %v411_v11  ;;  %v564_v36 = vadd.f32 %v563_v34, %v412_v40 }
  0x70   :  { %v421_v50 = vmul.f32 %v1973_v49, %v1973_v49  ;;  %v422_v43 = vmul.f32 %v1974_v20, %v1974_v20  ;;  %v460_v53 = vadd.f32 %v459_v28, %v413_v16  ;;  %v495_v54 = vadd.f32 %v494_v41, %v414_v61 }
  0x71   :  { %v423_v27 = vmul.f32 %v1975_v44, %v1975_v44  ;;  %v424_v57 = vmul.f32 %v1976_v51, %v1976_v51  ;;  %v530_v15 = vadd.f32 %v529_v19, %v415_v29  ;;  %v565_v55 = vadd.f32 %v564_v36, %v416_v31 }
  0x72   :  { %v425_v3 = vmul.f32 %v1977_v0, %v1977_v0  ;;  %v426_v48 = vmul.f32 %v1978_v52, %v1978_v52  ;;  %v461_v32 = vadd.f32 %v460_v53, %v417_v37  ;;  %v496_v58 = vadd.f32 %v495_v54, %v418_v12 }
  0x73   :  { %v427_v24 = vmul.f32 %v1979_v56, %v1979_v56  ;;  %v428_v8 = vmul.f32 %v1980_v23, %v1980_v23  ;;  %v531_v1 = vadd.f32 %v530_v15, %v419_v35  ;;  %v566_v59 = vadd.f32 %v565_v55, %v420_v46 }
  0x74   :  { %v429_v5 = vmul.f32 %v1981_v2, %v1981_v2  ;;  %v430_v9 = vmul.f32 %v1982_v6, %v1982_v6  ;;  %v462_v60 = vadd.f32 %v461_v32, %v421_v50  ;;  %v497_v10 = vadd.f32 %v496_v58, %v422_v43 }
  0x75   :  { %v431_v13 = vmul.f32 %v1983_v47, %v1983_v47  ;;  %v432_v11 = vmul.f32 %v1984_v14, %v1984_v14  ;;  %v532_v7 = vadd.f32 %v531_v1, %v423_v27  ;;  %v567_v40 = vadd.f32 %v566_v59, %v424_v57  ;;  %v316_v59 = vld [vmem:[%s1754_s2] sm:$0xf] }
  0x76   :  { %v433_v63 = vmul.f32 %v1985_v18, %v1985_v18  ;;  %v434_v16 = vmul.f32 %v1986_v21, %v1986_v21  ;;  %v463_v22 = vadd.f32 %v462_v60, %v425_v3  ;;  %v498_v61 = vadd.f32 %v497_v10, %v426_v48 }
  0x77   :  { %v435_v39 = vmul.f32 %v1987_v25, %v1987_v25  ;;  %v436_v29 = vmul.f32 %v1988_v26, %v1988_v26  ;;  %v533_v30 = vadd.f32 %v532_v7, %v427_v24  ;;  %v568_v31 = vadd.f32 %v567_v40, %v428_v8 }
  0x78   :  { %v464_v33 = vadd.f32 %v463_v22, %v429_v5  ;;  %v499_v34 = vadd.f32 %v498_v61, %v430_v9 }
  0x79   :  { %v534_v62 = vadd.f32 %v533_v30, %v431_v13  ;;  %v569_v37 = vadd.f32 %v568_v31, %v432_v11 }
  0x7a   :  { %v465_v38 = vadd.f32 %v464_v33, %v433_v63  ;;  %v500_v12 = vadd.f32 %v499_v34, %v434_v16 }
  0x7b   :  { %v535_v28 = vadd.f32 %v534_v62, %v435_v39  ;;  %v570_v41 = vadd.f32 %v569_v37, %v436_v29 }
  0x7c   :  { %v466_v42 = vrot.slane %v465_v38, 4  ;;  %v501_v35 = vrot.slane %v500_v12, 4 }
  0x7d   :  { %v536_v45 = vrot.slane %v535_v28, 4  ;;  %v571_v46 = vrot.slane %v570_v41, 4 }
  0x7e   :  { %v467_v19 = vadd.f32 %v466_v42, %v465_v38  ;;  %v502_v36 = vadd.f32 %v501_v35, %v500_v12 }
  0x7f   :  { %v537_v49 = vadd.f32 %v536_v45, %v535_v28  ;;  %v572_v50 = vadd.f32 %v571_v46, %v570_v41 }
  0x80   :  { %v468_v20 = vrot.slane %v467_v19, 2  ;;  %v503_v43 = vrot.slane %v502_v36, 2 }
  0x81   :  { %v538_v53 = vrot.slane %v537_v49, 2  ;;  %v573_v54 = vrot.slane %v572_v50, 2 }
  0x82   :  { %v469_v44 = vadd.f32 %v468_v20, %v467_v19  ;;  %v504_v27 = vadd.f32 %v503_v43, %v502_v36 }
  0x83   :  { %v539_v51 = vadd.f32 %v538_v53, %v537_v49  ;;  %v574_v57 = vadd.f32 %v573_v54, %v572_v50 }
  0x84   :  { %v470_v15 = vrot.slane %v469_v44, 1  ;;  %v505_v55 = vrot.slane %v504_v27, 1 }
  0x85   :  { %v540_v0 = vrot.slane %v539_v51, 1  ;;  %v575_v3 = vrot.slane %v574_v57, 1 }
  0x86   :  { %v471_v52 = vadd.f32 %v470_v15, %v469_v44  ;;  %v506_v48 = vadd.f32 %v505_v55, %v504_v27 }
  0x87   :  { %v541_v32 = vadd.f32 %v540_v0, %v539_v51  ;;  %v576_v58 = vadd.f32 %v575_v3, %v574_v57 }
  0x88   :  { %v581_v56 = vcombine.low %v471_v52, %v506_v48 }
  0x89   :  { %v582_v24 = vcombine.low %v541_v32, %v576_v58 }
  0x8a   :  { %v589_v23 = vrot.slane %v581_v56, %v1217_v4 }
  0x8b   :  { %v596_v8 = vrot.slane %v582_v24, %v1217_v4 }
  0x8d   :  { %v597_v1 = vcombine.low %v589_v23, %v596_v8 }
  0x8f   :  { %v604_v2 = vrot.slane %v597_v1, %v1217_v4 }
  0x91   :  { %v606_v5 = vadd.f32 %v604_v2, %v316_v59 }
  0x93   :  { %607 = vst.msk [vmem:[%s1754_s2] sm:$0xf] %vm646_vm0, %v606_v5 }

// kernel: _lambda_.25
= control target key start
LH: loop header
LB: loop body
LE: loop exit
PB: predicated region body
PF: predicated region fallthrough
CT: control target
= control target key end

     0   :  { %v136_v0 = vlaneseq  ;;  %s1904_s1 = inlined_call_operand.vmem [shape: f32[1,512], index: 1, kind: input, shape index: {}]   ;;  %s1905_s2 = inlined_call_operand.vmem [shape: f32[1,512], index: 2, kind: input, shape index: {}]   ;;  %s1906_s0 = inlined_call_operand.vmem [shape: f32[240,512], index: 0, kind: input, shape index: {}]   ;;  %s1907_s3 = inlined_call_operand.vmem [shape: bf16[240,512], index: 3, kind: output, shape index: {}]  }
   0x1   :  { %v134_v2 = vld [vmem:[%s1904_s1] sm:$0xf]  ;;  %v15_v5 = vld [vmem:[%s1906_s0 + $0x8] sm:$0xff]  ;;  %v16_v10 = vld [vmem:[%s1906_s0 + $0x10] sm:$0xff] }
   0x2   :  { %v137_v1 = vshrl.u32 %v136_v0, 7  ;;  %v276_v3 = vld [vmem:[%s1905_s2] sm:$0xf]  ;;  %v19_v12 = vld [vmem:[%s1906_s0 + $0x28] sm:$0xff]  ;;  %v17_v17 = vld [vmem:[%s1906_s0 + $0x18] sm:$0xff] }
   0x3   :  { %v14_v4 = vld [vmem:[%s1906_s0] sm:$0xff]  ;;  %v20_v18 = vld [vmem:[%s1906_s0 + $0x30] sm:$0xff]  ;;  %v21_v19 = vld [vmem:[%s1906_s0 + $0x38] sm:$0xff] }
   0x4   :  { %v138_v6 = vsub.s32 0, %v137_v1  ;;  %v142_v7 = vsub.s32 1, %v137_v1  ;;  %v146_v8 = vsub.s32 2, %v137_v1  ;;  %v150_v9 = vsub.s32 3, %v137_v1  ;;  %v18_v11 = vld [vmem:[%s1906_s0 + $0x20] sm:$0xff]  ;;  %v23_v41 = vld [vmem:[%s1906_s0 + $0x48] sm:$0xff] }
   0x5   :  { %v22_v40 = vld [vmem:[%s1906_s0 + $0x40] sm:$0xff]  ;;  %v24_v46 = vld [vmem:[%s1906_s0 + $0x50] sm:$0xff]  ;;  %v25_v47 = vld [vmem:[%s1906_s0 + $0x58] sm:$0xff] }
   0x6   :  { %v1123_v13 = vrot.slane %v134_v2, %v138_v6  ;;  %v1125_v14 = vrot.slane %v134_v2, %v142_v7  ;;  %v1127_v15 = vrot.slane %v276_v3, %v138_v6  ;;  %v1129_v16 = vrot.slane %v276_v3, %v142_v7  ;;  %v26_v52 = vld [vmem:[%s1906_s0 + $0x60] sm:$0xff]  ;;  %v27_v53 = vld [vmem:[%s1906_s0 + $0x68] sm:$0xff]  ;;  %v28_v58 = vld [vmem:[%s1906_s0 + $0x70] sm:$0xff] }
   0x7   :  { %v1140_v20 = vrot.slane %v134_v2, %v146_v8  ;;  %v1142_v21 = vrot.slane %v134_v2, %v150_v9  ;;  %v1144_v22 = vrot.slane %v276_v3, %v146_v8  ;;  %v1146_v23 = vrot.slane %v276_v3, %v150_v9  ;;  %v29_v59 = vld [vmem:[%s1906_s0 + $0x78] sm:$0xff]  ;;  %v30_v8 = vld [vmem:[%s1906_s0 + $0x80] sm:$0xff] }
   0x8   :  { %v156_v24 = vmul.f32 %v1123_v13, %v14_v4  ;;  %v157_v25 = vmul.f32 %v1125_v14, %v15_v5  ;;  %v160_v26 = vmul.f32 %v1123_v13, %v18_v11  ;;  %v161_v27 = vmul.f32 %v1125_v14, %v19_v12 }
   0x9   :  { %v158_v28 = vmul.f32 %v1140_v20, %v16_v10  ;;  %v159_v29 = vmul.f32 %v1142_v21, %v17_v17  ;;  %v162_v30 = vmul.f32 %v1140_v20, %v20_v18  ;;  %v163_v31 = vmul.f32 %v1142_v21, %v21_v19  ;;  %v31_v17 = vld [vmem:[%s1906_s0 + $0x88] sm:$0xff] }
   0xa   :  { %v298_v32 = vadd.f32 %v1127_v15, %v156_v24  ;;  %v299_v33 = vadd.f32 %v1129_v16, %v157_v25  ;;  %v302_v34 = vadd.f32 %v1127_v15, %v160_v26  ;;  %v303_v35 = vadd.f32 %v1129_v16, %v161_v27  ;;  %v32_v26 = vld [vmem:[%s1906_s0 + $0x90] sm:$0xff]  ;;  %v33_v27 = vld [vmem:[%s1906_s0 + $0x98] sm:$0xff] }
   0xb   :  { %v300_v36 = vadd.f32 %v1144_v22, %v158_v28  ;;  %v301_v37 = vadd.f32 %v1146_v23, %v159_v29  ;;  %v304_v38 = vadd.f32 %v1144_v22, %v162_v30  ;;  %v305_v39 = vadd.f32 %v1146_v23, %v163_v31 }
   0xc   :  { %v418_v42 = vmax.f32 %v298_v32, 0.0  ;;  %v419_v43 = vmax.f32 %v299_v33, 0.0  ;;  %v422_v44 = vmax.f32 %v302_v34, 0.0  ;;  %v423_v45 = vmax.f32 %v303_v35, 0.0  ;;  %v34_v32 = vld [vmem:[%s1906_s0 + $0xa0] sm:$0xff]  ;;  %v35_v33 = vld [vmem:[%s1906_s0 + $0xa8] sm:$0xff] }
   0xd   :  { %v420_v48 = vmax.f32 %v300_v36, 0.0  ;;  %v421_v49 = vmax.f32 %v301_v37, 0.0  ;;  %v424_v50 = vmax.f32 %v304_v38, 0.0  ;;  %v425_v51 = vmax.f32 %v305_v39, 0.0  ;;  %v36_v38 = vld [vmem:[%s1906_s0 + $0xb0] sm:$0xff] }
   0xe   :  { %v1022_v54 = vpack.c.bf16 %v419_v43, %v418_v42  ;;  %v1024_v55 = vpack.c.bf16 %v423_v45, %v422_v44  ;;  %v164_v56 = vmul.f32 %v1123_v13, %v22_v40  ;;  %v165_v57 = vmul.f32 %v1125_v14, %v23_v41  ;;  %v37_v43 = vld [vmem:[%s1906_s0 + $0xb8] sm:$0xff] }
   0xf   :  { %v1023_v60 = vpack.c.bf16 %v421_v49, %v420_v48  ;;  %v1025_v61 = vpack.c.bf16 %v425_v51, %v424_v50  ;;  %v166_v62 = vmul.f32 %v1140_v20, %v24_v46  ;;  %v167_v63 = vmul.f32 %v1142_v21, %v25_v47  ;;  %v38_v48 = vld [vmem:[%s1906_s0 + $0xc0] sm:$0xff] }
  0x10   :  { %898 = vst [vmem:[%s1907_s3] sm:$0xff] %v1022_v54  ;;  %900 = vst [vmem:[%s1907_s3 + $0x10] sm:$0xff] %v1024_v55  ;;  %v306_v0 = vadd.f32 %v1127_v15, %v164_v56  ;;  %v307_v1 = vadd.f32 %v1129_v16, %v165_v57  ;;  %v168_v2 = vmul.f32 %v1123_v13, %v26_v52  ;;  %v39_v57 = vld [vmem:[%s1906_s0 + $0xc8] sm:$0xff] }
  0x11   :  { %v169_v3 = vmul.f32 %v1125_v14, %v27_v53  ;;  %899 = vst [vmem:[%s1907_s3 + $0x8] sm:$0xff] %v1023_v60  ;;  %901 = vst [vmem:[%s1907_s3 + $0x18] sm:$0xff] %v1025_v61  ;;  %v308_v4 = vadd.f32 %v1144_v22, %v166_v62  ;;  %v309_v5 = vadd.f32 %v1146_v23, %v167_v63  ;;  %v40_v62 = vld [vmem:[%s1906_s0 + $0xd0] sm:$0xff]  ;;  %v41_v63 = vld [vmem:[%s1906_s0 + $0xd8] sm:$0xff] }
  0x12   :  { %v170_v6 = vmul.f32 %v1140_v20, %v28_v58  ;;  %v171_v7 = vmul.f32 %v1142_v21, %v29_v59  ;;  %v426_v9 = vmax.f32 %v306_v0, 0.0  ;;  %v427_v10 = vmax.f32 %v307_v1, 0.0 }
  0x13   :  { %v310_v11 = vadd.f32 %v1127_v15, %v168_v2  ;;  %v311_v12 = vadd.f32 %v1129_v16, %v169_v3  ;;  %v428_v18 = vmax.f32 %v308_v4, 0.0  ;;  %v429_v19 = vmax.f32 %v309_v5, 0.0  ;;  %v42_v4 = vld [vmem:[%s1906_s0 + $0xe0] sm:$0xff]  ;;  %v43_v5 = vld [vmem:[%s1906_s0 + $0xe8] sm:$0xff] }
  0x14   :  { %v312_v24 = vadd.f32 %v1144_v22, %v170_v6  ;;  %v313_v25 = vadd.f32 %v1146_v23, %v171_v7  ;;  %v1026_v28 = vpack.c.bf16 %v427_v10, %v426_v9  ;;  %v172_v31 = vmul.f32 %v1123_v13, %v30_v8  ;;  %v44_v10 = vld [vmem:[%s1906_s0 + $0xf0] sm:$0xff] }
  0x15   :  { %v430_v29 = vmax.f32 %v310_v11, 0.0  ;;  %v431_v30 = vmax.f32 %v311_v12, 0.0  ;;  %v1027_v34 = vpack.c.bf16 %v429_v19, %v428_v18  ;;  %v173_v37 = vmul.f32 %v1125_v14, %v31_v17  ;;  %v45_v19 = vld [vmem:[%s1906_s0 + $0xf8] sm:$0xff] }
  0x16   :  { %v432_v35 = vmax.f32 %v312_v24, 0.0  ;;  %v433_v36 = vmax.f32 %v313_v25, 0.0  ;;  %902 = vst [vmem:[%s1907_s3 + $0x20] sm:$0xff] %v1026_v28  ;;  %v314_v40 = vadd.f32 %v1127_v15, %v172_v31  ;;  %v174_v41 = vmul.f32 %v1140_v20, %v32_v26  ;;  %v46_v28 = vld [vmem:[%s1906_s0 + $0x100] sm:$0xff] }
  0x17   :  { %v1028_v39 = vpack.c.bf16 %v431_v30, %v430_v29  ;;  %v175_v42 = vmul.f32 %v1142_v21, %v33_v27  ;;  %903 = vst [vmem:[%s1907_s3 + $0x28] sm:$0xff] %v1027_v34  ;;  %v315_v45 = vadd.f32 %v1129_v16, %v173_v37  ;;  %v176_v46 = vmul.f32 %v1123_v13, %v34_v32  ;;  %v47_v37 = vld [vmem:[%s1906_s0 + $0x108] sm:$0xff] }
  0x18   :  { %v1029_v44 = vpack.c.bf16 %v433_v36, %v432_v35  ;;  %v177_v47 = vmul.f32 %v1125_v14, %v35_v33  ;;  %v434_v49 = vmax.f32 %v314_v40, 0.0  ;;  %v316_v50 = vadd.f32 %v1144_v22, %v174_v41 }
  0x19   :  { %904 = vst [vmem:[%s1907_s3 + $0x30] sm:$0xff] %v1028_v39  ;;  %v317_v51 = vadd.f32 %v1146_v23, %v175_v42  ;;  %v178_v52 = vmul.f32 %v1140_v20, %v36_v38  ;;  %v435_v53 = vmax.f32 %v315_v45, 0.0  ;;  %v318_v54 = vadd.f32 %v1127_v15, %v176_v46  ;;  %v48_v42 = vld [vmem:[%s1906_s0 + $0x110] sm:$0xff] }
  0x1a   :  { %905 = vst [vmem:[%s1907_s3 + $0x38] sm:$0xff] %v1029_v44  ;;  %v319_v55 = vadd.f32 %v1129_v16, %v177_v47  ;;  %v179_v56 = vmul.f32 %v1142_v21, %v37_v43  ;;  %v436_v58 = vmax.f32 %v316_v50, 0.0  ;;  %v180_v61 = vmul.f32 %v1123_v13, %v38_v48  ;;  %v49_v43 = vld [vmem:[%s1906_s0 + $0x118] sm:$0xff]  ;;  %v50_v48 = vld [vmem:[%s1906_s0 + $0x120] sm:$0xff] }
  0x1b   :  { %v437_v59 = vmax.f32 %v317_v51, 0.0  ;;  %v320_v60 = vadd.f32 %v1144_v22, %v178_v52  ;;  %v1030_v0 = vpack.c.bf16 %v435_v53, %v434_v49  ;;  %v438_v1 = vmax.f32 %v318_v54, 0.0  ;;  %v51_v49 = vld [vmem:[%s1906_s0 + $0x128] sm:$0xff]  ;;  %v52_v54 = vld [vmem:[%s1906_s0 + $0x130] sm:$0xff] }
  0x1c   :  { %v439_v2 = vmax.f32 %v319_v55, 0.0  ;;  %v321_v3 = vadd.f32 %v1146_v23, %v179_v56  ;;  %v181_v8 = vmul.f32 %v1125_v14, %v39_v57  ;;  %v322_v9 = vadd.f32 %v1127_v15, %v180_v61 }
  0x1d   :  { %v1031_v6 = vpack.c.bf16 %v437_v59, %v436_v58  ;;  %v440_v7 = vmax.f32 %v320_v60, 0.0  ;;  %906 = vst [vmem:[%s1907_s3 + $0x40] sm:$0xff] %v1030_v0  ;;  %v182_v17 = vmul.f32 %v1140_v20, %v40_v62  ;;  %v183_v18 = vmul.f32 %v1142_v21, %v41_v63  ;;  %v53_v59 = vld [vmem:[%s1906_s0 + $0x138] sm:$0xff]  ;;  %v54_v0 = vld [vmem:[%s1906_s0 + $0x140] sm:$0xff] }
  0x1e   :  { %v1032_v11 = vpack.c.bf16 %v439_v2, %v438_v1  ;;  %v441_v12 = vmax.f32 %v321_v3, 0.0  ;;  %v323_v24 = vadd.f32 %v1129_v16, %v181_v8  ;;  %v442_v25 = vmax.f32 %v322_v9, 0.0  ;;  %v55_v9 = vld [vmem:[%s1906_s0 + $0x148] sm:$0xff] }
  0x1f   :  { %907 = vst [vmem:[%s1907_s3 + $0x48] sm:$0xff] %v1031_v6  ;;  %v184_v26 = vmul.f32 %v1123_v13, %v42_v4  ;;  %v185_v27 = vmul.f32 %v1125_v14, %v43_v5  ;;  %v324_v30 = vadd.f32 %v1144_v22, %v182_v17  ;;  %v325_v31 = vadd.f32 %v1146_v23, %v183_v18  ;;  %v56_v18 = vld [vmem:[%s1906_s0 + $0x150] sm:$0xff] }
  0x20   :  { %908 = vst [vmem:[%s1907_s3 + $0x50] sm:$0xff] %v1032_v11  ;;  %v1033_v29 = vpack.c.bf16 %v441_v12, %v440_v7  ;;  %v186_v32 = vmul.f32 %v1140_v20, %v44_v10  ;;  %v443_v33 = vmax.f32 %v323_v24, 0.0  ;;  %v187_v36 = vmul.f32 %v1142_v21, %v45_v19  ;;  %v57_v19 = vld [vmem:[%s1906_s0 + $0x158] sm:$0xff] }
  0x21   :  { %v326_v34 = vadd.f32 %v1127_v15, %v184_v26  ;;  %v327_v35 = vadd.f32 %v1129_v16, %v185_v27  ;;  %v444_v38 = vmax.f32 %v324_v30, 0.0  ;;  %v445_v39 = vmax.f32 %v325_v31, 0.0 }
  0x22   :  { %909 = vst [vmem:[%s1907_s3 + $0x58] sm:$0xff] %v1033_v29  ;;  %v328_v40 = vadd.f32 %v1144_v22, %v186_v32  ;;  %v188_v41 = vmul.f32 %v1123_v13, %v46_v28  ;;  %v1034_v44 = vpack.c.bf16 %v443_v33, %v442_v25  ;;  %v329_v47 = vadd.f32 %v1146_v23, %v187_v36  ;;  %v58_v28 = vld [vmem:[%s1906_s0 + $0x160] sm:$0xff]  ;;  %v59_v29 = vld [vmem:[%s1906_s0 + $0x168] sm:$0xff] }
  0x23   :  { %v446_v45 = vmax.f32 %v326_v34, 0.0  ;;  %v447_v46 = vmax.f32 %v327_v35, 0.0  ;;  %v1035_v50 = vpack.c.bf16 %v445_v39, %v444_v38  ;;  %v189_v52 = vmul.f32 %v1125_v14, %v47_v37  ;;  %v60_v34 = vld [vmem:[%s1906_s0 + $0x170] sm:$0xff]  ;;  %v61_v39 = vld [vmem:[%s1906_s0 + $0x178] sm:$0xff] }
  0x24   :  { %v448_v51 = vmax.f32 %v328_v40, 0.0  ;;  %v330_v53 = vadd.f32 %v1127_v15, %v188_v41  ;;  %910 = vst [vmem:[%s1907_s3 + $0x60] sm:$0xff] %v1034_v44  ;;  %v449_v56 = vmax.f32 %v329_v47, 0.0  ;;  %v190_v57 = vmul.f32 %v1140_v20, %v48_v42  ;;  %v62_v44 = vld [vmem:[%s1906_s0 + $0x180] sm:$0xff] }
  0x25   :  { %v1036_v55 = vpack.c.bf16 %v447_v46, %v446_v45  ;;  %v191_v58 = vmul.f32 %v1142_v21, %v49_v43  ;;  %911 = vst [vmem:[%s1907_s3 + $0x68] sm:$0xff] %v1035_v50  ;;  %v331_v60 = vadd.f32 %v1129_v16, %v189_v52  ;;  %v192_v62 = vmul.f32 %v1123_v13, %v50_v48 }
  0x26   :  { %v450_v61 = vmax.f32 %v330_v53, 0.0  ;;  %v193_v63 = vmul.f32 %v1125_v14, %v51_v49  ;;  %v1037_v1 = vpack.c.bf16 %v449_v56, %v448_v51  ;;  %v332_v2 = vadd.f32 %v1144_v22, %v190_v57  ;;  %v63_v53 = vld [vmem:[%s1906_s0 + $0x188] sm:$0xff] }
  0x27   :  { %912 = vst [vmem:[%s1907_s3 + $0x70] sm:$0xff] %v1036_v55  ;;  %v333_v3 = vadd.f32 %v1146_v23, %v191_v58  ;;  %v194_v4 = vmul.f32 %v1140_v20, %v52_v54  ;;  %v451_v5 = vmax.f32 %v331_v60, 0.0  ;;  %v334_v6 = vadd.f32 %v1127_v15, %v192_v62  ;;  %v64_v58 = vld [vmem:[%s1906_s0 + $0x190] sm:$0xff] }
  0x28   :  { %v335_v7 = vadd.f32 %v1129_v16, %v193_v63  ;;  %v195_v8 = vmul.f32 %v1142_v21, %v53_v59  ;;  %913 = vst [vmem:[%s1907_s3 + $0x78] sm:$0xff] %v1037_v1  ;;  %v452_v10 = vmax.f32 %v332_v2, 0.0  ;;  %v196_v17 = vmul.f32 %v1123_v13, %v54_v0  ;;  %v65_v59 = vld [vmem:[%s1906_s0 + $0x198] sm:$0xff]  ;;  %v66_v0 = vld [vmem:[%s1906_s0 + $0x1a0] sm:$0xff]  ;;  %v67_v1 = vld [vmem:[%s1906_s0 + $0x1a8] sm:$0xff] }
  0x29   :  { %v453_v11 = vmax.f32 %v333_v3, 0.0  ;;  %v336_v12 = vadd.f32 %v1144_v22, %v194_v4  ;;  %v1038_v24 = vpack.c.bf16 %v451_v5, %v450_v61  ;;  %v454_v25 = vmax.f32 %v334_v6, 0.0  ;;  %v68_v6 = vld [vmem:[%s1906_s0 + $0x1b0] sm:$0xff] }
  0x2a   :  { %v455_v26 = vmax.f32 %v335_v7, 0.0  ;;  %v337_v27 = vadd.f32 %v1146_v23, %v195_v8  ;;  %v197_v32 = vmul.f32 %v1125_v14, %v55_v9  ;;  %v338_v33 = vadd.f32 %v1127_v15, %v196_v17 }
  0x2b   :  { %v1039_v30 = vpack.c.bf16 %v453_v11, %v452_v10  ;;  %v456_v31 = vmax.f32 %v336_v12, 0.0  ;;  %914 = vst [vmem:[%s1907_s3 + $0x80] sm:$0xff] %v1038_v24  ;;  %v198_v37 = vmul.f32 %v1140_v20, %v56_v18  ;;  %v199_v38 = vmul.f32 %v1142_v21, %v57_v19  ;;  %v69_v11 = vld [vmem:[%s1906_s0 + $0x1b8] sm:$0xff]  ;;  %v70_v24 = vld [vmem:[%s1906_s0 + $0x1c0] sm:$0xff] }
  0x2c   :  { %v1040_v35 = vpack.c.bf16 %v455_v26, %v454_v25  ;;  %v457_v36 = vmax.f32 %v337_v27, 0.0  ;;  %v339_v40 = vadd.f32 %v1129_v16, %v197_v32  ;;  %v458_v41 = vmax.f32 %v338_v33, 0.0  ;;  %v71_v33 = vld [vmem:[%s1906_s0 + $0x1c8] sm:$0xff] }
  0x2d   :  { %915 = vst [vmem:[%s1907_s3 + $0x88] sm:$0xff] %v1039_v30  ;;  %v200_v42 = vmul.f32 %v1123_v13, %v58_v28  ;;  %v201_v43 = vmul.f32 %v1125_v14, %v59_v29  ;;  %v340_v46 = vadd.f32 %v1144_v22, %v198_v37  ;;  %v341_v47 = vadd.f32 %v1146_v23, %v199_v38  ;;  %v72_v38 = vld [vmem:[%s1906_s0 + $0x1d0] sm:$0xff] }
  0x2e   :  { %916 = vst [vmem:[%s1907_s3 + $0x90] sm:$0xff] %v1040_v35  ;;  %v1041_v45 = vpack.c.bf16 %v457_v36, %v456_v31  ;;  %v202_v48 = vmul.f32 %v1140_v20, %v60_v34  ;;  %v459_v49 = vmax.f32 %v339_v40, 0.0  ;;  %v203_v52 = vmul.f32 %v1142_v21, %v61_v39  ;;  %v73_v39 = vld [vmem:[%s1906_s0 + $0x1d8] sm:$0xff] }
  0x2f   :  { %v342_v50 = vadd.f32 %v1127_v15, %v200_v42  ;;  %v343_v51 = vadd.f32 %v1129_v16, %v201_v43  ;;  %v460_v54 = vmax.f32 %v340_v46, 0.0  ;;  %v461_v55 = vmax.f32 %v341_v47, 0.0 }
  0x30   :  { %917 = vst [vmem:[%s1907_s3 + $0x98] sm:$0xff] %v1041_v45  ;;  %v344_v56 = vadd.f32 %v1144_v22, %v202_v48  ;;  %v204_v57 = vmul.f32 %v1123_v13, %v62_v44  ;;  %v1042_v60 = vpack.c.bf16 %v459_v49, %v458_v41  ;;  %v345_v63 = vadd.f32 %v1146_v23, %v203_v52  ;;  %v74_v44 = vld [vmem:[%s1906_s0 + $0x1e0] sm:$0xff]  ;;  %v75_v45 = vld [vmem:[%s1906_s0 + $0x1e8] sm:$0xff] }
  0x31   :  { %v462_v61 = vmax.f32 %v342_v50, 0.0  ;;  %v463_v62 = vmax.f32 %v343_v51, 0.0  ;;  %v1043_v2 = vpack.c.bf16 %v461_v55, %v460_v54  ;;  %v205_v4 = vmul.f32 %v1125_v14, %v63_v53  ;;  %v76_v50 = vld [vmem:[%s1906_s0 + $0x1f0] sm:$0xff]  ;;  %v77_v55 = vld [vmem:[%s1906_s0 + $0x1f8] sm:$0xff] }
  0x32   :  { %v464_v3 = vmax.f32 %v344_v56, 0.0  ;;  %v346_v5 = vadd.f32 %v1127_v15, %v204_v57  ;;  %918 = vst [vmem:[%s1907_s3 + $0xa0] sm:$0xff] %v1042_v60  ;;  %v465_v8 = vmax.f32 %v345_v63, 0.0  ;;  %v206_v9 = vmul.f32 %v1140_v20, %v64_v58  ;;  %v78_v60 = vld [vmem:[%s1906_s0 + $0x200] sm:$0xff] }
  0x33   :  { %v1044_v7 = vpack.c.bf16 %v463_v62, %v462_v61  ;;  %v207_v10 = vmul.f32 %v1142_v21, %v65_v59  ;;  %919 = vst [vmem:[%s1907_s3 + $0xa8] sm:$0xff] %v1043_v2  ;;  %v347_v12 = vadd.f32 %v1129_v16, %v205_v4  ;;  %v208_v18 = vmul.f32 %v1123_v13, %v66_v0 }
  0x34   :  { %v466_v17 = vmax.f32 %v346_v5, 0.0  ;;  %v209_v19 = vmul.f32 %v1125_v14, %v67_v1  ;;  %v1045_v25 = vpack.c.bf16 %v465_v8, %v464_v3  ;;  %v348_v26 = vadd.f32 %v1144_v22, %v206_v9  ;;  %v79_v5 = vld [vmem:[%s1906_s0 + $0x208] sm:$0xff] }
  0x35   :  { %920 = vst [vmem:[%s1907_s3 + $0xb0] sm:$0xff] %v1044_v7  ;;  %v349_v27 = vadd.f32 %v1146_v23, %v207_v10  ;;  %v210_v28 = vmul.f32 %v1140_v20, %v68_v6  ;;  %v467_v29 = vmax.f32 %v347_v12, 0.0  ;;  %v350_v30 = vadd.f32 %v1127_v15, %v208_v18  ;;  %v80_v10 = vld [vmem:[%s1906_s0 + $0x210] sm:$0xff] }
  0x36   :  { %v351_v31 = vadd.f32 %v1129_v16, %v209_v19  ;;  %v211_v32 = vmul.f32 %v1142_v21, %v69_v11  ;;  %921 = vst [vmem:[%s1907_s3 + $0xb8] sm:$0xff] %v1045_v25  ;;  %v468_v34 = vmax.f32 %v348_v26, 0.0  ;;  %v212_v37 = vmul.f32 %v1123_v13, %v70_v24  ;;  %v81_v11 = vld [vmem:[%s1906_s0 + $0x218] sm:$0xff]  ;;  %v82_v24 = vld [vmem:[%s1906_s0 + $0x220] sm:$0xff]  ;;  %v83_v25 = vld [vmem:[%s1906_s0 + $0x228] sm:$0xff] }
  0x37   :  { %v469_v35 = vmax.f32 %v349_v27, 0.0  ;;  %v352_v36 = vadd.f32 %v1144_v22, %v210_v28  ;;  %v1046_v40 = vpack.c.bf16 %v467_v29, %v466_v17  ;;  %v470_v41 = vmax.f32 %v350_v30, 0.0  ;;  %v84_v30 = vld [vmem:[%s1906_s0 + $0x230] sm:$0xff] }
  0x38   :  { %v471_v42 = vmax.f32 %v351_v31, 0.0  ;;  %v353_v43 = vadd.f32 %v1146_v23, %v211_v32  ;;  %v213_v48 = vmul.f32 %v1125_v14, %v71_v33  ;;  %v354_v49 = vadd.f32 %v1127_v15, %v212_v37 }
  0x39   :  { %v1047_v46 = vpack.c.bf16 %v469_v35, %v468_v34  ;;  %v472_v47 = vmax.f32 %v352_v36, 0.0  ;;  %922 = vst [vmem:[%s1907_s3 + $0xc0] sm:$0xff] %v1046_v40  ;;  %v214_v53 = vmul.f32 %v1140_v20, %v72_v38  ;;  %v215_v54 = vmul.f32 %v1142_v21, %v73_v39  ;;  %v85_v35 = vld [vmem:[%s1906_s0 + $0x238] sm:$0xff]  ;;  %v86_v40 = vld [vmem:[%s1906_s0 + $0x240] sm:$0xff] }
  0x3a   :  { %v1048_v51 = vpack.c.bf16 %v471_v42, %v470_v41  ;;  %v473_v52 = vmax.f32 %v353_v43, 0.0  ;;  %v355_v56 = vadd.f32 %v1129_v16, %v213_v48  ;;  %v474_v57 = vmax.f32 %v354_v49, 0.0  ;;  %v87_v49 = vld [vmem:[%s1906_s0 + $0x248] sm:$0xff] }
  0x3b   :  { %923 = vst [vmem:[%s1907_s3 + $0xc8] sm:$0xff] %v1047_v46  ;;  %v216_v58 = vmul.f32 %v1123_v13, %v74_v44  ;;  %v217_v59 = vmul.f32 %v1125_v14, %v75_v45  ;;  %v356_v62 = vadd.f32 %v1144_v22, %v214_v53  ;;  %v357_v63 = vadd.f32 %v1146_v23, %v215_v54  ;;  %v88_v54 = vld [vmem:[%s1906_s0 + $0x250] sm:$0xff] }
  0x3c   :  { %924 = vst [vmem:[%s1907_s3 + $0xd0] sm:$0xff] %v1048_v51  ;;  %v1049_v61 = vpack.c.bf16 %v473_v52, %v472_v47  ;;  %v218_v0 = vmul.f32 %v1140_v20, %v76_v50  ;;  %v475_v1 = vmax.f32 %v355_v56, 0.0  ;;  %v219_v4 = vmul.f32 %v1142_v21, %v77_v55  ;;  %v89_v55 = vld [vmem:[%s1906_s0 + $0x258] sm:$0xff] }
  0x3d   :  { %v358_v2 = vadd.f32 %v1127_v15, %v216_v58  ;;  %v359_v3 = vadd.f32 %v1129_v16, %v217_v59  ;;  %v476_v6 = vmax.f32 %v356_v62, 0.0  ;;  %v477_v7 = vmax.f32 %v357_v63, 0.0 }
  0x3e   :  { %925 = vst [vmem:[%s1907_s3 + $0xd8] sm:$0xff] %v1049_v61  ;;  %v360_v8 = vadd.f32 %v1144_v22, %v218_v0  ;;  %v220_v9 = vmul.f32 %v1123_v13, %v78_v60  ;;  %v1050_v12 = vpack.c.bf16 %v475_v1, %v474_v57  ;;  %v361_v19 = vadd.f32 %v1146_v23, %v219_v4  ;;  %v90_v60 = vld [vmem:[%s1906_s0 + $0x260] sm:$0xff]  ;;  %v91_v61 = vld [vmem:[%s1906_s0 + $0x268] sm:$0xff] }
  0x3f   :  { %v478_v17 = vmax.f32 %v358_v2, 0.0  ;;  %v479_v18 = vmax.f32 %v359_v3, 0.0  ;;  %v1051_v26 = vpack.c.bf16 %v477_v7, %v476_v6  ;;  %v221_v28 = vmul.f32 %v1125_v14, %v79_v5  ;;  %v92_v2 = vld [vmem:[%s1906_s0 + $0x270] sm:$0xff]  ;;  %v93_v7 = vld [vmem:[%s1906_s0 + $0x278] sm:$0xff] }
  0x40   :  { %v480_v27 = vmax.f32 %v360_v8, 0.0  ;;  %v362_v29 = vadd.f32 %v1127_v15, %v220_v9  ;;  %926 = vst [vmem:[%s1907_s3 + $0xe0] sm:$0xff] %v1050_v12  ;;  %v481_v32 = vmax.f32 %v361_v19, 0.0  ;;  %v222_v33 = vmul.f32 %v1140_v20, %v80_v10  ;;  %v94_v12 = vld [vmem:[%s1906_s0 + $0x280] sm:$0xff] }
  0x41   :  { %v1052_v31 = vpack.c.bf16 %v479_v18, %v478_v17  ;;  %v223_v34 = vmul.f32 %v1142_v21, %v81_v11  ;;  %927 = vst [vmem:[%s1907_s3 + $0xe8] sm:$0xff] %v1051_v26  ;;  %v363_v36 = vadd.f32 %v1129_v16, %v221_v28  ;;  %v224_v38 = vmul.f32 %v1123_v13, %v82_v24 }
  0x42   :  { %v482_v37 = vmax.f32 %v362_v29, 0.0  ;;  %v225_v39 = vmul.f32 %v1125_v14, %v83_v25  ;;  %v1053_v41 = vpack.c.bf16 %v481_v32, %v480_v27  ;;  %v364_v42 = vadd.f32 %v1144_v22, %v222_v33  ;;  %v95_v29 = vld [vmem:[%s1906_s0 + $0x288] sm:$0xff] }
  0x43   :  { %928 = vst [vmem:[%s1907_s3 + $0xf0] sm:$0xff] %v1052_v31  ;;  %v365_v43 = vadd.f32 %v1146_v23, %v223_v34  ;;  %v226_v44 = vmul.f32 %v1140_v20, %v84_v30  ;;  %v483_v45 = vmax.f32 %v363_v36, 0.0  ;;  %v366_v46 = vadd.f32 %v1127_v15, %v224_v38  ;;  %v96_v34 = vld [vmem:[%s1906_s0 + $0x290] sm:$0xff] }
  0x44   :  { %v367_v47 = vadd.f32 %v1129_v16, %v225_v39  ;;  %v227_v48 = vmul.f32 %v1142_v21, %v85_v35  ;;  %929 = vst [vmem:[%s1907_s3 + $0xf8] sm:$0xff] %v1053_v41  ;;  %v484_v50 = vmax.f32 %v364_v42, 0.0  ;;  %v228_v53 = vmul.f32 %v1123_v13, %v86_v40  ;;  %v97_v35 = vld [vmem:[%s1906_s0 + $0x298] sm:$0xff]  ;;  %v98_v40 = vld [vmem:[%s1906_s0 + $0x2a0] sm:$0xff]  ;;  %v99_v41 = vld [vmem:[%s1906_s0 + $0x2a8] sm:$0xff] }
  0x45   :  { %v485_v51 = vmax.f32 %v365_v43, 0.0  ;;  %v368_v52 = vadd.f32 %v1144_v22, %v226_v44  ;;  %v1054_v56 = vpack.c.bf16 %v483_v45, %v482_v37  ;;  %v486_v57 = vmax.f32 %v366_v46, 0.0  ;;  %v100_v46 = vld [vmem:[%s1906_s0 + $0x2b0] sm:$0xff] }
  0x46   :  { %v487_v58 = vmax.f32 %v367_v47, 0.0  ;;  %v369_v59 = vadd.f32 %v1146_v23, %v227_v48  ;;  %v229_v0 = vmul.f32 %v1125_v14, %v87_v49  ;;  %v370_v1 = vadd.f32 %v1127_v15, %v228_v53 }
  0x47   :  { %v1055_v62 = vpack.c.bf16 %v485_v51, %v484_v50  ;;  %v488_v63 = vmax.f32 %v368_v52, 0.0  ;;  %930 = vst [vmem:[%s1907_s3 + $0x100] sm:$0xff] %v1054_v56  ;;  %v230_v5 = vmul.f32 %v1140_v20, %v88_v54  ;;  %v231_v6 = vmul.f32 %v1142_v21, %v89_v55  ;;  %v101_v51 = vld [vmem:[%s1906_s0 + $0x2b8] sm:$0xff]  ;;  %v102_v56 = vld [vmem:[%s1906_s0 + $0x2c0] sm:$0xff] }
  0x48   :  { %v1056_v3 = vpack.c.bf16 %v487_v58, %v486_v57  ;;  %v489_v4 = vmax.f32 %v369_v59, 0.0  ;;  %v371_v8 = vadd.f32 %v1129_v16, %v229_v0  ;;  %v490_v9 = vmax.f32 %v370_v1, 0.0  ;;  %v103_v1 = vld [vmem:[%s1906_s0 + $0x2c8] sm:$0xff] }
  0x49   :  { %931 = vst [vmem:[%s1907_s3 + $0x108] sm:$0xff] %v1055_v62  ;;  %v232_v10 = vmul.f32 %v1123_v13, %v90_v60  ;;  %v233_v11 = vmul.f32 %v1125_v14, %v91_v61  ;;  %v372_v18 = vadd.f32 %v1144_v22, %v230_v5  ;;  %v373_v19 = vadd.f32 %v1146_v23, %v231_v6  ;;  %v104_v6 = vld [vmem:[%s1906_s0 + $0x2d0] sm:$0xff] }
  0x4a   :  { %932 = vst [vmem:[%s1907_s3 + $0x110] sm:$0xff] %v1056_v3  ;;  %v1057_v17 = vpack.c.bf16 %v489_v4, %v488_v63  ;;  %v234_v24 = vmul.f32 %v1140_v20, %v92_v2  ;;  %v491_v25 = vmax.f32 %v371_v8, 0.0  ;;  %v235_v28 = vmul.f32 %v1142_v21, %v93_v7  ;;  %v105_v7 = vld [vmem:[%s1906_s0 + $0x2d8] sm:$0xff] }
  0x4b   :  { %v374_v26 = vadd.f32 %v1127_v15, %v232_v10  ;;  %v375_v27 = vadd.f32 %v1129_v16, %v233_v11  ;;  %v492_v30 = vmax.f32 %v372_v18, 0.0  ;;  %v493_v31 = vmax.f32 %v373_v19, 0.0 }
  0x4c   :  { %933 = vst [vmem:[%s1907_s3 + $0x118] sm:$0xff] %v1057_v17  ;;  %v376_v32 = vadd.f32 %v1144_v22, %v234_v24  ;;  %v236_v33 = vmul.f32 %v1123_v13, %v94_v12  ;;  %v1058_v36 = vpack.c.bf16 %v491_v25, %v490_v9  ;;  %v377_v39 = vadd.f32 %v1146_v23, %v235_v28  ;;  %v106_v12 = vld [vmem:[%s1906_s0 + $0x2e0] sm:$0xff]  ;;  %v107_v17 = vld [vmem:[%s1906_s0 + $0x2e8] sm:$0xff] }
  0x4d   :  { %v494_v37 = vmax.f32 %v374_v26, 0.0  ;;  %v495_v38 = vmax.f32 %v375_v27, 0.0  ;;  %v1059_v42 = vpack.c.bf16 %v493_v31, %v492_v30  ;;  %v237_v44 = vmul.f32 %v1125_v14, %v95_v29  ;;  %v108_v26 = vld [vmem:[%s1906_s0 + $0x2f0] sm:$0xff]  ;;  %v109_v31 = vld [vmem:[%s1906_s0 + $0x2f8] sm:$0xff] }
  0x4e   :  { %v496_v43 = vmax.f32 %v376_v32, 0.0  ;;  %v378_v45 = vadd.f32 %v1127_v15, %v236_v33  ;;  %934 = vst [vmem:[%s1907_s3 + $0x120] sm:$0xff] %v1058_v36  ;;  %v497_v48 = vmax.f32 %v377_v39, 0.0  ;;  %v238_v49 = vmul.f32 %v1140_v20, %v96_v34  ;;  %v110_v36 = vld [vmem:[%s1906_s0 + $0x300] sm:$0xff] }
  0x4f   :  { %v1060_v47 = vpack.c.bf16 %v495_v38, %v494_v37  ;;  %v239_v50 = vmul.f32 %v1142_v21, %v97_v35  ;;  %935 = vst [vmem:[%s1907_s3 + $0x128] sm:$0xff] %v1059_v42  ;;  %v379_v52 = vadd.f32 %v1129_v16, %v237_v44  ;;  %v240_v54 = vmul.f32 %v1123_v13, %v98_v40 }
  0x50   :  { %v498_v53 = vmax.f32 %v378_v45, 0.0  ;;  %v241_v55 = vmul.f32 %v1125_v14, %v99_v41  ;;  %v1061_v57 = vpack.c.bf16 %v497_v48, %v496_v43  ;;  %v380_v58 = vadd.f32 %v1144_v22, %v238_v49  ;;  %v111_v45 = vld [vmem:[%s1906_s0 + $0x308] sm:$0xff] }
  0x51   :  { %936 = vst [vmem:[%s1907_s3 + $0x130] sm:$0xff] %v1060_v47  ;;  %v381_v59 = vadd.f32 %v1146_v23, %v239_v50  ;;  %v242_v60 = vmul.f32 %v1140_v20, %v100_v46  ;;  %v499_v61 = vmax.f32 %v379_v52, 0.0  ;;  %v382_v62 = vadd.f32 %v1127_v15, %v240_v54  ;;  %v112_v50 = vld [vmem:[%s1906_s0 + $0x310] sm:$0xff] }
  0x52   :  { %v383_v63 = vadd.f32 %v1129_v16, %v241_v55  ;;  %v243_v0 = vmul.f32 %v1142_v21, %v101_v51  ;;  %937 = vst [vmem:[%s1907_s3 + $0x138] sm:$0xff] %v1061_v57  ;;  %v500_v2 = vmax.f32 %v380_v58, 0.0  ;;  %v244_v5 = vmul.f32 %v1123_v13, %v102_v56  ;;  %v113_v51 = vld [vmem:[%s1906_s0 + $0x318] sm:$0xff]  ;;  %v114_v56 = vld [vmem:[%s1906_s0 + $0x320] sm:$0xff]  ;;  %v115_v57 = vld [vmem:[%s1906_s0 + $0x328] sm:$0xff] }
  0x53   :  { %v501_v3 = vmax.f32 %v381_v59, 0.0  ;;  %v384_v4 = vadd.f32 %v1144_v22, %v242_v60  ;;  %v1062_v8 = vpack.c.bf16 %v499_v61, %v498_v53  ;;  %v502_v9 = vmax.f32 %v382_v62, 0.0  ;;  %v116_v62 = vld [vmem:[%s1906_s0 + $0x330] sm:$0xff] }
  0x54   :  { %v503_v10 = vmax.f32 %v383_v63, 0.0  ;;  %v385_v11 = vadd.f32 %v1146_v23, %v243_v0  ;;  %v245_v24 = vmul.f32 %v1125_v14, %v103_v1  ;;  %v386_v25 = vadd.f32 %v1127_v15, %v244_v5 }
  0x55   :  { %v1063_v18 = vpack.c.bf16 %v501_v3, %v500_v2  ;;  %v504_v19 = vmax.f32 %v384_v4, 0.0  ;;  %938 = vst [vmem:[%s1907_s3 + $0x140] sm:$0xff] %v1062_v8  ;;  %v246_v29 = vmul.f32 %v1140_v20, %v104_v6  ;;  %v247_v30 = vmul.f32 %v1142_v21, %v105_v7  ;;  %v117_v3 = vld [vmem:[%s1906_s0 + $0x338] sm:$0xff]  ;;  %v118_v8 = vld [vmem:[%s1906_s0 + $0x340] sm:$0xff] }
  0x56   :  { %v1064_v27 = vpack.c.bf16 %v503_v10, %v502_v9  ;;  %v505_v28 = vmax.f32 %v385_v11, 0.0  ;;  %v387_v32 = vadd.f32 %v1129_v16, %v245_v24  ;;  %v506_v33 = vmax.f32 %v386_v25, 0.0  ;;  %v119_v25 = vld [vmem:[%s1906_s0 + $0x348] sm:$0xff] }
  0x57   :  { %939 = vst [vmem:[%s1907_s3 + $0x148] sm:$0xff] %v1063_v18  ;;  %v248_v34 = vmul.f32 %v1123_v13, %v106_v12  ;;  %v249_v35 = vmul.f32 %v1125_v14, %v107_v17  ;;  %v388_v38 = vadd.f32 %v1144_v22, %v246_v29  ;;  %v389_v39 = vadd.f32 %v1146_v23, %v247_v30  ;;  %v120_v30 = vld [vmem:[%s1906_s0 + $0x350] sm:$0xff] }
  0x58   :  { %940 = vst [vmem:[%s1907_s3 + $0x150] sm:$0xff] %v1064_v27  ;;  %v1065_v37 = vpack.c.bf16 %v505_v28, %v504_v19  ;;  %v250_v40 = vmul.f32 %v1140_v20, %v108_v26  ;;  %v507_v41 = vmax.f32 %v387_v32, 0.0  ;;  %v251_v44 = vmul.f32 %v1142_v21, %v109_v31  ;;  %v121_v31 = vld [vmem:[%s1906_s0 + $0x358] sm:$0xff] }
  0x59   :  { %v390_v42 = vadd.f32 %v1127_v15, %v248_v34  ;;  %v391_v43 = vadd.f32 %v1129_v16, %v249_v35  ;;  %v508_v46 = vmax.f32 %v388_v38, 0.0  ;;  %v509_v47 = vmax.f32 %v389_v39, 0.0 }
  0x5a   :  { %941 = vst [vmem:[%s1907_s3 + $0x158] sm:$0xff] %v1065_v37  ;;  %v392_v48 = vadd.f32 %v1144_v22, %v250_v40  ;;  %v252_v49 = vmul.f32 %v1123_v13, %v110_v36  ;;  %v1066_v52 = vpack.c.bf16 %v507_v41, %v506_v33  ;;  %v393_v55 = vadd.f32 %v1146_v23, %v251_v44  ;;  %v122_v36 = vld [vmem:[%s1906_s0 + $0x360] sm:$0xff]  ;;  %v123_v37 = vld [vmem:[%s1906_s0 + $0x368] sm:$0xff] }
  0x5b   :  { %v510_v53 = vmax.f32 %v390_v42, 0.0  ;;  %v511_v54 = vmax.f32 %v391_v43, 0.0  ;;  %v1067_v58 = vpack.c.bf16 %v509_v47, %v508_v46  ;;  %v253_v60 = vmul.f32 %v1125_v14, %v111_v45  ;;  %v124_v42 = vld [vmem:[%s1906_s0 + $0x370] sm:$0xff]  ;;  %v125_v47 = vld [vmem:[%s1906_s0 + $0x378] sm:$0xff] }
  0x5c   :  { %v512_v59 = vmax.f32 %v392_v48, 0.0  ;;  %v394_v61 = vadd.f32 %v1127_v15, %v252_v49  ;;  %942 = vst [vmem:[%s1907_s3 + $0x160] sm:$0xff] %v1066_v52  ;;  %v513_v0 = vmax.f32 %v393_v55, 0.0  ;;  %v254_v1 = vmul.f32 %v1140_v20, %v112_v50  ;;  %v126_v52 = vld [vmem:[%s1906_s0 + $0x380] sm:$0xff] }
  0x5d   :  { %v1068_v63 = vpack.c.bf16 %v511_v54, %v510_v53  ;;  %v255_v2 = vmul.f32 %v1142_v21, %v113_v51  ;;  %943 = vst [vmem:[%s1907_s3 + $0x168] sm:$0xff] %v1067_v58  ;;  %v395_v4 = vadd.f32 %v1129_v16, %v253_v60  ;;  %v256_v6 = vmul.f32 %v1123_v13, %v114_v56 }
  0x5e   :  { %v514_v5 = vmax.f32 %v394_v61, 0.0  ;;  %v257_v7 = vmul.f32 %v1125_v14, %v115_v57  ;;  %v1069_v9 = vpack.c.bf16 %v513_v0, %v512_v59  ;;  %v396_v10 = vadd.f32 %v1144_v22, %v254_v1  ;;  %v127_v61 = vld [vmem:[%s1906_s0 + $0x388] sm:$0xff] }
  0x5f   :  { %944 = vst [vmem:[%s1907_s3 + $0x170] sm:$0xff] %v1068_v63  ;;  %v397_v11 = vadd.f32 %v1146_v23, %v255_v2  ;;  %v258_v12 = vmul.f32 %v1140_v20, %v116_v62  ;;  %v515_v17 = vmax.f32 %v395_v4, 0.0  ;;  %v398_v18 = vadd.f32 %v1127_v15, %v256_v6  ;;  %v128_v2 = vld [vmem:[%s1906_s0 + $0x390] sm:$0xff] }
  0x60   :  { %v399_v19 = vadd.f32 %v1129_v16, %v257_v7  ;;  %v259_v24 = vmul.f32 %v1142_v21, %v117_v3  ;;  %945 = vst [vmem:[%s1907_s3 + $0x178] sm:$0xff] %v1069_v9  ;;  %v516_v26 = vmax.f32 %v396_v10, 0.0  ;;  %v260_v29 = vmul.f32 %v1123_v13, %v118_v8  ;;  %v129_v3 = vld [vmem:[%s1906_s0 + $0x398] sm:$0xff]  ;;  %v130_v8 = vld [vmem:[%s1906_s0 + $0x3a0] sm:$0xff]  ;;  %v131_v9 = vld [vmem:[%s1906_s0 + $0x3a8] sm:$0xff] }
  0x61   :  { %v517_v27 = vmax.f32 %v397_v11, 0.0  ;;  %v400_v28 = vadd.f32 %v1144_v22, %v258_v12  ;;  %v1070_v32 = vpack.c.bf16 %v515_v17, %v514_v5  ;;  %v518_v33 = vmax.f32 %v398_v18, 0.0  ;;  %v132_v18 = vld [vmem:[%s1906_s0 + $0x3b0] sm:$0xff] }
  0x62   :  { %v519_v34 = vmax.f32 %v399_v19, 0.0  ;;  %v401_v35 = vadd.f32 %v1146_v23, %v259_v24  ;;  %v261_v40 = vmul.f32 %v1125_v14, %v119_v25  ;;  %v402_v41 = vadd.f32 %v1127_v15, %v260_v29 }
  0x63   :  { %v1071_v38 = vpack.c.bf16 %v517_v27, %v516_v26  ;;  %v520_v39 = vmax.f32 %v400_v28, 0.0  ;;  %946 = vst [vmem:[%s1907_s3 + $0x180] sm:$0xff] %v1070_v32  ;;  %v262_v45 = vmul.f32 %v1140_v20, %v120_v30  ;;  %v263_v46 = vmul.f32 %v1142_v21, %v121_v31  ;;  %v133_v27 = vld [vmem:[%s1906_s0 + $0x3b8] sm:$0xff] }
  0x64   :  { %v1072_v43 = vpack.c.bf16 %v519_v34, %v518_v33  ;;  %v521_v44 = vmax.f32 %v401_v35, 0.0  ;;  %v403_v48 = vadd.f32 %v1129_v16, %v261_v40  ;;  %v522_v49 = vmax.f32 %v402_v41, 0.0 }
  0x65   :  { %947 = vst [vmem:[%s1907_s3 + $0x188] sm:$0xff] %v1071_v38  ;;  %v264_v50 = vmul.f32 %v1123_v13, %v122_v36  ;;  %v265_v51 = vmul.f32 %v1125_v14, %v123_v37  ;;  %v404_v54 = vadd.f32 %v1144_v22, %v262_v45  ;;  %v405_v55 = vadd.f32 %v1146_v23, %v263_v46 }
  0x66   :  { %948 = vst [vmem:[%s1907_s3 + $0x190] sm:$0xff] %v1072_v43  ;;  %v1073_v53 = vpack.c.bf16 %v521_v44, %v520_v39  ;;  %v266_v56 = vmul.f32 %v1140_v20, %v124_v42  ;;  %v523_v57 = vmax.f32 %v403_v48, 0.0  ;;  %v267_v60 = vmul.f32 %v1142_v21, %v125_v47 }
  0x67   :  { %v406_v58 = vadd.f32 %v1127_v15, %v264_v50  ;;  %v407_v59 = vadd.f32 %v1129_v16, %v265_v51  ;;  %v524_v62 = vmax.f32 %v404_v54, 0.0  ;;  %v525_v63 = vmax.f32 %v405_v55, 0.0 }
  0x68   :  { %949 = vst [vmem:[%s1907_s3 + $0x198] sm:$0xff] %v1073_v53  ;;  %v408_v0 = vadd.f32 %v1144_v22, %v266_v56  ;;  %v268_v1 = vmul.f32 %v1123_v13, %v126_v52  ;;  %v1074_v4 = vpack.c.bf16 %v523_v57, %v522_v49  ;;  %v409_v7 = vadd.f32 %v1146_v23, %v267_v60 }
  0x69   :  { %v526_v5 = vmax.f32 %v406_v58, 0.0  ;;  %v527_v6 = vmax.f32 %v407_v59, 0.0  ;;  %v1075_v10 = vpack.c.bf16 %v525_v63, %v524_v62  ;;  %v269_v12 = vmul.f32 %v1125_v14, %v127_v61 }
  0x6a   :  { %v528_v11 = vmax.f32 %v408_v0, 0.0  ;;  %v410_v17 = vadd.f32 %v1127_v15, %v268_v1  ;;  %950 = vst [vmem:[%s1907_s3 + $0x1a0] sm:$0xff] %v1074_v4  ;;  %v529_v24 = vmax.f32 %v409_v7, 0.0  ;;  %v270_v25 = vmul.f32 %v1140_v20, %v128_v2 }
  0x6b   :  { %v1076_v19 = vpack.c.bf16 %v527_v6, %v526_v5  ;;  %v271_v26 = vmul.f32 %v1142_v21, %v129_v3  ;;  %951 = vst [vmem:[%s1907_s3 + $0x1a8] sm:$0xff] %v1075_v10  ;;  %v411_v28 = vadd.f32 %v1129_v16, %v269_v12  ;;  %v272_v30 = vmul.f32 %v1123_v13, %v130_v8 }
  0x6c   :  { %v530_v29 = vmax.f32 %v410_v17, 0.0  ;;  %v273_v31 = vmul.f32 %v1125_v14, %v131_v9  ;;  %v1077_v32 = vpack.c.bf16 %v529_v24, %v528_v11  ;;  %v412_v33 = vadd.f32 %v1144_v22, %v270_v25 }
  0x6d   :  { %952 = vst [vmem:[%s1907_s3 + $0x1b0] sm:$0xff] %v1076_v19  ;;  %v413_v34 = vadd.f32 %v1146_v23, %v271_v26  ;;  %v274_v35 = vmul.f32 %v1140_v20, %v132_v18  ;;  %v531_v36 = vmax.f32 %v411_v28, 0.0  ;;  %v414_v37 = vadd.f32 %v1127_v15, %v272_v30 }
  0x6e   :  { %v415_v38 = vadd.f32 %v1129_v16, %v273_v31  ;;  %v275_v13 = vmul.f32 %v1142_v21, %v133_v27  ;;  %953 = vst [vmem:[%s1907_s3 + $0x1b8] sm:$0xff] %v1077_v32  ;;  %v532_v14 = vmax.f32 %v412_v33, 0.0 }
  0x6f   :  { %v533_v39 = vmax.f32 %v413_v34, 0.0  ;;  %v416_v40 = vadd.f32 %v1144_v22, %v274_v35  ;;  %v1078_v41 = vpack.c.bf16 %v531_v36, %v530_v29  ;;  %v534_v42 = vmax.f32 %v414_v37, 0.0 }
  0x70   :  { %v535_v43 = vmax.f32 %v415_v38, 0.0  ;;  %v417_v20 = vadd.f32 %v1146_v23, %v275_v13 }
  0x71   :  { %v1079_v44 = vpack.c.bf16 %v533_v39, %v532_v14  ;;  %v536_v45 = vmax.f32 %v416_v40, 0.0  ;;  %954 = vst [vmem:[%s1907_s3 + $0x1c0] sm:$0xff] %v1078_v41 }
  0x72   :  { %v1080_v15 = vpack.c.bf16 %v535_v43, %v534_v42  ;;  %v537_v16 = vmax.f32 %v417_v20, 0.0 }
  0x73   :  { %955 = vst [vmem:[%s1907_s3 + $0x1c8] sm:$0xff] %v1079_v44 }
  0x74   :  { %956 = vst [vmem:[%s1907_s3 + $0x1d0] sm:$0xff] %v1080_v15  ;;  %v1081_v21 = vpack.c.bf16 %v537_v16, %v536_v45 }
  0x76   :  { %957 = vst [vmem:[%s1907_s3 + $0x1d8] sm:$0xff] %v1081_v21 }

// kernel: _lambda_.26
= control target key start
LH: loop header
LB: loop body
LE: loop exit
PB: predicated region body
PF: predicated region fallthrough
CT: control target
= control target key end

     0   :  { %s1944_s9 = smov 0   ;;  %s2327_s0 = inlined_call_operand.vmem [shape: bf16[7488,16], index: 0, kind: input, shape index: {}]   ;;  %s2328_s1 = inlined_call_operand.vmem [shape: bf16[16,128], index: 1, kind: input, shape index: {}]   ;;  %s2329_s2 = inlined_call_operand.vmem [shape: f32[7488,128], index: 2, kind: output, shape index: {}]  }
   0x1 LB: > { %s1421_s10 = sadd.s32 4294967295, %s1925_s9   ;;  %p1425_p0 = scmp.ge.s32.totalorder %s1925_s9, 1  ;;  %s1925_s9 = sphi %s1944_s9, %s12_s9  }
   0x2   : > { %p113_p1 = scmp.lt.s32.totalorder %s1925_s9, 9 }
   0x4   : > { %p114_p2 = pnand %p1425_p0, %p113_p1 }
   0x5   : > { %s135_s13 = smul.u32 (!%p114_p2), 117, %s1421_s10 }
   0x6   : > { %117 = sbr.rel (%p114_p2) target bundleno = 447 (0x1bf), region = 28 }
   0x7   : > { %p136_p3 = scmp.lt.s32.totalorder (!%p114_p2), %s135_s13, 935 }
   0xb   : > { %v1859_v0 = vld [vmem:[%s2328_s1] sm:$0xff]   ;;  %v1927_v1 = vmov 0.0   ;;  %vm1928_vm0 = vmmov 0   ;;  %s2331_s13 = smov (!%p136_p3, %s135_s13), 935  ;;  %vm566_vm1 = vcmask 130048  }
   0xc   : > { %1609 = vmatprep.subr.bf16.mxu0 %v1927_v1  ;;  %1847 = vmatprep.subr.bf16.mxu1 %v1927_v1  ;;  %s1426_s14 = sshll.u32 %s2331_s13, 2  ;;  %s1427_s18 = sshll.u32 %s2331_s13, 3 }
   0xd   : > { %1610 = vmatpush3.bf16.msra.mxu0 %v1859_v0  ;;  %1848 = vmatpush3.bf16.msra.mxu1 %v1859_v0  ;;  %s1967_s17 = scalar_lea.vmem %s2327_s0, %s1426_s14  ;;  %s2167_s21 = scalar_lea.vmem %s2329_s2, %s1427_s18 }
   0xe   : > { %1611 = vmatprep.mubr.msk.bf16.mxu0 %vm1928_vm0, %v1927_v1  ;;  %1731 = vmatprep.mubr.msk.bf16.mxu1 %vm1928_vm0, %v1927_v1  ;;  %v1860_v2 = vld [vmem:[%s1967_s17] sm:$0xff]   ;;  %v1861_v3 = vld [vmem:[%s1967_s17 + $0xf0] sm:$0xff]   ;;  %v1862_v4 = vld [vmem:[%s1967_s17 + $0x8] sm:$0xff]  }
   0xf   : > { %v1863_v5 = vld [vmem:[%s1967_s17 + $0xf8] sm:$0xff]   ;;  %v1864_v6 = vld [vmem:[%s1967_s17 + $0x10] sm:$0xff]   ;;  %v1865_v7 = vld [vmem:[%s1967_s17 + $0x100] sm:$0xff]  }
  0x10   : > { %1612 = vmatmul.mubr.msk.bf16.vlgmr.msra.gmra.mxu0 %vm566_vm1, %v1860_v2  ;;  %1732 = vmatmul.mubr.msk.bf16.vlgmr.msra.gmra.mxu1 %vm566_vm1, %v1861_v3  ;;  %v1866_v8 = vld [vmem:[%s1967_s17 + $0x18] sm:$0xff]   ;;  %v1867_v9 = vld [vmem:[%s1967_s17 + $0x108] sm:$0xff]   ;;  %v1868_v10 = vld [vmem:[%s1967_s17 + $0x20] sm:$0xff]  }
  0x11   : > { %1615 = vmatprep.mubr.msk.bf16.mxu0 %vm1928_vm0, %v1927_v1  ;;  %1735 = vmatprep.mubr.msk.bf16.mxu1 %vm1928_vm0, %v1927_v1  ;;  %v1869_v11 = vld [vmem:[%s1967_s17 + $0x110] sm:$0xff]   ;;  %v1870_v12 = vld [vmem:[%s1967_s17 + $0x28] sm:$0xff]   ;;  %v1871_v13 = vld [vmem:[%s1967_s17 + $0x118] sm:$0xff]  }
  0x12   : > { %v1872_v14 = vld [vmem:[%s1967_s17 + $0x30] sm:$0xff]   ;;  %v1873_v15 = vld [vmem:[%s1967_s17 + $0x120] sm:$0xff]   ;;  %v1874_v16 = vld [vmem:[%s1967_s17 + $0x38] sm:$0xff]  }
  0x13   : > { %v1875_v17 = vld [vmem:[%s1967_s17 + $0x128] sm:$0xff]   ;;  %v1876_v18 = vld [vmem:[%s1967_s17 + $0x40] sm:$0xff]   ;;  %v1877_v19 = vld [vmem:[%s1967_s17 + $0x130] sm:$0xff]  }
  0x14   : > { %v1878_v20 = vld [vmem:[%s1967_s17 + $0x48] sm:$0xff]   ;;  %v1879_v21 = vld [vmem:[%s1967_s17 + $0x138] sm:$0xff]   ;;  %v1880_v22 = vld [vmem:[%s1967_s17 + $0x50] sm:$0xff]  }
  0x15   : > { %v1881_v23 = vld [vmem:[%s1967_s17 + $0x140] sm:$0xff]   ;;  %v1882_v24 = vld [vmem:[%s1967_s17 + $0x58] sm:$0xff]   ;;  %v1883_v25 = vld [vmem:[%s1967_s17 + $0x148] sm:$0xff]  }
  0x16   : > { %v1884_v26 = vld [vmem:[%s1967_s17 + $0x60] sm:$0xff]   ;;  %v1885_v27 = vld [vmem:[%s1967_s17 + $0x150] sm:$0xff]   ;;  %v1886_v28 = vld [vmem:[%s1967_s17 + $0x68] sm:$0xff]  }
  0x17   : > { %v1887_v29 = vld [vmem:[%s1967_s17 + $0x158] sm:$0xff]   ;;  %v1888_v30 = vld [vmem:[%s1967_s17 + $0x70] sm:$0xff]   ;;  %v1889_v31 = vld [vmem:[%s1967_s17 + $0x160] sm:$0xff]  }
  0x18   : > { %1616 = vmatmul.mubr.msk.bf16.gmra.mxu0 %vm566_vm1, %v1862_v4  ;;  %1736 = vmatmul.mubr.msk.bf16.gmra.mxu1 %vm566_vm1, %v1863_v5  ;;  %v1890_v32 = vld [vmem:[%s1967_s17 + $0x78] sm:$0xff]   ;;  %v1891_v33 = vld [vmem:[%s1967_s17 + $0x168] sm:$0xff]   ;;  %v1892_v34 = vld [vmem:[%s1967_s17 + $0x80] sm:$0xff]  }
  0x19   : > { %1619 = vmatprep.mubr.msk.bf16.mxu0 %vm1928_vm0, %v1927_v1  ;;  %1739 = vmatprep.mubr.msk.bf16.mxu1 %vm1928_vm0, %v1927_v1  ;;  %v1893_v35 = vld [vmem:[%s1967_s17 + $0x170] sm:$0xff]   ;;  %v1894_v36 = vld [vmem:[%s1967_s17 + $0x88] sm:$0xff]   ;;  %v1895_v37 = vld [vmem:[%s1967_s17 + $0x178] sm:$0xff]  }
  0x1a   : > { %v1896_v38 = vld [vmem:[%s1967_s17 + $0x90] sm:$0xff]   ;;  %v1897_v39 = vld [vmem:[%s1967_s17 + $0x180] sm:$0xff]   ;;  %v1898_v40 = vld [vmem:[%s1967_s17 + $0x98] sm:$0xff]  }
  0x1b   : > { %v1899_v41 = vld [vmem:[%s1967_s17 + $0x188] sm:$0xff]   ;;  %v1900_v42 = vld [vmem:[%s1967_s17 + $0xa0] sm:$0xff]   ;;  %v1901_v43 = vld [vmem:[%s1967_s17 + $0x190] sm:$0xff]  }
  0x1c   : > { %v1902_v44 = vld [vmem:[%s1967_s17 + $0xa8] sm:$0xff]   ;;  %v1903_v45 = vld [vmem:[%s1967_s17 + $0x198] sm:$0xff]   ;;  %v1904_v46 = vld [vmem:[%s1967_s17 + $0xb0] sm:$0xff]  }
  0x1d   : > { %v1905_v47 = vld [vmem:[%s1967_s17 + $0x1a0] sm:$0xff]   ;;  %v1906_v48 = vld [vmem:[%s1967_s17 + $0xb8] sm:$0xff]   ;;  %v1907_v49 = vld [vmem:[%s1967_s17 + $0x1a8] sm:$0xff]  }
  0x1e   : > { %v1908_v50 = vld [vmem:[%s1967_s17 + $0xc0] sm:$0xff]   ;;  %v1909_v51 = vld [vmem:[%s1967_s17 + $0x1b0] sm:$0xff]   ;;  %v1910_v57 = vld [vmem:[%s1967_s17 + $0xc8] sm:$0xff]  }
  0x1f   : > { %v1911_v59 = vld [vmem:[%s1967_s17 + $0x1b8] sm:$0xff]   ;;  %v1912_v4 = vld [vmem:[%s1967_s17 + $0xd0] sm:$0xff]  }
  0x20   : > { %1620 = vmatmul.mubr.msk.bf16.gmra.mxu0 %vm566_vm1, %v1864_v6  ;;  %1740 = vmatmul.mubr.msk.bf16.gmra.mxu1 %vm566_vm1, %v1865_v7  ;;  %v1913_v6 = vld [vmem:[%s1967_s17 + $0x1c0] sm:$0xff]  }
  0x21   : > { %1623 = vmatprep.mubr.msk.bf16.mxu0 %vm1928_vm0, %v1927_v1  ;;  %1743 = vmatprep.mubr.msk.bf16.mxu1 %vm1928_vm0, %v1927_v1 }
  0x28   : > { %1624 = vmatmul.mubr.msk.bf16.gmra.mxu0 %vm566_vm1, %v1866_v8  ;;  %1744 = vmatmul.mubr.msk.bf16.gmra.mxu1 %vm566_vm1, %v1867_v9 }
  0x29   : > { %1627 = vmatprep.mubr.msk.bf16.mxu0 %vm1928_vm0, %v1927_v1  ;;  %1747 = vmatprep.mubr.msk.bf16.mxu1 %vm1928_vm0, %v1927_v1 }
  0x30   : > { %1628 = vmatmul.mubr.msk.bf16.gmra.mxu0 %vm566_vm1, %v1868_v10  ;;  %1748 = vmatmul.mubr.msk.bf16.gmra.mxu1 %vm566_vm1, %v1869_v11 }
  0x31   : > { %1631 = vmatprep.mubr.msk.bf16.mxu0 %vm1928_vm0, %v1927_v1  ;;  %1751 = vmatprep.mubr.msk.bf16.mxu1 %vm1928_vm0, %v1927_v1 }
  0x38   : > { %1632 = vmatmul.mubr.msk.bf16.gmra.mxu0 %vm566_vm1, %v1870_v12  ;;  %1752 = vmatmul.mubr.msk.bf16.gmra.mxu1 %vm566_vm1, %v1871_v13 }
  0x39   : > { %1635 = vmatprep.mubr.msk.bf16.mxu0 %vm1928_vm0, %v1927_v1  ;;  %1755 = vmatprep.mubr.msk.bf16.mxu1 %vm1928_vm0, %v1927_v1 }
  0x40   : > { %1636 = vmatmul.mubr.msk.bf16.gmra.mxu0 %vm566_vm1, %v1872_v14  ;;  %1756 = vmatmul.mubr.msk.bf16.gmra.mxu1 %vm566_vm1, %v1873_v15  ;;  %v1914_v14 = vld [vmem:[%s1967_s17 + $0xd8] sm:$0xff]  }
  0x41   : > { %1639 = vmatprep.mubr.msk.bf16.mxu0 %vm1928_vm0, %v1927_v1  ;;  %1759 = vmatprep.mubr.msk.bf16.mxu1 %vm1928_vm0, %v1927_v1 }
  0x48   : > { %1640 = vmatmul.mubr.msk.bf16.gmra.mxu0 %vm566_vm1, %v1874_v16  ;;  %1760 = vmatmul.mubr.msk.bf16.gmra.mxu1 %vm566_vm1, %v1875_v17  ;;  %v1915_v16 = vld [vmem:[%s1967_s17 + $0x1c8] sm:$0xff]  }
  0x49   : > { %1643 = vmatprep.mubr.msk.bf16.mxu0 %vm1928_vm0, %v1927_v1  ;;  %1763 = vmatprep.mubr.msk.bf16.mxu1 %vm1928_vm0, %v1927_v1 }
  0x50   : > { %1644 = vmatmul.mubr.msk.bf16.gmra.mxu0 %vm566_vm1, %v1876_v18  ;;  %1764 = vmatmul.mubr.msk.bf16.gmra.mxu1 %vm566_vm1, %v1877_v19 }
  0x51   : > { %1647 = vmatprep.mubr.msk.bf16.mxu0 %vm1928_vm0, %v1927_v1  ;;  %1767 = vmatprep.mubr.msk.bf16.mxu1 %vm1928_vm0, %v1927_v1 }
  0x58   : > { %1648 = vmatmul.mubr.msk.bf16.gmra.mxu0 %vm566_vm1, %v1878_v20  ;;  %1768 = vmatmul.mubr.msk.bf16.gmra.mxu1 %vm566_vm1, %v1879_v21 }
  0x59   : > { %1651 = vmatprep.mubr.msk.bf16.mxu0 %vm1928_vm0, %v1927_v1  ;;  %1771 = vmatprep.mubr.msk.bf16.mxu1 %vm1928_vm0, %v1927_v1 }
  0x60   : > { %1652 = vmatmul.mubr.msk.bf16.gmra.mxu0 %vm566_vm1, %v1880_v22  ;;  %1772 = vmatmul.mubr.msk.bf16.gmra.mxu1 %vm566_vm1, %v1881_v23 }
  0x61   : > { %1655 = vmatprep.mubr.msk.bf16.mxu0 %vm1928_vm0, %v1927_v1  ;;  %1775 = vmatprep.mubr.msk.bf16.mxu1 %vm1928_vm0, %v1927_v1 }
  0x68   : > { %1656 = vmatmul.mubr.msk.bf16.gmra.mxu0 %vm566_vm1, %v1882_v24  ;;  %1776 = vmatmul.mubr.msk.bf16.gmra.mxu1 %vm566_vm1, %v1883_v25  ;;  %v1916_v24 = vld [vmem:[%s1967_s17 + $0xe0] sm:$0xff]  }
  0x69   : > { %1659 = vmatprep.mubr.msk.bf16.mxu0 %vm1928_vm0, %v1927_v1  ;;  %1779 = vmatprep.mubr.msk.bf16.mxu1 %vm1928_vm0, %v1927_v1 }
  0x70   : > { %1660 = vmatmul.mubr.msk.bf16.gmra.mxu0 %vm566_vm1, %v1884_v26  ;;  %1780 = vmatmul.mubr.msk.bf16.gmra.mxu1 %vm566_vm1, %v1885_v27  ;;  %v1917_v26 = vld [vmem:[%s1967_s17 + $0x1d0] ss:$0 sps:$4 sm:$0xff]  }
  0x71   : > { %1663 = vmatprep.mubr.msk.bf16.mxu0 %vm1928_vm0, %v1927_v1  ;;  %1783 = vmatprep.mubr.msk.bf16.mxu1 %vm1928_vm0, %v1927_v1 }
  0x78   : > { %1664 = vmatmul.mubr.msk.bf16.gmra.mxu0 %vm566_vm1, %v1886_v28  ;;  %1784 = vmatmul.mubr.msk.bf16.gmra.mxu1 %vm566_vm1, %v1887_v29 }
  0x79   : > { %1667 = vmatprep.mubr.msk.bf16.mxu0 %vm1928_vm0, %v1927_v1  ;;  %1787 = vmatprep.mubr.msk.bf16.mxu1 %vm1928_vm0, %v1927_v1 }
  0x80   : > { %1668 = vmatmul.mubr.msk.bf16.gmra.mxu0 %vm566_vm1, %v1888_v30  ;;  %1788 = vmatmul.mubr.msk.bf16.gmra.mxu1 %vm566_vm1, %v1889_v31 }
  0x81   : > { %1671 = vmatprep.mubr.msk.bf16.mxu0 %vm1928_vm0, %v1927_v1  ;;  %1791 = vmatprep.mubr.msk.bf16.mxu1 %vm1928_vm0, %v1927_v1 }
  0x88   : > { %1672 = vmatmul.mubr.msk.bf16.gmra.mxu0 %vm566_vm1, %v1890_v32  ;;  %1792 = vmatmul.mubr.msk.bf16.gmra.mxu1 %vm566_vm1, %v1891_v33 }
  0x89   : > { %1675 = vmatprep.mubr.msk.bf16.mxu0 %vm1928_vm0, %v1927_v1  ;;  %1795 = vmatprep.mubr.msk.bf16.mxu1 %vm1928_vm0, %v1927_v1 }
  0x90   : > { %1676 = vmatmul.mubr.msk.bf16.gmra.mxu0 %vm566_vm1, %v1892_v34  ;;  %1796 = vmatmul.mubr.msk.bf16.gmra.mxu1 %vm566_vm1, %v1893_v35  ;;  %v1918_v34 = vld [vmem:[%s1967_s17 + $0xe8] sm:$0xff]  }
  0x91   : > { %1679 = vmatprep.mubr.msk.bf16.mxu0 %vm1928_vm0, %v1927_v1  ;;  %1799 = vmatprep.mubr.msk.bf16.mxu1 %vm1928_vm0, %v1927_v1 }
  0x98   : > { %1680 = vmatmul.mubr.msk.bf16.gmra.mxu0 %vm566_vm1, %v1894_v36  ;;  %1800 = vmatmul.mubr.msk.bf16.gmra.mxu1 %vm566_vm1, %v1895_v37 }
  0x99   : > { %1683 = vmatprep.mubr.msk.bf16.mxu0 %vm1928_vm0, %v1927_v1  ;;  %1803 = vmatprep.mubr.msk.bf16.mxu1 %vm1928_vm0, %v1927_v1 }
  0xa0   : > { %1684 = vmatmul.mubr.msk.bf16.gmra.mxu0 %vm566_vm1, %v1896_v38  ;;  %1804 = vmatmul.mubr.msk.bf16.gmra.mxu1 %vm566_vm1, %v1897_v39 }
  0xa1   : > { %1687 = vmatprep.mubr.msk.bf16.mxu0 %vm1928_vm0, %v1927_v1  ;;  %1807 = vmatprep.mubr.msk.bf16.mxu1 %vm1928_vm0, %v1927_v1 }
  0xa8   : > { %1688 = vmatmul.mubr.msk.bf16.gmra.mxu0 %vm566_vm1, %v1898_v40  ;;  %1808 = vmatmul.mubr.msk.bf16.gmra.mxu1 %vm566_vm1, %v1899_v41 }
  0xa9   : > { %1691 = vmatprep.mubr.msk.bf16.mxu0 %vm1928_vm0, %v1927_v1  ;;  %1811 = vmatprep.mubr.msk.bf16.mxu1 %vm1928_vm0, %v1927_v1 }
  0xb0   : > { %1692 = vmatmul.mubr.msk.bf16.gmra.mxu0 %vm566_vm1, %v1900_v42  ;;  %1812 = vmatmul.mubr.msk.bf16.gmra.mxu1 %vm566_vm1, %v1901_v43 }
  0xb1   : > { %1695 = vmatprep.mubr.msk.bf16.mxu0 %vm1928_vm0, %v1927_v1  ;;  %1815 = vmatprep.mubr.msk.bf16.mxu1 %vm1928_vm0, %v1927_v1 }
  0xb8   : > { %1696 = vmatmul.mubr.msk.bf16.gmra.mxu0 %vm566_vm1, %v1902_v44  ;;  %1816 = vmatmul.mubr.msk.bf16.gmra.mxu1 %vm566_vm1, %v1903_v45 }
  0xb9   : > { %1699 = vmatprep.mubr.msk.bf16.mxu0 %vm1928_vm0, %v1927_v1  ;;  %1819 = vmatprep.mubr.msk.bf16.mxu1 %vm1928_vm0, %v1927_v1 }
  0xc0   : > { %1700 = vmatmul.mubr.msk.bf16.gmra.mxu0 %vm566_vm1, %v1904_v46  ;;  %1820 = vmatmul.mubr.msk.bf16.gmra.mxu1 %vm566_vm1, %v1905_v47 }
  0xc1   : > { %1703 = vmatprep.mubr.msk.bf16.mxu0 %vm1928_vm0, %v1927_v1  ;;  %1823 = vmatprep.mubr.msk.bf16.mxu1 %vm1928_vm0, %v1927_v1 }
  0xc8   : > { %1704 = vmatmul.mubr.msk.bf16.gmra.mxu0 %vm566_vm1, %v1906_v48  ;;  %1824 = vmatmul.mubr.msk.bf16.gmra.mxu1 %vm566_vm1, %v1907_v49 }
  0xc9   : > { %1707 = vmatprep.mubr.msk.bf16.mxu0 %vm1928_vm0, %v1927_v1  ;;  %1827 = vmatprep.mubr.msk.bf16.mxu1 %vm1928_vm0, %v1927_v1 }
  0xd0   : > { %v778_v52 = vpop.f32.mrf.mxu0  ;;  %1708 = vmatmul.mubr.msk.bf16.gmra.mxu0 %vm566_vm1, %v1908_v50  ;;  %v1018_v53 = vpop.f32.mrf.mxu1  ;;  %1828 = vmatmul.mubr.msk.bf16.gmra.mxu1 %vm566_vm1, %v1909_v51 }
  0xd1   : > { %1248 = vst [vmem:[%s2167_s21] sm:$0xff] %v778_v52  ;;  %1711 = vmatprep.mubr.msk.bf16.mxu0 %vm1928_vm0, %v1927_v1  ;;  %1308 = vst [vmem:[%s2167_s21 + $0x1e0] sm:$0xff] %v1018_v53  ;;  %1831 = vmatprep.mubr.msk.bf16.mxu1 %vm1928_vm0, %v1927_v1 }
  0xd2   : > { %v1613_v54 = vpop.f32.mrf.mxu0  ;;  %v1733_v55 = vpop.f32.mrf.mxu1 }
  0xd4   : > { %v781_v56 = vpop.f32.mrf.mxu0  ;;  %v1021_v58 = vpop.f32.mrf.mxu1 }
  0xd5   : > { %1249 = vst [vmem:[%s2167_s21 + $0x8] sm:$0xff] %v781_v56  ;;  %1309 = vst [vmem:[%s2167_s21 + $0x1e8] sm:$0xff] %v1021_v58 }
  0xd6   : > { %v1614_v60 = vpop.f32.mrf.mxu0  ;;  %v1734_v61 = vpop.f32.mrf.mxu1 }
  0xd8   : > { %v786_v62 = vpop.f32.mrf.mxu0  ;;  %1712 = vmatmul.mubr.msk.bf16.gmra.mxu0 %vm566_vm1, %v1910_v57  ;;  %v1026_v63 = vpop.f32.mrf.mxu1  ;;  %1832 = vmatmul.mubr.msk.bf16.gmra.mxu1 %vm566_vm1, %v1911_v59 }
  0xd9   : > { %1250 = vst [vmem:[%s2167_s21 + $0x10] sm:$0xff] %v786_v62  ;;  %1715 = vmatprep.mubr.msk.bf16.mxu0 %vm1928_vm0, %v1927_v1  ;;  %1310 = vst [vmem:[%s2167_s21 + $0x1f0] sm:$0xff] %v1026_v63  ;;  %1835 = vmatprep.mubr.msk.bf16.mxu1 %vm1928_vm0, %v1927_v1 }
  0xda   : > { %v1617_v0 = vpop.f32.mrf.mxu0  ;;  %v1737_v2 = vpop.f32.mrf.mxu1 }
  0xdc   : > { %v789_v3 = vpop.f32.mrf.mxu0  ;;  %v1029_v5 = vpop.f32.mrf.mxu1 }
  0xdd   : > { %1251 = vst [vmem:[%s2167_s21 + $0x18] sm:$0xff] %v789_v3  ;;  %1311 = vst [vmem:[%s2167_s21 + $0x1f8] sm:$0xff] %v1029_v5 }
  0xde   : > { %v1618_v7 = vpop.f32.mrf.mxu0  ;;  %v1738_v8 = vpop.f32.mrf.mxu1 }
  0xe0   : > { %v794_v9 = vpop.f32.mrf.mxu0  ;;  %1716 = vmatmul.mubr.msk.bf16.gmra.mxu0 %vm566_vm1, %v1912_v4  ;;  %v1034_v10 = vpop.f32.mrf.mxu1  ;;  %1836 = vmatmul.mubr.msk.bf16.gmra.mxu1 %vm566_vm1, %v1913_v6 }
  0xe1   : > { %1252 = vst [vmem:[%s2167_s21 + $0x20] sm:$0xff] %v794_v9  ;;  %1719 = vmatprep.mubr.msk.bf16.mxu0 %vm1928_vm0, %v1927_v1  ;;  %1312 = vst [vmem:[%s2167_s21 + $0x200] sm:$0xff] %v1034_v10  ;;  %1839 = vmatprep.mubr.msk.bf16.mxu1 %vm1928_vm0, %v1927_v1 }
  0xe2   : > { %v1621_v11 = vpop.f32.mrf.mxu0  ;;  %v1741_v12 = vpop.f32.mrf.mxu1 }
  0xe4   : > { %v797_v13 = vpop.f32.mrf.mxu0  ;;  %v1037_v15 = vpop.f32.mrf.mxu1 }
  0xe5   : > { %1253 = vst [vmem:[%s2167_s21 + $0x28] sm:$0xff] %v797_v13  ;;  %1313 = vst [vmem:[%s2167_s21 + $0x208] sm:$0xff] %v1037_v15 }
  0xe6   : > { %v1622_v17 = vpop.f32.mrf.mxu0  ;;  %v1742_v18 = vpop.f32.mrf.mxu1 }
  0xe8   : > { %v802_v19 = vpop.f32.mrf.mxu0  ;;  %1720 = vmatmul.mubr.msk.bf16.gmra.mxu0 %vm566_vm1, %v1914_v14  ;;  %v1042_v20 = vpop.f32.mrf.mxu1  ;;  %1840 = vmatmul.mubr.msk.bf16.gmra.mxu1 %vm566_vm1, %v1915_v16 }
  0xe9   : > { %1254 = vst [vmem:[%s2167_s21 + $0x30] sm:$0xff] %v802_v19  ;;  %1723 = vmatprep.mubr.msk.bf16.mxu0 %vm1928_vm0, %v1927_v1  ;;  %1314 = vst [vmem:[%s2167_s21 + $0x210] sm:$0xff] %v1042_v20  ;;  %1843 = vmatprep.mubr.msk.bf16.mxu1 %vm1928_vm0, %v1927_v1 }
  0xea   : > { %v1625_v21 = vpop.f32.mrf.mxu0  ;;  %v1745_v22 = vpop.f32.mrf.mxu1 }
  0xec   : > { %v805_v23 = vpop.f32.mrf.mxu0  ;;  %v1045_v25 = vpop.f32.mrf.mxu1 }
  0xed   : > { %1255 = vst [vmem:[%s2167_s21 + $0x38] sm:$0xff] %v805_v23  ;;  %1315 = vst [vmem:[%s2167_s21 + $0x218] sm:$0xff] %v1045_v25 }
  0xee   : > { %v1626_v27 = vpop.f32.mrf.mxu0  ;;  %v1746_v28 = vpop.f32.mrf.mxu1 }
  0xf0   : > { %v810_v29 = vpop.f32.mrf.mxu0  ;;  %1724 = vmatmul.mubr.msk.bf16.gmra.mxu0 %vm566_vm1, %v1916_v24  ;;  %v1050_v30 = vpop.f32.mrf.mxu1  ;;  %1844 = vmatmul.mubr.msk.bf16.gmra.mxu1 %vm566_vm1, %v1917_v26 }
  0xf1   : > { %1256 = vst [vmem:[%s2167_s21 + $0x40] sm:$0xff] %v810_v29  ;;  %1727 = vmatprep.mubr.msk.bf16.mxu0 %vm1928_vm0, %v1927_v1  ;;  %1316 = vst [vmem:[%s2167_s21 + $0x220] sm:$0xff] %v1050_v30 }
  0xf2   : > { %v1629_v31 = vpop.f32.mrf.mxu0  ;;  %v1749_v32 = vpop.f32.mrf.mxu1 }
  0xf4   : > { %v813_v33 = vpop.f32.mrf.mxu0  ;;  %v1053_v35 = vpop.f32.mrf.mxu1 }
  0xf5   : > { %1257 = vst [vmem:[%s2167_s21 + $0x48] sm:$0xff] %v813_v33  ;;  %1317 = vst [vmem:[%s2167_s21 + $0x228] sm:$0xff] %v1053_v35 }
  0xf6   : > { %v1630_v36 = vpop.f32.mrf.mxu0  ;;  %v1750_v37 = vpop.f32.mrf.mxu1 }
  0xf8   : > { %v818_v38 = vpop.f32.mrf.mxu0  ;;  %1728 = vmatmul.mubr.msk.bf16.gmra.mxu0 %vm566_vm1, %v1918_v34  ;;  %v1058_v1 = vpop.f32.mrf.mxu1 }
  0xf9   : > { %1258 = vst [vmem:[%s2167_s21 + $0x50] sm:$0xff] %v818_v38  ;;  %1318 = vst [vmem:[%s2167_s21 + $0x230] sm:$0xff] %v1058_v1 }
  0xfa   : > { %v1633_v39 = vpop.f32.mrf.mxu0  ;;  %v1753_v40 = vpop.f32.mrf.mxu1 }
  0xfc   : > { %v821_v41 = vpop.f32.mrf.mxu0  ;;  %v1061_v42 = vpop.f32.mrf.mxu1 }
  0xfd   : > { %1259 = vst [vmem:[%s2167_s21 + $0x58] sm:$0xff] %v821_v41  ;;  %1319 = vst [vmem:[%s2167_s21 + $0x238] sm:$0xff] %v1061_v42 }
  0xfe   : > { %v1634_v43 = vpop.f32.mrf.mxu0  ;;  %v1754_v44 = vpop.f32.mrf.mxu1 }
 0x100   : > { %v826_v45 = vpop.f32.mrf.mxu0  ;;  %v1066_v46 = vpop.f32.mrf.mxu1 }
 0x101   : > { %1260 = vst [vmem:[%s2167_s21 + $0x60] sm:$0xff] %v826_v45  ;;  %1320 = vst [vmem:[%s2167_s21 + $0x240] sm:$0xff] %v1066_v46 }
 0x102   : > { %v1637_v47 = vpop.f32.mrf.mxu0  ;;  %v1757_v48 = vpop.f32.mrf.mxu1 }
 0x104   : > { %v829_v49 = vpop.f32.mrf.mxu0  ;;  %v1069_v50 = vpop.f32.mrf.mxu1 }
 0x105   : > { %1261 = vst [vmem:[%s2167_s21 + $0x68] sm:$0xff] %v829_v49  ;;  %1321 = vst [vmem:[%s2167_s21 + $0x248] sm:$0xff] %v1069_v50 }
 0x106   : > { %v1638_v51 = vpop.f32.mrf.mxu0  ;;  %v1758_v52 = vpop.f32.mrf.mxu1 }
 0x108   : > { %v834_v53 = vpop.f32.mrf.mxu0  ;;  %v1074_v54 = vpop.f32.mrf.mxu1 }
 0x109   : > { %1262 = vst [vmem:[%s2167_s21 + $0x70] sm:$0xff] %v834_v53  ;;  %1322 = vst [vmem:[%s2167_s21 + $0x250] sm:$0xff] %v1074_v54 }
 0x10a   : > { %v1641_v55 = vpop.f32.mrf.mxu0  ;;  %v1761_v56 = vpop.f32.mrf.mxu1 }
 0x10c   : > { %v837_v57 = vpop.f32.mrf.mxu0  ;;  %v1077_v58 = vpop.f32.mrf.mxu1 }
 0x10d   : > { %1263 = vst [vmem:[%s2167_s21 + $0x78] sm:$0xff] %v837_v57  ;;  %1323 = vst [vmem:[%s2167_s21 + $0x258] sm:$0xff] %v1077_v58 }
 0x10e   : > { %v1642_v59 = vpop.f32.mrf.mxu0  ;;  %v1762_v60 = vpop.f32.mrf.mxu1 }
 0x110   : > { %v842_v61 = vpop.f32.mrf.mxu0  ;;  %v1082_v62 = vpop.f32.mrf.mxu1 }
 0x111   : > { %1264 = vst [vmem:[%s2167_s21 + $0x80] sm:$0xff] %v842_v61  ;;  %1324 = vst [vmem:[%s2167_s21 + $0x260] sm:$0xff] %v1082_v62 }
 0x112   : > { %v1645_v63 = vpop.f32.mrf.mxu0  ;;  %v1765_v0 = vpop.f32.mrf.mxu1 }
 0x114   : > { %v845_v2 = vpop.f32.mrf.mxu0  ;;  %v1085_v3 = vpop.f32.mrf.mxu1 }
 0x115   : > { %1265 = vst [vmem:[%s2167_s21 + $0x88] sm:$0xff] %v845_v2  ;;  %1325 = vst [vmem:[%s2167_s21 + $0x268] sm:$0xff] %v1085_v3 }
 0x116   : > { %v1646_v4 = vpop.f32.mrf.mxu0  ;;  %v1766_v5 = vpop.f32.mrf.mxu1 }
 0x118   : > { %v850_v6 = vpop.f32.mrf.mxu0  ;;  %v1090_v7 = vpop.f32.mrf.mxu1 }
 0x119   : > { %1266 = vst [vmem:[%s2167_s21 + $0x90] sm:$0xff] %v850_v6  ;;  %1326 = vst [vmem:[%s2167_s21 + $0x270] sm:$0xff] %v1090_v7 }
 0x11a   : > { %v1649_v8 = vpop.f32.mrf.mxu0  ;;  %v1769_v9 = vpop.f32.mrf.mxu1 }
 0x11c   : > { %v853_v10 = vpop.f32.mrf.mxu0  ;;  %v1093_v11 = vpop.f32.mrf.mxu1 }
 0x11d   : > { %1267 = vst [vmem:[%s2167_s21 + $0x98] sm:$0xff] %v853_v10  ;;  %1327 = vst [vmem:[%s2167_s21 + $0x278] sm:$0xff] %v1093_v11 }
 0x11e   : > { %v1650_v12 = vpop.f32.mrf.mxu0  ;;  %v1770_v13 = vpop.f32.mrf.mxu1 }
 0x120   : > { %v858_v14 = vpop.f32.mrf.mxu0  ;;  %v1098_v15 = vpop.f32.mrf.mxu1 }
 0x121   : > { %1268 = vst [vmem:[%s2167_s21 + $0xa0] sm:$0xff] %v858_v14  ;;  %1328 = vst [vmem:[%s2167_s21 + $0x280] sm:$0xff] %v1098_v15 }
 0x122   : > { %v1653_v16 = vpop.f32.mrf.mxu0  ;;  %v1773_v17 = vpop.f32.mrf.mxu1 }
 0x124   : > { %v861_v18 = vpop.f32.mrf.mxu0  ;;  %v1101_v19 = vpop.f32.mrf.mxu1 }
 0x125   : > { %1269 = vst [vmem:[%s2167_s21 + $0xa8] sm:$0xff] %v861_v18  ;;  %1329 = vst [vmem:[%s2167_s21 + $0x288] sm:$0xff] %v1101_v19 }
 0x126   : > { %v1654_v20 = vpop.f32.mrf.mxu0  ;;  %v1774_v21 = vpop.f32.mrf.mxu1 }
 0x128   : > { %v866_v22 = vpop.f32.mrf.mxu0  ;;  %v1106_v23 = vpop.f32.mrf.mxu1 }
 0x129   : > { %1270 = vst [vmem:[%s2167_s21 + $0xb0] sm:$0xff] %v866_v22  ;;  %1330 = vst [vmem:[%s2167_s21 + $0x290] sm:$0xff] %v1106_v23 }
 0x12a   : > { %v1657_v24 = vpop.f32.mrf.mxu0  ;;  %v1777_v25 = vpop.f32.mrf.mxu1 }
 0x12c   : > { %v869_v26 = vpop.f32.mrf.mxu0  ;;  %v1109_v27 = vpop.f32.mrf.mxu1 }
 0x12d   : > { %1271 = vst [vmem:[%s2167_s21 + $0xb8] sm:$0xff] %v869_v26  ;;  %1331 = vst [vmem:[%s2167_s21 + $0x298] sm:$0xff] %v1109_v27 }
 0x12e   : > { %v1658_v28 = vpop.f32.mrf.mxu0  ;;  %v1778_v29 = vpop.f32.mrf.mxu1 }
 0x130   : > { %v874_v30 = vpop.f32.mrf.mxu0  ;;  %v1114_v31 = vpop.f32.mrf.mxu1 }
 0x131   : > { %1272 = vst [vmem:[%s2167_s21 + $0xc0] sm:$0xff] %v874_v30  ;;  %1332 = vst [vmem:[%s2167_s21 + $0x2a0] sm:$0xff] %v1114_v31 }
 0x132   : > { %v1661_v32 = vpop.f32.mrf.mxu0  ;;  %v1781_v33 = vpop.f32.mrf.mxu1 }
 0x134   : > { %v877_v34 = vpop.f32.mrf.mxu0  ;;  %v1117_v35 = vpop.f32.mrf.mxu1 }
 0x135   : > { %1273 = vst [vmem:[%s2167_s21 + $0xc8] sm:$0xff] %v877_v34  ;;  %1333 = vst [vmem:[%s2167_s21 + $0x2a8] sm:$0xff] %v1117_v35 }
 0x136   : > { %v1662_v36 = vpop.f32.mrf.mxu0  ;;  %v1782_v37 = vpop.f32.mrf.mxu1 }
 0x138   : > { %v882_v38 = vpop.f32.mrf.mxu0  ;;  %v1122_v1 = vpop.f32.mrf.mxu1 }
 0x139   : > { %1274 = vst [vmem:[%s2167_s21 + $0xd0] sm:$0xff] %v882_v38  ;;  %1334 = vst [vmem:[%s2167_s21 + $0x2b0] sm:$0xff] %v1122_v1 }
 0x13a   : > { %v1665_v39 = vpop.f32.mrf.mxu0  ;;  %v1785_v40 = vpop.f32.mrf.mxu1 }
 0x13c   : > { %v885_v41 = vpop.f32.mrf.mxu0  ;;  %v1125_v42 = vpop.f32.mrf.mxu1 }
 0x13d   : > { %1275 = vst [vmem:[%s2167_s21 + $0xd8] sm:$0xff] %v885_v41  ;;  %1335 = vst [vmem:[%s2167_s21 + $0x2b8] sm:$0xff] %v1125_v42 }
 0x13e   : > { %v1666_v43 = vpop.f32.mrf.mxu0  ;;  %v1786_v44 = vpop.f32.mrf.mxu1 }
 0x140   : > { %v890_v45 = vpop.f32.mrf.mxu0  ;;  %v1130_v46 = vpop.f32.mrf.mxu1 }
 0x141   : > { %1276 = vst [vmem:[%s2167_s21 + $0xe0] sm:$0xff] %v890_v45  ;;  %1336 = vst [vmem:[%s2167_s21 + $0x2c0] sm:$0xff] %v1130_v46 }
 0x142   : > { %v1669_v47 = vpop.f32.mrf.mxu0  ;;  %v1789_v48 = vpop.f32.mrf.mxu1 }
 0x144   : > { %v893_v49 = vpop.f32.mrf.mxu0  ;;  %v1133_v50 = vpop.f32.mrf.mxu1 }
 0x145   : > { %1277 = vst [vmem:[%s2167_s21 + $0xe8] sm:$0xff] %v893_v49  ;;  %1337 = vst [vmem:[%s2167_s21 + $0x2c8] sm:$0xff] %v1133_v50 }
 0x146   : > { %v1670_v51 = vpop.f32.mrf.mxu0  ;;  %v1790_v52 = vpop.f32.mrf.mxu1 }
 0x148   : > { %v898_v53 = vpop.f32.mrf.mxu0  ;;  %v1138_v54 = vpop.f32.mrf.mxu1 }
 0x149   : > { %1278 = vst [vmem:[%s2167_s21 + $0xf0] sm:$0xff] %v898_v53  ;;  %1338 = vst [vmem:[%s2167_s21 + $0x2d0] sm:$0xff] %v1138_v54 }
 0x14a   : > { %v1673_v55 = vpop.f32.mrf.mxu0  ;;  %v1793_v56 = vpop.f32.mrf.mxu1 }
 0x14c   : > { %v901_v57 = vpop.f32.mrf.mxu0  ;;  %v1141_v58 = vpop.f32.mrf.mxu1 }
 0x14d   : > { %1279 = vst [vmem:[%s2167_s21 + $0xf8] sm:$0xff] %v901_v57  ;;  %1339 = vst [vmem:[%s2167_s21 + $0x2d8] sm:$0xff] %v1141_v58 }
 0x14e   : > { %v1674_v59 = vpop.f32.mrf.mxu0  ;;  %v1794_v60 = vpop.f32.mrf.mxu1 }
 0x150   : > { %v906_v61 = vpop.f32.mrf.mxu0  ;;  %v1146_v62 = vpop.f32.mrf.mxu1 }
 0x151   : > { %1280 = vst [vmem:[%s2167_s21 + $0x100] sm:$0xff] %v906_v61  ;;  %1340 = vst [vmem:[%s2167_s21 + $0x2e0] sm:$0xff] %v1146_v62 }
 0x152   : > { %v1677_v63 = vpop.f32.mrf.mxu0  ;;  %v1797_v0 = vpop.f32.mrf.mxu1 }
 0x154   : > { %v909_v2 = vpop.f32.mrf.mxu0  ;;  %v1149_v3 = vpop.f32.mrf.mxu1 }
 0x155   : > { %1281 = vst [vmem:[%s2167_s21 + $0x108] sm:$0xff] %v909_v2  ;;  %1341 = vst [vmem:[%s2167_s21 + $0x2e8] sm:$0xff] %v1149_v3 }
 0x156   : > { %v1678_v4 = vpop.f32.mrf.mxu0  ;;  %v1798_v5 = vpop.f32.mrf.mxu1 }
 0x158   : > { %v914_v6 = vpop.f32.mrf.mxu0  ;;  %v1154_v7 = vpop.f32.mrf.mxu1 }
 0x159   : > { %1282 = vst [vmem:[%s2167_s21 + $0x110] sm:$0xff] %v914_v6  ;;  %1342 = vst [vmem:[%s2167_s21 + $0x2f0] sm:$0xff] %v1154_v7 }
 0x15a   : > { %v1681_v8 = vpop.f32.mrf.mxu0  ;;  %v1801_v9 = vpop.f32.mrf.mxu1 }
 0x15c   : > { %v917_v10 = vpop.f32.mrf.mxu0  ;;  %v1157_v11 = vpop.f32.mrf.mxu1 }
 0x15d   : > { %1283 = vst [vmem:[%s2167_s21 + $0x118] sm:$0xff] %v917_v10  ;;  %1343 = vst [vmem:[%s2167_s21 + $0x2f8] sm:$0xff] %v1157_v11 }
 0x15e   : > { %v1682_v12 = vpop.f32.mrf.mxu0  ;;  %v1802_v13 = vpop.f32.mrf.mxu1 }
 0x160   : > { %v922_v14 = vpop.f32.mrf.mxu0  ;;  %v1162_v15 = vpop.f32.mrf.mxu1 }
 0x161   : > { %1284 = vst [vmem:[%s2167_s21 + $0x120] sm:$0xff] %v922_v14  ;;  %1344 = vst [vmem:[%s2167_s21 + $0x300] sm:$0xff] %v1162_v15 }
 0x162   : > { %v1685_v16 = vpop.f32.mrf.mxu0  ;;  %v1805_v17 = vpop.f32.mrf.mxu1 }
 0x164   : > { %v925_v18 = vpop.f32.mrf.mxu0  ;;  %v1165_v19 = vpop.f32.mrf.mxu1 }
 0x165   : > { %1285 = vst [vmem:[%s2167_s21 + $0x128] sm:$0xff] %v925_v18  ;;  %1345 = vst [vmem:[%s2167_s21 + $0x308] sm:$0xff] %v1165_v19 }
 0x166   : > { %v1686_v20 = vpop.f32.mrf.mxu0  ;;  %v1806_v21 = vpop.f32.mrf.mxu1 }
 0x168   : > { %v930_v22 = vpop.f32.mrf.mxu0  ;;  %v1170_v23 = vpop.f32.mrf.mxu1 }
 0x169   : > { %1286 = vst [vmem:[%s2167_s21 + $0x130] sm:$0xff] %v930_v22  ;;  %1346 = vst [vmem:[%s2167_s21 + $0x310] sm:$0xff] %v1170_v23 }
 0x16a   : > { %v1689_v24 = vpop.f32.mrf.mxu0  ;;  %v1809_v25 = vpop.f32.mrf.mxu1 }
 0x16c   : > { %v933_v26 = vpop.f32.mrf.mxu0  ;;  %v1173_v27 = vpop.f32.mrf.mxu1 }
 0x16d   : > { %1287 = vst [vmem:[%s2167_s21 + $0x138] sm:$0xff] %v933_v26  ;;  %1347 = vst [vmem:[%s2167_s21 + $0x318] sm:$0xff] %v1173_v27 }
 0x16e   : > { %v1690_v28 = vpop.f32.mrf.mxu0  ;;  %v1810_v29 = vpop.f32.mrf.mxu1 }
 0x170   : > { %v938_v30 = vpop.f32.mrf.mxu0  ;;  %v1178_v31 = vpop.f32.mrf.mxu1 }
 0x171   : > { %1288 = vst [vmem:[%s2167_s21 + $0x140] sm:$0xff] %v938_v30  ;;  %1348 = vst [vmem:[%s2167_s21 + $0x320] sm:$0xff] %v1178_v31 }
 0x172   : > { %v1693_v32 = vpop.f32.mrf.mxu0  ;;  %v1813_v33 = vpop.f32.mrf.mxu1 }
 0x174   : > { %v941_v34 = vpop.f32.mrf.mxu0  ;;  %v1181_v35 = vpop.f32.mrf.mxu1 }
 0x175   : > { %1289 = vst [vmem:[%s2167_s21 + $0x148] sm:$0xff] %v941_v34  ;;  %1349 = vst [vmem:[%s2167_s21 + $0x328] sm:$0xff] %v1181_v35 }
 0x176   : > { %v1694_v36 = vpop.f32.mrf.mxu0  ;;  %v1814_v37 = vpop.f32.mrf.mxu1 }
 0x178   : > { %v946_v38 = vpop.f32.mrf.mxu0  ;;  %v1186_v1 = vpop.f32.mrf.mxu1 }
 0x179   : > { %1290 = vst [vmem:[%s2167_s21 + $0x150] sm:$0xff] %v946_v38  ;;  %1350 = vst [vmem:[%s2167_s21 + $0x330] sm:$0xff] %v1186_v1 }
 0x17a   : > { %v1697_v39 = vpop.f32.mrf.mxu0  ;;  %v1817_v40 = vpop.f32.mrf.mxu1 }
 0x17c   : > { %v949_v41 = vpop.f32.mrf.mxu0  ;;  %v1189_v42 = vpop.f32.mrf.mxu1 }
 0x17d   : > { %1291 = vst [vmem:[%s2167_s21 + $0x158] sm:$0xff] %v949_v41  ;;  %1351 = vst [vmem:[%s2167_s21 + $0x338] sm:$0xff] %v1189_v42 }
 0x17e   : > { %v1698_v43 = vpop.f32.mrf.mxu0  ;;  %v1818_v44 = vpop.f32.mrf.mxu1 }
 0x180   : > { %v954_v45 = vpop.f32.mrf.mxu0  ;;  %v1194_v46 = vpop.f32.mrf.mxu1 }
 0x181   : > { %1292 = vst [vmem:[%s2167_s21 + $0x160] sm:$0xff] %v954_v45  ;;  %1352 = vst [vmem:[%s2167_s21 + $0x340] sm:$0xff] %v1194_v46 }
 0x182   : > { %v1701_v47 = vpop.f32.mrf.mxu0  ;;  %v1821_v48 = vpop.f32.mrf.mxu1 }
 0x184   : > { %v957_v49 = vpop.f32.mrf.mxu0  ;;  %v1197_v50 = vpop.f32.mrf.mxu1 }
 0x185   : > { %1293 = vst [vmem:[%s2167_s21 + $0x168] sm:$0xff] %v957_v49  ;;  %1353 = vst [vmem:[%s2167_s21 + $0x348] sm:$0xff] %v1197_v50 }
 0x186   : > { %v1702_v51 = vpop.f32.mrf.mxu0  ;;  %v1822_v52 = vpop.f32.mrf.mxu1 }
 0x188   : > { %v962_v53 = vpop.f32.mrf.mxu0  ;;  %v1202_v54 = vpop.f32.mrf.mxu1 }
 0x189   : > { %1294 = vst [vmem:[%s2167_s21 + $0x170] sm:$0xff] %v962_v53  ;;  %1354 = vst [vmem:[%s2167_s21 + $0x350] sm:$0xff] %v1202_v54 }
 0x18a   : > { %v1705_v55 = vpop.f32.mrf.mxu0  ;;  %v1825_v56 = vpop.f32.mrf.mxu1 }
 0x18c   : > { %v965_v57 = vpop.f32.mrf.mxu0  ;;  %v1205_v58 = vpop.f32.mrf.mxu1 }
 0x18d   : > { %1295 = vst [vmem:[%s2167_s21 + $0x178] sm:$0xff] %v965_v57  ;;  %1355 = vst [vmem:[%s2167_s21 + $0x358] sm:$0xff] %v1205_v58 }
 0x18e   : > { %v1706_v59 = vpop.f32.mrf.mxu0  ;;  %v1826_v60 = vpop.f32.mrf.mxu1 }
 0x190   : > { %v970_v61 = vpop.f32.mrf.mxu0  ;;  %v1210_v62 = vpop.f32.mrf.mxu1 }
 0x191   : > { %1296 = vst [vmem:[%s2167_s21 + $0x180] sm:$0xff] %v970_v61  ;;  %1356 = vst [vmem:[%s2167_s21 + $0x360] sm:$0xff] %v1210_v62 }
 0x192   : > { %v1709_v63 = vpop.f32.mrf.mxu0  ;;  %v1829_v0 = vpop.f32.mrf.mxu1 }
 0x194   : > { %v973_v2 = vpop.f32.mrf.mxu0  ;;  %v1213_v3 = vpop.f32.mrf.mxu1 }
 0x195   : > { %1297 = vst [vmem:[%s2167_s21 + $0x188] sm:$0xff] %v973_v2  ;;  %1357 = vst [vmem:[%s2167_s21 + $0x368] sm:$0xff] %v1213_v3 }
 0x196   : > { %v1710_v4 = vpop.f32.mrf.mxu0  ;;  %v1830_v5 = vpop.f32.mrf.mxu1 }
 0x198   : > { %v978_v6 = vpop.f32.mrf.mxu0  ;;  %v1218_v7 = vpop.f32.mrf.mxu1 }
 0x199   : > { %1298 = vst [vmem:[%s2167_s21 + $0x190] sm:$0xff] %v978_v6  ;;  %1358 = vst [vmem:[%s2167_s21 + $0x370] sm:$0xff] %v1218_v7 }
 0x19a   : > { %v1713_v8 = vpop.f32.mrf.mxu0  ;;  %v1833_v9 = vpop.f32.mrf.mxu1 }
 0x19c   : > { %v981_v10 = vpop.f32.mrf.mxu0  ;;  %v1221_v11 = vpop.f32.mrf.mxu1 }
 0x19d   : > { %1299 = vst [vmem:[%s2167_s21 + $0x198] sm:$0xff] %v981_v10  ;;  %1359 = vst [vmem:[%s2167_s21 + $0x378] sm:$0xff] %v1221_v11 }
 0x19e   : > { %v1714_v12 = vpop.f32.mrf.mxu0  ;;  %v1834_v13 = vpop.f32.mrf.mxu1 }
 0x1a0   : > { %v986_v14 = vpop.f32.mrf.mxu0  ;;  %v1226_v15 = vpop.f32.mrf.mxu1 }
 0x1a1   : > { %1300 = vst [vmem:[%s2167_s21 + $0x1a0] sm:$0xff] %v986_v14  ;;  %1360 = vst [vmem:[%s2167_s21 + $0x380] sm:$0xff] %v1226_v15 }
 0x1a2   : > { %v1717_v16 = vpop.f32.mrf.mxu0  ;;  %v1837_v17 = vpop.f32.mrf.mxu1 }
 0x1a4   : > { %v989_v18 = vpop.f32.mrf.mxu0  ;;  %v1229_v19 = vpop.f32.mrf.mxu1 }
 0x1a5   : > { %1301 = vst [vmem:[%s2167_s21 + $0x1a8] sm:$0xff] %v989_v18  ;;  %1361 = vst [vmem:[%s2167_s21 + $0x388] sm:$0xff] %v1229_v19 }
 0x1a6   : > { %v1718_v20 = vpop.f32.mrf.mxu0  ;;  %v1838_v21 = vpop.f32.mrf.mxu1 }
 0x1a8   : > { %v994_v22 = vpop.f32.mrf.mxu0  ;;  %v1234_v23 = vpop.f32.mrf.mxu1 }
 0x1a9   : > { %1302 = vst [vmem:[%s2167_s21 + $0x1b0] sm:$0xff] %v994_v22  ;;  %1362 = vst [vmem:[%s2167_s21 + $0x390] sm:$0xff] %v1234_v23 }
 0x1aa   : > { %v1721_v24 = vpop.f32.mrf.mxu0  ;;  %v1841_v25 = vpop.f32.mrf.mxu1 }
 0x1ac   : > { %v997_v26 = vpop.f32.mrf.mxu0  ;;  %v1237_v27 = vpop.f32.mrf.mxu1 }
 0x1ad   : > { %1303 = vst [vmem:[%s2167_s21 + $0x1b8] sm:$0xff] %v997_v26  ;;  %1363 = vst [vmem:[%s2167_s21 + $0x398] sm:$0xff] %v1237_v27 }
 0x1ae   : > { %v1722_v28 = vpop.f32.mrf.mxu0  ;;  %v1842_v29 = vpop.f32.mrf.mxu1 }
 0x1b0   : > { %v1002_v30 = vpop.f32.mrf.mxu0  ;;  %v1242_v31 = vpop.f32.mrf.mxu1 }
 0x1b1   : > { %1304 = vst [vmem:[%s2167_s21 + $0x1c0] sm:$0xff] %v1002_v30  ;;  %1364 = vst [vmem:[%s2167_s21 + $0x3a0] sm:$0xff] %v1242_v31 }
 0x1b2   : > { %v1725_v32 = vpop.f32.mrf.mxu0  ;;  %v1845_v33 = vpop.f32.mrf.mxu1 }
 0x1b4   : > { %v1005_v34 = vpop.f32.mrf.mxu0  ;;  %v1245_v35 = vpop.f32.mrf.mxu1 }
 0x1b5   : > { %1305 = vst [vmem:[%s2167_s21 + $0x1c8] sm:$0xff] %v1005_v34 }
 0x1b6   : > { %v1726_v36 = vpop.f32.mrf.mxu0  ;;  %v1846_v37 = vpop.f32.mrf.mxu1 }
 0x1b8   : > { %v1010_v38 = vpop.f32.mrf.mxu0 }
 0x1b9   : > { %1306 = vst [vmem:[%s2167_s21 + $0x1d0] sm:$0xff] %v1010_v38 }
 0x1ba   : > { %v1729_v1 = vpop.f32.mrf.mxu0 }
 0x1bc   : > { %v1013_v39 = vpop.f32.mrf.mxu0 }
 0x1bd   : > { %1307 = vst [vmem:[%s2167_s21 + $0x1d8] sm:$0xff] %v1013_v39 }
 0x1be   : > { %v1730_v40 = vpop.f32.mrf.mxu0 }
 0x1bf PF: > { %s12_s9 = sadd.s32 1, %s1925_s9  }
 0x1c0   : > { %p9_p4 = scmp.ge.s32.totalorder %s12_s9, 10  }
 0x1c2   :  { %11 = sbr.rel (!%p9_p4) target bundleno = 1 (0x1), region = 58 }

// kernel: tile.41
= control target key start
LH: loop header
LB: loop body
LE: loop exit
PB: predicated region body
PF: predicated region fallthrough
CT: control target
= control target key end

     0   :  { %s38_s0 = inlined_call_operand.<no memory space> [shape: f32[], index: 0, kind: input, shape index: {}]   ;;  %s39_s1 = inlined_call_operand.vmem [shape: f32[1,512], index: 1, kind: output, shape index: {}]  }
   0x1   :  { %v2_v0 = vstv %s38_s0 }
   0x2   :  { %3 = vst [vmem:[%s39_s1] sm:$0x1] %v2_v0  ;;  %10 = vst [vmem:[%s39_s1 + $0x1] sm:$0x1] %v2_v0 }
   0x3   :  { %11 = vst [vmem:[%s39_s1 + $0x2] sm:$0x1] %v2_v0  ;;  %12 = vst [vmem:[%s39_s1 + $0x3] sm:$0x1] %v2_v0 }

// kernel: _lambda_.27
= control target key start
LH: loop header
LB: loop body
LE: loop exit
PB: predicated region body
PF: predicated region fallthrough
CT: control target
= control target key end

     0   :  { %v45_v0 = vlaneseq  ;;  %s479_s1 = inlined_call_operand.vmem [shape: f32[1,512], index: 1, kind: input, shape index: {}]   ;;  %s480_s0 = inlined_call_operand.vmem [shape: f32[64,512], index: 0, kind: input, shape index: {}]   ;;  %s481_s2 = inlined_call_operand.vmem [shape: f32[64,512], index: 2, kind: output, shape index: {}]  }
   0x1   :  { %v43_v2 = vld [vmem:[%s479_s1] sm:$0xf]  ;;  %v12_v8 = vld [vmem:[%s480_s0 + $0x8] sm:$0xff]  ;;  %v13_v9 = vld [vmem:[%s480_s0 + $0x10] sm:$0xff] }
   0x2   :  { %v46_v1 = vshrl.u32 %v45_v0, 7  ;;  %v11_v7 = vld [vmem:[%s480_s0] sm:$0xff]  ;;  %v14_v13 = vld [vmem:[%s480_s0 + $0x18] sm:$0xff]  ;;  %v16_v19 = vld [vmem:[%s480_s0 + $0x28] sm:$0xff] }
   0x3   :  { %v15_v15 = vld [vmem:[%s480_s0 + $0x20] sm:$0xff]  ;;  %v17_v21 = vld [vmem:[%s480_s0 + $0x30] sm:$0xff]  ;;  %v18_v23 = vld [vmem:[%s480_s0 + $0x38] sm:$0xff] }
   0x4   :  { %v47_v3 = vsub.s32 0, %v46_v1  ;;  %v51_v4 = vsub.s32 1, %v46_v1  ;;  %v55_v5 = vsub.s32 2, %v46_v1  ;;  %v59_v6 = vsub.s32 3, %v46_v1  ;;  %v19_v25 = vld [vmem:[%s480_s0 + $0x40] sm:$0xff]  ;;  %v20_v27 = vld [vmem:[%s480_s0 + $0x48] sm:$0xff] }
   0x5   :  { %v21_v29 = vld [vmem:[%s480_s0 + $0x50] sm:$0xff]  ;;  %v22_v31 = vld [vmem:[%s480_s0 + $0x58] sm:$0xff]  ;;  %v23_v33 = vld [vmem:[%s480_s0 + $0x60] sm:$0xff] }
   0x6   :  { %v256_v10 = vrot.slane %v43_v2, %v47_v3  ;;  %v258_v11 = vrot.slane %v43_v2, %v51_v4  ;;  %v260_v12 = vrot.slane %v43_v2, %v55_v5  ;;  %v265_v14 = vrot.slane %v43_v2, %v59_v6  ;;  %v24_v35 = vld [vmem:[%s480_s0 + $0x68] sm:$0xff]  ;;  %v25_v37 = vld [vmem:[%s480_s0 + $0x70] sm:$0xff]  ;;  %v26_v39 = vld [vmem:[%s480_s0 + $0x78] sm:$0xff] }
   0x7   :  { %v27_v41 = vld [vmem:[%s480_s0 + $0x80] sm:$0xff]  ;;  %v28_v43 = vld [vmem:[%s480_s0 + $0x88] sm:$0xff]  ;;  %v29_v45 = vld [vmem:[%s480_s0 + $0x90] sm:$0xff] }
   0x8   :  { %v65_v16 = vadd.f32 %v256_v10, %v11_v7  ;;  %v66_v17 = vadd.f32 %v258_v11, %v12_v8  ;;  %v67_v18 = vadd.f32 %v260_v12, %v13_v9  ;;  %v68_v20 = vadd.f32 %v265_v14, %v14_v13  ;;  %v30_v47 = vld [vmem:[%s480_s0 + $0x98] sm:$0xff]  ;;  %v31_v50 = vld [vmem:[%s480_s0 + $0xa0] sm:$0xff]  ;;  %v32_v53 = vld [vmem:[%s480_s0 + $0xa8] sm:$0xff] }
   0x9   :  { %v69_v22 = vadd.f32 %v256_v10, %v15_v15  ;;  %v70_v24 = vadd.f32 %v258_v11, %v16_v19  ;;  %v71_v26 = vadd.f32 %v260_v12, %v17_v21  ;;  %v72_v28 = vadd.f32 %v265_v14, %v18_v23  ;;  %v33_v56 = vld [vmem:[%s480_s0 + $0xb0] sm:$0xff]  ;;  %v34_v59 = vld [vmem:[%s480_s0 + $0xb8] sm:$0xff]  ;;  %v35_v62 = vld [vmem:[%s480_s0 + $0xc0] sm:$0xff] }
   0xa   :  { %165 = vtanh.f32 %v65_v16  ;;  %v73_v30 = vadd.f32 %v256_v10, %v19_v25  ;;  %v74_v32 = vadd.f32 %v258_v11, %v20_v27  ;;  %v75_v34 = vadd.f32 %v260_v12, %v21_v29  ;;  %v36_v1 = vld [vmem:[%s480_s0 + $0xc8] sm:$0xff]  ;;  %v37_v4 = vld [vmem:[%s480_s0 + $0xd0] sm:$0xff]  ;;  %v38_v7 = vld [vmem:[%s480_s0 + $0xd8] sm:$0xff] }
   0xb   :  { %167 = vtanh.f32 %v66_v17  ;;  %v76_v36 = vadd.f32 %v265_v14, %v22_v31  ;;  %v77_v38 = vadd.f32 %v256_v10, %v23_v33  ;;  %v78_v40 = vadd.f32 %v258_v11, %v24_v35  ;;  %v39_v13 = vld [vmem:[%s480_s0 + $0xe0] sm:$0xff]  ;;  %v40_v17 = vld [vmem:[%s480_s0 + $0xe8] sm:$0xff]  ;;  %v42_v23 = vld [vmem:[%s480_s0 + $0xf8] sm:$0xff] }
   0xc   :  { %169 = vtanh.f32 %v67_v18  ;;  %v79_v42 = vadd.f32 %v260_v12, %v25_v37  ;;  %v80_v44 = vadd.f32 %v265_v14, %v26_v39  ;;  %v81_v46 = vadd.f32 %v256_v10, %v27_v41 }
   0xd   :  { %171 = vtanh.f32 %v68_v20  ;;  %v82_v49 = vadd.f32 %v258_v11, %v28_v43  ;;  %v83_v52 = vadd.f32 %v260_v12, %v29_v45  ;;  %v84_v55 = vadd.f32 %v265_v14, %v30_v47  ;;  %v41_v20 = vld [vmem:[%s480_s0 + $0xf0] sm:$0xff] }
   0xe   :  { %173 = vtanh.f32 %v69_v22  ;;  %v85_v58 = vadd.f32 %v256_v10, %v31_v50  ;;  %v86_v61 = vadd.f32 %v258_v11, %v32_v53  ;;  %v87_v0 = vadd.f32 %v260_v12, %v33_v56 }
   0xf   :  { %175 = vtanh.f32 %v70_v24  ;;  %v88_v3 = vadd.f32 %v265_v14, %v34_v59  ;;  %v89_v6 = vadd.f32 %v256_v10, %v35_v62  ;;  %v90_v9 = vadd.f32 %v258_v11, %v36_v1 }
  0x10   :  { %177 = vtanh.f32 %v71_v26  ;;  %v91_v16 = vadd.f32 %v260_v12, %v37_v4  ;;  %v92_v19 = vadd.f32 %v265_v14, %v38_v7  ;;  %v93_v22 = vadd.f32 %v256_v10, %v39_v13 }
  0x11   :  { %179 = vtanh.f32 %v72_v28  ;;  %v94_v25 = vadd.f32 %v258_v11, %v40_v17  ;;  %v95_v10 = vadd.f32 %v260_v12, %v41_v20  ;;  %v96_v28 = vadd.f32 %v265_v14, %v42_v23 }
  0x12   :  { %181 = vtanh.f32 %v73_v30 }
  0x13   :  { %183 = vtanh.f32 %v74_v32 }
  0x14   :  { %185 = vtanh.f32 %v75_v34 }
  0x15   :  { %187 = vtanh.f32 %v76_v36 }
  0x16   :  { %189 = vtanh.f32 %v77_v38 }
  0x17   :  { %v166_v48 = vpop.eup %165  ;;  %191 = vtanh.f32 %v78_v40 }
  0x18   :  { %v168_v51 = vpop.eup %167  ;;  %129 = vst [vmem:[%s481_s2] sm:$0xff] %v166_v48  ;;  %193 = vtanh.f32 %v79_v42 }
  0x19   :  { %v170_v54 = vpop.eup %169  ;;  %130 = vst [vmem:[%s481_s2 + $0x8] sm:$0xff] %v168_v51  ;;  %195 = vtanh.f32 %v80_v44 }
  0x1a   :  { %v172_v57 = vpop.eup %171  ;;  %131 = vst [vmem:[%s481_s2 + $0x10] sm:$0xff] %v170_v54  ;;  %197 = vtanh.f32 %v81_v46 }
  0x1b   :  { %v174_v60 = vpop.eup %173  ;;  %132 = vst [vmem:[%s481_s2 + $0x18] sm:$0xff] %v172_v57  ;;  %199 = vtanh.f32 %v82_v49 }
  0x1c   :  { %v176_v63 = vpop.eup %175  ;;  %133 = vst [vmem:[%s481_s2 + $0x20] sm:$0xff] %v174_v60  ;;  %201 = vtanh.f32 %v83_v52 }
  0x1d   :  { %v178_v2 = vpop.eup %177  ;;  %134 = vst [vmem:[%s481_s2 + $0x28] sm:$0xff] %v176_v63  ;;  %203 = vtanh.f32 %v84_v55 }
  0x1e   :  { %v180_v5 = vpop.eup %179  ;;  %135 = vst [vmem:[%s481_s2 + $0x30] sm:$0xff] %v178_v2  ;;  %205 = vtanh.f32 %v85_v58 }
  0x1f   :  { %v182_v8 = vpop.eup %181  ;;  %136 = vst [vmem:[%s481_s2 + $0x38] sm:$0xff] %v180_v5  ;;  %207 = vtanh.f32 %v86_v61 }
  0x20   :  { %v184_v15 = vpop.eup %183  ;;  %137 = vst [vmem:[%s481_s2 + $0x40] sm:$0xff] %v182_v8  ;;  %209 = vtanh.f32 %v87_v0 }
  0x21   :  { %v186_v18 = vpop.eup %185  ;;  %138 = vst [vmem:[%s481_s2 + $0x48] sm:$0xff] %v184_v15  ;;  %211 = vtanh.f32 %v88_v3 }
  0x22   :  { %v188_v21 = vpop.eup %187  ;;  %139 = vst [vmem:[%s481_s2 + $0x50] sm:$0xff] %v186_v18  ;;  %213 = vtanh.f32 %v89_v6 }
  0x23   :  { %v190_v24 = vpop.eup %189  ;;  %140 = vst [vmem:[%s481_s2 + $0x58] sm:$0xff] %v188_v21  ;;  %215 = vtanh.f32 %v90_v9 }
  0x24   :  { %v192_v26 = vpop.eup %191  ;;  %141 = vst [vmem:[%s481_s2 + $0x60] sm:$0xff] %v190_v24  ;;  %217 = vtanh.f32 %v91_v16 }
  0x25   :  { %v194_v27 = vpop.eup %193  ;;  %142 = vst [vmem:[%s481_s2 + $0x68] sm:$0xff] %v192_v26  ;;  %219 = vtanh.f32 %v92_v19 }
  0x26   :  { %v196_v29 = vpop.eup %195  ;;  %143 = vst [vmem:[%s481_s2 + $0x70] sm:$0xff] %v194_v27  ;;  %221 = vtanh.f32 %v93_v22 }
  0x27   :  { %v198_v11 = vpop.eup %197  ;;  %144 = vst [vmem:[%s481_s2 + $0x78] sm:$0xff] %v196_v29  ;;  %223 = vtanh.f32 %v94_v25 }
  0x28   :  { %v200_v12 = vpop.eup %199  ;;  %145 = vst [vmem:[%s481_s2 + $0x80] sm:$0xff] %v198_v11  ;;  %225 = vtanh.f32 %v95_v10 }
  0x29   :  { %v202_v30 = vpop.eup %201  ;;  %146 = vst [vmem:[%s481_s2 + $0x88] sm:$0xff] %v200_v12  ;;  %227 = vtanh.f32 %v96_v28 }
  0x2a   :  { %v204_v14 = vpop.eup %203  ;;  %147 = vst [vmem:[%s481_s2 + $0x90] sm:$0xff] %v202_v30 }
  0x2b   :  { %v206_v31 = vpop.eup %205  ;;  %148 = vst [vmem:[%s481_s2 + $0x98] sm:$0xff] %v204_v14 }
  0x2c   :  { %v208_v32 = vpop.eup %207  ;;  %149 = vst [vmem:[%s481_s2 + $0xa0] sm:$0xff] %v206_v31 }
  0x2d   :  { %v210_v33 = vpop.eup %209  ;;  %150 = vst [vmem:[%s481_s2 + $0xa8] sm:$0xff] %v208_v32 }
  0x2e   :  { %v212_v34 = vpop.eup %211  ;;  %151 = vst [vmem:[%s481_s2 + $0xb0] sm:$0xff] %v210_v33 }
  0x2f   :  { %v214_v35 = vpop.eup %213  ;;  %152 = vst [vmem:[%s481_s2 + $0xb8] sm:$0xff] %v212_v34 }
  0x30   :  { %v216_v36 = vpop.eup %215  ;;  %153 = vst [vmem:[%s481_s2 + $0xc0] sm:$0xff] %v214_v35 }
  0x31   :  { %v218_v37 = vpop.eup %217  ;;  %154 = vst [vmem:[%s481_s2 + $0xc8] sm:$0xff] %v216_v36 }
  0x32   :  { %v220_v38 = vpop.eup %219  ;;  %155 = vst [vmem:[%s481_s2 + $0xd0] sm:$0xff] %v218_v37 }
  0x33   :  { %v222_v39 = vpop.eup %221  ;;  %156 = vst [vmem:[%s481_s2 + $0xd8] sm:$0xff] %v220_v38 }
  0x34   :  { %v224_v40 = vpop.eup %223  ;;  %157 = vst [vmem:[%s481_s2 + $0xe0] sm:$0xff] %v222_v39 }
  0x35   :  { %v226_v41 = vpop.eup %225  ;;  %158 = vst [vmem:[%s481_s2 + $0xe8] sm:$0xff] %v224_v40 }
  0x36   :  { %v228_v42 = vpop.eup %227  ;;  %159 = vst [vmem:[%s481_s2 + $0xf0] sm:$0xff] %v226_v41 }
  0x37   :  { %160 = vst [vmem:[%s481_s2 + $0xf8] sm:$0xff] %v228_v42 }

</bundles_post_ra>
